<compile_context>
chip_gen: v6e
topology: v6e:2x2x1
jax: 0.10.0
libtpu: 0.0.40
codegen_flags: <defaults>
</compile_context>

<pallas_src>
import functools

import jax
import jax.numpy as jnp
from jax.experimental import pallas as pl
from jax.experimental.pallas import tpu as pltpu


def _round_up(v, m):
    return ((v + m - 1) // m) * m


# ----------------------------- Fused Pallas kernel ---------------------------

def _make_kernel(L, T, D, HP, O):
    """Kernel body: all GRU layers + time recurrence (wavefronted) + FC head."""
    G3 = 3 * HP

    def kernel(x_ref, h0_ref, *rest):
        nw = 4 * L
        w_refs = rest[:nw]                      # per layer: wi, wh, bi, bhn
        fc_w_ref, fc_b_ref = rest[nw], rest[nw + 1]
        out_ref, hid_ref = rest[nw + 2], rest[nw + 3]

        Bs = x_ref.shape[0]                     # batch rows handled by this grid program

        wis = [w_refs[4 * l + 0][...] for l in range(L)]   # bf16 (in_pad, 3*HP)
        whs = [w_refs[4 * l + 1][...] for l in range(L)]   # bf16 (HP, 3*HP)
        bis = [w_refs[4 * l + 2][...] for l in range(L)]   # f32  (1, 3*HP)  b_hr/b_hz folded
        bhn = [w_refs[4 * l + 3][...] for l in range(L)]   # f32  (1, HP)    b_hn only

        # Layer-0 input projection hoisted out of the recurrence: one MXU GEMM for the
        # whole sequence (bf16 x bf16 -> f32 accumulate).
        x_flat = x_ref[...].reshape(Bs * T, D).astype(jnp.bfloat16)
        gi0 = jnp.dot(x_flat, wis[0], preferred_element_type=jnp.float32) + bis[0]
        gi0 = gi0.reshape(Bs, T, G3)
        # Per-timestep slices depend only on gi0, so hoist them here: the sublane selects
        # stay off the serial critical path (same effect as a time-major reorder, without
        # an in-kernel transpose).
        gi0_t = [gi0[:, t, :] for t in range(T)]

        # Per-layer hidden state, register resident; elementwise math in f32.
        h = [h0_ref[:, l, :] for l in range(L)]
        outs = [None] * T                        # last-layer outputs per timestep

        def gru_cell(gi, h_in, l):
            gh = jnp.dot(h_in.astype(jnp.bfloat16), whs[l],
                         preferred_element_type=jnp.float32)          # (Bs, 3*HP)
            # Fused r/z sigmoid over a lane-aligned contiguous 2*HP slice.
            rz = jax.nn.sigmoid(gi[:, :2 * HP] + gh[:, :2 * HP])
            r = rz[:, :HP]
            z = rz[:, HP:]
            # b_hn must stay inside r * (.) to match PyTorch GRU semantics.
            n = jnp.tanh(gi[:, 2 * HP:] + r * (gh[:, 2 * HP:] + bhn[l]))
            return (1.0 - z) * n + z * h_in

        # Wavefront over (layer, time): all cells with l + t == s are independent, so
        # their MXU/EUP pushes pipeline; the dependency chain is L+T-1 steps, not L*T.
        for s in range(L + T - 1):
            h_prev = list(h)                     # snapshot of values before this step
            for l in range(max(0, s - (T - 1)), min(L, s + 1)):
                t = s - l
                if l == 0:
                    gi = gi0_t[t]
                else:
                    # Input projection for upper layers: previous layer's output at time t.
                    gi = jnp.dot(h_prev[l - 1].astype(jnp.bfloat16), wis[l],
                                 preferred_element_type=jnp.float32) + bis[l]
                h_new = gru_cell(gi, h_prev[l], l)
                h[l] = h_new
                if l == L - 1:
                    outs[t] = h_new

        # Final per-layer hidden states: L full-lane stores, off the critical path.
        for l in range(L):
            hid_ref[:, l, :] = h[l]

        # Fused FC head: one GEMM over the register-resident last-layer sequence, then a
        # single bulk batch-first store.
        seq = jnp.stack(outs, axis=1).reshape(Bs * T, HP).astype(jnp.bfloat16)
        out = (jnp.dot(seq, fc_w_ref[...], preferred_element_type=jnp.float32)
               + fc_b_ref[...])                   # (Bs*T, O)
        out_ref[...] = out.reshape(Bs, T, O)

    return kernel


# ------------------------------ Wrapper --------------------------------------

@functools.partial(jax.jit, static_argnames=("batch_shards",))
def thermal_gru_forward(x, hidden, flat_params, *, batch_shards=1):
    """x: (B, T, D) batch-first; hidden: (L, B, H). Returns (out (B,T,O), hidden (L,B,H)).

    batch_shards: independent batch shards run as a "parallel" grid axis.  Keep 1 on
    single-TensorCore chips (v5e/v6e) so the whole batch shares one latency-bound
    wavefront; set 2 on v7x so each TensorCore takes half the batch.
    """
    B, T, D = x.shape
    L, _, H = hidden.shape
    HP = flat_params[1].shape[0]            # padded hidden width (layer-0 W_hh rows)
    O = flat_params[-1].shape[-1]           # FC output lanes
    assert B % batch_shards == 0
    Bs = B // batch_shards

    # Initial hidden -> batch-leading, lane-padded layout (B, L, HP); padded lanes are 0
    # and provably stay 0 through the recurrence.
    h0p = jnp.zeros((B, L, HP), jnp.float32).at[:, :, :H].set(
        jnp.transpose(hidden, (1, 0, 2)))

    kernel = _make_kernel(L, T, D, HP, O)

    # Weights are whole-array VMEM resident (constant block index across the grid).
    w_specs = [pl.BlockSpec(w.shape, lambda b: (0, 0)) for w in flat_params]
    in_specs = [pl.BlockSpec((Bs, T, D), lambda b: (b, 0, 0)),
                pl.BlockSpec((Bs, L, HP), lambda b: (b, 0, 0))] + w_specs
    out_specs = (pl.BlockSpec((Bs, T, O), lambda b: (b, 0, 0)),
                 pl.BlockSpec((Bs, L, HP), lambda b: (b, 0, 0)))

    out, hid_p = pl.pallas_call(
        kernel,
        grid=(batch_shards,),
        in_specs=in_specs,
        out_specs=out_specs,
        out_shape=(jax.ShapeDtypeStruct((B, T, O), jnp.float32),
                   jax.ShapeDtypeStruct((B, L, HP), jnp.float32)),
        compiler_params=pltpu.CompilerParams(
            dimension_semantics=("parallel",),
            # Explicit VMEM budget; at large H/L on v7x (64 MiB physical) switch to
            # streaming W_ih per layer instead of whole-array residency.
            vmem_limit_bytes=32 * 1024 * 1024),
    )(x, h0p, *flat_params)

    hidden_out = jnp.transpose(hid_p[:, :, :H], (1, 0, 2))
    return out, hidden_out


# ------------------------- Parameters (PyTorch layout + kernel prep) ---------

def init_torch_params(key, input_size, hidden_size, output_size, num_layers):
    """PyTorch-layout GRU + Linear parameters (f32); gate order [r, z, n]."""
    H = hidden_size
    bound = 1.0 / (H ** 0.5)
    layers = []
    for l in range(num_layers):
        in_dim = input_size if l == 0 else H
        key, k1, k2, k3, k4 = jax.random.split(key, 5)
        layers.append(dict(
            w_ih=jax.random.uniform(k1, (3 * H, in_dim), jnp.float32, -bound, bound),
            w_hh=jax.random.uniform(k2, (3 * H, H), jnp.float32, -bound, bound),
            b_ih=jax.random.uniform(k3, (3 * H,), jnp.float32, -bound, bound),
            b_hh=jax.random.uniform(k4, (3 * H,), jnp.float32, -bound, bound)))
    key, k1, k2 = jax.random.split(key, 3)
    fc_w = jax.random.uniform(k1, (output_size, H), jnp.float32, -bound, bound)
    fc_b = jax.random.uniform(k2, (output_size,), jnp.float32, -bound, bound)
    return dict(layers=layers, fc_w=fc_w, fc_b=fc_b)


def prep_params(tp):
    """Kernel-ready parameters:
       * gate columns [r|z|n], each padded to a 128-lane boundary (vreg-aligned slices),
       * b_hr/b_hz folded into the input-side bias; b_hn kept separate (inside r*(.)),
       * matmul weights in bf16 (f32 accumulation in-kernel), biases kept f32."""
    H = tp["layers"][0]["w_hh"].shape[1]
    HP = max(128, _round_up(H, 128))
    flat = []
    for l, p in enumerate(tp["layers"]):
        in_dim = p["w_ih"].shape[1]
        in_pad = in_dim if l == 0 else HP
        wi = jnp.zeros((in_pad, 3 * HP), jnp.float32)
        wh = jnp.zeros((HP, 3 * HP), jnp.float32)
        bi = jnp.zeros((1, 3 * HP), jnp.float32)
        for g in range(3):
            wi = wi.at[:in_dim, g * HP:g * HP + H].set(p["w_ih"][g * H:(g + 1) * H, :].T)
            wh = wh.at[:H, g * HP:g * HP + H].set(p["w_hh"][g * H:(g + 1) * H, :].T)
        bi = bi.at[0, 0 * HP:0 * HP + H].set(p["b_ih"][0:H] + p["b_hh"][0:H])
        bi = bi.at[0, 1 * HP:1 * HP + H].set(p["b_ih"][H:2 * H] + p["b_hh"][H:2 * H])
        bi = bi.at[0, 2 * HP:2 * HP + H].set(p["b_ih"][2 * H:3 * H])
        bhn = jnp.zeros((1, HP), jnp.float32).at[0, :H].set(p["b_hh"][2 * H:3 * H])
        flat += [wi.astype(jnp.bfloat16), wh.astype(jnp.bfloat16), bi, bhn]
    O = tp["fc_w"].shape[0]
    fc_w = jnp.zeros((HP, O), jnp.float32).at[:H, :].set(tp["fc_w"].T)
    fc_b = tp["fc_b"].reshape(1, O)
    return flat + [fc_w.astype(jnp.bfloat16), fc_b]


# ------------------------------ Pure-JAX reference ---------------------------

def ref_forward(x, hidden, tp):
    H = hidden.shape[-1]
    layer_in = jnp.transpose(x, (1, 0, 2))      # (T, B, D)
    finals = []
    for l, p in enumerate(tp["layers"]):
        w_ih_t, w_hh_t = p["w_ih"].T, p["w_hh"].T
        b_ih, b_hh = p["b_ih"], p["b_hh"]

        def step(h, xt, w_ih_t=w_ih_t, w_hh_t=w_hh_t, b_ih=b_ih, b_hh=b_hh):
            gi = xt @ w_ih_t + b_ih
            gh = h @ w_hh_t + b_hh
            r = jax.nn.sigmoid(gi[:, :H] + gh[:, :H])
            z = jax.nn.sigmoid(gi[:, H:2 * H] + gh[:, H:2 * H])
            n = jnp.tanh(gi[:, 2 * H:] + r * gh[:, 2 * H:])
            hn = (1.0 - z) * n + z * h
            return hn, hn

        h_last, seq = jax.lax.scan(step, hidden[l], layer_in)
        finals.append(h_last)
        layer_in = seq
    out = layer_in @ tp["fc_w"].T + tp["fc_b"]
    return jnp.transpose(out, (1, 0, 2)), jnp.stack(finals, axis=0)


# ----------------------------------- Main ------------------------------------

if __name__ == "__main__":
    # Small shapes consistent with the module's constructor args.
    B, T = 2, 8
    INPUT_SIZE, HIDDEN_SIZE, OUTPUT_SIZE, NUM_LAYERS = 4, 32, 2, 3

    key = jax.random.PRNGKey(0)
    key, kx = jax.random.split(key)
    torch_params = init_torch_params(key, INPUT_SIZE, HIDDEN_SIZE, OUTPUT_SIZE, NUM_LAYERS)
    flat_params = prep_params(torch_params)

    x = jax.random.normal(kx, (B, T, INPUT_SIZE), jnp.float32)
    # init_hidden: zeros (num_layers, batch, hidden)
    hidden0 = jnp.zeros((NUM_LAYERS, B, HIDDEN_SIZE), jnp.float32)

    # Default: single program, whole batch in one wavefront (best on v5e/v6e).
    out, hidden = thermal_gru_forward(x, hidden0, flat_params)
    out = jax.block_until_ready(out)
    hidden = jax.block_until_ready(hidden)

    # Sanity check vs. pure-JAX f32 reference (bf16 matmul operands -> loosened tolerance).
    out_ref, hidden_ref = ref_forward(x, hidden0, torch_params)
    assert out.shape == (B, T, OUTPUT_SIZE)
    assert hidden.shape == (NUM_LAYERS, B, HIDDEN_SIZE)
    assert jnp.allclose(out, out_ref, atol=5e-2, rtol=5e-2)
    assert jnp.allclose(hidden, hidden_ref, atol=5e-2, rtol=5e-2)

    # v7x path: shard the batch across TensorCores via the "parallel" grid axis.
    out2, hidden2 = thermal_gru_forward(x, hidden0, flat_params, batch_shards=2)
    out2 = jax.block_until_ready(out2)
    hidden2 = jax.block_until_ready(hidden2)
    assert jnp.allclose(out2, out_ref, atol=5e-2, rtol=5e-2)
    assert jnp.allclose(hidden2, hidden_ref, atol=5e-2, rtol=5e-2)

    print("KERNEL_OK")
</pallas_src>

<mosaic_0001>
module attributes {stable_mosaic.version = 11 : i64} {
  func.func @kernel(%arg0: i32, %arg1: memref<2x8x4xf32, #tpu.memory_space<vmem>>, %arg2: memref<2x3x128xf32, #tpu.memory_space<vmem>>, %arg3: memref<4x384xbf16, #tpu.memory_space<vmem>>, %arg4: memref<128x384xbf16, #tpu.memory_space<vmem>>, %arg5: memref<1x384xf32, #tpu.memory_space<vmem>>, %arg6: memref<1x128xf32, #tpu.memory_space<vmem>>, %arg7: memref<128x384xbf16, #tpu.memory_space<vmem>>, %arg8: memref<128x384xbf16, #tpu.memory_space<vmem>>, %arg9: memref<1x384xf32, #tpu.memory_space<vmem>>, %arg10: memref<1x128xf32, #tpu.memory_space<vmem>>, %arg11: memref<128x384xbf16, #tpu.memory_space<vmem>>, %arg12: memref<128x384xbf16, #tpu.memory_space<vmem>>, %arg13: memref<1x384xf32, #tpu.memory_space<vmem>>, %arg14: memref<1x128xf32, #tpu.memory_space<vmem>>, %arg15: memref<128x2xbf16, #tpu.memory_space<vmem>>, %arg16: memref<1x2xf32, #tpu.memory_space<vmem>>, %arg17: memref<2x8x2xf32, #tpu.memory_space<vmem>>, %arg18: memref<2x3x128xf32, #tpu.memory_space<vmem>>) attributes {dimension_semantics = [#tpu.dimension_semantics<parallel>], iteration_bounds = array<i64: 1>, scalar_prefetch = 0 : i64, scratch_operands = 0 : i64, tpu.core_type = #tpu.core_type<tc>, window_params = [{transform_indices = @transform_0, window_bounds = array<i64: 2, 8, 4>}, {transform_indices = @transform_1, window_bounds = array<i64: 2, 3, 128>}, {pipeline_mode = #tpu.pipeline_mode<synchronous>, transform_indices = @transform_2, window_bounds = array<i64: 4, 384>}, {pipeline_mode = #tpu.pipeline_mode<synchronous>, transform_indices = @transform_3, window_bounds = array<i64: 128, 384>}, {pipeline_mode = #tpu.pipeline_mode<synchronous>, transform_indices = @transform_4, window_bounds = array<i64: 1, 384>}, {pipeline_mode = #tpu.pipeline_mode<synchronous>, transform_indices = @transform_5, window_bounds = array<i64: 1, 128>}, {pipeline_mode = #tpu.pipeline_mode<synchronous>, transform_indices = @transform_6, window_bounds = array<i64: 128, 384>}, {pipeline_mode = #tpu.pipeline_mode<synchronous>, transform_indices = @transform_7, window_bounds = array<i64: 128, 384>}, {pipeline_mode = #tpu.pipeline_mode<synchronous>, transform_indices = @transform_8, window_bounds = array<i64: 1, 384>}, {pipeline_mode = #tpu.pipeline_mode<synchronous>, transform_indices = @transform_9, window_bounds = array<i64: 1, 128>}, {pipeline_mode = #tpu.pipeline_mode<synchronous>, transform_indices = @transform_10, window_bounds = array<i64: 128, 384>}, {pipeline_mode = #tpu.pipeline_mode<synchronous>, transform_indices = @transform_11, window_bounds = array<i64: 128, 384>}, {pipeline_mode = #tpu.pipeline_mode<synchronous>, transform_indices = @transform_12, window_bounds = array<i64: 1, 384>}, {pipeline_mode = #tpu.pipeline_mode<synchronous>, transform_indices = @transform_13, window_bounds = array<i64: 1, 128>}, {pipeline_mode = #tpu.pipeline_mode<synchronous>, transform_indices = @transform_14, window_bounds = array<i64: 128, 2>}, {pipeline_mode = #tpu.pipeline_mode<synchronous>, transform_indices = @transform_15, window_bounds = array<i64: 1, 2>}, {transform_indices = @transform_16, window_bounds = array<i64: 2, 8, 2>}, {transform_indices = @transform_17, window_bounds = array<i64: 2, 3, 128>}]} {
    %c0 = arith.constant 0 : index
    %c0_0 = arith.constant 0 : index
    %0 = vector.load %arg3[%c0, %c0_0] : memref<4x384xbf16, #tpu.memory_space<vmem>>, vector<4x384xbf16>
    %c0_1 = arith.constant 0 : index
    %c0_2 = arith.constant 0 : index
    %1 = vector.load %arg7[%c0_1, %c0_2] : memref<128x384xbf16, #tpu.memory_space<vmem>>, vector<128x384xbf16>
    %c0_3 = arith.constant 0 : index
    %c0_4 = arith.constant 0 : index
    %2 = vector.load %arg11[%c0_3, %c0_4] : memref<128x384xbf16, #tpu.memory_space<vmem>>, vector<128x384xbf16>
    %c0_5 = arith.constant 0 : index
    %c0_6 = arith.constant 0 : index
    %3 = vector.load %arg4[%c0_5, %c0_6] : memref<128x384xbf16, #tpu.memory_space<vmem>>, vector<128x384xbf16>
    %c0_7 = arith.constant 0 : index
    %c0_8 = arith.constant 0 : index
    %4 = vector.load %arg8[%c0_7, %c0_8] : memref<128x384xbf16, #tpu.memory_space<vmem>>, vector<128x384xbf16>
    %c0_9 = arith.constant 0 : index
    %c0_10 = arith.constant 0 : index
    %5 = vector.load %arg12[%c0_9, %c0_10] : memref<128x384xbf16, #tpu.memory_space<vmem>>, vector<128x384xbf16>
    %c0_11 = arith.constant 0 : index
    %c0_12 = arith.constant 0 : index
    %6 = vector.load %arg5[%c0_11, %c0_12] : memref<1x384xf32, #tpu.memory_space<vmem>>, vector<1x384xf32>
    %c0_13 = arith.constant 0 : index
    %c0_14 = arith.constant 0 : index
    %7 = vector.load %arg9[%c0_13, %c0_14] : memref<1x384xf32, #tpu.memory_space<vmem>>, vector<1x384xf32>
    %c0_15 = arith.constant 0 : index
    %c0_16 = arith.constant 0 : index
    %8 = vector.load %arg13[%c0_15, %c0_16] : memref<1x384xf32, #tpu.memory_space<vmem>>, vector<1x384xf32>
    %c0_17 = arith.constant 0 : index
    %c0_18 = arith.constant 0 : index
    %9 = vector.load %arg6[%c0_17, %c0_18] : memref<1x128xf32, #tpu.memory_space<vmem>>, vector<1x128xf32>
    %c0_19 = arith.constant 0 : index
    %c0_20 = arith.constant 0 : index
    %10 = vector.load %arg10[%c0_19, %c0_20] : memref<1x128xf32, #tpu.memory_space<vmem>>, vector<1x128xf32>
    %c0_21 = arith.constant 0 : index
    %c0_22 = arith.constant 0 : index
    %11 = vector.load %arg14[%c0_21, %c0_22] : memref<1x128xf32, #tpu.memory_space<vmem>>, vector<1x128xf32>
    %c0_23 = arith.constant 0 : index
    %c0_24 = arith.constant 0 : index
    %c0_25 = arith.constant 0 : index
    %12 = vector.load %arg1[%c0_23, %c0_24, %c0_25] : memref<2x8x4xf32, #tpu.memory_space<vmem>>, vector<2x8x4xf32>
    %13 = vector.shape_cast %12 : vector<2x8x4xf32> to vector<16x4xf32>
    %14 = arith.truncf %13 : vector<16x4xf32> to vector<16x4xbf16>
    %cst = arith.constant dense<0.000000e+00> : vector<16x384xf32>
    %15 = tpu.matmul %14, %0, %cst {dimension_numbers = #tpu.dot_dimension_numbers<[1], [0], [0], [1], [0, 0, 1, 1], [], []>} : vector<16x4xbf16>, vector<4x384xbf16>, vector<16x384xf32> -> vector<16x384xf32>
    %16 = vector.broadcast %6 : vector<1x384xf32> to vector<16x384xf32>
    %17 = arith.addf %15, %16 : vector<16x384xf32>
    %18 = vector.shape_cast %17 : vector<16x384xf32> to vector<2x8x384xf32>
    %19 = vector.extract_strided_slice %18 {offsets = [0, 0, 0], sizes = [2, 1, 384], strides = [1, 1, 1]} : vector<2x8x384xf32> to vector<2x1x384xf32>
    %20 = vector.shape_cast %19 : vector<2x1x384xf32> to vector<2x384xf32>
    %21 = vector.extract_strided_slice %18 {offsets = [0, 1, 0], sizes = [2, 1, 384], strides = [1, 1, 1]} : vector<2x8x384xf32> to vector<2x1x384xf32>
    %22 = vector.shape_cast %21 : vector<2x1x384xf32> to vector<2x384xf32>
    %23 = vector.extract_strided_slice %18 {offsets = [0, 2, 0], sizes = [2, 1, 384], strides = [1, 1, 1]} : vector<2x8x384xf32> to vector<2x1x384xf32>
    %24 = vector.shape_cast %23 : vector<2x1x384xf32> to vector<2x384xf32>
    %25 = vector.extract_strided_slice %18 {offsets = [0, 3, 0], sizes = [2, 1, 384], strides = [1, 1, 1]} : vector<2x8x384xf32> to vector<2x1x384xf32>
    %26 = vector.shape_cast %25 : vector<2x1x384xf32> to vector<2x384xf32>
    %27 = vector.extract_strided_slice %18 {offsets = [0, 4, 0], sizes = [2, 1, 384], strides = [1, 1, 1]} : vector<2x8x384xf32> to vector<2x1x384xf32>
    %28 = vector.shape_cast %27 : vector<2x1x384xf32> to vector<2x384xf32>
    %29 = vector.extract_strided_slice %18 {offsets = [0, 5, 0], sizes = [2, 1, 384], strides = [1, 1, 1]} : vector<2x8x384xf32> to vector<2x1x384xf32>
    %30 = vector.shape_cast %29 : vector<2x1x384xf32> to vector<2x384xf32>
    %31 = vector.extract_strided_slice %18 {offsets = [0, 6, 0], sizes = [2, 1, 384], strides = [1, 1, 1]} : vector<2x8x384xf32> to vector<2x1x384xf32>
    %32 = vector.shape_cast %31 : vector<2x1x384xf32> to vector<2x384xf32>
    %33 = vector.extract_strided_slice %18 {offsets = [0, 7, 0], sizes = [2, 1, 384], strides = [1, 1, 1]} : vector<2x8x384xf32> to vector<2x1x384xf32>
    %34 = vector.shape_cast %33 : vector<2x1x384xf32> to vector<2x384xf32>
    %c0_26 = arith.constant 0 : index
    %c0_27 = arith.constant 0 : index
    %c0_28 = arith.constant 0 : index
    %35 = vector.load %arg2[%c0_26, %c0_27, %c0_28] : memref<2x3x128xf32, #tpu.memory_space<vmem>>, vector<2x1x128xf32>
    %36 = vector.shape_cast %35 : vector<2x1x128xf32> to vector<2x128xf32>
    %c0_29 = arith.constant 0 : index
    %c1 = arith.constant 1 : index
    %c0_30 = arith.constant 0 : index
    %37 = vector.load %arg2[%c0_29, %c1, %c0_30] : memref<2x3x128xf32, #tpu.memory_space<vmem>>, vector<2x1x128xf32>
    %38 = vector.shape_cast %37 : vector<2x1x128xf32> to vector<2x128xf32>
    %c0_31 = arith.constant 0 : index
    %c2 = arith.constant 2 : index
    %c0_32 = arith.constant 0 : index
    %39 = vector.load %arg2[%c0_31, %c2, %c0_32] : memref<2x3x128xf32, #tpu.memory_space<vmem>>, vector<2x1x128xf32>
    %40 = vector.shape_cast %39 : vector<2x1x128xf32> to vector<2x128xf32>
    %41 = arith.truncf %36 : vector<2x128xf32> to vector<2x128xbf16>
    %cst_33 = arith.constant dense<0.000000e+00> : vector<2x384xf32>
    %42 = tpu.matmul %41, %3, %cst_33 {dimension_numbers = #tpu.dot_dimension_numbers<[1], [0], [0], [1], [0, 0, 1, 1], [], []>} : vector<2x128xbf16>, vector<128x384xbf16>, vector<2x384xf32> -> vector<2x384xf32>
    %43 = vector.extract_strided_slice %20 {offsets = [0, 0], sizes = [2, 256], strides = [1, 1]} : vector<2x384xf32> to vector<2x256xf32>
    %44 = vector.extract_strided_slice %42 {offsets = [0, 0], sizes = [2, 256], strides = [1, 1]} : vector<2x384xf32> to vector<2x256xf32>
    %45 = arith.addf %43, %44 : vector<2x256xf32>
    %46 = arith.negf %45 : vector<2x256xf32>
    %47 = math.exp %46 : vector<2x256xf32>
    %cst_34 = arith.constant 1.000000e+00 : f32
    %48 = vector.broadcast %cst_34 : f32 to vector<2x256xf32>
    %49 = arith.addf %48, %47 : vector<2x256xf32>
    %50 = arith.divf %48, %49 : vector<2x256xf32>
    %51 = vector.extract_strided_slice %50 {offsets = [0, 0], sizes = [2, 128], strides = [1, 1]} : vector<2x256xf32> to vector<2x128xf32>
    %52 = vector.extract_strided_slice %50 {offsets = [0, 128], sizes = [2, 128], strides = [1, 1]} : vector<2x256xf32> to vector<2x128xf32>
    %53 = vector.extract_strided_slice %20 {offsets = [0, 256], sizes = [2, 128], strides = [1, 1]} : vector<2x384xf32> to vector<2x128xf32>
    %54 = vector.extract_strided_slice %42 {offsets = [0, 256], sizes = [2, 128], strides = [1, 1]} : vector<2x384xf32> to vector<2x128xf32>
    %55 = vector.broadcast %9 : vector<1x128xf32> to vector<2x128xf32>
    %56 = arith.addf %54, %55 : vector<2x128xf32>
    %57 = arith.mulf %51, %56 : vector<2x128xf32>
    %58 = arith.addf %53, %57 : vector<2x128xf32>
    %59 = math.tanh %58 : vector<2x128xf32>
    %cst_35 = arith.constant 1.000000e+00 : f32
    %60 = vector.broadcast %cst_35 : f32 to vector<2x128xf32>
    %61 = arith.subf %60, %52 : vector<2x128xf32>
    %62 = arith.mulf %61, %59 : vector<2x128xf32>
    %63 = arith.mulf %52, %36 : vector<2x128xf32>
    %64 = arith.addf %62, %63 : vector<2x128xf32>
    %65 = arith.truncf %64 : vector<2x128xf32> to vector<2x128xbf16>
    %cst_36 = arith.constant dense<0.000000e+00> : vector<2x384xf32>
    %66 = tpu.matmul %65, %3, %cst_36 {dimension_numbers = #tpu.dot_dimension_numbers<[1], [0], [0], [1], [0, 0, 1, 1], [], []>} : vector<2x128xbf16>, vector<128x384xbf16>, vector<2x384xf32> -> vector<2x384xf32>
    %67 = vector.extract_strided_slice %22 {offsets = [0, 0], sizes = [2, 256], strides = [1, 1]} : vector<2x384xf32> to vector<2x256xf32>
    %68 = vector.extract_strided_slice %66 {offsets = [0, 0], sizes = [2, 256], strides = [1, 1]} : vector<2x384xf32> to vector<2x256xf32>
    %69 = arith.addf %67, %68 : vector<2x256xf32>
    %70 = arith.negf %69 : vector<2x256xf32>
    %71 = math.exp %70 : vector<2x256xf32>
    %cst_37 = arith.constant 1.000000e+00 : f32
    %72 = vector.broadcast %cst_37 : f32 to vector<2x256xf32>
    %73 = arith.addf %72, %71 : vector<2x256xf32>
    %74 = arith.divf %72, %73 : vector<2x256xf32>
    %75 = vector.extract_strided_slice %74 {offsets = [0, 0], sizes = [2, 128], strides = [1, 1]} : vector<2x256xf32> to vector<2x128xf32>
    %76 = vector.extract_strided_slice %74 {offsets = [0, 128], sizes = [2, 128], strides = [1, 1]} : vector<2x256xf32> to vector<2x128xf32>
    %77 = vector.extract_strided_slice %22 {offsets = [0, 256], sizes = [2, 128], strides = [1, 1]} : vector<2x384xf32> to vector<2x128xf32>
    %78 = vector.extract_strided_slice %66 {offsets = [0, 256], sizes = [2, 128], strides = [1, 1]} : vector<2x384xf32> to vector<2x128xf32>
    %79 = vector.broadcast %9 : vector<1x128xf32> to vector<2x128xf32>
    %80 = arith.addf %78, %79 : vector<2x128xf32>
    %81 = arith.mulf %75, %80 : vector<2x128xf32>
    %82 = arith.addf %77, %81 : vector<2x128xf32>
    %83 = math.tanh %82 : vector<2x128xf32>
    %cst_38 = arith.constant 1.000000e+00 : f32
    %84 = vector.broadcast %cst_38 : f32 to vector<2x128xf32>
    %85 = arith.subf %84, %76 : vector<2x128xf32>
    %86 = arith.mulf %85, %83 : vector<2x128xf32>
    %87 = arith.mulf %76, %64 : vector<2x128xf32>
    %88 = arith.addf %86, %87 : vector<2x128xf32>
    %89 = arith.truncf %64 : vector<2x128xf32> to vector<2x128xbf16>
    %cst_39 = arith.constant dense<0.000000e+00> : vector<2x384xf32>
    %90 = tpu.matmul %89, %1, %cst_39 {dimension_numbers = #tpu.dot_dimension_numbers<[1], [0], [0], [1], [0, 0, 1, 1], [], []>} : vector<2x128xbf16>, vector<128x384xbf16>, vector<2x384xf32> -> vector<2x384xf32>
    %91 = vector.broadcast %7 : vector<1x384xf32> to vector<2x384xf32>
    %92 = arith.addf %90, %91 : vector<2x384xf32>
    %93 = arith.truncf %38 : vector<2x128xf32> to vector<2x128xbf16>
    %cst_40 = arith.constant dense<0.000000e+00> : vector<2x384xf32>
    %94 = tpu.matmul %93, %4, %cst_40 {dimension_numbers = #tpu.dot_dimension_numbers<[1], [0], [0], [1], [0, 0, 1, 1], [], []>} : vector<2x128xbf16>, vector<128x384xbf16>, vector<2x384xf32> -> vector<2x384xf32>
    %95 = vector.extract_strided_slice %92 {offsets = [0, 0], sizes = [2, 256], strides = [1, 1]} : vector<2x384xf32> to vector<2x256xf32>
    %96 = vector.extract_strided_slice %94 {offsets = [0, 0], sizes = [2, 256], strides = [1, 1]} : vector<2x384xf32> to vector<2x256xf32>
    %97 = arith.addf %95, %96 : vector<2x256xf32>
    %98 = arith.negf %97 : vector<2x256xf32>
    %99 = math.exp %98 : vector<2x256xf32>
    %cst_41 = arith.constant 1.000000e+00 : f32
    %100 = vector.broadcast %cst_41 : f32 to vector<2x256xf32>
    %101 = arith.addf %100, %99 : vector<2x256xf32>
    %102 = arith.divf %100, %101 : vector<2x256xf32>
    %103 = vector.extract_strided_slice %102 {offsets = [0, 0], sizes = [2, 128], strides = [1, 1]} : vector<2x256xf32> to vector<2x128xf32>
    %104 = vector.extract_strided_slice %102 {offsets = [0, 128], sizes = [2, 128], strides = [1, 1]} : vector<2x256xf32> to vector<2x128xf32>
    %105 = vector.extract_strided_slice %92 {offsets = [0, 256], sizes = [2, 128], strides = [1, 1]} : vector<2x384xf32> to vector<2x128xf32>
    %106 = vector.extract_strided_slice %94 {offsets = [0, 256], sizes = [2, 128], strides = [1, 1]} : vector<2x384xf32> to vector<2x128xf32>
    %107 = vector.broadcast %10 : vector<1x128xf32> to vector<2x128xf32>
    %108 = arith.addf %106, %107 : vector<2x128xf32>
    %109 = arith.mulf %103, %108 : vector<2x128xf32>
    %110 = arith.addf %105, %109 : vector<2x128xf32>
    %111 = math.tanh %110 : vector<2x128xf32>
    %cst_42 = arith.constant 1.000000e+00 : f32
    %112 = vector.broadcast %cst_42 : f32 to vector<2x128xf32>
    %113 = arith.subf %112, %104 : vector<2x128xf32>
    %114 = arith.mulf %113, %111 : vector<2x128xf32>
    %115 = arith.mulf %104, %38 : vector<2x128xf32>
    %116 = arith.addf %114, %115 : vector<2x128xf32>
    %117 = arith.truncf %88 : vector<2x128xf32> to vector<2x128xbf16>
    %cst_43 = arith.constant dense<0.000000e+00> : vector<2x384xf32>
    %118 = tpu.matmul %117, %3, %cst_43 {dimension_numbers = #tpu.dot_dimension_numbers<[1], [0], [0], [1], [0, 0, 1, 1], [], []>} : vector<2x128xbf16>, vector<128x384xbf16>, vector<2x384xf32> -> vector<2x384xf32>
    %119 = vector.extract_strided_slice %24 {offsets = [0, 0], sizes = [2, 256], strides = [1, 1]} : vector<2x384xf32> to vector<2x256xf32>
    %120 = vector.extract_strided_slice %118 {offsets = [0, 0], sizes = [2, 256], strides = [1, 1]} : vector<2x384xf32> to vector<2x256xf32>
    %121 = arith.addf %119, %120 : vector<2x256xf32>
    %122 = arith.negf %121 : vector<2x256xf32>
    %123 = math.exp %122 : vector<2x256xf32>
    %cst_44 = arith.constant 1.000000e+00 : f32
    %124 = vector.broadcast %cst_44 : f32 to vector<2x256xf32>
    %125 = arith.addf %124, %123 : vector<2x256xf32>
    %126 = arith.divf %124, %125 : vector<2x256xf32>
    %127 = vector.extract_strided_slice %126 {offsets = [0, 0], sizes = [2, 128], strides = [1, 1]} : vector<2x256xf32> to vector<2x128xf32>
    %128 = vector.extract_strided_slice %126 {offsets = [0, 128], sizes = [2, 128], strides = [1, 1]} : vector<2x256xf32> to vector<2x128xf32>
    %129 = vector.extract_strided_slice %24 {offsets = [0, 256], sizes = [2, 128], strides = [1, 1]} : vector<2x384xf32> to vector<2x128xf32>
    %130 = vector.extract_strided_slice %118 {offsets = [0, 256], sizes = [2, 128], strides = [1, 1]} : vector<2x384xf32> to vector<2x128xf32>
    %131 = vector.broadcast %9 : vector<1x128xf32> to vector<2x128xf32>
    %132 = arith.addf %130, %131 : vector<2x128xf32>
    %133 = arith.mulf %127, %132 : vector<2x128xf32>
    %134 = arith.addf %129, %133 : vector<2x128xf32>
    %135 = math.tanh %134 : vector<2x128xf32>
    %cst_45 = arith.constant 1.000000e+00 : f32
    %136 = vector.broadcast %cst_45 : f32 to vector<2x128xf32>
    %137 = arith.subf %136, %128 : vector<2x128xf32>
    %138 = arith.mulf %137, %135 : vector<2x128xf32>
    %139 = arith.mulf %128, %88 : vector<2x128xf32>
    %140 = arith.addf %138, %139 : vector<2x128xf32>
    %141 = arith.truncf %88 : vector<2x128xf32> to vector<2x128xbf16>
    %cst_46 = arith.constant dense<0.000000e+00> : vector<2x384xf32>
    %142 = tpu.matmul %141, %1, %cst_46 {dimension_numbers = #tpu.dot_dimension_numbers<[1], [0], [0], [1], [0, 0, 1, 1], [], []>} : vector<2x128xbf16>, vector<128x384xbf16>, vector<2x384xf32> -> vector<2x384xf32>
    %143 = vector.broadcast %7 : vector<1x384xf32> to vector<2x384xf32>
    %144 = arith.addf %142, %143 : vector<2x384xf32>
    %145 = arith.truncf %116 : vector<2x128xf32> to vector<2x128xbf16>
    %cst_47 = arith.constant dense<0.000000e+00> : vector<2x384xf32>
    %146 = tpu.matmul %145, %4, %cst_47 {dimension_numbers = #tpu.dot_dimension_numbers<[1], [0], [0], [1], [0, 0, 1, 1], [], []>} : vector<2x128xbf16>, vector<128x384xbf16>, vector<2x384xf32> -> vector<2x384xf32>
    %147 = vector.extract_strided_slice %144 {offsets = [0, 0], sizes = [2, 256], strides = [1, 1]} : vector<2x384xf32> to vector<2x256xf32>
    %148 = vector.extract_strided_slice %146 {offsets = [0, 0], sizes = [2, 256], strides = [1, 1]} : vector<2x384xf32> to vector<2x256xf32>
    %149 = arith.addf %147, %148 : vector<2x256xf32>
    %150 = arith.negf %149 : vector<2x256xf32>
    %151 = math.exp %150 : vector<2x256xf32>
    %cst_48 = arith.constant 1.000000e+00 : f32
    %152 = vector.broadcast %cst_48 : f32 to vector<2x256xf32>
    %153 = arith.addf %152, %151 : vector<2x256xf32>
    %154 = arith.divf %152, %153 : vector<2x256xf32>
    %155 = vector.extract_strided_slice %154 {offsets = [0, 0], sizes = [2, 128], strides = [1, 1]} : vector<2x256xf32> to vector<2x128xf32>
    %156 = vector.extract_strided_slice %154 {offsets = [0, 128], sizes = [2, 128], strides = [1, 1]} : vector<2x256xf32> to vector<2x128xf32>
    %157 = vector.extract_strided_slice %144 {offsets = [0, 256], sizes = [2, 128], strides = [1, 1]} : vector<2x384xf32> to vector<2x128xf32>
    %158 = vector.extract_strided_slice %146 {offsets = [0, 256], sizes = [2, 128], strides = [1, 1]} : vector<2x384xf32> to vector<2x128xf32>
    %159 = vector.broadcast %10 : vector<1x128xf32> to vector<2x128xf32>
    %160 = arith.addf %158, %159 : vector<2x128xf32>
    %161 = arith.mulf %155, %160 : vector<2x128xf32>
    %162 = arith.addf %157, %161 : vector<2x128xf32>
    %163 = math.tanh %162 : vector<2x128xf32>
    %cst_49 = arith.constant 1.000000e+00 : f32
    %164 = vector.broadcast %cst_49 : f32 to vector<2x128xf32>
    %165 = arith.subf %164, %156 : vector<2x128xf32>
    %166 = arith.mulf %165, %163 : vector<2x128xf32>
    %167 = arith.mulf %156, %116 : vector<2x128xf32>
    %168 = arith.addf %166, %167 : vector<2x128xf32>
    %169 = arith.truncf %116 : vector<2x128xf32> to vector<2x128xbf16>
    %cst_50 = arith.constant dense<0.000000e+00> : vector<2x384xf32>
    %170 = tpu.matmul %169, %2, %cst_50 {dimension_numbers = #tpu.dot_dimension_numbers<[1], [0], [0], [1], [0, 0, 1, 1], [], []>} : vector<2x128xbf16>, vector<128x384xbf16>, vector<2x384xf32> -> vector<2x384xf32>
    %171 = vector.broadcast %8 : vector<1x384xf32> to vector<2x384xf32>
    %172 = arith.addf %170, %171 : vector<2x384xf32>
    %173 = arith.truncf %40 : vector<2x128xf32> to vector<2x128xbf16>
    %cst_51 = arith.constant dense<0.000000e+00> : vector<2x384xf32>
    %174 = tpu.matmul %173, %5, %cst_51 {dimension_numbers = #tpu.dot_dimension_numbers<[1], [0], [0], [1], [0, 0, 1, 1], [], []>} : vector<2x128xbf16>, vector<128x384xbf16>, vector<2x384xf32> -> vector<2x384xf32>
    %175 = vector.extract_strided_slice %172 {offsets = [0, 0], sizes = [2, 256], strides = [1, 1]} : vector<2x384xf32> to vector<2x256xf32>
    %176 = vector.extract_strided_slice %174 {offsets = [0, 0], sizes = [2, 256], strides = [1, 1]} : vector<2x384xf32> to vector<2x256xf32>
    %177 = arith.addf %175, %176 : vector<2x256xf32>
    %178 = arith.negf %177 : vector<2x256xf32>
    %179 = math.exp %178 : vector<2x256xf32>
    %cst_52 = arith.constant 1.000000e+00 : f32
    %180 = vector.broadcast %cst_52 : f32 to vector<2x256xf32>
    %181 = arith.addf %180, %179 : vector<2x256xf32>
    %182 = arith.divf %180, %181 : vector<2x256xf32>
    %183 = vector.extract_strided_slice %182 {offsets = [0, 0], sizes = [2, 128], strides = [1, 1]} : vector<2x256xf32> to vector<2x128xf32>
    %184 = vector.extract_strided_slice %182 {offsets = [0, 128], sizes = [2, 128], strides = [1, 1]} : vector<2x256xf32> to vector<2x128xf32>
    %185 = vector.extract_strided_slice %172 {offsets = [0, 256], sizes = [2, 128], strides = [1, 1]} : vector<2x384xf32> to vector<2x128xf32>
    %186 = vector.extract_strided_slice %174 {offsets = [0, 256], sizes = [2, 128], strides = [1, 1]} : vector<2x384xf32> to vector<2x128xf32>
    %187 = vector.broadcast %11 : vector<1x128xf32> to vector<2x128xf32>
    %188 = arith.addf %186, %187 : vector<2x128xf32>
    %189 = arith.mulf %183, %188 : vector<2x128xf32>
    %190 = arith.addf %185, %189 : vector<2x128xf32>
    %191 = math.tanh %190 : vector<2x128xf32>
    %cst_53 = arith.constant 1.000000e+00 : f32
    %192 = vector.broadcast %cst_53 : f32 to vector<2x128xf32>
    %193 = arith.subf %192, %184 : vector<2x128xf32>
    %194 = arith.mulf %193, %191 : vector<2x128xf32>
    %195 = arith.mulf %184, %40 : vector<2x128xf32>
    %196 = arith.addf %194, %195 : vector<2x128xf32>
    %197 = arith.truncf %140 : vector<2x128xf32> to vector<2x128xbf16>
    %cst_54 = arith.constant dense<0.000000e+00> : vector<2x384xf32>
    %198 = tpu.matmul %197, %3, %cst_54 {dimension_numbers = #tpu.dot_dimension_numbers<[1], [0], [0], [1], [0, 0, 1, 1], [], []>} : vector<2x128xbf16>, vector<128x384xbf16>, vector<2x384xf32> -> vector<2x384xf32>
    %199 = vector.extract_strided_slice %26 {offsets = [0, 0], sizes = [2, 256], strides = [1, 1]} : vector<2x384xf32> to vector<2x256xf32>
    %200 = vector.extract_strided_slice %198 {offsets = [0, 0], sizes = [2, 256], strides = [1, 1]} : vector<2x384xf32> to vector<2x256xf32>
    %201 = arith.addf %199, %200 : vector<2x256xf32>
    %202 = arith.negf %201 : vector<2x256xf32>
    %203 = math.exp %202 : vector<2x256xf32>
    %cst_55 = arith.constant 1.000000e+00 : f32
    %204 = vector.broadcast %cst_55 : f32 to vector<2x256xf32>
    %205 = arith.addf %204, %203 : vector<2x256xf32>
    %206 = arith.divf %204, %205 : vector<2x256xf32>
    %207 = vector.extract_strided_slice %206 {offsets = [0, 0], sizes = [2, 128], strides = [1, 1]} : vector<2x256xf32> to vector<2x128xf32>
    %208 = vector.extract_strided_slice %206 {offsets = [0, 128], sizes = [2, 128], strides = [1, 1]} : vector<2x256xf32> to vector<2x128xf32>
    %209 = vector.extract_strided_slice %26 {offsets = [0, 256], sizes = [2, 128], strides = [1, 1]} : vector<2x384xf32> to vector<2x128xf32>
    %210 = vector.extract_strided_slice %198 {offsets = [0, 256], sizes = [2, 128], strides = [1, 1]} : vector<2x384xf32> to vector<2x128xf32>
    %211 = vector.broadcast %9 : vector<1x128xf32> to vector<2x128xf32>
    %212 = arith.addf %210, %211 : vector<2x128xf32>
    %213 = arith.mulf %207, %212 : vector<2x128xf32>
    %214 = arith.addf %209, %213 : vector<2x128xf32>
    %215 = math.tanh %214 : vector<2x128xf32>
    %cst_56 = arith.constant 1.000000e+00 : f32
    %216 = vector.broadcast %cst_56 : f32 to vector<2x128xf32>
    %217 = arith.subf %216, %208 : vector<2x128xf32>
    %218 = arith.mulf %217, %215 : vector<2x128xf32>
    %219 = arith.mulf %208, %140 : vector<2x128xf32>
    %220 = arith.addf %218, %219 : vector<2x128xf32>
    %221 = arith.truncf %140 : vector<2x128xf32> to vector<2x128xbf16>
    %cst_57 = arith.constant dense<0.000000e+00> : vector<2x384xf32>
    %222 = tpu.matmul %221, %1, %cst_57 {dimension_numbers = #tpu.dot_dimension_numbers<[1], [0], [0], [1], [0, 0, 1, 1], [], []>} : vector<2x128xbf16>, vector<128x384xbf16>, vector<2x384xf32> -> vector<2x384xf32>
    %223 = vector.broadcast %7 : vector<1x384xf32> to vector<2x384xf32>
    %224 = arith.addf %222, %223 : vector<2x384xf32>
    %225 = arith.truncf %168 : vector<2x128xf32> to vector<2x128xbf16>
    %cst_58 = arith.constant dense<0.000000e+00> : vector<2x384xf32>
    %226 = tpu.matmul %225, %4, %cst_58 {dimension_numbers = #tpu.dot_dimension_numbers<[1], [0], [0], [1], [0, 0, 1, 1], [], []>} : vector<2x128xbf16>, vector<128x384xbf16>, vector<2x384xf32> -> vector<2x384xf32>
    %227 = vector.extract_strided_slice %224 {offsets = [0, 0], sizes = [2, 256], strides = [1, 1]} : vector<2x384xf32> to vector<2x256xf32>
    %228 = vector.extract_strided_slice %226 {offsets = [0, 0], sizes = [2, 256], strides = [1, 1]} : vector<2x384xf32> to vector<2x256xf32>
    %229 = arith.addf %227, %228 : vector<2x256xf32>
    %230 = arith.negf %229 : vector<2x256xf32>
    %231 = math.exp %230 : vector<2x256xf32>
    %cst_59 = arith.constant 1.000000e+00 : f32
    %232 = vector.broadcast %cst_59 : f32 to vector<2x256xf32>
    %233 = arith.addf %232, %231 : vector<2x256xf32>
    %234 = arith.divf %232, %233 : vector<2x256xf32>
    %235 = vector.extract_strided_slice %234 {offsets = [0, 0], sizes = [2, 128], strides = [1, 1]} : vector<2x256xf32> to vector<2x128xf32>
    %236 = vector.extract_strided_slice %234 {offsets = [0, 128], sizes = [2, 128], strides = [1, 1]} : vector<2x256xf32> to vector<2x128xf32>
    %237 = vector.extract_strided_slice %224 {offsets = [0, 256], sizes = [2, 128], strides = [1, 1]} : vector<2x384xf32> to vector<2x128xf32>
    %238 = vector.extract_strided_slice %226 {offsets = [0, 256], sizes = [2, 128], strides = [1, 1]} : vector<2x384xf32> to vector<2x128xf32>
    %239 = vector.broadcast %10 : vector<1x128xf32> to vector<2x128xf32>
    %240 = arith.addf %238, %239 : vector<2x128xf32>
    %241 = arith.mulf %235, %240 : vector<2x128xf32>
    %242 = arith.addf %237, %241 : vector<2x128xf32>
    %243 = math.tanh %242 : vector<2x128xf32>
    %cst_60 = arith.constant 1.000000e+00 : f32
    %244 = vector.broadcast %cst_60 : f32 to vector<2x128xf32>
    %245 = arith.subf %244, %236 : vector<2x128xf32>
    %246 = arith.mulf %245, %243 : vector<2x128xf32>
    %247 = arith.mulf %236, %168 : vector<2x128xf32>
    %248 = arith.addf %246, %247 : vector<2x128xf32>
    %249 = arith.truncf %168 : vector<2x128xf32> to vector<2x128xbf16>
    %cst_61 = arith.constant dense<0.000000e+00> : vector<2x384xf32>
    %250 = tpu.matmul %249, %2, %cst_61 {dimension_numbers = #tpu.dot_dimension_numbers<[1], [0], [0], [1], [0, 0, 1, 1], [], []>} : vector<2x128xbf16>, vector<128x384xbf16>, vector<2x384xf32> -> vector<2x384xf32>
    %251 = vector.broadcast %8 : vector<1x384xf32> to vector<2x384xf32>
    %252 = arith.addf %250, %251 : vector<2x384xf32>
    %253 = arith.truncf %196 : vector<2x128xf32> to vector<2x128xbf16>
    %cst_62 = arith.constant dense<0.000000e+00> : vector<2x384xf32>
    %254 = tpu.matmul %253, %5, %cst_62 {dimension_numbers = #tpu.dot_dimension_numbers<[1], [0], [0], [1], [0, 0, 1, 1], [], []>} : vector<2x128xbf16>, vector<128x384xbf16>, vector<2x384xf32> -> vector<2x384xf32>
    %255 = vector.extract_strided_slice %252 {offsets = [0, 0], sizes = [2, 256], strides = [1, 1]} : vector<2x384xf32> to vector<2x256xf32>
    %256 = vector.extract_strided_slice %254 {offsets = [0, 0], sizes = [2, 256], strides = [1, 1]} : vector<2x384xf32> to vector<2x256xf32>
    %257 = arith.addf %255, %256 : vector<2x256xf32>
    %258 = arith.negf %257 : vector<2x256xf32>
    %259 = math.exp %258 : vector<2x256xf32>
    %cst_63 = arith.constant 1.000000e+00 : f32
    %260 = vector.broadcast %cst_63 : f32 to vector<2x256xf32>
    %261 = arith.addf %260, %259 : vector<2x256xf32>
    %262 = arith.divf %260, %261 : vector<2x256xf32>
    %263 = vector.extract_strided_slice %262 {offsets = [0, 0], sizes = [2, 128], strides = [1, 1]} : vector<2x256xf32> to vector<2x128xf32>
    %264 = vector.extract_strided_slice %262 {offsets = [0, 128], sizes = [2, 128], strides = [1, 1]} : vector<2x256xf32> to vector<2x128xf32>
    %265 = vector.extract_strided_slice %252 {offsets = [0, 256], sizes = [2, 128], strides = [1, 1]} : vector<2x384xf32> to vector<2x128xf32>
    %266 = vector.extract_strided_slice %254 {offsets = [0, 256], sizes = [2, 128], strides = [1, 1]} : vector<2x384xf32> to vector<2x128xf32>
    %267 = vector.broadcast %11 : vector<1x128xf32> to vector<2x128xf32>
    %268 = arith.addf %266, %267 : vector<2x128xf32>
    %269 = arith.mulf %263, %268 : vector<2x128xf32>
    %270 = arith.addf %265, %269 : vector<2x128xf32>
    %271 = math.tanh %270 : vector<2x128xf32>
    %cst_64 = arith.constant 1.000000e+00 : f32
    %272 = vector.broadcast %cst_64 : f32 to vector<2x128xf32>
    %273 = arith.subf %272, %264 : vector<2x128xf32>
    %274 = arith.mulf %273, %271 : vector<2x128xf32>
    %275 = arith.mulf %264, %196 : vector<2x128xf32>
    %276 = arith.addf %274, %275 : vector<2x128xf32>
    %277 = arith.truncf %220 : vector<2x128xf32> to vector<2x128xbf16>
    %cst_65 = arith.constant dense<0.000000e+00> : vector<2x384xf32>
    %278 = tpu.matmul %277, %3, %cst_65 {dimension_numbers = #tpu.dot_dimension_numbers<[1], [0], [0], [1], [0, 0, 1, 1], [], []>} : vector<2x128xbf16>, vector<128x384xbf16>, vector<2x384xf32> -> vector<2x384xf32>
    %279 = vector.extract_strided_slice %28 {offsets = [0, 0], sizes = [2, 256], strides = [1, 1]} : vector<2x384xf32> to vector<2x256xf32>
    %280 = vector.extract_strided_slice %278 {offsets = [0, 0], sizes = [2, 256], strides = [1, 1]} : vector<2x384xf32> to vector<2x256xf32>
    %281 = arith.addf %279, %280 : vector<2x256xf32>
    %282 = arith.negf %281 : vector<2x256xf32>
    %283 = math.exp %282 : vector<2x256xf32>
    %cst_66 = arith.constant 1.000000e+00 : f32
    %284 = vector.broadcast %cst_66 : f32 to vector<2x256xf32>
    %285 = arith.addf %284, %283 : vector<2x256xf32>
    %286 = arith.divf %284, %285 : vector<2x256xf32>
    %287 = vector.extract_strided_slice %286 {offsets = [0, 0], sizes = [2, 128], strides = [1, 1]} : vector<2x256xf32> to vector<2x128xf32>
    %288 = vector.extract_strided_slice %286 {offsets = [0, 128], sizes = [2, 128], strides = [1, 1]} : vector<2x256xf32> to vector<2x128xf32>
    %289 = vector.extract_strided_slice %28 {offsets = [0, 256], sizes = [2, 128], strides = [1, 1]} : vector<2x384xf32> to vector<2x128xf32>
    %290 = vector.extract_strided_slice %278 {offsets = [0, 256], sizes = [2, 128], strides = [1, 1]} : vector<2x384xf32> to vector<2x128xf32>
    %291 = vector.broadcast %9 : vector<1x128xf32> to vector<2x128xf32>
    %292 = arith.addf %290, %291 : vector<2x128xf32>
    %293 = arith.mulf %287, %292 : vector<2x128xf32>
    %294 = arith.addf %289, %293 : vector<2x128xf32>
    %295 = math.tanh %294 : vector<2x128xf32>
    %cst_67 = arith.constant 1.000000e+00 : f32
    %296 = vector.broadcast %cst_67 : f32 to vector<2x128xf32>
    %297 = arith.subf %296, %288 : vector<2x128xf32>
    %298 = arith.mulf %297, %295 : vector<2x128xf32>
    %299 = arith.mulf %288, %220 : vector<2x128xf32>
    %300 = arith.addf %298, %299 : vector<2x128xf32>
    %301 = arith.truncf %220 : vector<2x128xf32> to vector<2x128xbf16>
    %cst_68 = arith.constant dense<0.000000e+00> : vector<2x384xf32>
    %302 = tpu.matmul %301, %1, %cst_68 {dimension_numbers = #tpu.dot_dimension_numbers<[1], [0], [0], [1], [0, 0, 1, 1], [], []>} : vector<2x128xbf16>, vector<128x384xbf16>, vector<2x384xf32> -> vector<2x384xf32>
    %303 = vector.broadcast %7 : vector<1x384xf32> to vector<2x384xf32>
    %304 = arith.addf %302, %303 : vector<2x384xf32>
    %305 = arith.truncf %248 : vector<2x128xf32> to vector<2x128xbf16>
    %cst_69 = arith.constant dense<0.000000e+00> : vector<2x384xf32>
    %306 = tpu.matmul %305, %4, %cst_69 {dimension_numbers = #tpu.dot_dimension_numbers<[1], [0], [0], [1], [0, 0, 1, 1], [], []>} : vector<2x128xbf16>, vector<128x384xbf16>, vector<2x384xf32> -> vector<2x384xf32>
    %307 = vector.extract_strided_slice %304 {offsets = [0, 0], sizes = [2, 256], strides = [1, 1]} : vector<2x384xf32> to vector<2x256xf32>
    %308 = vector.extract_strided_slice %306 {offsets = [0, 0], sizes = [2, 256], strides = [1, 1]} : vector<2x384xf32> to vector<2x256xf32>
    %309 = arith.addf %307, %308 : vector<2x256xf32>
    %310 = arith.negf %309 : vector<2x256xf32>
    %311 = math.exp %310 : vector<2x256xf32>
    %cst_70 = arith.constant 1.000000e+00 : f32
    %312 = vector.broadcast %cst_70 : f32 to vector<2x256xf32>
    %313 = arith.addf %312, %311 : vector<2x256xf32>
    %314 = arith.divf %312, %313 : vector<2x256xf32>
    %315 = vector.extract_strided_slice %314 {offsets = [0, 0], sizes = [2, 128], strides = [1, 1]} : vector<2x256xf32> to vector<2x128xf32>
    %316 = vector.extract_strided_slice %314 {offsets = [0, 128], sizes = [2, 128], strides = [1, 1]} : vector<2x256xf32> to vector<2x128xf32>
    %317 = vector.extract_strided_slice %304 {offsets = [0, 256], sizes = [2, 128], strides = [1, 1]} : vector<2x384xf32> to vector<2x128xf32>
    %318 = vector.extract_strided_slice %306 {offsets = [0, 256], sizes = [2, 128], strides = [1, 1]} : vector<2x384xf32> to vector<2x128xf32>
    %319 = vector.broadcast %10 : vector<1x128xf32> to vector<2x128xf32>
    %320 = arith.addf %318, %319 : vector<2x128xf32>
    %321 = arith.mulf %315, %320 : vector<2x128xf32>
    %322 = arith.addf %317, %321 : vector<2x128xf32>
    %323 = math.tanh %322 : vector<2x128xf32>
    %cst_71 = arith.constant 1.000000e+00 : f32
    %324 = vector.broadcast %cst_71 : f32 to vector<2x128xf32>
    %325 = arith.subf %324, %316 : vector<2x128xf32>
    %326 = arith.mulf %325, %323 : vector<2x128xf32>
    %327 = arith.mulf %316, %248 : vector<2x128xf32>
    %328 = arith.addf %326, %327 : vector<2x128xf32>
    %329 = arith.truncf %248 : vector<2x128xf32> to vector<2x128xbf16>
    %cst_72 = arith.constant dense<0.000000e+00> : vector<2x384xf32>
    %330 = tpu.matmul %329, %2, %cst_72 {dimension_numbers = #tpu.dot_dimension_numbers<[1], [0], [0], [1], [0, 0, 1, 1], [], []>} : vector<2x128xbf16>, vector<128x384xbf16>, vector<2x384xf32> -> vector<2x384xf32>
    %331 = vector.broadcast %8 : vector<1x384xf32> to vector<2x384xf32>
    %332 = arith.addf %330, %331 : vector<2x384xf32>
    %333 = arith.truncf %276 : vector<2x128xf32> to vector<2x128xbf16>
    %cst_73 = arith.constant dense<0.000000e+00> : vector<2x384xf32>
    %334 = tpu.matmul %333, %5, %cst_73 {dimension_numbers = #tpu.dot_dimension_numbers<[1], [0], [0], [1], [0, 0, 1, 1], [], []>} : vector<2x128xbf16>, vector<128x384xbf16>, vector<2x384xf32> -> vector<2x384xf32>
    %335 = vector.extract_strided_slice %332 {offsets = [0, 0], sizes = [2, 256], strides = [1, 1]} : vector<2x384xf32> to vector<2x256xf32>
    %336 = vector.extract_strided_slice %334 {offsets = [0, 0], sizes = [2, 256], strides = [1, 1]} : vector<2x384xf32> to vector<2x256xf32>
    %337 = arith.addf %335, %336 : vector<2x256xf32>
    %338 = arith.negf %337 : vector<2x256xf32>
    %339 = math.exp %338 : vector<2x256xf32>
    %cst_74 = arith.constant 1.000000e+00 : f32
    %340 = vector.broadcast %cst_74 : f32 to vector<2x256xf32>
    %341 = arith.addf %340, %339 : vector<2x256xf32>
    %342 = arith.divf %340, %341 : vector<2x256xf32>
    %343 = vector.extract_strided_slice %342 {offsets = [0, 0], sizes = [2, 128], strides = [1, 1]} : vector<2x256xf32> to vector<2x128xf32>
    %344 = vector.extract_strided_slice %342 {offsets = [0, 128], sizes = [2, 128], strides = [1, 1]} : vector<2x256xf32> to vector<2x128xf32>
    %345 = vector.extract_strided_slice %332 {offsets = [0, 256], sizes = [2, 128], strides = [1, 1]} : vector<2x384xf32> to vector<2x128xf32>
    %346 = vector.extract_strided_slice %334 {offsets = [0, 256], sizes = [2, 128], strides = [1, 1]} : vector<2x384xf32> to vector<2x128xf32>
    %347 = vector.broadcast %11 : vector<1x128xf32> to vector<2x128xf32>
    %348 = arith.addf %346, %347 : vector<2x128xf32>
    %349 = arith.mulf %343, %348 : vector<2x128xf32>
    %350 = arith.addf %345, %349 : vector<2x128xf32>
    %351 = math.tanh %350 : vector<2x128xf32>
    %cst_75 = arith.constant 1.000000e+00 : f32
    %352 = vector.broadcast %cst_75 : f32 to vector<2x128xf32>
    %353 = arith.subf %352, %344 : vector<2x128xf32>
    %354 = arith.mulf %353, %351 : vector<2x128xf32>
    %355 = arith.mulf %344, %276 : vector<2x128xf32>
    %356 = arith.addf %354, %355 : vector<2x128xf32>
    %357 = arith.truncf %300 : vector<2x128xf32> to vector<2x128xbf16>
    %cst_76 = arith.constant dense<0.000000e+00> : vector<2x384xf32>
    %358 = tpu.matmul %357, %3, %cst_76 {dimension_numbers = #tpu.dot_dimension_numbers<[1], [0], [0], [1], [0, 0, 1, 1], [], []>} : vector<2x128xbf16>, vector<128x384xbf16>, vector<2x384xf32> -> vector<2x384xf32>
    %359 = vector.extract_strided_slice %30 {offsets = [0, 0], sizes = [2, 256], strides = [1, 1]} : vector<2x384xf32> to vector<2x256xf32>
    %360 = vector.extract_strided_slice %358 {offsets = [0, 0], sizes = [2, 256], strides = [1, 1]} : vector<2x384xf32> to vector<2x256xf32>
    %361 = arith.addf %359, %360 : vector<2x256xf32>
    %362 = arith.negf %361 : vector<2x256xf32>
    %363 = math.exp %362 : vector<2x256xf32>
    %cst_77 = arith.constant 1.000000e+00 : f32
    %364 = vector.broadcast %cst_77 : f32 to vector<2x256xf32>
    %365 = arith.addf %364, %363 : vector<2x256xf32>
    %366 = arith.divf %364, %365 : vector<2x256xf32>
    %367 = vector.extract_strided_slice %366 {offsets = [0, 0], sizes = [2, 128], strides = [1, 1]} : vector<2x256xf32> to vector<2x128xf32>
    %368 = vector.extract_strided_slice %366 {offsets = [0, 128], sizes = [2, 128], strides = [1, 1]} : vector<2x256xf32> to vector<2x128xf32>
    %369 = vector.extract_strided_slice %30 {offsets = [0, 256], sizes = [2, 128], strides = [1, 1]} : vector<2x384xf32> to vector<2x128xf32>
    %370 = vector.extract_strided_slice %358 {offsets = [0, 256], sizes = [2, 128], strides = [1, 1]} : vector<2x384xf32> to vector<2x128xf32>
    %371 = vector.broadcast %9 : vector<1x128xf32> to vector<2x128xf32>
    %372 = arith.addf %370, %371 : vector<2x128xf32>
    %373 = arith.mulf %367, %372 : vector<2x128xf32>
    %374 = arith.addf %369, %373 : vector<2x128xf32>
    %375 = math.tanh %374 : vector<2x128xf32>
    %cst_78 = arith.constant 1.000000e+00 : f32
    %376 = vector.broadcast %cst_78 : f32 to vector<2x128xf32>
    %377 = arith.subf %376, %368 : vector<2x128xf32>
    %378 = arith.mulf %377, %375 : vector<2x128xf32>
    %379 = arith.mulf %368, %300 : vector<2x128xf32>
    %380 = arith.addf %378, %379 : vector<2x128xf32>
    %381 = arith.truncf %300 : vector<2x128xf32> to vector<2x128xbf16>
    %cst_79 = arith.constant dense<0.000000e+00> : vector<2x384xf32>
    %382 = tpu.matmul %381, %1, %cst_79 {dimension_numbers = #tpu.dot_dimension_numbers<[1], [0], [0], [1], [0, 0, 1, 1], [], []>} : vector<2x128xbf16>, vector<128x384xbf16>, vector<2x384xf32> -> vector<2x384xf32>
    %383 = vector.broadcast %7 : vector<1x384xf32> to vector<2x384xf32>
    %384 = arith.addf %382, %383 : vector<2x384xf32>
    %385 = arith.truncf %328 : vector<2x128xf32> to vector<2x128xbf16>
    %cst_80 = arith.constant dense<0.000000e+00> : vector<2x384xf32>
    %386 = tpu.matmul %385, %4, %cst_80 {dimension_numbers = #tpu.dot_dimension_numbers<[1], [0], [0], [1], [0, 0, 1, 1], [], []>} : vector<2x128xbf16>, vector<128x384xbf16>, vector<2x384xf32> -> vector<2x384xf32>
    %387 = vector.extract_strided_slice %384 {offsets = [0, 0], sizes = [2, 256], strides = [1, 1]} : vector<2x384xf32> to vector<2x256xf32>
    %388 = vector.extract_strided_slice %386 {offsets = [0, 0], sizes = [2, 256], strides = [1, 1]} : vector<2x384xf32> to vector<2x256xf32>
    %389 = arith.addf %387, %388 : vector<2x256xf32>
    %390 = arith.negf %389 : vector<2x256xf32>
    %391 = math.exp %390 : vector<2x256xf32>
    %cst_81 = arith.constant 1.000000e+00 : f32
    %392 = vector.broadcast %cst_81 : f32 to vector<2x256xf32>
    %393 = arith.addf %392, %391 : vector<2x256xf32>
    %394 = arith.divf %392, %393 : vector<2x256xf32>
    %395 = vector.extract_strided_slice %394 {offsets = [0, 0], sizes = [2, 128], strides = [1, 1]} : vector<2x256xf32> to vector<2x128xf32>
    %396 = vector.extract_strided_slice %394 {offsets = [0, 128], sizes = [2, 128], strides = [1, 1]} : vector<2x256xf32> to vector<2x128xf32>
    %397 = vector.extract_strided_slice %384 {offsets = [0, 256], sizes = [2, 128], strides = [1, 1]} : vector<2x384xf32> to vector<2x128xf32>
    %398 = vector.extract_strided_slice %386 {offsets = [0, 256], sizes = [2, 128], strides = [1, 1]} : vector<2x384xf32> to vector<2x128xf32>
    %399 = vector.broadcast %10 : vector<1x128xf32> to vector<2x128xf32>
    %400 = arith.addf %398, %399 : vector<2x128xf32>
    %401 = arith.mulf %395, %400 : vector<2x128xf32>
    %402 = arith.addf %397, %401 : vector<2x128xf32>
    %403 = math.tanh %402 : vector<2x128xf32>
    %cst_82 = arith.constant 1.000000e+00 : f32
    %404 = vector.broadcast %cst_82 : f32 to vector<2x128xf32>
    %405 = arith.subf %404, %396 : vector<2x128xf32>
    %406 = arith.mulf %405, %403 : vector<2x128xf32>
    %407 = arith.mulf %396, %328 : vector<2x128xf32>
    %408 = arith.addf %406, %407 : vector<2x128xf32>
    %409 = arith.truncf %328 : vector<2x128xf32> to vector<2x128xbf16>
    %cst_83 = arith.constant dense<0.000000e+00> : vector<2x384xf32>
    %410 = tpu.matmul %409, %2, %cst_83 {dimension_numbers = #tpu.dot_dimension_numbers<[1], [0], [0], [1], [0, 0, 1, 1], [], []>} : vector<2x128xbf16>, vector<128x384xbf16>, vector<2x384xf32> -> vector<2x384xf32>
    %411 = vector.broadcast %8 : vector<1x384xf32> to vector<2x384xf32>
    %412 = arith.addf %410, %411 : vector<2x384xf32>
    %413 = arith.truncf %356 : vector<2x128xf32> to vector<2x128xbf16>
    %cst_84 = arith.constant dense<0.000000e+00> : vector<2x384xf32>
    %414 = tpu.matmul %413, %5, %cst_84 {dimension_numbers = #tpu.dot_dimension_numbers<[1], [0], [0], [1], [0, 0, 1, 1], [], []>} : vector<2x128xbf16>, vector<128x384xbf16>, vector<2x384xf32> -> vector<2x384xf32>
    %415 = vector.extract_strided_slice %412 {offsets = [0, 0], sizes = [2, 256], strides = [1, 1]} : vector<2x384xf32> to vector<2x256xf32>
    %416 = vector.extract_strided_slice %414 {offsets = [0, 0], sizes = [2, 256], strides = [1, 1]} : vector<2x384xf32> to vector<2x256xf32>
    %417 = arith.addf %415, %416 : vector<2x256xf32>
    %418 = arith.negf %417 : vector<2x256xf32>
    %419 = math.exp %418 : vector<2x256xf32>
    %cst_85 = arith.constant 1.000000e+00 : f32
    %420 = vector.broadcast %cst_85 : f32 to vector<2x256xf32>
    %421 = arith.addf %420, %419 : vector<2x256xf32>
    %422 = arith.divf %420, %421 : vector<2x256xf32>
    %423 = vector.extract_strided_slice %422 {offsets = [0, 0], sizes = [2, 128], strides = [1, 1]} : vector<2x256xf32> to vector<2x128xf32>
    %424 = vector.extract_strided_slice %422 {offsets = [0, 128], sizes = [2, 128], strides = [1, 1]} : vector<2x256xf32> to vector<2x128xf32>
    %425 = vector.extract_strided_slice %412 {offsets = [0, 256], sizes = [2, 128], strides = [1, 1]} : vector<2x384xf32> to vector<2x128xf32>
    %426 = vector.extract_strided_slice %414 {offsets = [0, 256], sizes = [2, 128], strides = [1, 1]} : vector<2x384xf32> to vector<2x128xf32>
    %427 = vector.broadcast %11 : vector<1x128xf32> to vector<2x128xf32>
    %428 = arith.addf %426, %427 : vector<2x128xf32>
    %429 = arith.mulf %423, %428 : vector<2x128xf32>
    %430 = arith.addf %425, %429 : vector<2x128xf32>
    %431 = math.tanh %430 : vector<2x128xf32>
    %cst_86 = arith.constant 1.000000e+00 : f32
    %432 = vector.broadcast %cst_86 : f32 to vector<2x128xf32>
    %433 = arith.subf %432, %424 : vector<2x128xf32>
    %434 = arith.mulf %433, %431 : vector<2x128xf32>
    %435 = arith.mulf %424, %356 : vector<2x128xf32>
    %436 = arith.addf %434, %435 : vector<2x128xf32>
    %437 = arith.truncf %380 : vector<2x128xf32> to vector<2x128xbf16>
    %cst_87 = arith.constant dense<0.000000e+00> : vector<2x384xf32>
    %438 = tpu.matmul %437, %3, %cst_87 {dimension_numbers = #tpu.dot_dimension_numbers<[1], [0], [0], [1], [0, 0, 1, 1], [], []>} : vector<2x128xbf16>, vector<128x384xbf16>, vector<2x384xf32> -> vector<2x384xf32>
    %439 = vector.extract_strided_slice %32 {offsets = [0, 0], sizes = [2, 256], strides = [1, 1]} : vector<2x384xf32> to vector<2x256xf32>
    %440 = vector.extract_strided_slice %438 {offsets = [0, 0], sizes = [2, 256], strides = [1, 1]} : vector<2x384xf32> to vector<2x256xf32>
    %441 = arith.addf %439, %440 : vector<2x256xf32>
    %442 = arith.negf %441 : vector<2x256xf32>
    %443 = math.exp %442 : vector<2x256xf32>
    %cst_88 = arith.constant 1.000000e+00 : f32
    %444 = vector.broadcast %cst_88 : f32 to vector<2x256xf32>
    %445 = arith.addf %444, %443 : vector<2x256xf32>
    %446 = arith.divf %444, %445 : vector<2x256xf32>
    %447 = vector.extract_strided_slice %446 {offsets = [0, 0], sizes = [2, 128], strides = [1, 1]} : vector<2x256xf32> to vector<2x128xf32>
    %448 = vector.extract_strided_slice %446 {offsets = [0, 128], sizes = [2, 128], strides = [1, 1]} : vector<2x256xf32> to vector<2x128xf32>
    %449 = vector.extract_strided_slice %32 {offsets = [0, 256], sizes = [2, 128], strides = [1, 1]} : vector<2x384xf32> to vector<2x128xf32>
    %450 = vector.extract_strided_slice %438 {offsets = [0, 256], sizes = [2, 128], strides = [1, 1]} : vector<2x384xf32> to vector<2x128xf32>
    %451 = vector.broadcast %9 : vector<1x128xf32> to vector<2x128xf32>
    %452 = arith.addf %450, %451 : vector<2x128xf32>
    %453 = arith.mulf %447, %452 : vector<2x128xf32>
    %454 = arith.addf %449, %453 : vector<2x128xf32>
    %455 = math.tanh %454 : vector<2x128xf32>
    %cst_89 = arith.constant 1.000000e+00 : f32
    %456 = vector.broadcast %cst_89 : f32 to vector<2x128xf32>
    %457 = arith.subf %456, %448 : vector<2x128xf32>
    %458 = arith.mulf %457, %455 : vector<2x128xf32>
    %459 = arith.mulf %448, %380 : vector<2x128xf32>
    %460 = arith.addf %458, %459 : vector<2x128xf32>
    %461 = arith.truncf %380 : vector<2x128xf32> to vector<2x128xbf16>
    %cst_90 = arith.constant dense<0.000000e+00> : vector<2x384xf32>
    %462 = tpu.matmul %461, %1, %cst_90 {dimension_numbers = #tpu.dot_dimension_numbers<[1], [0], [0], [1], [0, 0, 1, 1], [], []>} : vector<2x128xbf16>, vector<128x384xbf16>, vector<2x384xf32> -> vector<2x384xf32>
    %463 = vector.broadcast %7 : vector<1x384xf32> to vector<2x384xf32>
    %464 = arith.addf %462, %463 : vector<2x384xf32>
    %465 = arith.truncf %408 : vector<2x128xf32> to vector<2x128xbf16>
    %cst_91 = arith.constant dense<0.000000e+00> : vector<2x384xf32>
    %466 = tpu.matmul %465, %4, %cst_91 {dimension_numbers = #tpu.dot_dimension_numbers<[1], [0], [0], [1], [0, 0, 1, 1], [], []>} : vector<2x128xbf16>, vector<128x384xbf16>, vector<2x384xf32> -> vector<2x384xf32>
    %467 = vector.extract_strided_slice %464 {offsets = [0, 0], sizes = [2, 256], strides = [1, 1]} : vector<2x384xf32> to vector<2x256xf32>
    %468 = vector.extract_strided_slice %466 {offsets = [0, 0], sizes = [2, 256], strides = [1, 1]} : vector<2x384xf32> to vector<2x256xf32>
    %469 = arith.addf %467, %468 : vector<2x256xf32>
    %470 = arith.negf %469 : vector<2x256xf32>
    %471 = math.exp %470 : vector<2x256xf32>
    %cst_92 = arith.constant 1.000000e+00 : f32
    %472 = vector.broadcast %cst_92 : f32 to vector<2x256xf32>
    %473 = arith.addf %472, %471 : vector<2x256xf32>
    %474 = arith.divf %472, %473 : vector<2x256xf32>
    %475 = vector.extract_strided_slice %474 {offsets = [0, 0], sizes = [2, 128], strides = [1, 1]} : vector<2x256xf32> to vector<2x128xf32>
    %476 = vector.extract_strided_slice %474 {offsets = [0, 128], sizes = [2, 128], strides = [1, 1]} : vector<2x256xf32> to vector<2x128xf32>
    %477 = vector.extract_strided_slice %464 {offsets = [0, 256], sizes = [2, 128], strides = [1, 1]} : vector<2x384xf32> to vector<2x128xf32>
    %478 = vector.extract_strided_slice %466 {offsets = [0, 256], sizes = [2, 128], strides = [1, 1]} : vector<2x384xf32> to vector<2x128xf32>
    %479 = vector.broadcast %10 : vector<1x128xf32> to vector<2x128xf32>
    %480 = arith.addf %478, %479 : vector<2x128xf32>
    %481 = arith.mulf %475, %480 : vector<2x128xf32>
    %482 = arith.addf %477, %481 : vector<2x128xf32>
    %483 = math.tanh %482 : vector<2x128xf32>
    %cst_93 = arith.constant 1.000000e+00 : f32
    %484 = vector.broadcast %cst_93 : f32 to vector<2x128xf32>
    %485 = arith.subf %484, %476 : vector<2x128xf32>
    %486 = arith.mulf %485, %483 : vector<2x128xf32>
    %487 = arith.mulf %476, %408 : vector<2x128xf32>
    %488 = arith.addf %486, %487 : vector<2x128xf32>
    %489 = arith.truncf %408 : vector<2x128xf32> to vector<2x128xbf16>
    %cst_94 = arith.constant dense<0.000000e+00> : vector<2x384xf32>
    %490 = tpu.matmul %489, %2, %cst_94 {dimension_numbers = #tpu.dot_dimension_numbers<[1], [0], [0], [1], [0, 0, 1, 1], [], []>} : vector<2x128xbf16>, vector<128x384xbf16>, vector<2x384xf32> -> vector<2x384xf32>
    %491 = vector.broadcast %8 : vector<1x384xf32> to vector<2x384xf32>
    %492 = arith.addf %490, %491 : vector<2x384xf32>
    %493 = arith.truncf %436 : vector<2x128xf32> to vector<2x128xbf16>
    %cst_95 = arith.constant dense<0.000000e+00> : vector<2x384xf32>
    %494 = tpu.matmul %493, %5, %cst_95 {dimension_numbers = #tpu.dot_dimension_numbers<[1], [0], [0], [1], [0, 0, 1, 1], [], []>} : vector<2x128xbf16>, vector<128x384xbf16>, vector<2x384xf32> -> vector<2x384xf32>
    %495 = vector.extract_strided_slice %492 {offsets = [0, 0], sizes = [2, 256], strides = [1, 1]} : vector<2x384xf32> to vector<2x256xf32>
    %496 = vector.extract_strided_slice %494 {offsets = [0, 0], sizes = [2, 256], strides = [1, 1]} : vector<2x384xf32> to vector<2x256xf32>
    %497 = arith.addf %495, %496 : vector<2x256xf32>
    %498 = arith.negf %497 : vector<2x256xf32>
    %499 = math.exp %498 : vector<2x256xf32>
    %cst_96 = arith.constant 1.000000e+00 : f32
    %500 = vector.broadcast %cst_96 : f32 to vector<2x256xf32>
    %501 = arith.addf %500, %499 : vector<2x256xf32>
    %502 = arith.divf %500, %501 : vector<2x256xf32>
    %503 = vector.extract_strided_slice %502 {offsets = [0, 0], sizes = [2, 128], strides = [1, 1]} : vector<2x256xf32> to vector<2x128xf32>
    %504 = vector.extract_strided_slice %502 {offsets = [0, 128], sizes = [2, 128], strides = [1, 1]} : vector<2x256xf32> to vector<2x128xf32>
    %505 = vector.extract_strided_slice %492 {offsets = [0, 256], sizes = [2, 128], strides = [1, 1]} : vector<2x384xf32> to vector<2x128xf32>
    %506 = vector.extract_strided_slice %494 {offsets = [0, 256], sizes = [2, 128], strides = [1, 1]} : vector<2x384xf32> to vector<2x128xf32>
    %507 = vector.broadcast %11 : vector<1x128xf32> to vector<2x128xf32>
    %508 = arith.addf %506, %507 : vector<2x128xf32>
    %509 = arith.mulf %503, %508 : vector<2x128xf32>
    %510 = arith.addf %505, %509 : vector<2x128xf32>
    %511 = math.tanh %510 : vector<2x128xf32>
    %cst_97 = arith.constant 1.000000e+00 : f32
    %512 = vector.broadcast %cst_97 : f32 to vector<2x128xf32>
    %513 = arith.subf %512, %504 : vector<2x128xf32>
    %514 = arith.mulf %513, %511 : vector<2x128xf32>
    %515 = arith.mulf %504, %436 : vector<2x128xf32>
    %516 = arith.addf %514, %515 : vector<2x128xf32>
    %517 = arith.truncf %460 : vector<2x128xf32> to vector<2x128xbf16>
    %cst_98 = arith.constant dense<0.000000e+00> : vector<2x384xf32>
    %518 = tpu.matmul %517, %3, %cst_98 {dimension_numbers = #tpu.dot_dimension_numbers<[1], [0], [0], [1], [0, 0, 1, 1], [], []>} : vector<2x128xbf16>, vector<128x384xbf16>, vector<2x384xf32> -> vector<2x384xf32>
    %519 = vector.extract_strided_slice %34 {offsets = [0, 0], sizes = [2, 256], strides = [1, 1]} : vector<2x384xf32> to vector<2x256xf32>
    %520 = vector.extract_strided_slice %518 {offsets = [0, 0], sizes = [2, 256], strides = [1, 1]} : vector<2x384xf32> to vector<2x256xf32>
    %521 = arith.addf %519, %520 : vector<2x256xf32>
    %522 = arith.negf %521 : vector<2x256xf32>
    %523 = math.exp %522 : vector<2x256xf32>
    %cst_99 = arith.constant 1.000000e+00 : f32
    %524 = vector.broadcast %cst_99 : f32 to vector<2x256xf32>
    %525 = arith.addf %524, %523 : vector<2x256xf32>
    %526 = arith.divf %524, %525 : vector<2x256xf32>
    %527 = vector.extract_strided_slice %526 {offsets = [0, 0], sizes = [2, 128], strides = [1, 1]} : vector<2x256xf32> to vector<2x128xf32>
    %528 = vector.extract_strided_slice %526 {offsets = [0, 128], sizes = [2, 128], strides = [1, 1]} : vector<2x256xf32> to vector<2x128xf32>
    %529 = vector.extract_strided_slice %34 {offsets = [0, 256], sizes = [2, 128], strides = [1, 1]} : vector<2x384xf32> to vector<2x128xf32>
    %530 = vector.extract_strided_slice %518 {offsets = [0, 256], sizes = [2, 128], strides = [1, 1]} : vector<2x384xf32> to vector<2x128xf32>
    %531 = vector.broadcast %9 : vector<1x128xf32> to vector<2x128xf32>
    %532 = arith.addf %530, %531 : vector<2x128xf32>
    %533 = arith.mulf %527, %532 : vector<2x128xf32>
    %534 = arith.addf %529, %533 : vector<2x128xf32>
    %535 = math.tanh %534 : vector<2x128xf32>
    %cst_100 = arith.constant 1.000000e+00 : f32
    %536 = vector.broadcast %cst_100 : f32 to vector<2x128xf32>
    %537 = arith.subf %536, %528 : vector<2x128xf32>
    %538 = arith.mulf %537, %535 : vector<2x128xf32>
    %539 = arith.mulf %528, %460 : vector<2x128xf32>
    %540 = arith.addf %538, %539 : vector<2x128xf32>
    %541 = arith.truncf %460 : vector<2x128xf32> to vector<2x128xbf16>
    %cst_101 = arith.constant dense<0.000000e+00> : vector<2x384xf32>
    %542 = tpu.matmul %541, %1, %cst_101 {dimension_numbers = #tpu.dot_dimension_numbers<[1], [0], [0], [1], [0, 0, 1, 1], [], []>} : vector<2x128xbf16>, vector<128x384xbf16>, vector<2x384xf32> -> vector<2x384xf32>
    %543 = vector.broadcast %7 : vector<1x384xf32> to vector<2x384xf32>
    %544 = arith.addf %542, %543 : vector<2x384xf32>
    %545 = arith.truncf %488 : vector<2x128xf32> to vector<2x128xbf16>
    %cst_102 = arith.constant dense<0.000000e+00> : vector<2x384xf32>
    %546 = tpu.matmul %545, %4, %cst_102 {dimension_numbers = #tpu.dot_dimension_numbers<[1], [0], [0], [1], [0, 0, 1, 1], [], []>} : vector<2x128xbf16>, vector<128x384xbf16>, vector<2x384xf32> -> vector<2x384xf32>
    %547 = vector.extract_strided_slice %544 {offsets = [0, 0], sizes = [2, 256], strides = [1, 1]} : vector<2x384xf32> to vector<2x256xf32>
    %548 = vector.extract_strided_slice %546 {offsets = [0, 0], sizes = [2, 256], strides = [1, 1]} : vector<2x384xf32> to vector<2x256xf32>
    %549 = arith.addf %547, %548 : vector<2x256xf32>
    %550 = arith.negf %549 : vector<2x256xf32>
    %551 = math.exp %550 : vector<2x256xf32>
    %cst_103 = arith.constant 1.000000e+00 : f32
    %552 = vector.broadcast %cst_103 : f32 to vector<2x256xf32>
    %553 = arith.addf %552, %551 : vector<2x256xf32>
    %554 = arith.divf %552, %553 : vector<2x256xf32>
    %555 = vector.extract_strided_slice %554 {offsets = [0, 0], sizes = [2, 128], strides = [1, 1]} : vector<2x256xf32> to vector<2x128xf32>
    %556 = vector.extract_strided_slice %554 {offsets = [0, 128], sizes = [2, 128], strides = [1, 1]} : vector<2x256xf32> to vector<2x128xf32>
    %557 = vector.extract_strided_slice %544 {offsets = [0, 256], sizes = [2, 128], strides = [1, 1]} : vector<2x384xf32> to vector<2x128xf32>
    %558 = vector.extract_strided_slice %546 {offsets = [0, 256], sizes = [2, 128], strides = [1, 1]} : vector<2x384xf32> to vector<2x128xf32>
    %559 = vector.broadcast %10 : vector<1x128xf32> to vector<2x128xf32>
    %560 = arith.addf %558, %559 : vector<2x128xf32>
    %561 = arith.mulf %555, %560 : vector<2x128xf32>
    %562 = arith.addf %557, %561 : vector<2x128xf32>
    %563 = math.tanh %562 : vector<2x128xf32>
    %cst_104 = arith.constant 1.000000e+00 : f32
    %564 = vector.broadcast %cst_104 : f32 to vector<2x128xf32>
    %565 = arith.subf %564, %556 : vector<2x128xf32>
    %566 = arith.mulf %565, %563 : vector<2x128xf32>
    %567 = arith.mulf %556, %488 : vector<2x128xf32>
    %568 = arith.addf %566, %567 : vector<2x128xf32>
    %569 = arith.truncf %488 : vector<2x128xf32> to vector<2x128xbf16>
    %cst_105 = arith.constant dense<0.000000e+00> : vector<2x384xf32>
    %570 = tpu.matmul %569, %2, %cst_105 {dimension_numbers = #tpu.dot_dimension_numbers<[1], [0], [0], [1], [0, 0, 1, 1], [], []>} : vector<2x128xbf16>, vector<128x384xbf16>, vector<2x384xf32> -> vector<2x384xf32>
    %571 = vector.broadcast %8 : vector<1x384xf32> to vector<2x384xf32>
    %572 = arith.addf %570, %571 : vector<2x384xf32>
    %573 = arith.truncf %516 : vector<2x128xf32> to vector<2x128xbf16>
    %cst_106 = arith.constant dense<0.000000e+00> : vector<2x384xf32>
    %574 = tpu.matmul %573, %5, %cst_106 {dimension_numbers = #tpu.dot_dimension_numbers<[1], [0], [0], [1], [0, 0, 1, 1], [], []>} : vector<2x128xbf16>, vector<128x384xbf16>, vector<2x384xf32> -> vector<2x384xf32>
    %575 = vector.extract_strided_slice %572 {offsets = [0, 0], sizes = [2, 256], strides = [1, 1]} : vector<2x384xf32> to vector<2x256xf32>
    %576 = vector.extract_strided_slice %574 {offsets = [0, 0], sizes = [2, 256], strides = [1, 1]} : vector<2x384xf32> to vector<2x256xf32>
    %577 = arith.addf %575, %576 : vector<2x256xf32>
    %578 = arith.negf %577 : vector<2x256xf32>
    %579 = math.exp %578 : vector<2x256xf32>
    %cst_107 = arith.constant 1.000000e+00 : f32
    %580 = vector.broadcast %cst_107 : f32 to vector<2x256xf32>
    %581 = arith.addf %580, %579 : vector<2x256xf32>
    %582 = arith.divf %580, %581 : vector<2x256xf32>
    %583 = vector.extract_strided_slice %582 {offsets = [0, 0], sizes = [2, 128], strides = [1, 1]} : vector<2x256xf32> to vector<2x128xf32>
    %584 = vector.extract_strided_slice %582 {offsets = [0, 128], sizes = [2, 128], strides = [1, 1]} : vector<2x256xf32> to vector<2x128xf32>
    %585 = vector.extract_strided_slice %572 {offsets = [0, 256], sizes = [2, 128], strides = [1, 1]} : vector<2x384xf32> to vector<2x128xf32>
    %586 = vector.extract_strided_slice %574 {offsets = [0, 256], sizes = [2, 128], strides = [1, 1]} : vector<2x384xf32> to vector<2x128xf32>
    %587 = vector.broadcast %11 : vector<1x128xf32> to vector<2x128xf32>
    %588 = arith.addf %586, %587 : vector<2x128xf32>
    %589 = arith.mulf %583, %588 : vector<2x128xf32>
    %590 = arith.addf %585, %589 : vector<2x128xf32>
    %591 = math.tanh %590 : vector<2x128xf32>
    %cst_108 = arith.constant 1.000000e+00 : f32
    %592 = vector.broadcast %cst_108 : f32 to vector<2x128xf32>
    %593 = arith.subf %592, %584 : vector<2x128xf32>
    %594 = arith.mulf %593, %591 : vector<2x128xf32>
    %595 = arith.mulf %584, %516 : vector<2x128xf32>
    %596 = arith.addf %594, %595 : vector<2x128xf32>
    %597 = arith.truncf %540 : vector<2x128xf32> to vector<2x128xbf16>
    %cst_109 = arith.constant dense<0.000000e+00> : vector<2x384xf32>
    %598 = tpu.matmul %597, %1, %cst_109 {dimension_numbers = #tpu.dot_dimension_numbers<[1], [0], [0], [1], [0, 0, 1, 1], [], []>} : vector<2x128xbf16>, vector<128x384xbf16>, vector<2x384xf32> -> vector<2x384xf32>
    %599 = vector.broadcast %7 : vector<1x384xf32> to vector<2x384xf32>
    %600 = arith.addf %598, %599 : vector<2x384xf32>
    %601 = arith.truncf %568 : vector<2x128xf32> to vector<2x128xbf16>
    %cst_110 = arith.constant dense<0.000000e+00> : vector<2x384xf32>
    %602 = tpu.matmul %601, %4, %cst_110 {dimension_numbers = #tpu.dot_dimension_numbers<[1], [0], [0], [1], [0, 0, 1, 1], [], []>} : vector<2x128xbf16>, vector<128x384xbf16>, vector<2x384xf32> -> vector<2x384xf32>
    %603 = vector.extract_strided_slice %600 {offsets = [0, 0], sizes = [2, 256], strides = [1, 1]} : vector<2x384xf32> to vector<2x256xf32>
    %604 = vector.extract_strided_slice %602 {offsets = [0, 0], sizes = [2, 256], strides = [1, 1]} : vector<2x384xf32> to vector<2x256xf32>
    %605 = arith.addf %603, %604 : vector<2x256xf32>
    %606 = arith.negf %605 : vector<2x256xf32>
    %607 = math.exp %606 : vector<2x256xf32>
    %cst_111 = arith.constant 1.000000e+00 : f32
    %608 = vector.broadcast %cst_111 : f32 to vector<2x256xf32>
    %609 = arith.addf %608, %607 : vector<2x256xf32>
    %610 = arith.divf %608, %609 : vector<2x256xf32>
    %611 = vector.extract_strided_slice %610 {offsets = [0, 0], sizes = [2, 128], strides = [1, 1]} : vector<2x256xf32> to vector<2x128xf32>
    %612 = vector.extract_strided_slice %610 {offsets = [0, 128], sizes = [2, 128], strides = [1, 1]} : vector<2x256xf32> to vector<2x128xf32>
    %613 = vector.extract_strided_slice %600 {offsets = [0, 256], sizes = [2, 128], strides = [1, 1]} : vector<2x384xf32> to vector<2x128xf32>
    %614 = vector.extract_strided_slice %602 {offsets = [0, 256], sizes = [2, 128], strides = [1, 1]} : vector<2x384xf32> to vector<2x128xf32>
    %615 = vector.broadcast %10 : vector<1x128xf32> to vector<2x128xf32>
    %616 = arith.addf %614, %615 : vector<2x128xf32>
    %617 = arith.mulf %611, %616 : vector<2x128xf32>
    %618 = arith.addf %613, %617 : vector<2x128xf32>
    %619 = math.tanh %618 : vector<2x128xf32>
    %cst_112 = arith.constant 1.000000e+00 : f32
    %620 = vector.broadcast %cst_112 : f32 to vector<2x128xf32>
    %621 = arith.subf %620, %612 : vector<2x128xf32>
    %622 = arith.mulf %621, %619 : vector<2x128xf32>
    %623 = arith.mulf %612, %568 : vector<2x128xf32>
    %624 = arith.addf %622, %623 : vector<2x128xf32>
    %625 = arith.truncf %568 : vector<2x128xf32> to vector<2x128xbf16>
    %cst_113 = arith.constant dense<0.000000e+00> : vector<2x384xf32>
    %626 = tpu.matmul %625, %2, %cst_113 {dimension_numbers = #tpu.dot_dimension_numbers<[1], [0], [0], [1], [0, 0, 1, 1], [], []>} : vector<2x128xbf16>, vector<128x384xbf16>, vector<2x384xf32> -> vector<2x384xf32>
    %627 = vector.broadcast %8 : vector<1x384xf32> to vector<2x384xf32>
    %628 = arith.addf %626, %627 : vector<2x384xf32>
    %629 = arith.truncf %596 : vector<2x128xf32> to vector<2x128xbf16>
    %cst_114 = arith.constant dense<0.000000e+00> : vector<2x384xf32>
    %630 = tpu.matmul %629, %5, %cst_114 {dimension_numbers = #tpu.dot_dimension_numbers<[1], [0], [0], [1], [0, 0, 1, 1], [], []>} : vector<2x128xbf16>, vector<128x384xbf16>, vector<2x384xf32> -> vector<2x384xf32>
    %631 = vector.extract_strided_slice %628 {offsets = [0, 0], sizes = [2, 256], strides = [1, 1]} : vector<2x384xf32> to vector<2x256xf32>
    %632 = vector.extract_strided_slice %630 {offsets = [0, 0], sizes = [2, 256], strides = [1, 1]} : vector<2x384xf32> to vector<2x256xf32>
    %633 = arith.addf %631, %632 : vector<2x256xf32>
    %634 = arith.negf %633 : vector<2x256xf32>
    %635 = math.exp %634 : vector<2x256xf32>
    %cst_115 = arith.constant 1.000000e+00 : f32
    %636 = vector.broadcast %cst_115 : f32 to vector<2x256xf32>
    %637 = arith.addf %636, %635 : vector<2x256xf32>
    %638 = arith.divf %636, %637 : vector<2x256xf32>
    %639 = vector.extract_strided_slice %638 {offsets = [0, 0], sizes = [2, 128], strides = [1, 1]} : vector<2x256xf32> to vector<2x128xf32>
    %640 = vector.extract_strided_slice %638 {offsets = [0, 128], sizes = [2, 128], strides = [1, 1]} : vector<2x256xf32> to vector<2x128xf32>
    %641 = vector.extract_strided_slice %628 {offsets = [0, 256], sizes = [2, 128], strides = [1, 1]} : vector<2x384xf32> to vector<2x128xf32>
    %642 = vector.extract_strided_slice %630 {offsets = [0, 256], sizes = [2, 128], strides = [1, 1]} : vector<2x384xf32> to vector<2x128xf32>
    %643 = vector.broadcast %11 : vector<1x128xf32> to vector<2x128xf32>
    %644 = arith.addf %642, %643 : vector<2x128xf32>
    %645 = arith.mulf %639, %644 : vector<2x128xf32>
    %646 = arith.addf %641, %645 : vector<2x128xf32>
    %647 = math.tanh %646 : vector<2x128xf32>
    %cst_116 = arith.constant 1.000000e+00 : f32
    %648 = vector.broadcast %cst_116 : f32 to vector<2x128xf32>
    %649 = arith.subf %648, %640 : vector<2x128xf32>
    %650 = arith.mulf %649, %647 : vector<2x128xf32>
    %651 = arith.mulf %640, %596 : vector<2x128xf32>
    %652 = arith.addf %650, %651 : vector<2x128xf32>
    %653 = arith.truncf %624 : vector<2x128xf32> to vector<2x128xbf16>
    %cst_117 = arith.constant dense<0.000000e+00> : vector<2x384xf32>
    %654 = tpu.matmul %653, %2, %cst_117 {dimension_numbers = #tpu.dot_dimension_numbers<[1], [0], [0], [1], [0, 0, 1, 1], [], []>} : vector<2x128xbf16>, vector<128x384xbf16>, vector<2x384xf32> -> vector<2x384xf32>
    %655 = vector.broadcast %8 : vector<1x384xf32> to vector<2x384xf32>
    %656 = arith.addf %654, %655 : vector<2x384xf32>
    %657 = arith.truncf %652 : vector<2x128xf32> to vector<2x128xbf16>
    %cst_118 = arith.constant dense<0.000000e+00> : vector<2x384xf32>
    %658 = tpu.matmul %657, %5, %cst_118 {dimension_numbers = #tpu.dot_dimension_numbers<[1], [0], [0], [1], [0, 0, 1, 1], [], []>} : vector<2x128xbf16>, vector<128x384xbf16>, vector<2x384xf32> -> vector<2x384xf32>
    %659 = vector.extract_strided_slice %656 {offsets = [0, 0], sizes = [2, 256], strides = [1, 1]} : vector<2x384xf32> to vector<2x256xf32>
    %660 = vector.extract_strided_slice %658 {offsets = [0, 0], sizes = [2, 256], strides = [1, 1]} : vector<2x384xf32> to vector<2x256xf32>
    %661 = arith.addf %659, %660 : vector<2x256xf32>
    %662 = arith.negf %661 : vector<2x256xf32>
    %663 = math.exp %662 : vector<2x256xf32>
    %cst_119 = arith.constant 1.000000e+00 : f32
    %664 = vector.broadcast %cst_119 : f32 to vector<2x256xf32>
    %665 = arith.addf %664, %663 : vector<2x256xf32>
    %666 = arith.divf %664, %665 : vector<2x256xf32>
    %667 = vector.extract_strided_slice %666 {offsets = [0, 0], sizes = [2, 128], strides = [1, 1]} : vector<2x256xf32> to vector<2x128xf32>
    %668 = vector.extract_strided_slice %666 {offsets = [0, 128], sizes = [2, 128], strides = [1, 1]} : vector<2x256xf32> to vector<2x128xf32>
    %669 = vector.extract_strided_slice %656 {offsets = [0, 256], sizes = [2, 128], strides = [1, 1]} : vector<2x384xf32> to vector<2x128xf32>
    %670 = vector.extract_strided_slice %658 {offsets = [0, 256], sizes = [2, 128], strides = [1, 1]} : vector<2x384xf32> to vector<2x128xf32>
    %671 = vector.broadcast %11 : vector<1x128xf32> to vector<2x128xf32>
    %672 = arith.addf %670, %671 : vector<2x128xf32>
    %673 = arith.mulf %667, %672 : vector<2x128xf32>
    %674 = arith.addf %669, %673 : vector<2x128xf32>
    %675 = math.tanh %674 : vector<2x128xf32>
    %cst_120 = arith.constant 1.000000e+00 : f32
    %676 = vector.broadcast %cst_120 : f32 to vector<2x128xf32>
    %677 = arith.subf %676, %668 : vector<2x128xf32>
    %678 = arith.mulf %677, %675 : vector<2x128xf32>
    %679 = arith.mulf %668, %652 : vector<2x128xf32>
    %680 = arith.addf %678, %679 : vector<2x128xf32>
    %c0_121 = arith.constant 0 : index
    %c0_122 = arith.constant 0 : index
    %c0_123 = arith.constant 0 : index
    %681 = vector.load %arg18[%c0_121, %c0_122, %c0_123] : memref<2x3x128xf32, #tpu.memory_space<vmem>>, vector<2x1x128xf32>
    %682 = vector.shape_cast %681 : vector<2x1x128xf32> to vector<2x128xf32>
    %683 = vector.shape_cast %540 : vector<2x128xf32> to vector<2x1x128xf32>
    tpu.vector_store %arg18[%c0_121, %c0_122, %c0_123], %683 {strides = array<i32>} : memref<2x3x128xf32, #tpu.memory_space<vmem>>, vector<2x1x128xf32>,
    %c0_124 = arith.constant 0 : index
    %c1_125 = arith.constant 1 : index
    %c0_126 = arith.constant 0 : index
    %684 = vector.load %arg18[%c0_124, %c1_125, %c0_126] : memref<2x3x128xf32, #tpu.memory_space<vmem>>, vector<2x1x128xf32>
    %685 = vector.shape_cast %684 : vector<2x1x128xf32> to vector<2x128xf32>
    %686 = vector.shape_cast %624 : vector<2x128xf32> to vector<2x1x128xf32>
    tpu.vector_store %arg18[%c0_124, %c1_125, %c0_126], %686 {strides = array<i32>} : memref<2x3x128xf32, #tpu.memory_space<vmem>>, vector<2x1x128xf32>,
    %c0_127 = arith.constant 0 : index
    %c2_128 = arith.constant 2 : index
    %c0_129 = arith.constant 0 : index
    %687 = vector.load %arg18[%c0_127, %c2_128, %c0_129] : memref<2x3x128xf32, #tpu.memory_space<vmem>>, vector<2x1x128xf32>
    %688 = vector.shape_cast %687 : vector<2x1x128xf32> to vector<2x128xf32>
    %689 = vector.shape_cast %680 : vector<2x128xf32> to vector<2x1x128xf32>
    tpu.vector_store %arg18[%c0_127, %c2_128, %c0_129], %689 {strides = array<i32>} : memref<2x3x128xf32, #tpu.memory_space<vmem>>, vector<2x1x128xf32>,
    %690 = vector.shape_cast %196 : vector<2x128xf32> to vector<2x1x128xf32>
    %691 = vector.shape_cast %276 : vector<2x128xf32> to vector<2x1x128xf32>
    %692 = vector.shape_cast %356 : vector<2x128xf32> to vector<2x1x128xf32>
    %693 = vector.shape_cast %436 : vector<2x128xf32> to vector<2x1x128xf32>
    %694 = vector.shape_cast %516 : vector<2x128xf32> to vector<2x1x128xf32>
    %695 = vector.shape_cast %596 : vector<2x128xf32> to vector<2x1x128xf32>
    %696 = vector.shape_cast %652 : vector<2x128xf32> to vector<2x1x128xf32>
    %697 = vector.shape_cast %680 : vector<2x128xf32> to vector<2x1x128xf32>
    %698 = tpu.concatenate %690, %691, %692, %693, %694, %695, %696, %697 in 1 : vector<2x1x128xf32>, vector<2x1x128xf32>, vector<2x1x128xf32>, vector<2x1x128xf32>, vector<2x1x128xf32>, vector<2x1x128xf32>, vector<2x1x128xf32>, vector<2x1x128xf32> -> vector<2x8x128xf32>
    %699 = vector.shape_cast %698 : vector<2x8x128xf32> to vector<16x128xf32>
    %700 = arith.truncf %699 : vector<16x128xf32> to vector<16x128xbf16>
    %c0_130 = arith.constant 0 : index
    %c0_131 = arith.constant 0 : index
    %701 = vector.load %arg15[%c0_130, %c0_131] : memref<128x2xbf16, #tpu.memory_space<vmem>>, vector<128x2xbf16>
    %cst_132 = arith.constant dense<0.000000e+00> : vector<16x2xf32>
    %702 = tpu.matmul %700, %701, %cst_132 {dimension_numbers = #tpu.dot_dimension_numbers<[1], [0], [0], [1], [0, 0, 1, 1], [], []>} : vector<16x128xbf16>, vector<128x2xbf16>, vector<16x2xf32> -> vector<16x2xf32>
    %c0_133 = arith.constant 0 : index
    %c0_134 = arith.constant 0 : index
    %703 = vector.load %arg16[%c0_133, %c0_134] : memref<1x2xf32, #tpu.memory_space<vmem>>, vector<1x2xf32>
    %704 = vector.broadcast %703 : vector<1x2xf32> to vector<16x2xf32>
    %705 = arith.addf %702, %704 : vector<16x2xf32>
    %706 = vector.shape_cast %705 : vector<16x2xf32> to vector<2x8x2xf32>
    %c0_135 = arith.constant 0 : index
    %c0_136 = arith.constant 0 : index
    %c0_137 = arith.constant 0 : index
    %707 = vector.load %arg17[%c0_135, %c0_136, %c0_137] : memref<2x8x2xf32, #tpu.memory_space<vmem>>, vector<2x8x2xf32>
    tpu.vector_store %arg17[%c0_135, %c0_136, %c0_137], %706 {strides = array<i32>} : memref<2x8x2xf32, #tpu.memory_space<vmem>>, vector<2x8x2xf32>,
    return
  }
  func.func @transform_0(%arg0: i32) -> (i32, i32, i32) {
    %c0_i32 = arith.constant 0 : i32
    %c0_i32_0 = arith.constant 0 : i32
    %c0_i32_1 = arith.constant 0 : i32
    return %arg0, %c0_i32, %c0_i32_0 : i32, i32, i32
  }
  func.func @transform_1(%arg0: i32) -> (i32, i32, i32) {
    %c0_i32 = arith.constant 0 : i32
    %c0_i32_0 = arith.constant 0 : i32
    %c0_i32_1 = arith.constant 0 : i32
    return %arg0, %c0_i32, %c0_i32_0 : i32, i32, i32
  }
  func.func @transform_2(%arg0: i32) -> (i32, i32) {
    %c0_i32 = arith.constant 0 : i32
    %c0_i32_0 = arith.constant 0 : i32
    %c0_i32_1 = arith.constant 0 : i32
    return %c0_i32, %c0_i32_0 : i32, i32
  }
  func.func @transform_3(%arg0: i32) -> (i32, i32) {
    %c0_i32 = arith.constant 0 : i32
    %c0_i32_0 = arith.constant 0 : i32
    %c0_i32_1 = arith.constant 0 : i32
    return %c0_i32, %c0_i32_0 : i32, i32
  }
  func.func @transform_4(%arg0: i32) -> (i32, i32) {
    %c0_i32 = arith.constant 0 : i32
    %c0_i32_0 = arith.constant 0 : i32
    %c0_i32_1 = arith.constant 0 : i32
    return %c0_i32, %c0_i32_0 : i32, i32
  }
  func.func @transform_5(%arg0: i32) -> (i32, i32) {
    %c0_i32 = arith.constant 0 : i32
    %c0_i32_0 = arith.constant 0 : i32
    %c0_i32_1 = arith.constant 0 : i32
    return %c0_i32, %c0_i32_0 : i32, i32
  }
  func.func @transform_6(%arg0: i32) -> (i32, i32) {
    %c0_i32 = arith.constant 0 : i32
    %c0_i32_0 = arith.constant 0 : i32
    %c0_i32_1 = arith.constant 0 : i32
    return %c0_i32, %c0_i32_0 : i32, i32
  }
  func.func @transform_7(%arg0: i32) -> (i32, i32) {
    %c0_i32 = arith.constant 0 : i32
    %c0_i32_0 = arith.constant 0 : i32
    %c0_i32_1 = arith.constant 0 : i32
    return %c0_i32, %c0_i32_0 : i32, i32
  }
  func.func @transform_8(%arg0: i32) -> (i32, i32) {
    %c0_i32 = arith.constant 0 : i32
    %c0_i32_0 = arith.constant 0 : i32
    %c0_i32_1 = arith.constant 0 : i32
    return %c0_i32, %c0_i32_0 : i32, i32
  }
  func.func @transform_9(%arg0: i32) -> (i32, i32) {
    %c0_i32 = arith.constant 0 : i32
    %c0_i32_0 = arith.constant 0 : i32
    %c0_i32_1 = arith.constant 0 : i32
    return %c0_i32, %c0_i32_0 : i32, i32
  }
  func.func @transform_10(%arg0: i32) -> (i32, i32) {
    %c0_i32 = arith.constant 0 : i32
    %c0_i32_0 = arith.constant 0 : i32
    %c0_i32_1 = arith.constant 0 : i32
    return %c0_i32, %c0_i32_0 : i32, i32
  }
  func.func @transform_11(%arg0: i32) -> (i32, i32) {
    %c0_i32 = arith.constant 0 : i32
    %c0_i32_0 = arith.constant 0 : i32
    %c0_i32_1 = arith.constant 0 : i32
    return %c0_i32, %c0_i32_0 : i32, i32
  }
  func.func @transform_12(%arg0: i32) -> (i32, i32) {
    %c0_i32 = arith.constant 0 : i32
    %c0_i32_0 = arith.constant 0 : i32
    %c0_i32_1 = arith.constant 0 : i32
    return %c0_i32, %c0_i32_0 : i32, i32
  }
  func.func @transform_13(%arg0: i32) -> (i32, i32) {
    %c0_i32 = arith.constant 0 : i32
    %c0_i32_0 = arith.constant 0 : i32
    %c0_i32_1 = arith.constant 0 : i32
    return %c0_i32, %c0_i32_0 : i32, i32
  }
  func.func @transform_14(%arg0: i32) -> (i32, i32) {
    %c0_i32 = arith.constant 0 : i32
    %c0_i32_0 = arith.constant 0 : i32
    %c0_i32_1 = arith.constant 0 : i32
    return %c0_i32, %c0_i32_0 : i32, i32
  }
  func.func @transform_15(%arg0: i32) -> (i32, i32) {
    %c0_i32 = arith.constant 0 : i32
    %c0_i32_0 = arith.constant 0 : i32
    %c0_i32_1 = arith.constant 0 : i32
    return %c0_i32, %c0_i32_0 : i32, i32
  }
  func.func @transform_16(%arg0: i32) -> (i32, i32, i32) {
    %c0_i32 = arith.constant 0 : i32
    %c0_i32_0 = arith.constant 0 : i32
    %c0_i32_1 = arith.constant 0 : i32
    return %arg0, %c0_i32, %c0_i32_0 : i32, i32, i32
  }
  func.func @transform_17(%arg0: i32) -> (i32, i32, i32) {
    %c0_i32 = arith.constant 0 : i32
    %c0_i32_0 = arith.constant 0 : i32
    %c0_i32_1 = arith.constant 0 : i32
    return %arg0, %c0_i32, %c0_i32_0 : i32, i32, i32
  }
}

</mosaic_0001>

<bundles_post_ra>
// kernel: thermal_gru_forward.1
= control target key start
LH: loop header
LB: loop body
LE: loop exit
PB: predicated region body
PF: predicated region fallthrough
CT: control target
= control target key end

     0   :  { %s11315_s0 = inlined_call_operand.vmem [shape: f32[2,8,4], index: 0, kind: input, shape index: {}]   ;;  %s11316_s1 = inlined_call_operand.vmem [shape: f32[2,3,128], index: 1, kind: input, shape index: {}]   ;;  %s11317_s2 = inlined_call_operand.vmem [shape: bf16[4,384], index: 2, kind: input, shape index: {}]   ;;  %s11318_s3 = inlined_call_operand.hbm [shape: bf16[128,384], index: 3, kind: input, shape index: {}]   ;;  %s11319_s4 = inlined_call_operand.vmem [shape: f32[1,384], index: 4, kind: input, shape index: {}]   ;;  %s11320_s5 = inlined_call_operand.vmem [shape: f32[1,128], index: 5, kind: input, shape index: {}]   ;;  %s11321_s6 = inlined_call_operand.hbm [shape: bf16[128,384], index: 6, kind: input, shape index: {}]   ;;  %s11322_s7 = inlined_call_operand.hbm [shape: bf16[128,384], index: 7, kind: input, shape index: {}]   ;;  %s11323_s8 = inlined_call_operand.vmem [shape: f32[1,384], index: 8, kind: input, shape index: {}]   ;;  %s11324_s9 = inlined_call_operand.vmem [shape: f32[1,128], index: 9, kind: input, shape index: {}]   ;;  %s11325_s10 = inlined_call_operand.hbm [shape: bf16[128,384], index: 10, kind: input, shape index: {}]   ;;  %s11326_s11 = inlined_call_operand.hbm [shape: bf16[128,384], index: 11, kind: input, shape index: {}]   ;;  %s11327_s12 = inlined_call_operand.vmem [shape: f32[1,384], index: 12, kind: input, shape index: {}]   ;;  %s11328_s13 = inlined_call_operand.vmem [shape: f32[1,128], index: 13, kind: input, shape index: {}]   ;;  %s11329_s14 = inlined_call_operand.vmem [shape: bf16[128,2], index: 14, kind: input, shape index: {}]   ;;  %s11330_s15 = inlined_call_operand.vmem [shape: f32[1,2], index: 15, kind: input, shape index: {}]   ;;  %s11331_s16 = inlined_call_operand.vmem [shape: f32[2,8,2], index: 16, kind: output, shape index: {0}]   ;;  %s11332_s17 = inlined_call_operand.vmem [shape: f32[2,3,128], index: 17, kind: output, shape index: {1}]  }
   0x1   :  { %11612 = sst [smem:[#allocation105_spill]] %s11315_s0 }
   0x2   :  { %11613 = sst [smem:[#allocation106_spill]] %s11316_s1 }
   0x3   :  { %23 = vsyncpa [#allocation3], 0 }
   0x4   :  { %24 = vsyncpa [#allocation5], 0 }
   0x5   :  { %25 = vsyncpa [#allocation8], 0  ;;  %s8167_s24 = smov [#allocation4]   ;;  %s8168_s26 = smov [#allocation7]  }
   0x6   :  { %s53_s25 = sshll.u32 %s8167_s24, 4  ;;  %s81_s27 = sshll.u32 %s8168_s26, 4  ;;  %s54_s25 = int_to_ptr.vmem [resolvable:$true] %s53_s25  ;;  %s82_s27 = int_to_ptr.vmem [resolvable:$true] %s81_s27 }
   0x7   :  { %s8069_s28 = scalar_lea.vmem %s54_s25, 3072  ;;  %p8074_p1 = scmp.lt.s32.totalorder %s54_s25, %s54_s25 }
   0x8   :  { %p8070_p0 = scmp.ne.s32.totalorder %s54_s25, %s8069_s28  ;;  %p8075_p2 = scmp.lt.s32.totalorder %s8069_s28, %s8069_s28 }
   0xa   :  { %p8076_p3 = por %p8075_p2, %p8074_p1 }
   0xc   :  { %p8077_p4 = pnand %p8076_p3, %p8070_p0 }
   0xe   :  { %8080 = shalt.err (!%p8077_p4)
}
   0xf   :  { %s8169_s29 = smov 192   ;;  %s8170_s0 = smov 12  }
  0x10   :  { %59 = dma.hbm_to_vmem [thread:$0]  %s11321_s6, 3072, %s54_s25, [#allocation5], %s8169_s29, %s8169_s29, %s8170_s0  }
  0x11   :  { %s8089_s19 = scalar_lea.vmem %s82_s27, 3072  ;;  %p8094_p6 = scmp.lt.s32.totalorder %s82_s27, %s82_s27 }
  0x12   :  { %p8090_p5 = scmp.ne.s32.totalorder %s82_s27, %s8089_s19  ;;  %p8095_p7 = scmp.lt.s32.totalorder %s8089_s19, %s8089_s19 }
  0x14   :  { %p8096_p8 = por %p8095_p7, %p8094_p6 }
  0x16   :  { %p8097_p9 = pnand %p8096_p8, %p8090_p5 }
  0x18   :  { %8100 = shalt.err (!%p8097_p9)
}
  0x19   :  { %87 = dma.hbm_to_vmem [thread:$0]  %s11325_s10, 3072, %s82_s27, [#allocation8], %s8169_s29, %s8169_s29, %s8170_s0  }
  0x1a   :  { %s8171_s21 = smov [#allocation2]   ;;  %s8172_s23 = smov [#allocation6]  }
  0x1b   :  { %s37_s22 = sshll.u32 %s8171_s21, 4  ;;  %s65_s24 = sshll.u32 %s8172_s23, 4  ;;  %s38_s22 = int_to_ptr.vmem [resolvable:$true] %s37_s22  ;;  %s66_s24 = int_to_ptr.vmem [resolvable:$true] %s65_s24 }
  0x1c   :  { %s8109_s6 = scalar_lea.vmem %s38_s22, 3072  ;;  %p8114_p11 = scmp.lt.s32.totalorder %s38_s22, %s38_s22 }
  0x1d   :  { %p8110_p10 = scmp.ne.s32.totalorder %s38_s22, %s8109_s6  ;;  %p8115_p12 = scmp.lt.s32.totalorder %s8109_s6, %s8109_s6 }
  0x1f   :  { %p8116_p13 = por %p8115_p12, %p8114_p11 }
  0x21   :  { %p8117_p0 = pnand %p8116_p13, %p8110_p10 }
  0x23   :  { %8120 = shalt.err (!%p8117_p0)
}
  0x24   :  { %43 = dma.hbm_to_vmem [thread:$0]  %s11318_s3, 3072, %s38_s22, [#allocation3], %s8169_s29, %s8169_s29, %s8170_s0  }
  0x25   :  { %s8129_s10 = scalar_lea.vmem %s66_s24, 3072  ;;  %p8134_p2 = scmp.lt.s32.totalorder %s66_s24, %s66_s24 }
  0x26   :  { %p8130_p1 = scmp.ne.s32.totalorder %s66_s24, %s8129_s10  ;;  %p8135_p3 = scmp.lt.s32.totalorder %s8129_s10, %s8129_s10 }
  0x28   :  { %p8136_p4 = por %p8135_p3, %p8134_p2 }
  0x2a   :  { %p8137_p5 = pnand %p8136_p4, %p8130_p1 }
  0x2c   :  { %8140 = shalt.err (!%p8137_p5)
}
  0x2d   :  { %71 = dma.hbm_to_vmem [thread:$0]  %s11322_s7, 3072, %s66_s24, [#allocation5], %s8169_s29, %s8169_s29, %s8170_s0  }
  0x2e   :  { %s8173_s30 = smov [#allocation9]  }
  0x2f   :  { %s93_s18 = sshll.u32 %s8173_s30, 4  ;;  %s94_s18 = int_to_ptr.vmem [resolvable:$true] %s93_s18 }
  0x30   :  { %s8149_s19 = scalar_lea.vmem %s94_s18, 3072  ;;  %p8154_p7 = scmp.lt.s32.totalorder %s94_s18, %s94_s18 }
  0x31   :  { %p8150_p6 = scmp.ne.s32.totalorder %s94_s18, %s8149_s19  ;;  %p8155_p8 = scmp.lt.s32.totalorder %s8149_s19, %s8149_s19 }
  0x33   :  { %p8156_p9 = por %p8155_p8, %p8154_p7 }
  0x35   :  { %p8157_p10 = pnand %p8156_p9, %p8150_p6 }
  0x37   :  { %8160 = shalt.err (!%p8157_p10)
}
  0x38   :  { %99 = dma.hbm_to_vmem [thread:$0]  %s11326_s11, 3072, %s94_s18, [#allocation8], %s8169_s29, %s8169_s29, %s8170_s0  }
  0x39   :  { %8161 = dma.done.wait [#allocation3], 3072  }
  0x3a   :  { %8162 = vsyncadd [#allocation3], 4294964224 }
  0x3b   :  { %8163 = dma.done.wait [#allocation5], 6144  }
  0x3c   :  { %8164 = vsyncadd [#allocation5], 4294961152 }
  0x3d   :  { %8165 = dma.done.wait [#allocation8], 6144  }
  0x3e   :  { %8166 = vsyncadd [#allocation8], 4294961152  ;;  %v295_v0 = vlaneseq  ;;  %v8174_v1 = vmov 1983009808   ;;  %v11337_v3 = vmov 0   ;;  %vm331_vm0 = vcmask 1041408  }
  0x3f   :  { %v313_v2 = vunpack.c.l.s4 %v8174_v1  ;;  %373 = vmatprep.mubr.bf16.mxu1 %v11337_v3  ;;  %602 = vmatprep.mubr.bf16.mxu0 %v11337_v3  ;;  %v8303_v6 = vld [vmem:[#allocation2 + $0xac] ss:$12 sps:$4 sm:$0xff]   ;;  %v8305_v7 = vld [vmem:[#allocation2 + $0xa8] ss:$12 sps:$4 sm:$0xff]   ;;  %v8312_v10 = vld [vmem:[#allocation2 + $0x90] ss:$12 sps:$4 sm:$0xff]  }
  0x40   :  { %v8301_v4 = vshrl.u32 %v295_v0, 7  ;;  %570 = vmatprep.subr.bf16.mxu0 %v8303_v6  ;;  %v8308_v8 = vld [vmem:[#allocation2 + $0x94] ss:$12 sps:$4 sm:$0xff]   ;;  %v8315_v11 = vld [vmem:[#allocation2 + $0x7c] ss:$12 sps:$4 sm:$0xff]   ;;  %s11615_s20 = sld [smem:[#allocation105_spill]] }
  0x41   :  { %v314_v5 = vunpack.c.0.s8 %v313_v2  ;;  %571 = vmatpush1.bf16.msra.mxu0 %v8305_v7  ;;  %v124_v12 = vld [vmem:[%s11317_s2] sm:$0x3f]  ;;  %vm327_vm1 = vcmask 31744   ;;  %v8338_v24 = vld [vmem:[#allocation2 + $0x4c] ss:$12 sps:$4 sm:$0xff]   ;;  %v11403_v25 = vmov 0.0  }
  0x42   :  { %11614 = vst [vmem:[#allocation13_spill] sm:$0xff] %v8301_v4  ;;  %572 = vmatprep.subr.bf16.mxu0 %v8308_v8  ;;  %v8320_v13 = vld [vmem:[#allocation2 + $0x78] ss:$12 sps:$4 sm:$0xff]   ;;  %v311_v14 = vcombine.high %v124_v12, %v124_v12  ;;  %v8335_v23 = vld [vmem:[#allocation2 + $0x60] ss:$12 sps:$4 sm:$0xff]   ;;  %s11616_s24 = sld [smem:[#allocation106_spill]] }
  0x43   :  { %v317_v9 = vsub.s32 %v314_v5, %v8301_v4  ;;  %v8330_v18 = vld [vmem:[#allocation2 + $0x64] ss:$12 sps:$4 sm:$0xff]   ;;  %v8342_v27 = vld [vmem:[#allocation2 + $0x48] ss:$12 sps:$4 sm:$0xff]   ;;  %vm8177_vm2 = vmmov 0   ;;  %vm438_vm3 = vcmask 1041409  }
  0x44   :  { %v8351_v29 = vld [vmem:[#allocation2 + $0x34] ss:$12 sps:$4 sm:$0xff]   ;;  %v8364_v32 = vld [vmem:[#allocation2 + $0x30] ss:$12 sps:$4 sm:$0xff]   ;;  %v8374_v37 = vld [vmem:[#allocation2 + $0x18] ss:$12 sps:$4 sm:$0xff]  }
  0x45   :  { %v318_v15 = vrot.slane %v124_v12, %v317_v9  ;;  %573 = vmatpush1.bf16.msra.mxu0 %v8312_v10  ;;  %v325_v21 = vrot.slane %v311_v14, %v317_v9  ;;  %v8367_v33 = vld [vmem:[#allocation2 + $0xb0] ss:$12 sps:$4 sm:$0xff]   ;;  %v8376_v38 = vld [vmem:[#allocation2 + $0x98] ss:$12 sps:$4 sm:$0xff]   ;;  %v8385_v42 = vld [vmem:[#allocation2] ss:$12 sps:$4 sm:$0xff]  }
  0x46   :  { %v291_v16 = vld [vmem:[%s11615_s20] sm:$0xff]  ;;  %v292_v17 = vld [vmem:[%s11615_s20 + $0x8] sm:$0xff]  ;;  %574 = vmatprep.subr.bf16.mxu0 %v8315_v11  ;;  %v8402_v47 = vld [vmem:[#allocation2 + $0x50] ss:$12 sps:$4 sm:$0xff]   ;;  %v8458_v58 = vsub.s32 0, %v8301_v4  ;;  %v8465_v63 = vsub.s32 1, %v8301_v4 }
  0x47   :  { %v326_v19 = vcombine.high %v318_v15, %v318_v15  ;;  %v333_v20 = vsel %vm331_vm0, %v318_v15, 0  ;;  %v293_v22 = vpack.c.bf16 %v292_v17, %v291_v16  ;;  %v339_v26 = vsel %vm331_vm0, %v325_v21, 0  ;;  %v8372_v36 = vld [vmem:[#allocation2 + $0x1c] ss:$12 sps:$4 sm:$0xff]   ;;  %v8379_v39 = vld [vmem:[#allocation2 + $0x4] ss:$12 sps:$4 sm:$0xff]  }
  0x48   :  { %v8348_v28 = vld [vmem:[%s11616_s24 + $0x4] sm:$0x1]  ;;  %v8361_v31 = vld [vmem:[%s11616_s24] sm:$0x1]  ;;  %v8396_v45 = vld [vmem:[#allocation2 + $0x68] ss:$12 sps:$4 sm:$0xff]  }
  0x49   :  { %5791 = vmatprep.subr.msk.bf16.mxu1 %vm331_vm0, %v326_v19  ;;  %575 = vmatpush1.bf16.msra.mxu0 %v8320_v13  ;;  %v432_v30 = vpack.c.bf16 %v8348_v28, %v8348_v28  ;;  %v431_v34 = vpack.c.bf16 %v8361_v31, %v8361_v31  ;;  %v8387_v43 = vld [vmem:[#allocation2 + $0x80] ss:$12 sps:$4 sm:$0xff]   ;;  %v8408_v48 = vld [vmem:[#allocation2 + $0x38] ss:$12 sps:$4 sm:$0xff]   ;;  %v8421_v50 = vld [vmem:[#allocation2 + $0x8] ss:$12 sps:$4 sm:$0xff]  }
  0x4a   :  { %356 = vmatpush1.bf16.msra.mxu1 %v333_v20  ;;  %576 = vmatprep.subr.bf16.mxu0 %v8330_v18  ;;  %v8415_v49 = vld [vmem:[#allocation2 + $0x20] ss:$12 sps:$4 sm:$0xff]   ;;  %11617 = vst [vmem:[#allocation14_spill] sm:$0xff] %v8458_v58  ;;  %vm5644_vm4 = vcmask 1040384   ;;  %vm5649_vm5 = vcmask 1042432   ;;  %vm5652_vm6 = vcmask 1043456  }
  0x4b   :  { %6365 = vmatprep.subr.bf16.mxu1 %v11403_v25  ;;  %v436_v35 = vunpack.c.l.b16 %v432_v30  ;;  %v435_v40 = vunpack.c.l.b16 %v431_v34  ;;  %v8454_v51 = vld [vmem:[#allocation4 + $0xac] ss:$12 sps:$4 sm:$0xff]   ;;  %v285_v59 = vld [vmem:[%s11319_s4] sm:$0x7]  ;;  %vm5655_vm7 = vcmask 1044480   ;;  %vm5658_vm8 = vcmask 1045504  }
  0x4c   :  { %v298_v62 = vrot.slane %v285_v59, %v8458_v58  ;;  %v302_v2 = vrot.slane %v285_v59, %v8465_v63  ;;  %vm5661_vm9 = vcmask 1046528   ;;  %vm5777_vm10 = vcmask 15360  }
  0x4d   :  { %5792 = vmatmul.mubr.msk.bf16.vlgmr.msra.gmra.mxu1 %vm327_vm1, %v293_v22  ;;  %577 = vmatpush1.bf16.msra.mxu0 %v8335_v23  ;;  %v437_v41 = vrot.slane %v436_v35, 7 }
  0x4e   :  { %6366 = vmatpush3.bf16.msra.mxu1 %v339_v26  ;;  %578 = vmatprep.subr.bf16.mxu0 %v8338_v24 }
  0x4f   :  { %6367 = vmatprep.mubr.msk.bf16.mxu1 %vm8177_vm2, %v11403_v25  ;;  %6371 = vmatprep.subr.bf16.mxu1 %v11403_v25  ;;  %v439_v44 = vsel %vm438_vm3, %v437_v41, %v435_v40 }
  0x50   :  { %v440_v46 = vpack.c.b16 %v439_v44, %v439_v44 }
  0x51   :  { %579 = vmatpush1.bf16.msra.mxu0 %v8342_v27 }
  0x52   :  { %580 = vmatprep.subr.bf16.mxu0 %v8351_v29 }
  0x55   :  { %6368 = vmatmul.mubr.msk.bf16.vlgmr.msra.gmra.mxu1 %vm327_vm1, %v293_v22  ;;  %581 = vmatpush1.bf16.msra.mxu0 %v8364_v32 }
  0x56   :  { %6372 = vmatpush3.bf16.msra.mxu1 %v8367_v33  ;;  %582 = vmatprep.subr.bf16.mxu0 %v8372_v36 }
  0x57   :  { %6373 = vmatprep.subr.bf16.mxu1 %v11403_v25  ;;  %6387 = vmatprep.mubr.msk.bf16.mxu1 %vm8177_vm2, %v11403_v25 }
  0x59   :  { %583 = vmatpush1.bf16.msra.mxu0 %v8374_v37 }
  0x5a   :  { %6374 = vmatpush3.bf16.msra.mxu1 %v8376_v38  ;;  %584 = vmatprep.subr.bf16.mxu0 %v8379_v39 }
  0x5b   :  { %6375 = vmatprep.subr.bf16.mxu1 %v11403_v25 }
  0x5d   :  { %585 = vmatpush1.bf16.msra.mxu0 %v8385_v42 }
  0x5e   :  { %6376 = vmatpush3.bf16.msra.mxu1 %v8387_v43  ;;  %722 = vmatprep.subr.bf16.mxu0 %v8303_v6 }
  0x5f   :  { %6377 = vmatprep.subr.bf16.mxu1 %v11403_v25 }
  0x60   :  { %603 = vmatmul.mubr.bf16.vlgmr.msra.gmra.mxu0 %v440_v46 }
  0x61   :  { %723 = vmatpush1.bf16.msra.mxu0 %v8305_v7  ;;  %754 = vmatprep.mubr.bf16.mxu0 %v11337_v3 }
  0x62   :  { %6378 = vmatpush3.bf16.msra.mxu1 %v8396_v45  ;;  %724 = vmatprep.subr.bf16.mxu0 %v8308_v8 }
  0x63   :  { %6379 = vmatprep.subr.bf16.mxu1 %v11403_v25 }
  0x65   :  { %725 = vmatpush1.bf16.msra.mxu0 %v8312_v10 }
  0x66   :  { %6380 = vmatpush3.bf16.msra.mxu1 %v8402_v47  ;;  %726 = vmatprep.subr.bf16.mxu0 %v8315_v11 }
  0x67   :  { %6381 = vmatprep.subr.bf16.mxu1 %v11403_v25 }
  0x69   :  { %727 = vmatpush1.bf16.msra.mxu0 %v8320_v13 }
  0x6a   :  { %6382 = vmatpush3.bf16.msra.mxu1 %v8408_v48  ;;  %728 = vmatprep.subr.bf16.mxu0 %v8330_v18 }
  0x6b   :  { %6383 = vmatprep.subr.bf16.mxu1 %v11403_v25 }
  0x6d   :  { %729 = vmatpush1.bf16.msra.mxu0 %v8335_v23 }
  0x6e   :  { %6384 = vmatpush3.bf16.msra.mxu1 %v8415_v49  ;;  %730 = vmatprep.subr.bf16.mxu0 %v8338_v24 }
  0x6f   :  { %6385 = vmatprep.subr.bf16.mxu1 %v11403_v25 }
  0x71   :  { %731 = vmatpush1.bf16.msra.mxu0 %v8342_v27 }
  0x72   :  { %6386 = vmatpush3.bf16.msra.mxu1 %v8421_v50  ;;  %732 = vmatprep.subr.bf16.mxu0 %v8351_v29 }
  0x73   :  { %6391 = vmatprep.subr.bf16.mxu1 %v11403_v25 }
  0x75   :  { %6388 = vmatmul.mubr.bf16.vlgmr.msra.gmra.mxu1 %v440_v46  ;;  %733 = vmatpush1.bf16.msra.mxu0 %v8364_v32  ;;  %v8483_v46 = vld [vmem:[%s11320_s5] ss:$0 sm:$0xff] }
  0x76   :  { %6392 = vmatpush3.bf16.msra.mxu1 %v8367_v33  ;;  %734 = vmatprep.subr.bf16.mxu0 %v8372_v36 }
  0x77   :  { %6393 = vmatprep.subr.bf16.mxu1 %v11403_v25  ;;  %6407 = vmatprep.mubr.msk.bf16.mxu1 %vm8177_vm2, %v11403_v25 }
  0x79   :  { %735 = vmatpush1.bf16.msra.mxu0 %v8374_v37 }
  0x7a   :  { %6394 = vmatpush3.bf16.msra.mxu1 %v8376_v38  ;;  %736 = vmatprep.subr.bf16.mxu0 %v8379_v39 }
  0x7b   :  { %6395 = vmatprep.subr.bf16.mxu1 %v11403_v25 }
  0x7d   :  { %737 = vmatpush1.bf16.msra.mxu0 %v8385_v42 }
  0x7e   :  { %6396 = vmatpush3.bf16.msra.mxu1 %v8387_v43  ;;  %1008 = vmatprep.subr.bf16.mxu0 %v8454_v51 }
  0x7f   :  { %6397 = vmatprep.subr.bf16.mxu1 %v11403_v25 }
  0x82   :  { %6398 = vmatpush3.bf16.msra.mxu1 %v8396_v45 }
  0x83   :  { %6399 = vmatprep.subr.bf16.mxu1 %v11403_v25 }
  0x86   :  { %6400 = vmatpush3.bf16.msra.mxu1 %v8402_v47 }
  0x87   :  { %6401 = vmatprep.subr.bf16.mxu1 %v11403_v25 }
  0x8a   :  { %6402 = vmatpush3.bf16.msra.mxu1 %v8408_v48 }
  0x8b   :  { %6403 = vmatprep.subr.bf16.mxu1 %v11403_v25 }
  0x8e   :  { %6404 = vmatpush3.bf16.msra.mxu1 %v8415_v49 }
  0x8f   :  { %6405 = vmatprep.subr.bf16.mxu1 %v11403_v25 }
  0x92   :  { %6406 = vmatpush3.bf16.msra.mxu1 %v8421_v50 }
  0x93   :  { %6411 = vmatprep.subr.bf16.mxu1 %v11403_v25 }
 0x10d   :  { %v375_v52 = vpop.f32.mrf.mxu1 }
 0x10e   :  { %v8467_v0 = vadd.f32 %v375_v52, %v298_v62 }
 0x10f   :  { %v377_v53 = vpop.f32.mrf.mxu1 }
 0x110   :  { %11618 = vst [vmem:[#allocation15_spill] sm:$0xff] %v8467_v0  ;;  %v8474_v12 = vadd.f32 %v377_v53, %v302_v2  ;;  %v8486_v53 = vsub.s32 2, %v8301_v4  ;;  %v8601_v4 = vld [vmem:[#allocation6 + $0x7c] ss:$12 sps:$4 sm:$0xff]  }
 0x111   :  { %v379_v54 = vpop.f32.mrf.mxu1  ;;  %11633 = vst [vmem:[#allocation30_spill] sm:$0xff] %v8601_v4 }
 0x112   :  { %v8470_v5 = vadd.f32 %v379_v54, %v298_v62  ;;  %11620 = vst [vmem:[#allocation17_spill] sm:$0xff] %v8474_v12  ;;  %11622 = vst [vmem:[#allocation19_spill] sm:$0xff] %v8486_v53 }
 0x113   :  { %v381_v55 = vpop.f32.mrf.mxu1 }
 0x114   :  { %11619 = vst [vmem:[#allocation16_spill] sm:$0xff] %v8470_v5  ;;  %v8476_v17 = vadd.f32 %v381_v55, %v302_v2 }
 0x115   :  { %v418_v56 = vpop.f32.mrf.mxu1 }
 0x116   :  { %11621 = vst [vmem:[#allocation18_spill] sm:$0xff] %v8476_v17 }
 0x117   :  { %v6369_v57 = vpop.f32.mrf.mxu1 }
 0x119   :  { %v421_v60 = vpop.f32.mrf.mxu1 }
 0x11b   :  { %v6370_v61 = vpop.f32.mrf.mxu1 }
 0x11c   :  { %v306_v61 = vrot.slane %v285_v59, %v8486_v53  ;;  %v8660_v53 = vld [vmem:[#allocation6 + $0x38] ss:$12 sps:$4 sm:$0xff]  }
 0x120   :  { %v604_v1 = vpop.f32.mrf.mxu0 }
 0x121   :  { %v653_v6 = vrot.slane %v604_v1, 1  ;;  %v659_v7 = vadd.f32 %v604_v1, %v8467_v0 }
 0x122   :  { %v606_v8 = vpop.f32.mrf.mxu0 }
 0x123   :  { %v661_v9 = vadd.f32 %v653_v6, %v8470_v5  ;;  %v5818_v10 = vmul.f32 -1.442695, %v659_v7  ;;  %v654_v15 = vrot.slane %v606_v8, 1  ;;  %v660_v19 = vadd.f32 %v606_v8, %v8474_v12 }
 0x124   :  { %v608_v11 = vpop.f32.mrf.mxu0  ;;  %v8490_v7 = vadd.f32 %v418_v56, %v306_v61 }
 0x125   :  { %7372 = vpow2.f32 %v5818_v10  ;;  %v5820_v14 = vmul.f32 -1.442695, %v661_v9  ;;  %v662_v20 = vadd.f32 %v654_v15, %v8476_v17  ;;  %v5819_v21 = vmul.f32 -1.442695, %v660_v19 }
 0x126   :  { %v609_v16 = vpop.f32.mrf.mxu0  ;;  %11623 = vst [vmem:[#allocation20_spill] sm:$0xff] %v8490_v7  ;;  %v8492_v10 = vadd.f32 %v421_v60, %v306_v61  ;;  %v8511_v61 = vld [vmem:[#allocation4 + $0x94] ss:$12 sps:$4 sm:$0xff]  }
 0x127   :  { %7374 = vpow2.f32 %v5820_v14  ;;  %v5821_v22 = vmul.f32 -1.442695, %v662_v20 }
 0x128   :  { %7376 = vpow2.f32 %v5819_v21  ;;  %11624 = vst [vmem:[#allocation21_spill] sm:$0xff] %v8492_v10 }
 0x129   :  { %7378 = vpow2.f32 %v5821_v22 }
 0x132   :  { %v7373_v26 = vpop.eup %7372 }
 0x133   :  { %v675_v30 = vadd.f32 1.0, %v7373_v26 }
 0x134   :  { %v7375_v34 = vpop.eup %7374 }
 0x135   :  { %v645_v35 = vpop.f32.mrf.mxu1  ;;  %v677_v40 = vadd.f32 1.0, %v7375_v34  ;;  %7380 = vrcp.f32 %v675_v30  ;;  %v7377_v54 = vpop.eup %7376 }
 0x136   :  { %v693_v55 = vadd.f32 %v8483_v46, %v645_v35  ;;  %v7379_v57 = vpop.eup %7378  ;;  %v676_v62 = vadd.f32 1.0, %v7377_v54 }
 0x137   :  { %v6389_v41 = vpop.f32.mrf.mxu1  ;;  %7382 = vrcp.f32 %v677_v40  ;;  %v678_v1 = vadd.f32 1.0, %v7379_v57  ;;  %v8509_v57 = vld [vmem:[#allocation4 + $0xb0] ss:$12 sps:$4 sm:$0xff]  }
 0x138   :  { %v695_v2 = vrot.slane %v693_v55, 1  ;;  %7384 = vrcp.f32 %v676_v62  ;;  %v8515_v62 = vld [vmem:[#allocation4 + $0x90] ss:$12 sps:$4 sm:$0xff]  }
 0x139   :  { %v648_v44 = vpop.f32.mrf.mxu1  ;;  %7386 = vrcp.f32 %v678_v1  ;;  %v8517_v1 = vld [vmem:[#allocation4 + $0x98] ss:$12 sps:$4 sm:$0xff]  }
 0x13b   :  { %v6390_v52 = vpop.f32.mrf.mxu1 }
 0x142   :  { %v7381_v6 = vpop.eup %7380 }
 0x143   :  { %v698_v8 = vmul.f32 %v7381_v6, %v693_v55  ;;  %v8528_v6 = vld [vmem:[#allocation4 + $0x78] ss:$12 sps:$4 sm:$0xff]  }
 0x144   :  { %v7383_v9 = vpop.eup %7382 }
 0x145   :  { %v699_v11 = vmul.f32 %v7383_v9, %v695_v2  ;;  %v700_v14 = vadd.f32 %v698_v8, %v8490_v7  ;;  %v7385_v59 = vpop.eup %7384  ;;  %v8521_v2 = vld [vmem:[#allocation4 + $0x7c] ss:$12 sps:$4 sm:$0xff]   ;;  %v8530_v8 = vld [vmem:[#allocation4 + $0x80] ss:$12 sps:$4 sm:$0xff]   ;;  %v8534_v9 = vld [vmem:[#allocation4 + $0x64] ss:$12 sps:$4 sm:$0xff]  }
 0x146   :  { %v7387_v16 = vpop.eup %7386  ;;  %v704_v19 = vsub.f32 1.0, %v7385_v59  ;;  %v708_v22 = vmul.f32 %v7385_v59, %v8361_v31  ;;  %v8507_v31 = vld [vmem:[#allocation4 + $0xa8] ss:$12 sps:$4 sm:$0xff]  }
 0x147   :  { %v701_v15 = vadd.f32 %v699_v11, %v8492_v10  ;;  %7388 = vtanh.f32 %v700_v14  ;;  %v705_v21 = vsub.f32 1.0, %v7387_v16  ;;  %v709_v60 = vmul.f32 %v7387_v16, %v8348_v28  ;;  %v8538_v11 = vld [vmem:[#allocation4 + $0x60] ss:$12 sps:$4 sm:$0xff]   ;;  %v8540_v14 = vld [vmem:[#allocation4 + $0x68] ss:$12 sps:$4 sm:$0xff]  }
 0x148   :  { %v8548_v59 = vld [vmem:[#allocation4 + $0x48] ss:$12 sps:$4 sm:$0xff]   ;;  %v8550_v16 = vld [vmem:[#allocation4 + $0x50] ss:$12 sps:$4 sm:$0xff]  }
 0x149   :  { %7390 = vtanh.f32 %v701_v15  ;;  %v8544_v15 = vld [vmem:[#allocation4 + $0x4c] ss:$12 sps:$4 sm:$0xff]  }
 0x154   :  { %v7389_v20 = vpop.eup %7388 }
 0x155   :  { %v706_v56 = vmul.f32 %v7389_v20, %v704_v19  ;;  %v8554_v19 = vld [vmem:[#allocation4 + $0x34] ss:$12 sps:$4 sm:$0xff]   ;;  %v8558_v20 = vld [vmem:[#allocation4 + $0x30] ss:$12 sps:$4 sm:$0xff]  }
 0x156   :  { %v7391_v26 = vpop.eup %7390 }
 0x157   :  { %v707_v30 = vmul.f32 %v7391_v26, %v705_v21  ;;  %v8498_v34 = vadd.f32 %v708_v22, %v706_v56  ;;  %v8560_v21 = vld [vmem:[#allocation4 + $0x38] ss:$12 sps:$4 sm:$0xff]   ;;  %v8564_v56 = vld [vmem:[#allocation4 + $0x1c] ss:$12 sps:$4 sm:$0xff]   ;;  %v8570_v26 = vld [vmem:[#allocation4 + $0x20] ss:$12 sps:$4 sm:$0xff]  }
 0x158   :  { %v8568_v22 = vld [vmem:[#allocation4 + $0x18] ss:$12 sps:$4 sm:$0xff]  }
 0x159   :  { %v8500_v35 = vadd.f32 %v709_v60, %v707_v30  ;;  %v712_v40 = vpack.c.bf16 %v8498_v34, %v8498_v34  ;;  %v8574_v30 = vld [vmem:[#allocation4 + $0x4] ss:$12 sps:$4 sm:$0xff]   ;;  %v8578_v60 = vld [vmem:[#allocation4] ss:$12 sps:$4 sm:$0xff]  }
 0x15a   :  { %11625 = vst [vmem:[#allocation22_spill] sm:$0xff] %v8574_v30  ;;  %11626 = vst [vmem:[#allocation23_spill] sm:$0xff] %v8578_v60 }
 0x15b   :  { %v713_v41 = vpack.c.bf16 %v8500_v35, %v8500_v35  ;;  %v716_v52 = vunpack.c.l.b16 %v712_v40  ;;  %v8580_v40 = vld [vmem:[#allocation4 + $0x8] ss:$12 sps:$4 sm:$0xff]  }
 0x15c   :  { %11627 = vst [vmem:[#allocation24_spill] sm:$0xff] %v8580_v40 }
 0x15d   :  { %v717_v44 = vunpack.c.l.b16 %v713_v41  ;;  %v8584_v41 = vld [vmem:[#allocation6 + $0xac] ss:$12 sps:$4 sm:$0xff]  }
 0x15e   :  { %11628 = vst [vmem:[#allocation25_spill] sm:$0xff] %v8584_v41 }
 0x15f   :  { %v718_v54 = vrot.slane %v717_v44, 7  ;;  %v8588_v44 = vld [vmem:[#allocation6 + $0xa8] ss:$12 sps:$4 sm:$0xff]  }
 0x160   :  { %11629 = vst [vmem:[#allocation26_spill] sm:$0xff] %v8588_v44 }
 0x161   :  { %v719_v55 = vsel %vm438_vm3, %v718_v54, %v716_v52  ;;  %v8591_v52 = vld [vmem:[#allocation6 + $0x94] ss:$12 sps:$4 sm:$0xff]   ;;  %v8594_v54 = vld [vmem:[#allocation6 + $0xb0] ss:$12 sps:$4 sm:$0xff]  }
 0x162   :  { %v720_v28 = vpack.c.b16 %v719_v55, %v719_v55  ;;  %11630 = vst [vmem:[#allocation27_spill] sm:$0xff] %v8591_v52  ;;  %11631 = vst [vmem:[#allocation28_spill] sm:$0xff] %v8594_v54  ;;  %v8597_v55 = vld [vmem:[#allocation6 + $0x90] ss:$12 sps:$4 sm:$0xff]  }
 0x163   :  { %11632 = vst [vmem:[#allocation29_spill] sm:$0xff] %v8597_v55 }
 0x164   :  { %755 = vmatmul.mubr.bf16.vlgmr.msra.gmra.mxu0 %v720_v28  ;;  %6408 = vmatmul.mubr.bf16.vlgmr.msra.gmra.mxu1 %v720_v28 }
 0x165   :  { %1009 = vmatpush1.bf16.msra.mxu0 %v8507_v31  ;;  %6412 = vmatpush3.bf16.msra.mxu1 %v8509_v57 }
 0x166   :  { %1010 = vmatprep.subr.bf16.mxu0 %v8511_v61  ;;  %6413 = vmatprep.subr.bf16.mxu1 %v11403_v25 }
 0x167   :  { %1040 = vmatprep.mubr.bf16.mxu0 %v11337_v3  ;;  %6427 = vmatprep.mubr.msk.bf16.mxu1 %vm8177_vm2, %v11403_v25 }
 0x169   :  { %1011 = vmatpush1.bf16.msra.mxu0 %v8515_v62  ;;  %6414 = vmatpush3.bf16.msra.mxu1 %v8517_v1 }
 0x16a   :  { %1012 = vmatprep.subr.bf16.mxu0 %v8521_v2  ;;  %6415 = vmatprep.subr.bf16.mxu1 %v11403_v25 }
 0x16d   :  { %1013 = vmatpush1.bf16.msra.mxu0 %v8528_v6  ;;  %6416 = vmatpush3.bf16.msra.mxu1 %v8530_v8 }
 0x16e   :  { %1014 = vmatprep.subr.bf16.mxu0 %v8534_v9  ;;  %6417 = vmatprep.subr.bf16.mxu1 %v11403_v25 }
 0x171   :  { %1015 = vmatpush1.bf16.msra.mxu0 %v8538_v11  ;;  %6418 = vmatpush3.bf16.msra.mxu1 %v8540_v14 }
 0x172   :  { %1016 = vmatprep.subr.bf16.mxu0 %v8544_v15  ;;  %6419 = vmatprep.subr.bf16.mxu1 %v11403_v25 }
 0x175   :  { %1017 = vmatpush1.bf16.msra.mxu0 %v8548_v59  ;;  %6420 = vmatpush3.bf16.msra.mxu1 %v8550_v16 }
 0x176   :  { %1018 = vmatprep.subr.bf16.mxu0 %v8554_v19  ;;  %6421 = vmatprep.subr.bf16.mxu1 %v11403_v25 }
 0x179   :  { %1019 = vmatpush1.bf16.msra.mxu0 %v8558_v20  ;;  %6422 = vmatpush3.bf16.msra.mxu1 %v8560_v21 }
 0x17a   :  { %1020 = vmatprep.subr.bf16.mxu0 %v8564_v56  ;;  %6423 = vmatprep.subr.bf16.mxu1 %v11403_v25 }
 0x17d   :  { %1021 = vmatpush1.bf16.msra.mxu0 %v8568_v22  ;;  %6424 = vmatpush3.bf16.msra.mxu1 %v8570_v26 }
 0x17e   :  { %1022 = vmatprep.subr.bf16.mxu0 %v8574_v30  ;;  %6425 = vmatprep.subr.bf16.mxu1 %v11403_v25 }
 0x181   :  { %1023 = vmatpush1.bf16.msra.mxu0 %v8578_v60  ;;  %6426 = vmatpush3.bf16.msra.mxu1 %v8580_v40  ;;  %v8645_v40 = vld [vmem:[%s11616_s24 + $0x1] sm:$0x1]  ;;  %v8657_v60 = vld [vmem:[#allocation6 + $0x1c] ss:$12 sps:$4 sm:$0xff]  }
 0x182   :  { %1227 = vmatprep.subr.bf16.mxu0 %v8584_v41  ;;  %6431 = vmatprep.subr.bf16.mxu1 %v11403_v25  ;;  %v8604_v41 = vld [vmem:[#allocation6 + $0x98] ss:$12 sps:$4 sm:$0xff]   ;;  %11644 = vst [vmem:[#allocation41_spill] sm:$0xff] %v8645_v40  ;;  %11646 = vst [vmem:[#allocation43_spill] sm:$0xff] %v8657_v60 }
 0x183   :  { %11634 = vst [vmem:[#allocation31_spill] sm:$0xff] %v8604_v41 }
 0x184   :  { %1041 = vmatmul.mubr.bf16.vlgmr.msra.gmra.mxu0 %v720_v28  ;;  %6428 = vmatmul.mubr.bf16.vlgmr.msra.gmra.mxu1 %v720_v28  ;;  %v8610_v28 = vld [vmem:[#allocation6 + $0x78] ss:$12 sps:$4 sm:$0xff]  }
 0x185   :  { %1228 = vmatpush1.bf16.msra.mxu0 %v8588_v44  ;;  %1259 = vmatprep.mubr.bf16.mxu0 %v11337_v3  ;;  %11635 = vst [vmem:[#allocation32_spill] sm:$0xff] %v8610_v28  ;;  %v8613_v3 = vld [vmem:[#allocation6 + $0x64] ss:$12 sps:$4 sm:$0xff]   ;;  %v8623_v44 = vld [vmem:[#allocation6 + $0x4c] ss:$12 sps:$4 sm:$0xff]  }
 0x186   :  { %1229 = vmatprep.subr.bf16.mxu0 %v8591_v52  ;;  %6432 = vmatpush3.bf16.msra.mxu1 %v8594_v54  ;;  %11636 = vst [vmem:[#allocation33_spill] sm:$0xff] %v8613_v3  ;;  %v8616_v52 = vld [vmem:[#allocation6 + $0x80] ss:$12 sps:$4 sm:$0xff]   ;;  %11639 = vst [vmem:[#allocation36_spill] sm:$0xff] %v8623_v44 }
 0x187   :  { %6433 = vmatprep.subr.bf16.mxu1 %v11403_v25  ;;  %6447 = vmatprep.mubr.msk.bf16.mxu1 %vm8177_vm2, %v11403_v25  ;;  %11637 = vst [vmem:[#allocation34_spill] sm:$0xff] %v8616_v52  ;;  %v8620_v54 = vld [vmem:[#allocation6 + $0x60] ss:$12 sps:$4 sm:$0xff]  }
 0x188   :  { %11638 = vst [vmem:[#allocation35_spill] sm:$0xff] %v8620_v54 }
 0x189   :  { %1230 = vmatpush1.bf16.msra.mxu0 %v8597_v55  ;;  %v8640_v55 = vld [vmem:[#allocation6 + $0x34] ss:$12 sps:$4 sm:$0xff]  }
 0x18a   :  { %1231 = vmatprep.subr.bf16.mxu0 %v8601_v4  ;;  %6434 = vmatpush3.bf16.msra.mxu1 %v8604_v41  ;;  %v8628_v4 = vld [vmem:[%s11616_s24 + $0x5] sm:$0x1]  ;;  %v8631_v41 = vld [vmem:[#allocation6 + $0x68] ss:$12 sps:$4 sm:$0xff]   ;;  %11643 = vst [vmem:[#allocation40_spill] sm:$0xff] %v8640_v55 }
 0x18b   :  { %6435 = vmatprep.subr.bf16.mxu1 %v11403_v25  ;;  %11640 = vst [vmem:[#allocation37_spill] sm:$0xff] %v8628_v4  ;;  %11641 = vst [vmem:[#allocation38_spill] sm:$0xff] %v8631_v41 }
 0x18d   :  { %1232 = vmatpush1.bf16.msra.mxu0 %v8610_v28  ;;  %v8635_v28 = vld [vmem:[#allocation6 + $0x48] ss:$12 sps:$4 sm:$0xff]  }
 0x18e   :  { %1233 = vmatprep.subr.bf16.mxu0 %v8613_v3  ;;  %6436 = vmatpush3.bf16.msra.mxu1 %v8616_v52  ;;  %11642 = vst [vmem:[#allocation39_spill] sm:$0xff] %v8635_v28  ;;  %v1090_v3 = vpack.c.bf16 %v8628_v4, %v8628_v4  ;;  %v8648_v52 = vld [vmem:[#allocation6 + $0x50] ss:$12 sps:$4 sm:$0xff]  }
 0x18f   :  { %6437 = vmatprep.subr.bf16.mxu1 %v11403_v25 }
 0x190   :  { %v1094_v4 = vunpack.c.l.b16 %v1090_v3  ;;  %v8670_v3 = vld [vmem:[#allocation6 + $0x20] ss:$12 sps:$4 sm:$0xff]  }
 0x191   :  { %1234 = vmatpush1.bf16.msra.mxu0 %v8620_v54  ;;  %v8652_v54 = vld [vmem:[#allocation6 + $0x30] ss:$12 sps:$4 sm:$0xff]  }
 0x192   :  { %1235 = vmatprep.subr.bf16.mxu0 %v8623_v44  ;;  %6438 = vmatpush3.bf16.msra.mxu1 %v8631_v41  ;;  %11645 = vst [vmem:[#allocation42_spill] sm:$0xff] %v8652_v54  ;;  %v1089_v44 = vpack.c.bf16 %v8645_v40, %v8645_v40  ;;  %v8664_v41 = vld [vmem:[#allocation6 + $0x18] ss:$12 sps:$4 sm:$0xff]   ;;  %v1095_v30 = vrot.slane %v1094_v4, 7  ;;  %v8679_v4 = vld [vmem:[#allocation6 + $0x8] ss:$12 sps:$4 sm:$0xff]  }
 0x193   :  { %6439 = vmatprep.subr.bf16.mxu1 %v11403_v25  ;;  %v8667_v40 = vld [vmem:[#allocation6 + $0x4] ss:$12 sps:$4 sm:$0xff]  }
 0x195   :  { %1236 = vmatpush1.bf16.msra.mxu0 %v8635_v28  ;;  %v1093_v28 = vunpack.c.l.b16 %v1089_v44 }
 0x196   :  { %1237 = vmatprep.subr.bf16.mxu0 %v8640_v55  ;;  %6440 = vmatpush3.bf16.msra.mxu1 %v8648_v52  ;;  %v8674_v55 = vld [vmem:[#allocation6] ss:$12 sps:$4 sm:$0xff]  }
 0x197   :  { %6441 = vmatprep.subr.bf16.mxu1 %v11403_v25 }
 0x199   :  { %1238 = vmatpush1.bf16.msra.mxu0 %v8652_v54  ;;  %v1096_v54 = vsel %vm438_vm3, %v1095_v30, %v1093_v28  ;;  %v8688_v30 = vld [vmem:[#allocation2 + $0xa8] ss:$12 sps:$4 sm:$0xff]  }
 0x19a   :  { %1239 = vmatprep.subr.bf16.mxu0 %v8657_v60  ;;  %6442 = vmatpush3.bf16.msra.mxu1 %v8660_v53  ;;  %v1097_v44 = vpack.c.b16 %v1096_v54, %v1096_v54  ;;  %v8684_v60 = vld [vmem:[#allocation2 + $0xac] ss:$12 sps:$4 sm:$0xff]   ;;  %v8692_v28 = vld [vmem:[#allocation2 + $0x94] ss:$12 sps:$4 sm:$0xff]   ;;  %v11648_v54 = vmov 0  }
 0x19b   :  { %6443 = vmatprep.subr.bf16.mxu1 %v11403_v25  ;;  %11647 = vst [vmem:[#allocation44_spill] sm:$0xff] %v8684_v60 }
 0x19d   :  { %1240 = vmatpush1.bf16.msra.mxu0 %v8664_v41 }
 0x19e   :  { %1241 = vmatprep.subr.bf16.mxu0 %v8667_v40  ;;  %6444 = vmatpush3.bf16.msra.mxu1 %v8670_v3 }
 0x19f   :  { %6445 = vmatprep.subr.bf16.mxu1 %v11403_v25 }
 0x1a1   :  { %1242 = vmatpush1.bf16.msra.mxu0 %v8674_v55 }
 0x1a2   :  { %6446 = vmatpush3.bf16.msra.mxu1 %v8679_v4  ;;  %1351 = vmatprep.subr.bf16.mxu0 %v8684_v60  ;;  %v8699_v60 = vld [vmem:[#allocation2 + $0x90] ss:$12 sps:$4 sm:$0xff]  }
 0x1a3   :  { %6451 = vmatprep.subr.bf16.mxu1 %v11403_v25 }
 0x1a4   :  { %1260 = vmatmul.mubr.bf16.vlgmr.msra.gmra.mxu0 %v1097_v44 }
 0x1a5   :  { %6448 = vmatmul.mubr.bf16.vlgmr.msra.gmra.mxu1 %v1097_v44  ;;  %1352 = vmatpush1.bf16.msra.mxu0 %v8688_v30  ;;  %v8703_v44 = vld [vmem:[#allocation2 + $0x7c] ss:$12 sps:$4 sm:$0xff]  }
 0x1a6   :  { %6452 = vmatpush3.bf16.msra.mxu1 %v8367_v33  ;;  %1353 = vmatprep.subr.bf16.mxu0 %v8692_v28 }
 0x1a7   :  { %6453 = vmatprep.subr.bf16.mxu1 %v11403_v25  ;;  %1383 = vmatprep.mubr.bf16.mxu0 %v11648_v54 }
 0x1a8   :  { %6467 = vmatprep.mubr.msk.bf16.mxu1 %vm8177_vm2, %v11403_v25 }
 0x1a9   :  { %1354 = vmatpush1.bf16.msra.mxu0 %v8699_v60 }
 0x1aa   :  { %6454 = vmatpush3.bf16.msra.mxu1 %v8376_v38  ;;  %1355 = vmatprep.subr.bf16.mxu0 %v8703_v44 }
 0x1ab   :  { %6455 = vmatprep.subr.bf16.mxu1 %v11403_v25 }
 0x1ad   :  { %1356 = vmatpush1.bf16.msra.mxu0 %v8320_v13 }
 0x1ae   :  { %6456 = vmatpush3.bf16.msra.mxu1 %v8387_v43  ;;  %1357 = vmatprep.subr.bf16.mxu0 %v8330_v18 }
 0x1af   :  { %6457 = vmatprep.subr.bf16.mxu1 %v11403_v25 }
 0x1b1   :  { %1358 = vmatpush1.bf16.msra.mxu0 %v8335_v23 }
 0x1b2   :  { %6458 = vmatpush3.bf16.msra.mxu1 %v8396_v45  ;;  %1359 = vmatprep.subr.bf16.mxu0 %v8338_v24 }
 0x1b3   :  { %6459 = vmatprep.subr.bf16.mxu1 %v11403_v25 }
 0x1b5   :  { %1360 = vmatpush1.bf16.msra.mxu0 %v8342_v27 }
 0x1b6   :  { %6460 = vmatpush3.bf16.msra.mxu1 %v8402_v47  ;;  %1361 = vmatprep.subr.bf16.mxu0 %v8351_v29 }
 0x1b7   :  { %6461 = vmatprep.subr.bf16.mxu1 %v11403_v25 }
 0x1b9   :  { %1362 = vmatpush1.bf16.msra.mxu0 %v8364_v32 }
 0x1ba   :  { %6462 = vmatpush3.bf16.msra.mxu1 %v8408_v48  ;;  %1363 = vmatprep.subr.bf16.mxu0 %v8372_v36 }
 0x1bb   :  { %6463 = vmatprep.subr.bf16.mxu1 %v11403_v25 }
 0x1bd   :  { %1364 = vmatpush1.bf16.msra.mxu0 %v8374_v37 }
 0x1be   :  { %6464 = vmatpush3.bf16.msra.mxu1 %v8415_v49  ;;  %1365 = vmatprep.subr.bf16.mxu0 %v8379_v39 }
 0x1bf   :  { %6465 = vmatprep.subr.bf16.mxu1 %v11403_v25 }
 0x1c1   :  { %1366 = vmatpush1.bf16.msra.mxu0 %v8385_v42 }
 0x1c2   :  { %6466 = vmatpush3.bf16.msra.mxu1 %v8421_v50  ;;  %1496 = vmatprep.subr.bf16.mxu0 %v8454_v51 }
 0x1c3   :  { %6471 = vmatprep.subr.bf16.mxu1 %v11403_v25 }
 0x224   :  { %v756_v13 = vpop.f32.mrf.mxu0  ;;  %v797_v18 = vpop.f32.mrf.mxu1 }
 0x225   :  { %v805_v23 = vrot.slane %v756_v13, 7  ;;  %v813_v24 = vadd.f32 %v756_v13, %v8470_v5 }
 0x226   :  { %v758_v27 = vpop.f32.mrf.mxu0  ;;  %v6409_v29 = vpop.f32.mrf.mxu1 }
 0x227   :  { %v811_v32 = vadd.f32 %v805_v23, %v8467_v0  ;;  %v5825_v33 = vmul.f32 -1.442695, %v813_v24  ;;  %v806_v39 = vrot.slane %v758_v27, 7  ;;  %v814_v45 = vadd.f32 %v758_v27, %v8476_v17 }
 0x228   :  { %v760_v36 = vpop.f32.mrf.mxu0  ;;  %v800_v37 = vpop.f32.mrf.mxu1 }
 0x229   :  { %v5823_v38 = vmul.f32 -1.442695, %v811_v32  ;;  %7392 = vpow2.f32 %v5825_v33  ;;  %v812_v47 = vadd.f32 %v806_v39, %v8474_v12  ;;  %v5826_v48 = vmul.f32 -1.442695, %v814_v45 }
 0x22a   :  { %v761_v42 = vpop.f32.mrf.mxu0  ;;  %v6410_v43 = vpop.f32.mrf.mxu1  ;;  %v839_v32 = vadd.f32 %v8483_v46, %v797_v18 }
 0x22b   :  { %7394 = vpow2.f32 %v5823_v38  ;;  %v5824_v49 = vmul.f32 -1.442695, %v812_v47 }
 0x22c   :  { %7396 = vpow2.f32 %v5826_v48  ;;  %v841_v43 = vrot.slane %v839_v32, 7 }
 0x22d   :  { %7398 = vpow2.f32 %v5824_v49 }
 0x236   :  { %v7393_v50 = vpop.eup %7392 }
 0x237   :  { %v829_v51 = vadd.f32 1.0, %v7393_v50 }
 0x238   :  { %v7395_v13 = vpop.eup %7394 }
 0x239   :  { %v827_v23 = vadd.f32 1.0, %v7395_v13  ;;  %7400 = vrcp.f32 %v829_v51  ;;  %v7397_v24 = vpop.eup %7396 }
 0x23a   :  { %v7399_v29 = vpop.eup %7398  ;;  %v830_v33 = vadd.f32 1.0, %v7397_v24 }
 0x23b   :  { %7402 = vrcp.f32 %v827_v23  ;;  %v828_v27 = vadd.f32 1.0, %v7399_v29  ;;  %v857_v29 = vrot.slane %v8500_v35, 7 }
 0x23c   :  { %7404 = vrcp.f32 %v830_v33  ;;  %v856_v33 = vrot.slane %v8498_v34, 7 }
 0x23d   :  { %7406 = vrcp.f32 %v828_v27 }
 0x244   :  { %v1042_v36 = vpop.f32.mrf.mxu0  ;;  %v8736_v37 = vpop.f32.mrf.mxu1 }
 0x246   :  { %v7401_v38 = vpop.eup %7400  ;;  %v1044_v39 = vpop.f32.mrf.mxu0 }
 0x247   :  { %v6429_v42 = vpop.f32.mrf.mxu1  ;;  %v845_v45 = vmul.f32 %v7401_v38, %v839_v32 }
 0x248   :  { %v7403_v47 = vpop.eup %7402  ;;  %v1046_v48 = vpop.f32.mrf.mxu0 }
 0x249   :  { %v1086_v49 = vpop.f32.mrf.mxu1  ;;  %v844_v50 = vmul.f32 %v7403_v47, %v841_v43  ;;  %v847_v51 = vadd.f32 %v845_v45, %v8492_v10  ;;  %v7405_v23 = vpop.eup %7404 }
 0x24a   :  { %v1047_v13 = vpop.f32.mrf.mxu0  ;;  %v7407_v24 = vpop.eup %7406  ;;  %v851_v42 = vsub.f32 1.0, %v7405_v23  ;;  %v861_v43 = vmul.f32 %v7405_v23, %v857_v29 }
 0x24b   :  { %v6430_v46 = vpop.f32.mrf.mxu1  ;;  %v846_v18 = vadd.f32 %v844_v50, %v8490_v7  ;;  %7408 = vtanh.f32 %v847_v51  ;;  %v850_v38 = vsub.f32 1.0, %v7407_v24  ;;  %v860_v27 = vmul.f32 %v7407_v24, %v856_v33  ;;  %v8747_v50 = vld [vmem:[%s11323_s8] sm:$0x7] }
 0x24c   :  { %v8753_v35 = vrot.slane %v8747_v50, %v8458_v58 }
 0x24d   :  { %7410 = vtanh.f32 %v846_v18 }
 0x24e   :  { %11649 = vst [vmem:[#allocation45_spill] sm:$0xff] %v8753_v35  ;;  %v1043_v18 = vadd.f32 %v1042_v36, %v8753_v35 }
 0x258   :  { %v7409_v32 = vpop.eup %7408 }
 0x259   :  { %v853_v48 = vmul.f32 %v7409_v32, %v851_v42  ;;  %v8762_v42 = vrot.slane %v8747_v50, %v8465_v63 }
 0x25a   :  { %v7411_v47 = vpop.eup %7410 }
 0x25b   :  { %v852_v45 = vmul.f32 %v7411_v47, %v850_v38  ;;  %v8742_v49 = vadd.f32 %v861_v43, %v853_v48  ;;  %11650 = vst [vmem:[#allocation46_spill] sm:$0xff] %v8762_v42  ;;  %v1045_v36 = vadd.f32 %v1044_v39, %v8762_v42  ;;  %v11661_v39 = vld [vmem:[#allocation31_spill] sm:$0xff] }
 0x25d   :  { %v8749_v51 = vadd.f32 %v860_v27, %v852_v45  ;;  %v1342_v13 = vpack.c.bf16 %v8742_v49, %v8742_v49 }
 0x25f   :  { %v1341_v34 = vpack.c.bf16 %v8749_v51, %v8749_v51  ;;  %v1346_v23 = vunpack.c.l.b16 %v1342_v13 }
 0x261   :  { %v1345_v46 = vunpack.c.l.b16 %v1341_v34 }
 0x263   :  { %v1347_v24 = vrot.slane %v1345_v46, 1 }
 0x264   :  { %v1261_v29 = vpop.f32.mrf.mxu0 }
 0x265   :  { %v1308_v32 = vadd.f32 %v1261_v29, %v1043_v18  ;;  %v1348_v33 = vsel %vm438_vm3, %v1346_v23, %v1347_v24  ;;  %v1302_v38 = vpop.f32.mrf.mxu1  ;;  %v11663_v23 = vld [vmem:[#allocation32_spill] sm:$0xff]  ;;  %v11664_v24 = vld [vmem:[#allocation34_spill] sm:$0xff]  ;;  %v11665_v29 = vld [vmem:[#allocation37_spill] sm:$0xff] }
 0x266   :  { %v1263_v48 = vpop.f32.mrf.mxu0  ;;  %v1349_v43 = vpack.c.b16 %v1348_v33, %v1348_v33  ;;  %v11666_v33 = vld [vmem:[#allocation33_spill] sm:$0xff] }
 0x267   :  { %v5875_v47 = vmul.f32 -1.442695, %v1308_v32  ;;  %v6449_v45 = vpop.f32.mrf.mxu1  ;;  %v1309_v46 = vadd.f32 %v1263_v48, %v1045_v36  ;;  %v1336_v32 = vrot.slane %v11665_v29, 7  ;;  %v11667_v48 = vld [vmem:[#allocation35_spill] sm:$0xff]  ;;  %v8938_v29 = vld [vmem:[#allocation9 + $0xac] ss:$12 sps:$4 sm:$0xff]  }
 0x268   :  { %1384 = vmatmul.mubr.bf16.vlgmr.msra.gmra.mxu0 %v1349_v43  ;;  %6468 = vmatmul.mubr.bf16.vlgmr.msra.gmra.mxu1 %v1349_v43  ;;  %v1265_v27 = vpop.f32.mrf.mxu0  ;;  %v11670_v45 = vld [vmem:[#allocation41_spill] sm:$0xff] }
 0x269   :  { %7412 = vpow2.f32 %v5875_v47  ;;  %1497 = vmatpush1.bf16.msra.mxu0 %v8507_v31  ;;  %6472 = vmatpush3.bf16.msra.mxu1 %v8509_v57  ;;  %v1305_v34 = vpop.f32.mrf.mxu1  ;;  %v5876_v31 = vmul.f32 -1.442695, %v1309_v46  ;;  %v11669_v47 = vld [vmem:[#allocation36_spill] sm:$0xff]  ;;  %v1337_v27 = vsel %vm438_vm3, %v1336_v32, %v11670_v45  ;;  %v8942_v32 = vld [vmem:[#allocation9 + $0xa8] ss:$12 sps:$4 sm:$0xff]  }
 0x26a   :  { %1498 = vmatprep.subr.bf16.mxu0 %v8511_v61  ;;  %6473 = vmatprep.subr.bf16.mxu1 %v11403_v25  ;;  %v1266_v13 = vpop.f32.mrf.mxu0  ;;  %v8966_v45 = vld [vmem:[#allocation9 + $0x78] ss:$12 sps:$4 sm:$0xff]  }
 0x26b   :  { %1528 = vmatprep.mubr.bf16.mxu0 %v11648_v54  ;;  %6487 = vmatprep.mubr.msk.bf16.mxu1 %vm8177_vm2, %v11403_v25  ;;  %v6450_v18 = vpop.f32.mrf.mxu1  ;;  %7414 = vpow2.f32 %v5876_v31  ;;  %v11671_v13 = vld [vmem:[#allocation39_spill] sm:$0xff]  ;;  %v11672_v31 = vld [vmem:[#allocation40_spill] sm:$0xff] }
 0x26d   :  { %1499 = vmatpush1.bf16.msra.mxu0 %v8515_v62  ;;  %6474 = vmatpush3.bf16.msra.mxu1 %v8517_v1  ;;  %v8796_v1 = vld [vmem:[%s11324_s9] ss:$0 sm:$0xff] }
 0x26e   :  { %1500 = vmatprep.subr.bf16.mxu0 %v8521_v2  ;;  %6475 = vmatprep.subr.bf16.mxu1 %v11403_v25  ;;  %v11651_v2 = vld [vmem:[#allocation22_spill] sm:$0xff] }
 0x271   :  { %1501 = vmatpush1.bf16.msra.mxu0 %v8528_v6  ;;  %6476 = vmatpush3.bf16.msra.mxu1 %v8530_v8  ;;  %v11652_v6 = vld [vmem:[#allocation19_spill] sm:$0xff] }
 0x272   :  { %1502 = vmatprep.subr.bf16.mxu0 %v8534_v9  ;;  %6477 = vmatprep.subr.bf16.mxu1 %v11403_v25  ;;  %v8804_v8 = vrot.slane %v8747_v50, %v11652_v6  ;;  %v11662_v50 = vld [vmem:[#allocation30_spill] sm:$0xff] }
 0x274   :  { %11653 = vst [vmem:[#allocation22_spill] sm:$0xff] %v8804_v8 }
 0x275   :  { %1503 = vmatpush1.bf16.msra.mxu0 %v8538_v11  ;;  %6478 = vmatpush3.bf16.msra.mxu1 %v8540_v14  ;;  %v1328_v11 = vadd.f32 %v8796_v1, %v1302_v38  ;;  %v11654_v14 = vld [vmem:[#allocation23_spill] sm:$0xff] }
 0x276   :  { %v7413_v57 = vpop.eup %7412  ;;  %1504 = vmatprep.subr.bf16.mxu0 %v8544_v15  ;;  %6479 = vmatprep.subr.bf16.mxu1 %v11403_v25  ;;  %v11655_v15 = vld [vmem:[#allocation24_spill] sm:$0xff] }
 0x277   :  { %v1316_v61 = vadd.f32 1.0, %v7413_v57  ;;  %11677 = vst [vmem:[#allocation24_spill] sm:$0xff] %v8966_v45 }
 0x278   :  { %v7415_v62 = vpop.eup %7414 }
 0x279   :  { %7416 = vrcp.f32 %v1316_v61  ;;  %1505 = vmatpush1.bf16.msra.mxu0 %v8548_v59  ;;  %6480 = vmatpush3.bf16.msra.mxu1 %v8550_v16  ;;  %v1317_v9 = vadd.f32 1.0, %v7415_v62  ;;  %v11656_v16 = vld [vmem:[#allocation25_spill] sm:$0xff]  ;;  %v11673_v61 = vld [vmem:[#allocation42_spill] sm:$0xff]  ;;  %v11674_v62 = vld [vmem:[#allocation43_spill] sm:$0xff] }
 0x27a   :  { %1506 = vmatprep.subr.bf16.mxu0 %v8554_v19  ;;  %6481 = vmatprep.subr.bf16.mxu1 %v11403_v25  ;;  %v1084_v19 = vadd.f32 %v8736_v37, %v8804_v8  ;;  %v11660_v37 = vld [vmem:[#allocation29_spill] sm:$0xff] }
 0x27b   :  { %7418 = vrcp.f32 %v1317_v9 }
 0x27d   :  { %1507 = vmatpush1.bf16.msra.mxu0 %v8558_v20  ;;  %6482 = vmatpush3.bf16.msra.mxu1 %v8560_v21 }
 0x27e   :  { %1508 = vmatprep.subr.bf16.mxu0 %v8564_v56  ;;  %6483 = vmatprep.subr.bf16.mxu1 %v11403_v25  ;;  %v11657_v56 = vld [vmem:[#allocation26_spill] sm:$0xff] }
 0x281   :  { %1509 = vmatpush1.bf16.msra.mxu0 %v8568_v22  ;;  %6484 = vmatpush3.bf16.msra.mxu1 %v8570_v26  ;;  %v11658_v22 = vld [vmem:[#allocation28_spill] sm:$0xff]  ;;  %v11659_v26 = vld [vmem:[#allocation27_spill] sm:$0xff] }
 0x282   :  { %1510 = vmatprep.subr.bf16.mxu0 %v11651_v2  ;;  %6485 = vmatprep.subr.bf16.mxu1 %v11403_v25  ;;  %v8853_v2 = vld [vmem:[#allocation7 + $0xa8] ss:$12 sps:$4 sm:$0xff]  }
 0x285   :  { %1511 = vmatpush1.bf16.msra.mxu0 %v11654_v14  ;;  %6486 = vmatpush3.bf16.msra.mxu1 %v11655_v15  ;;  %v8888_v14 = vld [vmem:[#allocation7 + $0x64] ss:$12 sps:$4 sm:$0xff]   ;;  %v8892_v15 = vld [vmem:[#allocation7 + $0x60] ss:$12 sps:$4 sm:$0xff]  }
 0x286   :  { %v7417_v59 = vpop.eup %7416  ;;  %1578 = vmatprep.subr.bf16.mxu0 %v11656_v16  ;;  %6491 = vmatprep.subr.bf16.mxu1 %v11403_v25  ;;  %v8898_v16 = vld [vmem:[#allocation7 + $0x4c] ss:$12 sps:$4 sm:$0xff]  }
 0x287   :  { %v1329_v20 = vmul.f32 %v7417_v59, %v1328_v11  ;;  %v8884_v11 = vld [vmem:[#allocation7 + $0x80] ss:$12 sps:$4 sm:$0xff]   ;;  %v8894_v59 = vld [vmem:[#allocation7 + $0x68] ss:$12 sps:$4 sm:$0xff]  }
 0x288   :  { %1529 = vmatmul.mubr.bf16.vlgmr.msra.gmra.mxu0 %v1349_v43  ;;  %6488 = vmatmul.mubr.bf16.vlgmr.msra.gmra.mxu1 %v1349_v43  ;;  %v7419_v38 = vpop.eup %7418  ;;  %v11668_v43 = vld [vmem:[#allocation38_spill] sm:$0xff] }
 0x289   :  { %v1330_v21 = vadd.f32 %v1329_v20, %v1084_v19  ;;  %1579 = vmatpush1.bf16.msra.mxu0 %v11657_v56  ;;  %6492 = vmatpush3.bf16.msra.mxu1 %v11658_v22  ;;  %v1332_v36 = vsub.f32 1.0, %v7419_v38  ;;  %v1339_v18 = vmul.f32 %v7419_v38, %v1337_v27  ;;  %v8902_v19 = vld [vmem:[#allocation7 + $0x48] ss:$12 sps:$4 sm:$0xff]   ;;  %v8904_v20 = vld [vmem:[#allocation7 + $0x50] ss:$12 sps:$4 sm:$0xff]  }
 0x28a   :  { %1580 = vmatprep.subr.bf16.mxu0 %v11659_v26  ;;  %6493 = vmatprep.subr.bf16.mxu1 %v11403_v25  ;;  %v8912_v56 = vld [vmem:[#allocation7 + $0x30] ss:$12 sps:$4 sm:$0xff]   ;;  %v8914_v22 = vld [vmem:[#allocation7 + $0x38] ss:$12 sps:$4 sm:$0xff]  }
 0x28b   :  { %7420 = vtanh.f32 %v1330_v21  ;;  %1610 = vmatprep.mubr.bf16.mxu0 %v11648_v54  ;;  %6507 = vmatprep.mubr.msk.bf16.mxu1 %vm8177_vm2, %v11403_v25  ;;  %v8908_v21 = vld [vmem:[#allocation7 + $0x34] ss:$12 sps:$4 sm:$0xff]   ;;  %v8918_v26 = vld [vmem:[#allocation7 + $0x1c] ss:$12 sps:$4 sm:$0xff]   ;;  %v8969_v27 = vld [vmem:[#allocation9 + $0x64] ss:$12 sps:$4 sm:$0xff]  }
 0x28c   :  { %v8948_v38 = vld [vmem:[#allocation9 + $0xb0] ss:$12 sps:$4 sm:$0xff]   ;;  %11678 = vst [vmem:[#allocation25_spill] sm:$0xff] %v8969_v27 }
 0x28d   :  { %1581 = vmatpush1.bf16.msra.mxu0 %v11660_v37  ;;  %6494 = vmatpush3.bf16.msra.mxu1 %v11661_v39  ;;  %v8922_v37 = vld [vmem:[#allocation7 + $0x18] ss:$12 sps:$4 sm:$0xff]   ;;  %v8924_v39 = vld [vmem:[#allocation7 + $0x20] ss:$12 sps:$4 sm:$0xff]  }
 0x28e   :  { %1582 = vmatprep.subr.bf16.mxu0 %v11662_v50  ;;  %6495 = vmatprep.subr.bf16.mxu1 %v11403_v25  ;;  %v8928_v50 = vld [vmem:[#allocation7 + $0x4] ss:$12 sps:$4 sm:$0xff]  }
 0x291   :  { %1583 = vmatpush1.bf16.msra.mxu0 %v11663_v23  ;;  %6496 = vmatpush3.bf16.msra.mxu1 %v11664_v24  ;;  %v8932_v23 = vld [vmem:[#allocation7] ss:$12 sps:$4 sm:$0xff]   ;;  %v8934_v24 = vld [vmem:[#allocation7 + $0x8] ss:$12 sps:$4 sm:$0xff]  }
 0x292   :  { %1584 = vmatprep.subr.bf16.mxu0 %v11666_v33  ;;  %6497 = vmatprep.subr.bf16.mxu1 %v11403_v25  ;;  %v8945_v33 = vld [vmem:[#allocation9 + $0x94] ss:$12 sps:$4 sm:$0xff]  }
 0x295   :  { %1585 = vmatpush1.bf16.msra.mxu0 %v11667_v48  ;;  %6498 = vmatpush3.bf16.msra.mxu1 %v11668_v43  ;;  %v8953_v48 = vld [vmem:[#allocation9 + $0x90] ss:$12 sps:$4 sm:$0xff]  }
 0x296   :  { %1586 = vmatprep.subr.bf16.mxu0 %v11669_v47  ;;  %6499 = vmatprep.subr.bf16.mxu1 %v11403_v25  ;;  %v8957_v43 = vld [vmem:[#allocation9 + $0x7c] ss:$12 sps:$4 sm:$0xff]   ;;  %v8960_v47 = vld [vmem:[#allocation9 + $0x98] ss:$12 sps:$4 sm:$0xff]  }
 0x297   :  { %11675 = vst [vmem:[#allocation19_spill] sm:$0xff] %v8957_v43  ;;  %11676 = vst [vmem:[#allocation23_spill] sm:$0xff] %v8960_v47 }
 0x298   :  { %v7421_v34 = vpop.eup %7420 }
 0x299   :  { %1587 = vmatpush1.bf16.msra.mxu0 %v11671_v13  ;;  %6500 = vmatpush3.bf16.msra.mxu1 %v8648_v52  ;;  %v1333_v46 = vmul.f32 %v7421_v34, %v1332_v36  ;;  %v8849_v52 = vld [vmem:[#allocation7 + $0xac] ss:$12 sps:$4 sm:$0xff]  }
 0x29a   :  { %1588 = vmatprep.subr.bf16.mxu0 %v11672_v31  ;;  %6501 = vmatprep.subr.bf16.mxu1 %v11403_v25  ;;  %v8972_v36 = vld [vmem:[#allocation9 + $0x80] ss:$12 sps:$4 sm:$0xff]   ;;  %v8991_v31 = vld [vmem:[#allocation9 + $0x48] ss:$12 sps:$4 sm:$0xff]  }
 0x29b   :  { %v8839_v57 = vadd.f32 %v1339_v18, %v1333_v46  ;;  %11679 = vst [vmem:[#allocation26_spill] sm:$0xff] %v8972_v36  ;;  %v8976_v34 = vld [vmem:[#allocation9 + $0x60] ss:$12 sps:$4 sm:$0xff]   ;;  %v8984_v46 = vld [vmem:[%s11616_s24 + $0x6] sm:$0x1]  ;;  %11684 = vst [vmem:[#allocation30_spill] sm:$0xff] %v8991_v31 }
 0x29c   :  { %11680 = vst [vmem:[#allocation28_spill] sm:$0xff] %v8976_v34  ;;  %v8979_v13 = vld [vmem:[#allocation9 + $0x4c] ss:$12 sps:$4 sm:$0xff]   ;;  %11682 = vst [vmem:[#allocation29_spill] sm:$0xff] %v8984_v46  ;;  %v8987_v18 = vld [vmem:[#allocation9 + $0x68] ss:$12 sps:$4 sm:$0xff]  }
 0x29d   :  { %1589 = vmatpush1.bf16.msra.mxu0 %v11673_v61  ;;  %6502 = vmatpush3.bf16.msra.mxu1 %v8660_v53  ;;  %v8855_v53 = vld [vmem:[#allocation7 + $0xb0] ss:$12 sps:$4 sm:$0xff]   ;;  %v8859_v9 = vpack.c.bf16 %v8839_v57, %v8839_v57  ;;  %11681 = vst [vmem:[#allocation27_spill] sm:$0xff] %v8979_v13  ;;  %11683 = vst [vmem:[#allocation31_spill] sm:$0xff] %v8987_v18  ;;  %v1907_v61 = vpack.c.bf16 %v8984_v46, %v8984_v46  ;;  %v9016_v46 = vld [vmem:[#allocation9 + $0x38] ss:$12 sps:$4 sm:$0xff]  }
 0x29e   :  { %1590 = vmatprep.subr.bf16.mxu0 %v11674_v62  ;;  %6503 = vmatprep.subr.bf16.mxu1 %v11403_v25  ;;  %v8996_v62 = vld [vmem:[#allocation9 + $0x34] ss:$12 sps:$4 sm:$0xff]   ;;  %11690 = vst [vmem:[#allocation38_spill] sm:$0xff] %v9016_v46 }
 0x29f   :  { %11685 = vst [vmem:[#allocation32_spill] sm:$0xff] %v8996_v62 }
 0x2a1   :  { %1591 = vmatpush1.bf16.msra.mxu0 %v8664_v41  ;;  %6504 = vmatpush3.bf16.msra.mxu1 %v8670_v3  ;;  %v8869_v41 = vld [vmem:[#allocation7 + $0x90] ss:$12 sps:$4 sm:$0xff]  }
 0x2a2   :  { %1592 = vmatprep.subr.bf16.mxu0 %v8667_v40  ;;  %6505 = vmatprep.subr.bf16.mxu1 %v11403_v25  ;;  %v8863_v40 = vld [vmem:[#allocation7 + $0x94] ss:$12 sps:$4 sm:$0xff]   ;;  %v8875_v3 = vld [vmem:[#allocation7 + $0x7c] ss:$12 sps:$4 sm:$0xff]  }
 0x2a5   :  { %1593 = vmatpush1.bf16.msra.mxu0 %v8674_v55  ;;  %6506 = vmatpush3.bf16.msra.mxu1 %v8679_v4  ;;  %v8871_v55 = vld [vmem:[#allocation7 + $0x98] ss:$12 sps:$4 sm:$0xff]  }
 0x2a6   :  { %1825 = vmatprep.subr.bf16.mxu0 %v8849_v52  ;;  %6511 = vmatprep.subr.bf16.mxu1 %v11403_v25  ;;  %v8882_v4 = vld [vmem:[#allocation7 + $0x78] ss:$12 sps:$4 sm:$0xff]  }
 0x2a8   :  { %1611 = vmatmul.mubr.bf16.vlgmr.msra.gmra.mxu0 %v8859_v9  ;;  %6508 = vmatmul.mubr.bf16.vlgmr.msra.gmra.mxu1 %v8859_v9 }
 0x2a9   :  { %1826 = vmatpush1.bf16.msra.mxu0 %v8853_v2  ;;  %6512 = vmatpush3.bf16.msra.mxu1 %v8855_v53 }
 0x2aa   :  { %1827 = vmatprep.subr.bf16.mxu0 %v8863_v40  ;;  %6513 = vmatprep.subr.bf16.mxu1 %v11403_v25 }
 0x2ab   :  { %1857 = vmatprep.mubr.bf16.mxu0 %v11648_v54  ;;  %6527 = vmatprep.mubr.msk.bf16.mxu1 %vm8177_vm2, %v11403_v25 }
 0x2ad   :  { %1828 = vmatpush1.bf16.msra.mxu0 %v8869_v41  ;;  %6514 = vmatpush3.bf16.msra.mxu1 %v8871_v55 }
 0x2ae   :  { %1829 = vmatprep.subr.bf16.mxu0 %v8875_v3  ;;  %6515 = vmatprep.subr.bf16.mxu1 %v11403_v25 }
 0x2b1   :  { %1830 = vmatpush1.bf16.msra.mxu0 %v8882_v4  ;;  %6516 = vmatpush3.bf16.msra.mxu1 %v8884_v11 }
 0x2b2   :  { %1831 = vmatprep.subr.bf16.mxu0 %v8888_v14  ;;  %6517 = vmatprep.subr.bf16.mxu1 %v11403_v25 }
 0x2b5   :  { %1832 = vmatpush1.bf16.msra.mxu0 %v8892_v15  ;;  %6518 = vmatpush3.bf16.msra.mxu1 %v8894_v59 }
 0x2b6   :  { %1833 = vmatprep.subr.bf16.mxu0 %v8898_v16  ;;  %6519 = vmatprep.subr.bf16.mxu1 %v11403_v25 }
 0x2b9   :  { %1834 = vmatpush1.bf16.msra.mxu0 %v8902_v19  ;;  %6520 = vmatpush3.bf16.msra.mxu1 %v8904_v20 }
 0x2ba   :  { %1835 = vmatprep.subr.bf16.mxu0 %v8908_v21  ;;  %6521 = vmatprep.subr.bf16.mxu1 %v11403_v25 }
 0x2bd   :  { %1836 = vmatpush1.bf16.msra.mxu0 %v8912_v56  ;;  %6522 = vmatpush3.bf16.msra.mxu1 %v8914_v22 }
 0x2be   :  { %1837 = vmatprep.subr.bf16.mxu0 %v8918_v26  ;;  %6523 = vmatprep.subr.bf16.mxu1 %v11403_v25 }
 0x2c1   :  { %1838 = vmatpush1.bf16.msra.mxu0 %v8922_v37  ;;  %6524 = vmatpush3.bf16.msra.mxu1 %v8924_v39 }
 0x2c2   :  { %1839 = vmatprep.subr.bf16.mxu0 %v8928_v50  ;;  %6525 = vmatprep.subr.bf16.mxu1 %v11403_v25 }
 0x2c5   :  { %1840 = vmatpush1.bf16.msra.mxu0 %v8932_v23  ;;  %6526 = vmatpush3.bf16.msra.mxu1 %v8934_v24 }
 0x2c6   :  { %2044 = vmatprep.subr.bf16.mxu0 %v8938_v29  ;;  %6531 = vmatprep.subr.bf16.mxu1 %v11403_v25 }
 0x2c8   :  { %1858 = vmatmul.mubr.bf16.vlgmr.msra.gmra.mxu0 %v8859_v9  ;;  %6528 = vmatmul.mubr.bf16.vlgmr.msra.gmra.mxu1 %v8859_v9  ;;  %v9001_v9 = vld [vmem:[%s11616_s24 + $0x2] sm:$0x1] }
 0x2c9   :  { %2045 = vmatpush1.bf16.msra.mxu0 %v8942_v32  ;;  %2076 = vmatprep.mubr.bf16.mxu0 %v11648_v54  ;;  %11686 = vst [vmem:[#allocation34_spill] sm:$0xff] %v9001_v9 }
 0x2ca   :  { %2046 = vmatprep.subr.bf16.mxu0 %v8945_v33  ;;  %6532 = vmatpush3.bf16.msra.mxu1 %v8948_v38 }
 0x2cb   :  { %6533 = vmatprep.subr.bf16.mxu1 %v11403_v25  ;;  %6547 = vmatprep.mubr.msk.bf16.mxu1 %vm8177_vm2, %v11403_v25 }
 0x2cd   :  { %2047 = vmatpush1.bf16.msra.mxu0 %v8953_v48 }
 0x2ce   :  { %2048 = vmatprep.subr.bf16.mxu0 %v8957_v43  ;;  %6534 = vmatpush3.bf16.msra.mxu1 %v8960_v47 }
 0x2cf   :  { %6535 = vmatprep.subr.bf16.mxu1 %v11403_v25 }
 0x2d1   :  { %2049 = vmatpush1.bf16.msra.mxu0 %v8966_v45  ;;  %v9013_v45 = vld [vmem:[#allocation9 + $0x1c] ss:$12 sps:$4 sm:$0xff]  }
 0x2d2   :  { %2050 = vmatprep.subr.bf16.mxu0 %v8969_v27  ;;  %6536 = vmatpush3.bf16.msra.mxu1 %v8972_v36  ;;  %v9004_v27 = vld [vmem:[#allocation9 + $0x50] ss:$12 sps:$4 sm:$0xff]   ;;  %v1911_v36 = vunpack.c.l.b16 %v1907_v61  ;;  %11689 = vst [vmem:[#allocation35_spill] sm:$0xff] %v9013_v45  ;;  %v9026_v61 = vld [vmem:[#allocation9 + $0x20] ss:$12 sps:$4 sm:$0xff]  }
 0x2d3   :  { %6537 = vmatprep.subr.bf16.mxu1 %v11403_v25  ;;  %11687 = vst [vmem:[#allocation37_spill] sm:$0xff] %v9004_v27  ;;  %11693 = vst [vmem:[#allocation39_spill] sm:$0xff] %v9026_v61 }
 0x2d4   :  { %v1912_v43 = vrot.slane %v1911_v36, 7  ;;  %v9035_v36 = vld [vmem:[#allocation9 + $0x8] ss:$12 sps:$4 sm:$0xff]  }
 0x2d5   :  { %2051 = vmatpush1.bf16.msra.mxu0 %v8976_v34  ;;  %v9008_v34 = vld [vmem:[#allocation9 + $0x30] ss:$12 sps:$4 sm:$0xff]   ;;  %11695 = vst [vmem:[#allocation42_spill] sm:$0xff] %v9035_v36 }
 0x2d6   :  { %2052 = vmatprep.subr.bf16.mxu0 %v8979_v13  ;;  %6538 = vmatpush3.bf16.msra.mxu1 %v8987_v18  ;;  %11688 = vst [vmem:[#allocation33_spill] sm:$0xff] %v9008_v34  ;;  %v1906_v13 = vpack.c.bf16 %v9001_v9, %v9001_v9  ;;  %v9020_v18 = vld [vmem:[#allocation9 + $0x18] ss:$12 sps:$4 sm:$0xff]  }
 0x2d7   :  { %6539 = vmatprep.subr.bf16.mxu1 %v11403_v25  ;;  %11691 = vst [vmem:[#allocation36_spill] sm:$0xff] %v9020_v18  ;;  %v9023_v9 = vld [vmem:[#allocation9 + $0x4] ss:$12 sps:$4 sm:$0xff]  }
 0x2d8   :  { %11692 = vst [vmem:[#allocation41_spill] sm:$0xff] %v9023_v9 }
 0x2d9   :  { %2053 = vmatpush1.bf16.msra.mxu0 %v8991_v31  ;;  %v1910_v31 = vunpack.c.l.b16 %v1906_v13 }
 0x2da   :  { %2054 = vmatprep.subr.bf16.mxu0 %v8996_v62  ;;  %6540 = vmatpush3.bf16.msra.mxu1 %v9004_v27  ;;  %v9030_v62 = vld [vmem:[#allocation9] ss:$12 sps:$4 sm:$0xff]  }
 0x2db   :  { %6541 = vmatprep.subr.bf16.mxu1 %v11403_v25  ;;  %11694 = vst [vmem:[#allocation40_spill] sm:$0xff] %v9030_v62 }
 0x2dd   :  { %2055 = vmatpush1.bf16.msra.mxu0 %v9008_v34  ;;  %v1913_v34 = vsel %vm438_vm3, %v1912_v43, %v1910_v31  ;;  %v9043_v43 = vld [vmem:[#allocation2 + $0xb0] ss:$12 sps:$4 sm:$0xff]   ;;  %v9073_v31 = vld [vmem:[#allocation2 + $0x4c] ss:$12 sps:$4 sm:$0xff]  }
 0x2de   :  { %2056 = vmatprep.subr.bf16.mxu0 %v9013_v45  ;;  %6542 = vmatpush3.bf16.msra.mxu1 %v9016_v46  ;;  %v1914_v13 = vpack.c.b16 %v1913_v34, %v1913_v34  ;;  %v11696_v45 = vld [vmem:[#allocation44_spill] sm:$0xff]  ;;  %11697 = vst [vmem:[#allocation43_spill] sm:$0xff] %v9043_v43  ;;  %v9063_v34 = vld [vmem:[#allocation2 + $0x64] ss:$12 sps:$4 sm:$0xff]   ;;  %11704 = vst [vmem:[#allocation52_spill] sm:$0xff] %v9073_v31 }
 0x2df   :  { %6543 = vmatprep.subr.bf16.mxu1 %v11403_v25  ;;  %11701 = vst [vmem:[#allocation49_spill] sm:$0xff] %v9063_v34 }
 0x2e1   :  { %2057 = vmatpush1.bf16.msra.mxu0 %v9020_v18 }
 0x2e2   :  { %2058 = vmatprep.subr.bf16.mxu0 %v9023_v9  ;;  %6544 = vmatpush3.bf16.msra.mxu1 %v9026_v61 }
 0x2e3   :  { %6545 = vmatprep.subr.bf16.mxu1 %v11403_v25 }
 0x2e5   :  { %2059 = vmatpush1.bf16.msra.mxu0 %v9030_v62 }
 0x2e6   :  { %6546 = vmatpush3.bf16.msra.mxu1 %v9035_v36  ;;  %2169 = vmatprep.subr.bf16.mxu0 %v11696_v45  ;;  %v9052_v45 = vld [vmem:[#allocation2 + $0x98] ss:$12 sps:$4 sm:$0xff]  }
 0x2e7   :  { %6551 = vmatprep.subr.bf16.mxu1 %v11403_v25  ;;  %11698 = vst [vmem:[#allocation44_spill] sm:$0xff] %v9052_v45 }
 0x2e8   :  { %2077 = vmatmul.mubr.bf16.vlgmr.msra.gmra.mxu0 %v1914_v13 }
 0x2e9   :  { %6548 = vmatmul.mubr.bf16.vlgmr.msra.gmra.mxu1 %v1914_v13  ;;  %2170 = vmatpush1.bf16.msra.mxu0 %v8688_v30  ;;  %v9057_v30 = vld [vmem:[#allocation2 + $0x78] ss:$12 sps:$4 sm:$0xff]   ;;  %v9077_v13 = vld [vmem:[#allocation2 + $0x48] ss:$12 sps:$4 sm:$0xff]  }
 0x2ea   :  { %6552 = vmatpush3.bf16.msra.mxu1 %v9043_v43  ;;  %2171 = vmatprep.subr.bf16.mxu0 %v8692_v28  ;;  %11699 = vst [vmem:[#allocation47_spill] sm:$0xff] %v9057_v30  ;;  %v9060_v28 = vld [vmem:[#allocation2 + $0x80] ss:$12 sps:$4 sm:$0xff]   ;;  %11705 = vst [vmem:[#allocation53_spill] sm:$0xff] %v9077_v13 }
 0x2eb   :  { %6553 = vmatprep.subr.bf16.mxu1 %v11403_v25  ;;  %2201 = vmatprep.mubr.bf16.mxu0 %v11648_v54  ;;  %11700 = vst [vmem:[#allocation48_spill] sm:$0xff] %v9060_v28 }
 0x2ec   :  { %6567 = vmatprep.mubr.msk.bf16.mxu1 %vm8177_vm2, %v11403_v25 }
 0x2ed   :  { %2172 = vmatpush1.bf16.msra.mxu0 %v8699_v60  ;;  %v9067_v60 = vld [vmem:[#allocation2 + $0x60] ss:$12 sps:$4 sm:$0xff]  }
 0x2ee   :  { %6554 = vmatpush3.bf16.msra.mxu1 %v9052_v45  ;;  %2173 = vmatprep.subr.bf16.mxu0 %v8703_v44  ;;  %11702 = vst [vmem:[#allocation50_spill] sm:$0xff] %v9067_v60  ;;  %v9070_v44 = vld [vmem:[#allocation2 + $0x68] ss:$12 sps:$4 sm:$0xff]  }
 0x2ef   :  { %6555 = vmatprep.subr.bf16.mxu1 %v11403_v25  ;;  %11703 = vst [vmem:[#allocation51_spill] sm:$0xff] %v9070_v44 }
 0x2f1   :  { %2174 = vmatpush1.bf16.msra.mxu0 %v9057_v30 }
 0x2f2   :  { %6556 = vmatpush3.bf16.msra.mxu1 %v9060_v28  ;;  %2175 = vmatprep.subr.bf16.mxu0 %v9063_v34  ;;  %v9080_v34 = vld [vmem:[#allocation2 + $0x50] ss:$12 sps:$4 sm:$0xff]   ;;  %v9083_v28 = vld [vmem:[#allocation2 + $0x34] ss:$12 sps:$4 sm:$0xff]  }
 0x2f3   :  { %6557 = vmatprep.subr.bf16.mxu1 %v11403_v25  ;;  %11706 = vst [vmem:[#allocation54_spill] sm:$0xff] %v9080_v34  ;;  %11707 = vst [vmem:[#allocation55_spill] sm:$0xff] %v9083_v28 }
 0x2f5   :  { %2176 = vmatpush1.bf16.msra.mxu0 %v9067_v60  ;;  %v9093_v60 = vld [vmem:[#allocation2 + $0x1c] ss:$12 sps:$4 sm:$0xff]  }
 0x2f6   :  { %6558 = vmatpush3.bf16.msra.mxu1 %v9070_v44  ;;  %2177 = vmatprep.subr.bf16.mxu0 %v9073_v31  ;;  %v9087_v44 = vld [vmem:[#allocation2 + $0x30] ss:$12 sps:$4 sm:$0xff]   ;;  %v9090_v31 = vld [vmem:[#allocation2 + $0x38] ss:$12 sps:$4 sm:$0xff]   ;;  %11710 = vst [vmem:[#allocation58_spill] sm:$0xff] %v9093_v60 }
 0x2f7   :  { %6559 = vmatprep.subr.bf16.mxu1 %v11403_v25  ;;  %11708 = vst [vmem:[#allocation56_spill] sm:$0xff] %v9087_v44  ;;  %11709 = vst [vmem:[#allocation57_spill] sm:$0xff] %v9090_v31 }
 0x2f9   :  { %2178 = vmatpush1.bf16.msra.mxu0 %v9077_v13  ;;  %v9103_v13 = vld [vmem:[#allocation2 + $0x4] ss:$12 sps:$4 sm:$0xff]  }
 0x2fa   :  { %6560 = vmatpush3.bf16.msra.mxu1 %v9080_v34  ;;  %2179 = vmatprep.subr.bf16.mxu0 %v9083_v28  ;;  %v9097_v34 = vld [vmem:[#allocation2 + $0x18] ss:$12 sps:$4 sm:$0xff]   ;;  %v9100_v28 = vld [vmem:[#allocation2 + $0x20] ss:$12 sps:$4 sm:$0xff]   ;;  %11713 = vst [vmem:[#allocation61_spill] sm:$0xff] %v9103_v13 }
 0x2fb   :  { %6561 = vmatprep.subr.bf16.mxu1 %v11403_v25  ;;  %11711 = vst [vmem:[#allocation59_spill] sm:$0xff] %v9097_v34  ;;  %11712 = vst [vmem:[#allocation60_spill] sm:$0xff] %v9100_v28 }
 0x2fd   :  { %2180 = vmatpush1.bf16.msra.mxu0 %v9087_v44  ;;  %v9113_v44 = vld [vmem:[#allocation4 + $0xac] ss:$12 sps:$4 sm:$0xff]  }
 0x2fe   :  { %6562 = vmatpush3.bf16.msra.mxu1 %v9090_v31  ;;  %2181 = vmatprep.subr.bf16.mxu0 %v9093_v60  ;;  %v9107_v31 = vld [vmem:[#allocation2] ss:$12 sps:$4 sm:$0xff]   ;;  %v9110_v60 = vld [vmem:[#allocation2 + $0x8] ss:$12 sps:$4 sm:$0xff]   ;;  %11716 = vst [vmem:[#allocation64_spill] sm:$0xff] %v9113_v44 }
 0x2ff   :  { %6563 = vmatprep.subr.bf16.mxu1 %v11403_v25  ;;  %11714 = vst [vmem:[#allocation62_spill] sm:$0xff] %v9107_v31  ;;  %11715 = vst [vmem:[#allocation63_spill] sm:$0xff] %v9110_v60 }
 0x301   :  { %2182 = vmatpush1.bf16.msra.mxu0 %v9097_v34 }
 0x302   :  { %6564 = vmatpush3.bf16.msra.mxu1 %v9100_v28  ;;  %2183 = vmatprep.subr.bf16.mxu0 %v9103_v13 }
 0x303   :  { %6565 = vmatprep.subr.bf16.mxu1 %v11403_v25 }
 0x305   :  { %2184 = vmatpush1.bf16.msra.mxu0 %v9107_v31 }
 0x306   :  { %6566 = vmatpush3.bf16.msra.mxu1 %v9110_v60  ;;  %2314 = vmatprep.subr.bf16.mxu0 %v9113_v44 }
 0x307   :  { %6571 = vmatprep.subr.bf16.mxu1 %v11403_v25 }
 0x328   :  { %v1385_v28 = vpop.f32.mrf.mxu0  ;;  %v1426_v34 = vpop.f32.mrf.mxu1 }
 0x329   :  { %v1434_v30 = vrot.slane %v1385_v28, 6  ;;  %v1436_v13 = vrot.slane %v1385_v28, 7 }
 0x32a   :  { %v1387_v45 = vpop.f32.mrf.mxu0  ;;  %v6469_v43 = vpop.f32.mrf.mxu1 }
 0x32b   :  { %v1442_v36 = vadd.f32 %v1434_v30, %v8467_v0  ;;  %v1444_v31 = vadd.f32 %v1436_v13, %v8470_v5  ;;  %v1435_v18 = vrot.slane %v1387_v45, 6  ;;  %v1437_v46 = vrot.slane %v1387_v45, 7 }
 0x32c   :  { %v1389_v62 = vpop.f32.mrf.mxu0  ;;  %v1429_v9 = vpop.f32.mrf.mxu1  ;;  %v1488_v5 = vrot.slane %v8749_v51, 7 }
 0x32d   :  { %v5878_v61 = vmul.f32 -1.442695, %v1442_v36  ;;  %v5880_v60 = vmul.f32 -1.442695, %v1444_v31  ;;  %v1443_v25 = vadd.f32 %v1435_v18, %v8474_v12  ;;  %v1445_v28 = vadd.f32 %v1437_v46, %v8476_v17 }
 0x32e   :  { %v1390_v27 = vpop.f32.mrf.mxu0  ;;  %v6470_v44 = vpop.f32.mrf.mxu1 }
 0x32f   :  { %7422 = vpow2.f32 %v5878_v61  ;;  %v5879_v47 = vmul.f32 -1.442695, %v1443_v25  ;;  %v5881_v43 = vmul.f32 -1.442695, %v1445_v28  ;;  %v9124_v27 = vld [vmem:[%s11320_s5] ss:$0 sm:$0xff] }
 0x330   :  { %7424 = vpow2.f32 %v5880_v60  ;;  %11717 = vst [vmem:[#allocation65_spill] sm:$0xff] %v9124_v27  ;;  %v1470_v18 = vadd.f32 %v9124_v27, %v1426_v34 }
 0x331   :  { %7426 = vpow2.f32 %v5879_v47 }
 0x332   :  { %7428 = vpow2.f32 %v5881_v43  ;;  %v1472_v31 = vrot.slane %v1470_v18, 6  ;;  %v1473_v43 = vrot.slane %v1470_v18, 7 }
 0x33c   :  { %v7423_v30 = vpop.eup %7422 }
 0x33d   :  { %v7425_v13 = vpop.eup %7424  ;;  %v1458_v62 = vadd.f32 1.0, %v7423_v30 }
 0x33e   :  { %v1460_v9 = vadd.f32 1.0, %v7425_v13  ;;  %v7427_v36 = vpop.eup %7426 }
 0x33f   :  { %7430 = vrcp.f32 %v1458_v62  ;;  %v7429_v45 = vpop.eup %7428  ;;  %v1459_v47 = vadd.f32 1.0, %v7427_v36 }
 0x340   :  { %7432 = vrcp.f32 %v1460_v9  ;;  %v1461_v61 = vadd.f32 1.0, %v7429_v45 }
 0x341   :  { %7434 = vrcp.f32 %v1459_v47 }
 0x342   :  { %7436 = vrcp.f32 %v1461_v61 }
 0x348   :  { %v1530_v46 = vpop.f32.mrf.mxu0  ;;  %v9127_v25 = vpop.f32.mrf.mxu1 }
 0x34a   :  { %v9129_v60 = vpop.f32.mrf.mxu0  ;;  %v6489_v44 = vpop.f32.mrf.mxu1 }
 0x34c   :  { %v7431_v28 = vpop.eup %7430  ;;  %v1534_v30 = vpop.f32.mrf.mxu0 }
 0x34d   :  { %v1574_v13 = vpop.f32.mrf.mxu1  ;;  %v7433_v62 = vpop.eup %7432  ;;  %v1476_v9 = vmul.f32 %v7431_v28, %v1472_v31 }
 0x34e   :  { %v1477_v17 = vmul.f32 %v7433_v62, %v1473_v43  ;;  %v1535_v12 = vpop.f32.mrf.mxu0  ;;  %v7435_v45 = vpop.eup %7434  ;;  %v1489_v13 = vrot.slane %v8742_v49, 7  ;;  %v1531_v49 = vadd.f32 %v1530_v46, %v8753_v35  ;;  %v9151_v46 = vld [vmem:[#allocation4 + $0xa8] ss:$12 sps:$4 sm:$0xff]  }
 0x34f   :  { %v6490_v34 = vpop.f32.mrf.mxu1  ;;  %v1478_v27 = vadd.f32 %v1476_v9, %v8490_v7  ;;  %v7437_v44 = vpop.eup %7436  ;;  %v1482_v18 = vsub.f32 1.0, %v7435_v45  ;;  %v1492_v61 = vmul.f32 %v7435_v45, %v1488_v5 }
 0x350   :  { %v1479_v36 = vadd.f32 %v1477_v17, %v8492_v10  ;;  %v1483_v31 = vsub.f32 1.0, %v7437_v44  ;;  %v1493_v43 = vmul.f32 %v7437_v44, %v1489_v13 }
 0x351   :  { %7438 = vtanh.f32 %v1478_v27 }
 0x352   :  { %7440 = vtanh.f32 %v1479_v36 }
 0x35e   :  { %v7439_v30 = vpop.eup %7438 }
 0x35f   :  { %v7441_v47 = vpop.eup %7440  ;;  %v1484_v28 = vmul.f32 %v7439_v30, %v1482_v18 }
 0x360   :  { %v1485_v12 = vmul.f32 %v7441_v47, %v1483_v31 }
 0x361   :  { %v9135_v62 = vadd.f32 %v1492_v61, %v1484_v28 }
 0x362   :  { %v9137_v9 = vadd.f32 %v1493_v43, %v1485_v12  ;;  %v9154_v12 = vld [vmem:[#allocation4 + $0xb0] ss:$12 sps:$4 sm:$0xff]  }
 0x363   :  { %v2158_v17 = vpack.c.bf16 %v9135_v62, %v9135_v62 }
 0x364   :  { %v2159_v51 = vpack.c.bf16 %v9137_v9, %v9137_v9 }
 0x365   :  { %v2162_v27 = vunpack.c.l.b16 %v2158_v17  ;;  %v9157_v17 = vld [vmem:[#allocation4 + $0x94] ss:$12 sps:$4 sm:$0xff]  }
 0x366   :  { %v2163_v34 = vunpack.c.l.b16 %v2159_v51  ;;  %v11718_v51 = vmov 0.0  }
 0x367   :  { %v2164_v36 = vrot.slane %v2162_v27, 2  ;;  %v1533_v27 = vadd.f32 %v9129_v60, %v8762_v42  ;;  %v9179_v60 = vld [vmem:[#allocation4 + $0x80] ss:$12 sps:$4 sm:$0xff]  }
 0x368   :  { %v1612_v10 = vpop.f32.mrf.mxu0  ;;  %v9144_v18 = vpop.f32.mrf.mxu1  ;;  %v2165_v5 = vrot.slane %v2163_v34, 1  ;;  %v9166_v34 = vld [vmem:[#allocation4 + $0x90] ss:$12 sps:$4 sm:$0xff]   ;;  %11720 = vst [vmem:[#allocation67_spill] sm:$0xff] %v9179_v60 }
 0x369   :  { %v1659_v45 = vadd.f32 %v1612_v10, %v1531_v49  ;;  %v9169_v49 = vld [vmem:[#allocation4 + $0x98] ss:$12 sps:$4 sm:$0xff]  }
 0x36a   :  { %v1614_v44 = vpop.f32.mrf.mxu0  ;;  %v6509_v30 = vpop.f32.mrf.mxu1  ;;  %v2166_v13 = vsel %vm438_vm3, %v2165_v5, %v2164_v36  ;;  %v9172_v36 = vld [vmem:[#allocation4 + $0x7c] ss:$12 sps:$4 sm:$0xff]  }
 0x36b   :  { %v5882_v31 = vmul.f32 -1.442695, %v1659_v45  ;;  %v9147_v47 = vpack.c.b16 %v2166_v13, %v2166_v13  ;;  %v1660_v5 = vadd.f32 %v1614_v44, %v1533_v27  ;;  %v9176_v45 = vld [vmem:[#allocation4 + $0x78] ss:$12 sps:$4 sm:$0xff]   ;;  %v9189_v44 = vld [vmem:[#allocation4 + $0x68] ss:$12 sps:$4 sm:$0xff]  }
 0x36c   :  { %v1616_v28 = vpop.f32.mrf.mxu0  ;;  %v1656_v61 = vpop.f32.mrf.mxu1  ;;  %11719 = vst [vmem:[#allocation66_spill] sm:$0xff] %v9176_v45  ;;  %v9182_v30 = vld [vmem:[#allocation4 + $0x64] ss:$12 sps:$4 sm:$0xff]   ;;  %11723 = vst [vmem:[#allocation70_spill] sm:$0xff] %v9189_v44 }
 0x36d   :  { %7442 = vpow2.f32 %v5882_v31  ;;  %2202 = vmatmul.mubr.bf16.vlgmr.msra.gmra.mxu0 %v9147_v47  ;;  %6568 = vmatmul.mubr.bf16.vlgmr.msra.gmra.mxu1 %v9147_v47  ;;  %11721 = vst [vmem:[#allocation68_spill] sm:$0xff] %v9182_v30  ;;  %v5883_v13 = vmul.f32 -1.442695, %v1660_v5  ;;  %v9186_v28 = vld [vmem:[#allocation4 + $0x60] ss:$12 sps:$4 sm:$0xff]  }
 0x36e   :  { %2315 = vmatpush1.bf16.msra.mxu0 %v9151_v46  ;;  %6572 = vmatpush3.bf16.msra.mxu1 %v9154_v12  ;;  %v1617_v10 = vpop.f32.mrf.mxu0  ;;  %v6510_v43 = vpop.f32.mrf.mxu1  ;;  %11722 = vst [vmem:[#allocation69_spill] sm:$0xff] %v9186_v28  ;;  %v9199_v27 = vld [vmem:[#allocation4 + $0x50] ss:$12 sps:$4 sm:$0xff]   ;;  %v9202_v5 = vld [vmem:[#allocation4 + $0x34] ss:$12 sps:$4 sm:$0xff]  }
 0x36f   :  { %2316 = vmatprep.subr.bf16.mxu0 %v9157_v17  ;;  %6573 = vmatprep.subr.bf16.mxu1 %v11718_v51  ;;  %v9192_v10 = vld [vmem:[#allocation4 + $0x4c] ss:$12 sps:$4 sm:$0xff]   ;;  %7444 = vpow2.f32 %v5883_v13  ;;  %v9196_v43 = vld [vmem:[#allocation4 + $0x48] ss:$12 sps:$4 sm:$0xff]   ;;  %11726 = vst [vmem:[#allocation73_spill] sm:$0xff] %v9199_v27  ;;  %11727 = vst [vmem:[#allocation74_spill] sm:$0xff] %v9202_v5 }
 0x370   :  { %2346 = vmatprep.mubr.bf16.mxu0 %v11648_v54  ;;  %6587 = vmatprep.mubr.msk.bf16.mxu1 %vm8177_vm2, %v11718_v51  ;;  %11724 = vst [vmem:[#allocation71_spill] sm:$0xff] %v9192_v10  ;;  %11725 = vst [vmem:[#allocation72_spill] sm:$0xff] %v9196_v43  ;;  %v9209_v13 = vld [vmem:[#allocation4 + $0x38] ss:$12 sps:$4 sm:$0xff]  }
 0x371   :  { %11729 = vst [vmem:[#allocation76_spill] sm:$0xff] %v9209_v13 }
 0x372   :  { %2317 = vmatpush1.bf16.msra.mxu0 %v9166_v34  ;;  %6574 = vmatpush3.bf16.msra.mxu1 %v9169_v49 }
 0x373   :  { %2318 = vmatprep.subr.bf16.mxu0 %v9172_v36  ;;  %6575 = vmatprep.subr.bf16.mxu1 %v11718_v51 }
 0x376   :  { %2319 = vmatpush1.bf16.msra.mxu0 %v9176_v45  ;;  %6576 = vmatpush3.bf16.msra.mxu1 %v9179_v60  ;;  %v9240_v60 = vld [vmem:[#allocation6 + $0xac] ss:$12 sps:$4 sm:$0xff]   ;;  %v1572_v45 = vadd.f32 %v9127_v25, %v8804_v8  ;;  %v9261_v25 = vld [vmem:[#allocation6 + $0x90] ss:$12 sps:$4 sm:$0xff]  }
 0x377   :  { %2320 = vmatprep.subr.bf16.mxu0 %v9182_v30  ;;  %6577 = vmatprep.subr.bf16.mxu1 %v11718_v51  ;;  %11738 = vst [vmem:[#allocation85_spill] sm:$0xff] %v9261_v25 }
 0x37a   :  { %v7443_v31 = vpop.eup %7442  ;;  %2321 = vmatpush1.bf16.msra.mxu0 %v9186_v28  ;;  %6578 = vmatpush3.bf16.msra.mxu1 %v9189_v44 }
 0x37b   :  { %v1667_v61 = vadd.f32 1.0, %v7443_v31  ;;  %2322 = vmatprep.subr.bf16.mxu0 %v9192_v10  ;;  %6579 = vmatprep.subr.bf16.mxu1 %v11718_v51  ;;  %v9206_v31 = vld [vmem:[#allocation4 + $0x30] ss:$12 sps:$4 sm:$0xff]   ;;  %v1673_v10 = vadd.f32 %v8796_v1, %v9144_v18 }
 0x37c   :  { %11728 = vst [vmem:[#allocation75_spill] sm:$0xff] %v9206_v31 }
 0x37d   :  { %7446 = vrcp.f32 %v1667_v61  ;;  %v9212_v61 = vld [vmem:[#allocation4 + $0x1c] ss:$12 sps:$4 sm:$0xff]  }
 0x37e   :  { %2323 = vmatpush1.bf16.msra.mxu0 %v9196_v43  ;;  %6580 = vmatpush3.bf16.msra.mxu1 %v9199_v27  ;;  %11730 = vst [vmem:[#allocation77_spill] sm:$0xff] %v9212_v61  ;;  %v9216_v27 = vld [vmem:[#allocation4 + $0x18] ss:$12 sps:$4 sm:$0xff]  }
 0x37f   :  { %2324 = vmatprep.subr.bf16.mxu0 %v9202_v5  ;;  %6581 = vmatprep.subr.bf16.mxu1 %v11718_v51  ;;  %11731 = vst [vmem:[#allocation78_spill] sm:$0xff] %v9216_v27  ;;  %v9219_v5 = vld [vmem:[#allocation4 + $0x20] ss:$12 sps:$4 sm:$0xff]   ;;  %v9222_v43 = vld [vmem:[#allocation4 + $0x4] ss:$12 sps:$4 sm:$0xff]  }
 0x380   :  { %11732 = vst [vmem:[#allocation79_spill] sm:$0xff] %v9219_v5  ;;  %11733 = vst [vmem:[#allocation80_spill] sm:$0xff] %v9222_v43 }
 0x382   :  { %2325 = vmatpush1.bf16.msra.mxu0 %v9206_v31  ;;  %6582 = vmatpush3.bf16.msra.mxu1 %v9209_v13 }
 0x383   :  { %2326 = vmatprep.subr.bf16.mxu0 %v9212_v61  ;;  %6583 = vmatprep.subr.bf16.mxu1 %v11718_v51  ;;  %v7445_v61 = vpop.eup %7444 }
 0x386   :  { %2327 = vmatpush1.bf16.msra.mxu0 %v9216_v27  ;;  %6584 = vmatpush3.bf16.msra.mxu1 %v9219_v5  ;;  %v9232_v27 = vld [vmem:[#allocation4] ss:$12 sps:$4 sm:$0xff]   ;;  %v9235_v5 = vld [vmem:[#allocation4 + $0x8] ss:$12 sps:$4 sm:$0xff]  }
 0x387   :  { %2328 = vmatprep.subr.bf16.mxu0 %v9222_v43  ;;  %6585 = vmatprep.subr.bf16.mxu1 %v11718_v51  ;;  %11734 = vst [vmem:[#allocation81_spill] sm:$0xff] %v9232_v27  ;;  %11735 = vst [vmem:[#allocation82_spill] sm:$0xff] %v9235_v5 }
 0x388   :  { %v9226_v13 = vpop.f32.mrf.mxu0  ;;  %v9228_v31 = vpop.f32.mrf.mxu1 }
 0x38a   :  { %v7447_v44 = vpop.eup %7446  ;;  %2329 = vmatpush1.bf16.msra.mxu0 %v9232_v27  ;;  %6586 = vmatpush3.bf16.msra.mxu1 %v9235_v5  ;;  %v9238_v43 = vpop.f32.mrf.mxu0  ;;  %v1668_v27 = vadd.f32 1.0, %v7445_v61  ;;  %v9248_v5 = vld [vmem:[#allocation6 + $0xa8] ss:$12 sps:$4 sm:$0xff]   ;;  %v9277_v61 = vld [vmem:[#allocation6 + $0x64] ss:$12 sps:$4 sm:$0xff]  }
 0x38b   :  { %v6529_v28 = vpop.f32.mrf.mxu1  ;;  %v1674_v30 = vmul.f32 %v7447_v44, %v1673_v10  ;;  %2396 = vmatprep.subr.bf16.mxu0 %v9240_v60  ;;  %6591 = vmatprep.subr.bf16.mxu1 %v11718_v51  ;;  %11743 = vst [vmem:[#allocation90_spill] sm:$0xff] %v9277_v61 }
 0x38c   :  { %v1863_v1 = vpop.f32.mrf.mxu0  ;;  %v9251_v28 = vld [vmem:[#allocation6 + $0xb0] ss:$12 sps:$4 sm:$0xff]   ;;  %7448 = vrcp.f32 %v1668_v27  ;;  %v9274_v27 = vld [vmem:[#allocation6 + $0x80] ss:$12 sps:$4 sm:$0xff]  }
 0x38d   :  { %v1903_v18 = vpop.f32.mrf.mxu1  ;;  %2347 = vmatmul.mubr.bf16.vlgmr.msra.gmra.mxu0 %v9147_v47  ;;  %6588 = vmatmul.mubr.bf16.vlgmr.msra.gmra.mxu1 %v9147_v47  ;;  %11736 = vst [vmem:[#allocation83_spill] sm:$0xff] %v9251_v28  ;;  %v1675_v1 = vadd.f32 %v1674_v30, %v1572_v45  ;;  %v9264_v47 = vld [vmem:[#allocation6 + $0x98] ss:$12 sps:$4 sm:$0xff]   ;;  %v9267_v45 = vld [vmem:[#allocation6 + $0x7c] ss:$12 sps:$4 sm:$0xff]   ;;  %11742 = vst [vmem:[#allocation89_spill] sm:$0xff] %v9274_v27 }
 0x38e   :  { %2397 = vmatpush1.bf16.msra.mxu0 %v9248_v5  ;;  %6592 = vmatpush3.bf16.msra.mxu1 %v9251_v28  ;;  %v1864_v44 = vpop.f32.mrf.mxu0  ;;  %v9254_v18 = vld [vmem:[#allocation6 + $0x94] ss:$12 sps:$4 sm:$0xff]   ;;  %11739 = vst [vmem:[#allocation86_spill] sm:$0xff] %v9264_v47  ;;  %11740 = vst [vmem:[#allocation87_spill] sm:$0xff] %v9267_v45  ;;  %v9271_v30 = vld [vmem:[#allocation6 + $0x78] ss:$12 sps:$4 sm:$0xff]  }
 0x38f   :  { %v6530_v10 = vpop.f32.mrf.mxu1  ;;  %11737 = vst [vmem:[#allocation84_spill] sm:$0xff] %v9254_v18  ;;  %2398 = vmatprep.subr.bf16.mxu0 %v9254_v18  ;;  %6593 = vmatprep.subr.bf16.mxu1 %v11718_v51  ;;  %7450 = vtanh.f32 %v1675_v1  ;;  %11741 = vst [vmem:[#allocation88_spill] sm:$0xff] %v9271_v30  ;;  %v9281_v44 = vld [vmem:[#allocation6 + $0x60] ss:$12 sps:$4 sm:$0xff]   ;;  %v9321_v28 = vld [vmem:[#allocation6 + $0x18] ss:$12 sps:$4 sm:$0xff]  }
 0x390   :  { %2428 = vmatprep.mubr.bf16.mxu0 %v11648_v54  ;;  %6607 = vmatprep.mubr.msk.bf16.mxu1 %vm8177_vm2, %v11718_v51  ;;  %11744 = vst [vmem:[#allocation91_spill] sm:$0xff] %v9281_v44  ;;  %v9284_v10 = vld [vmem:[#allocation6 + $0x68] ss:$12 sps:$4 sm:$0xff]   ;;  %v9287_v1 = vld [vmem:[#allocation6 + $0x4c] ss:$12 sps:$4 sm:$0xff]   ;;  %11754 = vst [vmem:[#allocation101_spill] sm:$0xff] %v9321_v28 }
 0x391   :  { %11745 = vst [vmem:[#allocation92_spill] sm:$0xff] %v9284_v10  ;;  %11746 = vst [vmem:[#allocation93_spill] sm:$0xff] %v9287_v1 }
 0x392   :  { %2399 = vmatpush1.bf16.msra.mxu0 %v9261_v25  ;;  %6594 = vmatpush3.bf16.msra.mxu1 %v9264_v47  ;;  %v9306_v47 = vld [vmem:[#allocation6 + $0x30] ss:$12 sps:$4 sm:$0xff]  }
 0x393   :  { %2400 = vmatprep.subr.bf16.mxu0 %v9267_v45  ;;  %6595 = vmatprep.subr.bf16.mxu1 %v11718_v51  ;;  %11750 = vst [vmem:[#allocation97_spill] sm:$0xff] %v9306_v47 }
 0x396   :  { %2401 = vmatpush1.bf16.msra.mxu0 %v9271_v30  ;;  %6596 = vmatpush3.bf16.msra.mxu1 %v9274_v27  ;;  %v9291_v30 = vld [vmem:[#allocation6 + $0x48] ss:$12 sps:$4 sm:$0xff]  }
 0x397   :  { %2402 = vmatprep.subr.bf16.mxu0 %v9277_v61  ;;  %6597 = vmatprep.subr.bf16.mxu1 %v11718_v51  ;;  %11747 = vst [vmem:[#allocation94_spill] sm:$0xff] %v9291_v30  ;;  %v9294_v61 = vld [vmem:[#allocation6 + $0x50] ss:$12 sps:$4 sm:$0xff]  }
 0x398   :  { %11748 = vst [vmem:[#allocation95_spill] sm:$0xff] %v9294_v61 }
 0x399   :  { %v7449_v27 = vpop.eup %7448 }
 0x39a   :  { %2403 = vmatpush1.bf16.msra.mxu0 %v9281_v44  ;;  %6598 = vmatpush3.bf16.msra.mxu1 %v9284_v10  ;;  %v9297_v44 = vld [vmem:[#allocation6 + $0x34] ss:$12 sps:$4 sm:$0xff]   ;;  %v1677_v45 = vsub.f32 1.0, %v7449_v27  ;;  %v1679_v18 = vmul.f32 %v7449_v27, %v8839_v57 }
 0x39b   :  { %2404 = vmatprep.subr.bf16.mxu0 %v9287_v1  ;;  %6599 = vmatprep.subr.bf16.mxu1 %v11718_v51  ;;  %11749 = vst [vmem:[#allocation96_spill] sm:$0xff] %v9297_v44  ;;  %v9304_v1 = vld [vmem:[%s11327_s12] sm:$0x7] }
 0x39c   :  { %v7451_v10 = vpop.eup %7450  ;;  %v9337_v27 = vrot.slane %v9304_v1, %v8465_v63 }
 0x39d   :  { %v1678_v25 = vmul.f32 %v7451_v10, %v1677_v45 }
 0x39e   :  { %2405 = vmatpush1.bf16.msra.mxu0 %v9291_v30  ;;  %6600 = vmatpush3.bf16.msra.mxu1 %v9294_v61  ;;  %v9309_v30 = vld [vmem:[#allocation6 + $0x38] ss:$12 sps:$4 sm:$0xff]   ;;  %v9316_v61 = vld [vmem:[#allocation6 + $0x1c] ss:$12 sps:$4 sm:$0xff]  }
 0x39f   :  { %2406 = vmatprep.subr.bf16.mxu0 %v9297_v44  ;;  %6601 = vmatprep.subr.bf16.mxu1 %v11718_v51  ;;  %11751 = vst [vmem:[#allocation98_spill] sm:$0xff] %v9309_v30  ;;  %v9314_v44 = vrot.slane %v9304_v1, %v8458_v58  ;;  %11753 = vst [vmem:[#allocation100_spill] sm:$0xff] %v9316_v61  ;;  %v9333_v45 = vadd.f32 %v1679_v18, %v1678_v25 }
 0x3a0   :  { %v1862_v25 = vadd.f32 %v9238_v43, %v9337_v27 }
 0x3a1   :  { %11752 = vst [vmem:[#allocation99_spill] sm:$0xff] %v9314_v44  ;;  %v1860_v58 = vadd.f32 %v9226_v13, %v9314_v44  ;;  %v9342_v13 = vld [vmem:[#allocation6 + $0x8] ss:$12 sps:$4 sm:$0xff]   ;;  %v2395_v18 = vpack.c.bf16 %v9333_v45, %v9333_v45 }
 0x3a2   :  { %2407 = vmatpush1.bf16.msra.mxu0 %v9306_v47  ;;  %6602 = vmatpush3.bf16.msra.mxu1 %v9309_v30  ;;  %v9324_v47 = vld [vmem:[#allocation6 + $0x20] ss:$12 sps:$4 sm:$0xff]   ;;  %v9329_v30 = vld [vmem:[#allocation6 + $0x4] ss:$12 sps:$4 sm:$0xff]   ;;  %11756 = vst [vmem:[#allocation103_spill] sm:$0xff] %v9342_v13 }
 0x3a3   :  { %2408 = vmatprep.subr.bf16.mxu0 %v9316_v61  ;;  %6603 = vmatprep.subr.bf16.mxu1 %v11718_v51  ;;  %11755 = vst [vmem:[#allocation102_spill] sm:$0xff] %v9329_v30  ;;  %v9339_v61 = vld [vmem:[#allocation6] ss:$12 sps:$4 sm:$0xff]  }
 0x3a6   :  { %2409 = vmatpush1.bf16.msra.mxu0 %v9321_v28  ;;  %6604 = vmatpush3.bf16.msra.mxu1 %v9324_v47 }
 0x3a7   :  { %2410 = vmatprep.subr.bf16.mxu0 %v9329_v30  ;;  %6605 = vmatprep.subr.bf16.mxu1 %v11718_v51 }
 0x3a8   :  { %v2078_v57 = vpop.f32.mrf.mxu0 }
 0x3a9   :  { %v2125_v10 = vadd.f32 %v2078_v57, %v1860_v58  ;;  %v2119_v28 = vpop.f32.mrf.mxu1 }
 0x3aa   :  { %2411 = vmatpush1.bf16.msra.mxu0 %v9339_v61  ;;  %6606 = vmatpush3.bf16.msra.mxu1 %v9342_v13  ;;  %v2080_v30 = vpop.f32.mrf.mxu0 }
 0x3ab   :  { %v5932_v44 = vmul.f32 -1.442695, %v2125_v10  ;;  %2499 = vmatprep.subr.bf16.mxu0 %v8849_v52  ;;  %6611 = vmatprep.subr.bf16.mxu1 %v11718_v51  ;;  %v6549_v63 = vpop.f32.mrf.mxu1  ;;  %v2126_v13 = vadd.f32 %v2080_v30, %v1862_v25  ;;  %v11778_v25 = vld [vmem:[#allocation40_spill] sm:$0xff] }
 0x3ac   :  { %v2082_v58 = vpop.f32.mrf.mxu0  ;;  %v11776_v63 = vld [vmem:[#allocation39_spill] sm:$0xff] }
 0x3ad   :  { %7452 = vpow2.f32 %v5932_v44  ;;  %2429 = vmatmul.mubr.bf16.vlgmr.msra.gmra.mxu0 %v2395_v18  ;;  %6608 = vmatmul.mubr.bf16.vlgmr.msra.gmra.mxu1 %v2395_v18  ;;  %v2122_v57 = vpop.f32.mrf.mxu1  ;;  %v5933_v43 = vmul.f32 -1.442695, %v2126_v13  ;;  %v11772_v44 = vld [vmem:[#allocation33_spill] sm:$0xff]  ;;  %v11774_v13 = vld [vmem:[#allocation35_spill] sm:$0xff] }
 0x3ae   :  { %2500 = vmatpush1.bf16.msra.mxu0 %v8853_v2  ;;  %6612 = vmatpush3.bf16.msra.mxu1 %v8855_v53  ;;  %v2083_v10 = vpop.f32.mrf.mxu0  ;;  %v11777_v58 = vld [vmem:[#allocation41_spill] sm:$0xff]  ;;  %v11779_v57 = vld [vmem:[#allocation42_spill] sm:$0xff] }
 0x3af   :  { %2501 = vmatprep.subr.bf16.mxu0 %v8863_v40  ;;  %6613 = vmatprep.subr.bf16.mxu1 %v11718_v51  ;;  %v6550_v52 = vpop.f32.mrf.mxu1  ;;  %7454 = vpow2.f32 %v5933_v43  ;;  %v9442_v43 = vld [vmem:[#allocation2 + $0xa8] ss:$12 sps:$4 sm:$0xff]  }
 0x3b0   :  { %2531 = vmatprep.mubr.bf16.mxu0 %v11648_v54  ;;  %6627 = vmatprep.mubr.msk.bf16.mxu1 %vm8177_vm2, %v11718_v51  ;;  %v9438_v52 = vld [vmem:[#allocation2 + $0xac] ss:$12 sps:$4 sm:$0xff]  }
 0x3b2   :  { %2502 = vmatpush1.bf16.msra.mxu0 %v8869_v41  ;;  %6614 = vmatpush3.bf16.msra.mxu1 %v8871_v55  ;;  %v9381_v41 = vld [vmem:[%s11328_s13] ss:$0 sm:$0xff]  ;;  %v9387_v55 = vrot.slane %v9304_v1, %v11652_v6  ;;  %v11773_v1 = vld [vmem:[#allocation38_spill] sm:$0xff] }
 0x3b3   :  { %2503 = vmatprep.subr.bf16.mxu0 %v8875_v3  ;;  %6615 = vmatprep.subr.bf16.mxu1 %v11718_v51 }
 0x3b4   :  { %11757 = vst [vmem:[#allocation104_spill] sm:$0xff] %v9387_v55 }
 0x3b6   :  { %2504 = vmatpush1.bf16.msra.mxu0 %v8882_v4  ;;  %6616 = vmatpush3.bf16.msra.mxu1 %v8884_v11  ;;  %v2145_v4 = vadd.f32 %v9381_v41, %v2119_v28  ;;  %v11770_v28 = vld [vmem:[#allocation32_spill] sm:$0xff] }
 0x3b7   :  { %2505 = vmatprep.subr.bf16.mxu0 %v8888_v14  ;;  %6617 = vmatprep.subr.bf16.mxu1 %v11718_v51  ;;  %v1901_v14 = vadd.f32 %v9228_v31, %v9387_v55  ;;  %v11769_v31 = vld [vmem:[#allocation37_spill] sm:$0xff] }
 0x3ba   :  { %v7453_v2 = vpop.eup %7452  ;;  %2506 = vmatpush1.bf16.msra.mxu0 %v8892_v15  ;;  %6618 = vmatpush3.bf16.msra.mxu1 %v8894_v59  ;;  %v11758_v59 = vld [vmem:[#allocation23_spill] sm:$0xff] }
 0x3bb   :  { %v2133_v53 = vadd.f32 1.0, %v7453_v2  ;;  %2507 = vmatprep.subr.bf16.mxu0 %v8898_v16  ;;  %6619 = vmatprep.subr.bf16.mxu1 %v11718_v51  ;;  %v11759_v16 = vld [vmem:[#allocation19_spill] sm:$0xff] }
 0x3bc   :  { %v7455_v40 = vpop.eup %7454  ;;  %v11780_v2 = vld [vmem:[#allocation43_spill] sm:$0xff] }
 0x3bd   :  { %7456 = vrcp.f32 %v2133_v53  ;;  %v2134_v3 = vadd.f32 1.0, %v7455_v40  ;;  %v9446_v53 = vld [vmem:[#allocation2 + $0x94] ss:$12 sps:$4 sm:$0xff]   ;;  %v9453_v40 = vld [vmem:[#allocation2 + $0x90] ss:$12 sps:$4 sm:$0xff]  }
 0x3be   :  { %2508 = vmatpush1.bf16.msra.mxu0 %v8902_v19  ;;  %6620 = vmatpush3.bf16.msra.mxu1 %v8904_v20  ;;  %v11760_v19 = vld [vmem:[#allocation29_spill] sm:$0xff] }
 0x3bf   :  { %2509 = vmatprep.subr.bf16.mxu0 %v8908_v21  ;;  %6621 = vmatprep.subr.bf16.mxu1 %v11718_v51  ;;  %7458 = vrcp.f32 %v2134_v3  ;;  %v2153_v20 = vrot.slane %v11760_v19, 7  ;;  %v11761_v21 = vld [vmem:[#allocation24_spill] sm:$0xff]  ;;  %v11788_v19 = vld [vmem:[#allocation53_spill] sm:$0xff] }
 0x3c0   :  { %v11781_v3 = vld [vmem:[#allocation44_spill] sm:$0xff] }
 0x3c2   :  { %2510 = vmatpush1.bf16.msra.mxu0 %v8912_v56  ;;  %6622 = vmatpush3.bf16.msra.mxu1 %v8914_v22  ;;  %v11762_v56 = vld [vmem:[#allocation26_spill] sm:$0xff]  ;;  %v11763_v22 = vld [vmem:[#allocation25_spill] sm:$0xff] }
 0x3c3   :  { %2511 = vmatprep.subr.bf16.mxu0 %v8918_v26  ;;  %6623 = vmatprep.subr.bf16.mxu1 %v11718_v51 }
 0x3c6   :  { %2512 = vmatpush1.bf16.msra.mxu0 %v8922_v37  ;;  %6624 = vmatpush3.bf16.msra.mxu1 %v8924_v39  ;;  %v11764_v37 = vld [vmem:[#allocation28_spill] sm:$0xff]  ;;  %v11765_v39 = vld [vmem:[#allocation31_spill] sm:$0xff] }
 0x3c7   :  { %2513 = vmatprep.subr.bf16.mxu0 %v8928_v50  ;;  %6625 = vmatprep.subr.bf16.mxu1 %v11718_v51  ;;  %v11766_v50 = vld [vmem:[#allocation34_spill] sm:$0xff] }
 0x3ca   :  { %v7457_v11 = vpop.eup %7456  ;;  %2514 = vmatpush1.bf16.msra.mxu0 %v8932_v23  ;;  %6626 = vmatpush3.bf16.msra.mxu1 %v8934_v24  ;;  %v2154_v23 = vsel %vm438_vm3, %v2153_v20, %v11766_v50  ;;  %v11767_v24 = vld [vmem:[#allocation27_spill] sm:$0xff]  ;;  %v11789_v20 = vld [vmem:[#allocation54_spill] sm:$0xff]  ;;  %v11796_v50 = vld [vmem:[#allocation61_spill] sm:$0xff] }
 0x3cb   :  { %v2146_v15 = vmul.f32 %v7457_v11, %v2145_v4  ;;  %2581 = vmatprep.subr.bf16.mxu0 %v8938_v29  ;;  %6631 = vmatprep.subr.bf16.mxu1 %v11718_v51  ;;  %v9457_v4 = vld [vmem:[#allocation2 + $0x7c] ss:$12 sps:$4 sm:$0xff]   ;;  %v11782_v11 = vld [vmem:[#allocation47_spill] sm:$0xff] }
 0x3cc   :  { %v7459_v26 = vpop.eup %7458 }
 0x3cd   :  { %v2147_v6 = vadd.f32 %v2146_v15, %v1901_v14  ;;  %2532 = vmatmul.mubr.bf16.vlgmr.msra.gmra.mxu0 %v2395_v18  ;;  %6628 = vmatmul.mubr.bf16.vlgmr.msra.gmra.mxu1 %v2395_v18  ;;  %v2149_v29 = vsub.f32 1.0, %v7459_v26  ;;  %v11775_v18 = vld [vmem:[#allocation36_spill] sm:$0xff]  ;;  %v11784_v15 = vld [vmem:[#allocation49_spill] sm:$0xff] }
 0x3ce   :  { %2582 = vmatpush1.bf16.msra.mxu0 %v8942_v32  ;;  %6632 = vmatpush3.bf16.msra.mxu1 %v8948_v38  ;;  %v2156_v38 = vmul.f32 %v7459_v26, %v2154_v23  ;;  %v11783_v14 = vld [vmem:[#allocation48_spill] sm:$0xff]  ;;  %v11793_v26 = vld [vmem:[#allocation58_spill] sm:$0xff] }
 0x3cf   :  { %7460 = vtanh.f32 %v2147_v6  ;;  %2583 = vmatprep.subr.bf16.mxu0 %v8945_v33  ;;  %6633 = vmatprep.subr.bf16.mxu1 %v11718_v51  ;;  %v11785_v6 = vld [vmem:[#allocation50_spill] sm:$0xff] }
 0x3d0   :  { %2613 = vmatprep.mubr.bf16.mxu0 %v11648_v54  ;;  %6647 = vmatprep.mubr.msk.bf16.mxu1 %vm8177_vm2, %v11718_v51  ;;  %v11797_v23 = vld [vmem:[#allocation62_spill] sm:$0xff] }
 0x3d2   :  { %2584 = vmatpush1.bf16.msra.mxu0 %v8953_v48  ;;  %6634 = vmatpush3.bf16.msra.mxu1 %v11758_v59  ;;  %v11768_v48 = vld [vmem:[#allocation30_spill] sm:$0xff]  ;;  %v11786_v59 = vld [vmem:[#allocation51_spill] sm:$0xff] }
 0x3d3   :  { %2585 = vmatprep.subr.bf16.mxu0 %v11759_v16  ;;  %6635 = vmatprep.subr.bf16.mxu1 %v11718_v51  ;;  %v11787_v16 = vld [vmem:[#allocation52_spill] sm:$0xff] }
 0x3d6   :  { %2586 = vmatpush1.bf16.msra.mxu0 %v11761_v21  ;;  %6636 = vmatpush3.bf16.msra.mxu1 %v11762_v56  ;;  %v11790_v21 = vld [vmem:[#allocation55_spill] sm:$0xff]  ;;  %v11791_v56 = vld [vmem:[#allocation56_spill] sm:$0xff] }
 0x3d7   :  { %2587 = vmatprep.subr.bf16.mxu0 %v11763_v22  ;;  %6637 = vmatprep.subr.bf16.mxu1 %v11718_v51  ;;  %v11792_v22 = vld [vmem:[#allocation57_spill] sm:$0xff] }
 0x3da   :  { %2588 = vmatpush1.bf16.msra.mxu0 %v11764_v37  ;;  %6638 = vmatpush3.bf16.msra.mxu1 %v11765_v39  ;;  %v11794_v37 = vld [vmem:[#allocation59_spill] sm:$0xff]  ;;  %v11795_v39 = vld [vmem:[#allocation60_spill] sm:$0xff] }
 0x3db   :  { %2589 = vmatprep.subr.bf16.mxu0 %v11767_v24  ;;  %6639 = vmatprep.subr.bf16.mxu1 %v11718_v51  ;;  %v11798_v24 = vld [vmem:[#allocation63_spill] sm:$0xff] }
 0x3dc   :  { %v7461_v32 = vpop.eup %7460 }
 0x3dd   :  { %v2150_v33 = vmul.f32 %v7461_v32, %v2149_v29  ;;  %v11799_v29 = vld [vmem:[#allocation64_spill] sm:$0xff] }
 0x3de   :  { %2590 = vmatpush1.bf16.msra.mxu0 %v11768_v48  ;;  %6640 = vmatpush3.bf16.msra.mxu1 %v11769_v31 }
 0x3df   :  { %2591 = vmatprep.subr.bf16.mxu0 %v11770_v28  ;;  %6641 = vmatprep.subr.bf16.mxu1 %v11718_v51  ;;  %v9424_v30 = vadd.f32 %v2156_v38, %v2150_v33 }
 0x3e1   :  { %11771 = vst [vmem:[#allocation23_spill] sm:$0xff] %v9424_v30  ;;  %v2580_v10 = vpack.c.bf16 %v9424_v30, %v9424_v30 }
 0x3e2   :  { %2592 = vmatpush1.bf16.msra.mxu0 %v11772_v44  ;;  %6642 = vmatpush3.bf16.msra.mxu1 %v11773_v1  ;;  %v11800_v1 = vld [vmem:[#allocation16_spill] sm:$0xff] }
 0x3e3   :  { %2593 = vmatprep.subr.bf16.mxu0 %v11774_v13  ;;  %6643 = vmatprep.subr.bf16.mxu1 %v11718_v51 }
 0x3e6   :  { %2594 = vmatpush1.bf16.msra.mxu0 %v11775_v18  ;;  %6644 = vmatpush3.bf16.msra.mxu1 %v11776_v63 }
 0x3e7   :  { %2595 = vmatprep.subr.bf16.mxu0 %v11777_v58  ;;  %6645 = vmatprep.subr.bf16.mxu1 %v11718_v51 }
 0x3ea   :  { %2596 = vmatpush1.bf16.msra.mxu0 %v11778_v25  ;;  %6646 = vmatpush3.bf16.msra.mxu1 %v11779_v57 }
 0x3eb   :  { %2695 = vmatprep.subr.bf16.mxu0 %v9438_v52  ;;  %6651 = vmatprep.subr.bf16.mxu1 %v11718_v51 }
 0x3ed   :  { %2614 = vmatmul.mubr.bf16.vlgmr.msra.gmra.mxu0 %v2580_v10  ;;  %6648 = vmatmul.mubr.bf16.vlgmr.msra.gmra.mxu1 %v2580_v10 }
 0x3ee   :  { %2696 = vmatpush1.bf16.msra.mxu0 %v9442_v43  ;;  %6652 = vmatpush3.bf16.msra.mxu1 %v11780_v2 }
 0x3ef   :  { %2697 = vmatprep.subr.bf16.mxu0 %v9446_v53  ;;  %6653 = vmatprep.subr.bf16.mxu1 %v11718_v51 }
 0x3f0   :  { %2727 = vmatprep.mubr.bf16.mxu0 %v11648_v54  ;;  %6667 = vmatprep.mubr.msk.bf16.mxu1 %vm8177_vm2, %v11718_v51 }
 0x3f2   :  { %2698 = vmatpush1.bf16.msra.mxu0 %v9453_v40  ;;  %6654 = vmatpush3.bf16.msra.mxu1 %v11781_v3 }
 0x3f3   :  { %2699 = vmatprep.subr.bf16.mxu0 %v9457_v4  ;;  %6655 = vmatprep.subr.bf16.mxu1 %v11718_v51 }
 0x3f6   :  { %2700 = vmatpush1.bf16.msra.mxu0 %v11782_v11  ;;  %6656 = vmatpush3.bf16.msra.mxu1 %v11783_v14  ;;  %v11801_v11 = vld [vmem:[#allocation17_spill] sm:$0xff] }
 0x3f7   :  { %2701 = vmatprep.subr.bf16.mxu0 %v11784_v15  ;;  %6657 = vmatprep.subr.bf16.mxu1 %v11718_v51  ;;  %v11802_v15 = vld [vmem:[#allocation18_spill] sm:$0xff] }
 0x3fa   :  { %2702 = vmatpush1.bf16.msra.mxu0 %v11785_v6  ;;  %6658 = vmatpush3.bf16.msra.mxu1 %v11786_v59 }
 0x3fb   :  { %2703 = vmatprep.subr.bf16.mxu0 %v11787_v16  ;;  %6659 = vmatprep.subr.bf16.mxu1 %v11718_v51 }
 0x3fe   :  { %2704 = vmatpush1.bf16.msra.mxu0 %v11788_v19  ;;  %6660 = vmatpush3.bf16.msra.mxu1 %v11789_v20 }
 0x3ff   :  { %2705 = vmatprep.subr.bf16.mxu0 %v11790_v21  ;;  %6661 = vmatprep.subr.bf16.mxu1 %v11718_v51 }
 0x402   :  { %2706 = vmatpush1.bf16.msra.mxu0 %v11791_v56  ;;  %6662 = vmatpush3.bf16.msra.mxu1 %v11792_v22 }
 0x403   :  { %2707 = vmatprep.subr.bf16.mxu0 %v11793_v26  ;;  %6663 = vmatprep.subr.bf16.mxu1 %v11718_v51 }
 0x406   :  { %2708 = vmatpush1.bf16.msra.mxu0 %v11794_v37  ;;  %6664 = vmatpush3.bf16.msra.mxu1 %v11795_v39  ;;  %v11803_v37 = vld [vmem:[#allocation65_spill] sm:$0xff] }
 0x407   :  { %2709 = vmatprep.subr.bf16.mxu0 %v11796_v50  ;;  %6665 = vmatprep.subr.bf16.mxu1 %v11718_v51 }
 0x40a   :  { %2710 = vmatpush1.bf16.msra.mxu0 %v11797_v23  ;;  %6666 = vmatpush3.bf16.msra.mxu1 %v11798_v24 }
 0x40b   :  { %2840 = vmatprep.subr.bf16.mxu0 %v11799_v29  ;;  %6671 = vmatprep.subr.bf16.mxu1 %v11718_v51 }
 0x42d   :  { %v2203_v32 = vpop.f32.mrf.mxu0  ;;  %v2244_v33 = vpop.f32.mrf.mxu1 }
 0x42e   :  { %v2252_v38 = vrot.slane %v2203_v32, 5  ;;  %v2254_v48 = vrot.slane %v2203_v32, 6  ;;  %v2288_v39 = vadd.f32 %v11803_v37, %v2244_v33 }
 0x42f   :  { %v2205_v31 = vpop.f32.mrf.mxu0  ;;  %v6569_v28 = vpop.f32.mrf.mxu1 }
 0x430   :  { %v2260_v44 = vadd.f32 %v2252_v38, %v8467_v0  ;;  %v2262_v13 = vadd.f32 %v2254_v48, %v11800_v1  ;;  %v2253_v57 = vrot.slane %v2205_v31, 5  ;;  %v2255_v10 = vrot.slane %v2205_v31, 6 }
 0x431   :  { %v2207_v18 = vpop.f32.mrf.mxu0  ;;  %v2247_v63 = vpop.f32.mrf.mxu1  ;;  %v2290_v48 = vrot.slane %v2288_v39, 5  ;;  %v2291_v28 = vrot.slane %v2288_v39, 6 }
 0x432   :  { %v5935_v58 = vmul.f32 -1.442695, %v2260_v44  ;;  %v5937_v25 = vmul.f32 -1.442695, %v2262_v13  ;;  %v2261_v14 = vadd.f32 %v2253_v57, %v11801_v11  ;;  %v2263_v6 = vadd.f32 %v2255_v10, %v11802_v15  ;;  %v11804_v10 = vld [vmem:[#allocation21_spill] sm:$0xff] }
 0x433   :  { %v2208_v2 = vpop.f32.mrf.mxu0  ;;  %v6570_v3 = vpop.f32.mrf.mxu1 }
 0x434   :  { %7462 = vpow2.f32 %v5935_v58  ;;  %v5936_v59 = vmul.f32 -1.442695, %v2261_v14  ;;  %v5938_v16 = vmul.f32 -1.442695, %v2263_v6  ;;  %v2306_v6 = vrot.slane %v9135_v62, 7 }
 0x435   :  { %7464 = vpow2.f32 %v5937_v25 }
 0x436   :  { %7466 = vpow2.f32 %v5936_v59 }
 0x437   :  { %7468 = vpow2.f32 %v5938_v16 }
 0x441   :  { %v7463_v19 = vpop.eup %7462 }
 0x442   :  { %v7465_v20 = vpop.eup %7464  ;;  %v2276_v21 = vadd.f32 1.0, %v7463_v19  ;;  %v2307_v19 = vrot.slane %v9137_v9, 7 }
 0x443   :  { %v2278_v56 = vadd.f32 1.0, %v7465_v20  ;;  %v7467_v22 = vpop.eup %7466 }
 0x444   :  { %7470 = vrcp.f32 %v2276_v21  ;;  %v7469_v26 = vpop.eup %7468  ;;  %v2277_v24 = vadd.f32 1.0, %v7467_v22 }
 0x445   :  { %7472 = vrcp.f32 %v2278_v56  ;;  %v2279_v29 = vadd.f32 1.0, %v7469_v26 }
 0x446   :  { %7474 = vrcp.f32 %v2277_v24 }
 0x447   :  { %7476 = vrcp.f32 %v2279_v29 }
 0x44d   :  { %v2348_v50 = vpop.f32.mrf.mxu0  ;;  %v9490_v23 = vpop.f32.mrf.mxu1 }
 0x44e   :  { %v2349_v9 = vadd.f32 %v2348_v50, %v8753_v35 }
 0x44f   :  { %v2350_v32 = vpop.f32.mrf.mxu0  ;;  %v6589_v38 = vpop.f32.mrf.mxu1 }
 0x451   :  { %v7471_v31 = vpop.eup %7470  ;;  %v2352_v44 = vpop.f32.mrf.mxu0 }
 0x452   :  { %v2392_v13 = vpop.f32.mrf.mxu1  ;;  %v7473_v18 = vpop.eup %7472  ;;  %v2294_v63 = vmul.f32 %v7471_v31, %v2290_v48 }
 0x453   :  { %v2295_v58 = vmul.f32 %v7473_v18, %v2291_v28  ;;  %v2353_v25 = vpop.f32.mrf.mxu0  ;;  %v7475_v3 = vpop.eup %7474 }
 0x454   :  { %v6590_v57 = vpop.f32.mrf.mxu1  ;;  %v2296_v33 = vadd.f32 %v2294_v63, %v8490_v7  ;;  %v7477_v14 = vpop.eup %7476  ;;  %v2300_v59 = vsub.f32 1.0, %v7475_v3  ;;  %v2310_v22 = vmul.f32 %v7475_v3, %v2306_v6  ;;  %v2351_v6 = vadd.f32 %v2350_v32, %v8762_v42  ;;  %v11808_v32 = vld [vmem:[#allocation69_spill] sm:$0xff] }
 0x455   :  { %v2297_v2 = vadd.f32 %v2295_v58, %v11804_v10  ;;  %v2301_v20 = vsub.f32 1.0, %v7477_v14  ;;  %v2311_v37 = vmul.f32 %v7477_v14, %v2307_v19 }
 0x456   :  { %7478 = vtanh.f32 %v2296_v33 }
 0x457   :  { %7480 = vtanh.f32 %v2297_v2 }
 0x463   :  { %v7479_v16 = vpop.eup %7478 }
 0x464   :  { %v7481_v21 = vpop.eup %7480  ;;  %v2302_v56 = vmul.f32 %v7479_v16, %v2300_v59  ;;  %v11807_v59 = vld [vmem:[#allocation68_spill] sm:$0xff] }
 0x465   :  { %v2303_v26 = vmul.f32 %v7481_v21, %v2301_v20  ;;  %v11810_v20 = vld [vmem:[#allocation71_spill] sm:$0xff]  ;;  %v11812_v21 = vld [vmem:[#allocation73_spill] sm:$0xff] }
 0x466   :  { %v9496_v39 = vadd.f32 %v2310_v22, %v2302_v56  ;;  %v11813_v56 = vld [vmem:[#allocation74_spill] sm:$0xff]  ;;  %v11814_v22 = vld [vmem:[#allocation75_spill] sm:$0xff] }
 0x467   :  { %v9498_v24 = vadd.f32 %v2311_v37, %v2303_v26  ;;  %v11815_v26 = vld [vmem:[#allocation76_spill] sm:$0xff]  ;;  %v11816_v37 = vld [vmem:[#allocation77_spill] sm:$0xff] }
 0x468   :  { %v2684_v29 = vpack.c.bf16 %v9496_v39, %v9496_v39 }
 0x469   :  { %v2685_v62 = vpack.c.bf16 %v9498_v24, %v9498_v24 }
 0x46a   :  { %v2688_v38 = vunpack.c.l.b16 %v2684_v29  ;;  %v11817_v29 = vld [vmem:[#allocation78_spill] sm:$0xff] }
 0x46b   :  { %v2689_v48 = vunpack.c.l.b16 %v2685_v62  ;;  %v11818_v62 = vld [vmem:[#allocation79_spill] sm:$0xff] }
 0x46c   :  { %v2690_v31 = vrot.slane %v2688_v38, 3  ;;  %v11819_v38 = vld [vmem:[#allocation80_spill] sm:$0xff] }
 0x46d   :  { %v2430_v28 = vpop.f32.mrf.mxu0  ;;  %v2471_v44 = vpop.f32.mrf.mxu1  ;;  %v2691_v13 = vrot.slane %v2689_v48, 2 }
 0x46e   :  { %v2477_v18 = vadd.f32 %v2430_v28, %v2349_v9  ;;  %v9543_v28 = vld [vmem:[%s11324_s9] ss:$0 sm:$0xff] }
 0x46f   :  { %v2432_v63 = vpop.f32.mrf.mxu0  ;;  %v6609_v58 = vpop.f32.mrf.mxu1  ;;  %v2692_v25 = vsel %vm438_vm3, %v2691_v13, %v2690_v31  ;;  %v2491_v13 = vadd.f32 %v9543_v28, %v2471_v44  ;;  %v11822_v44 = vld [vmem:[#allocation83_spill] sm:$0xff] }
 0x470   :  { %v5939_v57 = vmul.f32 -1.442695, %v2477_v18  ;;  %v2693_v33 = vpack.c.b16 %v2692_v25, %v2692_v25  ;;  %v11821_v58 = vld [vmem:[#allocation82_spill] sm:$0xff] }
 0x471   :  { %v2434_v2 = vpop.f32.mrf.mxu0  ;;  %v2474_v3 = vpop.f32.mrf.mxu1 }
 0x472   :  { %7482 = vpow2.f32 %v5939_v57  ;;  %2728 = vmatmul.mubr.bf16.vlgmr.msra.gmra.mxu0 %v2693_v33  ;;  %6668 = vmatmul.mubr.bf16.vlgmr.msra.gmra.mxu1 %v2693_v33 }
 0x473   :  { %2841 = vmatpush1.bf16.msra.mxu0 %v9151_v46  ;;  %6672 = vmatpush3.bf16.msra.mxu1 %v9154_v12  ;;  %v2435_v50 = vpop.f32.mrf.mxu0  ;;  %v6610_v14 = vpop.f32.mrf.mxu1  ;;  %v2478_v46 = vadd.f32 %v2432_v63, %v2351_v6  ;;  %v11805_v12 = vld [vmem:[#allocation66_spill] sm:$0xff]  ;;  %v11820_v63 = vld [vmem:[#allocation81_spill] sm:$0xff] }
 0x474   :  { %2842 = vmatprep.subr.bf16.mxu0 %v9157_v17  ;;  %6673 = vmatprep.subr.bf16.mxu1 %v11718_v51  ;;  %v11806_v17 = vld [vmem:[#allocation67_spill] sm:$0xff]  ;;  %v2390_v14 = vadd.f32 %v9490_v23, %v8804_v8  ;;  %v11825_v23 = vld [vmem:[#allocation86_spill] sm:$0xff] }
 0x475   :  { %2872 = vmatprep.mubr.bf16.mxu0 %v11648_v54  ;;  %6687 = vmatprep.mubr.msk.bf16.mxu1 %vm8177_vm2, %v11718_v51  ;;  %v5940_v16 = vmul.f32 -1.442695, %v2478_v46 }
 0x477   :  { %2843 = vmatpush1.bf16.msra.mxu0 %v9166_v34  ;;  %6674 = vmatpush3.bf16.msra.mxu1 %v9169_v49  ;;  %v11809_v34 = vld [vmem:[#allocation70_spill] sm:$0xff]  ;;  %7484 = vpow2.f32 %v5940_v16  ;;  %v11828_v16 = vld [vmem:[#allocation89_spill] sm:$0xff] }
 0x478   :  { %2844 = vmatprep.subr.bf16.mxu0 %v9172_v36  ;;  %6675 = vmatprep.subr.bf16.mxu1 %v11718_v51  ;;  %v11811_v36 = vld [vmem:[#allocation72_spill] sm:$0xff] }
 0x47b   :  { %2845 = vmatpush1.bf16.msra.mxu0 %v11805_v12  ;;  %6676 = vmatpush3.bf16.msra.mxu1 %v11806_v17 }
 0x47c   :  { %2846 = vmatprep.subr.bf16.mxu0 %v11807_v59  ;;  %6677 = vmatprep.subr.bf16.mxu1 %v11718_v51  ;;  %v11823_v59 = vld [vmem:[#allocation84_spill] sm:$0xff] }
 0x47f   :  { %v7483_v19 = vpop.eup %7482  ;;  %2847 = vmatpush1.bf16.msra.mxu0 %v11808_v32  ;;  %6678 = vmatpush3.bf16.msra.mxu1 %v11809_v34  ;;  %v11830_v32 = vld [vmem:[#allocation91_spill] sm:$0xff]  ;;  %v11831_v34 = vld [vmem:[#allocation92_spill] sm:$0xff] }
 0x480   :  { %v2485_v49 = vadd.f32 1.0, %v7483_v19  ;;  %2848 = vmatprep.subr.bf16.mxu0 %v11810_v20  ;;  %6679 = vmatprep.subr.bf16.mxu1 %v11718_v51  ;;  %v11829_v19 = vld [vmem:[#allocation90_spill] sm:$0xff] }
 0x482   :  { %7486 = vrcp.f32 %v2485_v49  ;;  %v11832_v49 = vld [vmem:[#allocation93_spill] sm:$0xff] }
 0x483   :  { %2849 = vmatpush1.bf16.msra.mxu0 %v11811_v36  ;;  %6680 = vmatpush3.bf16.msra.mxu1 %v11812_v21  ;;  %v11833_v36 = vld [vmem:[#allocation94_spill] sm:$0xff]  ;;  %v11834_v21 = vld [vmem:[#allocation95_spill] sm:$0xff] }
 0x484   :  { %2850 = vmatprep.subr.bf16.mxu0 %v11813_v56  ;;  %6681 = vmatprep.subr.bf16.mxu1 %v11718_v51  ;;  %v7485_v31 = vpop.eup %7484  ;;  %v11835_v56 = vld [vmem:[#allocation96_spill] sm:$0xff] }
 0x485   :  { %v2486_v6 = vadd.f32 1.0, %v7485_v31 }
 0x487   :  { %2851 = vmatpush1.bf16.msra.mxu0 %v11814_v22  ;;  %6682 = vmatpush3.bf16.msra.mxu1 %v11815_v26  ;;  %7488 = vrcp.f32 %v2486_v6 }
 0x488   :  { %2852 = vmatprep.subr.bf16.mxu0 %v11816_v37  ;;  %6683 = vmatprep.subr.bf16.mxu1 %v11718_v51  ;;  %v11836_v37 = vld [vmem:[#allocation97_spill] sm:$0xff] }
 0x48b   :  { %2853 = vmatpush1.bf16.msra.mxu0 %v11817_v29  ;;  %6684 = vmatpush3.bf16.msra.mxu1 %v11818_v62  ;;  %v11837_v29 = vld [vmem:[#allocation98_spill] sm:$0xff]  ;;  %v11838_v62 = vld [vmem:[#allocation100_spill] sm:$0xff] }
 0x48c   :  { %2854 = vmatprep.subr.bf16.mxu0 %v11819_v38  ;;  %6685 = vmatprep.subr.bf16.mxu1 %v11718_v51 }
 0x48d   :  { %v2533_v48 = vpop.f32.mrf.mxu0  ;;  %v9538_v9 = vpop.f32.mrf.mxu1 }
 0x48f   :  { %v7487_v18 = vpop.eup %7486  ;;  %2855 = vmatpush1.bf16.msra.mxu0 %v11820_v63  ;;  %6686 = vmatpush3.bf16.msra.mxu1 %v11821_v58  ;;  %v9548_v25 = vpop.f32.mrf.mxu0  ;;  %v11841_v58 = vld [vmem:[#allocation102_spill] sm:$0xff] }
 0x490   :  { %v6629_v57 = vpop.f32.mrf.mxu1  ;;  %v2492_v2 = vmul.f32 %v7487_v18, %v2491_v13  ;;  %2922 = vmatprep.subr.bf16.mxu0 %v9240_v60  ;;  %6691 = vmatprep.subr.bf16.mxu1 %v11718_v51  ;;  %v11824_v60 = vld [vmem:[#allocation85_spill] sm:$0xff]  ;;  %v11840_v18 = vld [vmem:[#allocation99_spill] sm:$0xff] }
 0x491   :  { %v2537_v3 = vpop.f32.mrf.mxu0  ;;  %v11839_v13 = vld [vmem:[#allocation101_spill] sm:$0xff]  ;;  %v2534_v63 = vadd.f32 %v2533_v48, %v11840_v18  ;;  %v9597_v48 = vld [vmem:[#allocation7 + $0xac] ss:$12 sps:$4 sm:$0xff]  }
 0x492   :  { %v2577_v50 = vpop.f32.mrf.mxu1  ;;  %2873 = vmatmul.mubr.bf16.vlgmr.msra.gmra.mxu0 %v2693_v33  ;;  %6688 = vmatmul.mubr.bf16.vlgmr.msra.gmra.mxu1 %v2693_v33  ;;  %v2493_v17 = vadd.f32 %v2492_v2, %v2390_v14  ;;  %v11827_v33 = vld [vmem:[#allocation88_spill] sm:$0xff]  ;;  %v11842_v14 = vld [vmem:[#allocation103_spill] sm:$0xff] }
 0x493   :  { %2923 = vmatpush1.bf16.msra.mxu0 %v9248_v5  ;;  %6692 = vmatpush3.bf16.msra.mxu1 %v11822_v44  ;;  %v2538_v46 = vpop.f32.mrf.mxu0  ;;  %v11826_v5 = vld [vmem:[#allocation87_spill] sm:$0xff] }
 0x494   :  { %v6630_v12 = vpop.f32.mrf.mxu1  ;;  %2924 = vmatprep.subr.bf16.mxu0 %v11823_v59  ;;  %6693 = vmatprep.subr.bf16.mxu1 %v11718_v51  ;;  %7490 = vtanh.f32 %v2493_v17  ;;  %v7489_v20 = vpop.eup %7488  ;;  %v9606_v17 = vld [vmem:[#allocation7 + $0xb0] ss:$12 sps:$4 sm:$0xff]  }
 0x495   :  { %2954 = vmatprep.mubr.bf16.mxu0 %v11648_v54  ;;  %6707 = vmatprep.mubr.msk.bf16.mxu1 %vm8177_vm2, %v11718_v51  ;;  %v2495_v26 = vsub.f32 1.0, %v7489_v20  ;;  %v2497_v31 = vmul.f32 %v7489_v20, %v9333_v45 }
 0x497   :  { %2925 = vmatpush1.bf16.msra.mxu0 %v11824_v60  ;;  %6694 = vmatpush3.bf16.msra.mxu1 %v11825_v23  ;;  %v9609_v23 = vld [vmem:[#allocation7 + $0x94] ss:$12 sps:$4 sm:$0xff]  }
 0x498   :  { %2926 = vmatprep.subr.bf16.mxu0 %v11826_v5  ;;  %6695 = vmatprep.subr.bf16.mxu1 %v11718_v51  ;;  %v2536_v5 = vadd.f32 %v9548_v25, %v9337_v27  ;;  %v9631_v25 = vld [vmem:[#allocation7 + $0x80] ss:$12 sps:$4 sm:$0xff]  }
 0x49b   :  { %2927 = vmatpush1.bf16.msra.mxu0 %v11827_v33  ;;  %6696 = vmatpush3.bf16.msra.mxu1 %v11828_v16  ;;  %v9618_v33 = vld [vmem:[#allocation7 + $0x90] ss:$12 sps:$4 sm:$0xff]   ;;  %v9621_v16 = vld [vmem:[#allocation7 + $0x98] ss:$12 sps:$4 sm:$0xff]  }
 0x49c   :  { %2928 = vmatprep.subr.bf16.mxu0 %v11829_v19  ;;  %6697 = vmatprep.subr.bf16.mxu1 %v11718_v51  ;;  %v9624_v19 = vld [vmem:[#allocation7 + $0x7c] ss:$12 sps:$4 sm:$0xff]  }
 0x49f   :  { %2929 = vmatpush1.bf16.msra.mxu0 %v11830_v32  ;;  %6698 = vmatpush3.bf16.msra.mxu1 %v11831_v34  ;;  %v9628_v34 = vld [vmem:[#allocation7 + $0x78] ss:$12 sps:$4 sm:$0xff]  }
 0x4a0   :  { %2930 = vmatprep.subr.bf16.mxu0 %v11832_v49  ;;  %6699 = vmatprep.subr.bf16.mxu1 %v11718_v51  ;;  %v9634_v49 = vld [vmem:[#allocation7 + $0x64] ss:$12 sps:$4 sm:$0xff]  }
 0x4a1   :  { %v7491_v22 = vpop.eup %7490 }
 0x4a2   :  { %v2496_v38 = vmul.f32 %v7491_v22, %v2495_v26  ;;  %v9644_v26 = vld [vmem:[#allocation7 + $0x4c] ss:$12 sps:$4 sm:$0xff]  }
 0x4a3   :  { %2931 = vmatpush1.bf16.msra.mxu0 %v11833_v36  ;;  %6700 = vmatpush3.bf16.msra.mxu1 %v11834_v21  ;;  %v9638_v21 = vld [vmem:[#allocation7 + $0x60] ss:$12 sps:$4 sm:$0xff]  }
 0x4a4   :  { %2932 = vmatprep.subr.bf16.mxu0 %v11835_v56  ;;  %6701 = vmatprep.subr.bf16.mxu1 %v11718_v51  ;;  %v9587_v57 = vadd.f32 %v2497_v31, %v2496_v38  ;;  %v9641_v56 = vld [vmem:[#allocation7 + $0x68] ss:$12 sps:$4 sm:$0xff]   ;;  %v9658_v38 = vld [vmem:[#allocation7 + $0x30] ss:$12 sps:$4 sm:$0xff]   ;;  %v9661_v31 = vld [vmem:[#allocation7 + $0x38] ss:$12 sps:$4 sm:$0xff]  }
 0x4a7   :  { %2933 = vmatpush1.bf16.msra.mxu0 %v11836_v37  ;;  %6702 = vmatpush3.bf16.msra.mxu1 %v11837_v29  ;;  %v9648_v37 = vld [vmem:[#allocation7 + $0x48] ss:$12 sps:$4 sm:$0xff]   ;;  %v9651_v29 = vld [vmem:[#allocation7 + $0x50] ss:$12 sps:$4 sm:$0xff]  }
 0x4a8   :  { %2934 = vmatprep.subr.bf16.mxu0 %v11838_v62  ;;  %6703 = vmatprep.subr.bf16.mxu1 %v11718_v51  ;;  %v9654_v62 = vld [vmem:[#allocation7 + $0x34] ss:$12 sps:$4 sm:$0xff]  }
 0x4ab   :  { %2935 = vmatpush1.bf16.msra.mxu0 %v11839_v13  ;;  %6704 = vmatpush3.bf16.msra.mxu1 %v9324_v47  ;;  %v9595_v47 = vpack.c.bf16 %v9587_v57, %v9587_v57  ;;  %v9664_v13 = vld [vmem:[#allocation7 + $0x1c] ss:$12 sps:$4 sm:$0xff]  }
 0x4ac   :  { %2936 = vmatprep.subr.bf16.mxu0 %v11841_v58  ;;  %6705 = vmatprep.subr.bf16.mxu1 %v11718_v51  ;;  %v9671_v58 = vld [vmem:[#allocation7 + $0x20] ss:$12 sps:$4 sm:$0xff]  }
 0x4ad   :  { %v2615_v2 = vpop.f32.mrf.mxu0  ;;  %v9589_v3 = vpop.f32.mrf.mxu1 }
 0x4ae   :  { %v2662_v50 = vadd.f32 %v2615_v2, %v2534_v63  ;;  %v9668_v63 = vld [vmem:[#allocation7 + $0x18] ss:$12 sps:$4 sm:$0xff]  }
 0x4af   :  { %2937 = vmatpush1.bf16.msra.mxu0 %v9339_v61  ;;  %6706 = vmatpush3.bf16.msra.mxu1 %v11842_v14  ;;  %v2617_v45 = vpop.f32.mrf.mxu0  ;;  %v6649_v6 = vpop.f32.mrf.mxu1  ;;  %v9603_v61 = vld [vmem:[#allocation7 + $0xa8] ss:$12 sps:$4 sm:$0xff]   ;;  %v9674_v2 = vld [vmem:[#allocation7 + $0x4] ss:$12 sps:$4 sm:$0xff]   ;;  %v2676_v14 = vadd.f32 %v9381_v41, %v9589_v3 }
 0x4b0   :  { %v5941_v44 = vmul.f32 -1.442695, %v2662_v50  ;;  %3025 = vmatprep.subr.bf16.mxu0 %v9597_v48  ;;  %6711 = vmatprep.subr.bf16.mxu1 %v11718_v51  ;;  %v2663_v32 = vadd.f32 %v2617_v45, %v2536_v5  ;;  %v9680_v6 = vld [vmem:[#allocation7] ss:$12 sps:$4 sm:$0xff]   ;;  %v9694_v3 = vld [vmem:[#allocation9 + $0xa8] ss:$12 sps:$4 sm:$0xff]  }
 0x4b1   :  { %v2619_v46 = vpop.f32.mrf.mxu0  ;;  %v2659_v12 = vpop.f32.mrf.mxu1 }
 0x4b2   :  { %7492 = vpow2.f32 %v5941_v44  ;;  %2955 = vmatmul.mubr.bf16.vlgmr.msra.gmra.mxu0 %v9595_v47  ;;  %6708 = vmatmul.mubr.bf16.vlgmr.msra.gmra.mxu1 %v9595_v47  ;;  %v5942_v20 = vmul.f32 -1.442695, %v2663_v32  ;;  %v9683_v44 = vld [vmem:[#allocation7 + $0x8] ss:$12 sps:$4 sm:$0xff]   ;;  %v9686_v12 = vld [vmem:[#allocation9 + $0xac] ss:$12 sps:$4 sm:$0xff]  }
 0x4b3   :  { %3026 = vmatpush1.bf16.msra.mxu0 %v9603_v61  ;;  %6712 = vmatpush3.bf16.msra.mxu1 %v9606_v17  ;;  %v2620_v59 = vpop.f32.mrf.mxu0  ;;  %v6650_v60 = vpop.f32.mrf.mxu1  ;;  %v9700_v32 = vld [vmem:[#allocation9 + $0x94] ss:$12 sps:$4 sm:$0xff]  }
 0x4b4   :  { %3027 = vmatprep.subr.bf16.mxu0 %v9609_v23  ;;  %6713 = vmatprep.subr.bf16.mxu1 %v11718_v51  ;;  %7494 = vpow2.f32 %v5942_v20  ;;  %v2575_v59 = vadd.f32 %v9538_v9, %v9387_v55  ;;  %v9697_v60 = vld [vmem:[#allocation9 + $0xb0] ss:$12 sps:$4 sm:$0xff]  }
 0x4b5   :  { %3057 = vmatprep.mubr.bf16.mxu0 %v11648_v54  ;;  %6727 = vmatprep.mubr.msk.bf16.mxu1 %vm8177_vm2, %v11718_v51  ;;  %v9707_v9 = vld [vmem:[#allocation9 + $0x90] ss:$12 sps:$4 sm:$0xff]  }
 0x4b6   :  { %11843 = vst [vmem:[#allocation19_spill] sm:$0xff] %v9707_v9  ;;  %v9713_v20 = vld [vmem:[#allocation9 + $0x7c] ss:$12 sps:$4 sm:$0xff]  }
 0x4b7   :  { %3028 = vmatpush1.bf16.msra.mxu0 %v9618_v33  ;;  %6714 = vmatpush3.bf16.msra.mxu1 %v9621_v16  ;;  %11845 = vst [vmem:[#allocation24_spill] sm:$0xff] %v9713_v20 }
 0x4b8   :  { %3029 = vmatprep.subr.bf16.mxu0 %v9624_v19  ;;  %6715 = vmatprep.subr.bf16.mxu1 %v11718_v51 }
 0x4bb   :  { %3030 = vmatpush1.bf16.msra.mxu0 %v9628_v34  ;;  %6716 = vmatpush3.bf16.msra.mxu1 %v9631_v25 }
 0x4bc   :  { %3031 = vmatprep.subr.bf16.mxu0 %v9634_v49  ;;  %6717 = vmatprep.subr.bf16.mxu1 %v11718_v51 }
 0x4bf   :  { %v7493_v36 = vpop.eup %7492  ;;  %3032 = vmatpush1.bf16.msra.mxu0 %v9638_v21  ;;  %6718 = vmatpush3.bf16.msra.mxu1 %v9641_v56 }
 0x4c0   :  { %v2670_v22 = vadd.f32 1.0, %v7493_v36  ;;  %3033 = vmatprep.subr.bf16.mxu0 %v9644_v26  ;;  %6719 = vmatprep.subr.bf16.mxu1 %v11718_v51  ;;  %v9717_v36 = vld [vmem:[#allocation9 + $0x78] ss:$12 sps:$4 sm:$0xff]  }
 0x4c1   :  { %v7495_v50 = vpop.eup %7494  ;;  %11846 = vst [vmem:[#allocation26_spill] sm:$0xff] %v9717_v36 }
 0x4c2   :  { %7496 = vrcp.f32 %v2670_v22  ;;  %v2671_v41 = vadd.f32 1.0, %v7495_v50  ;;  %v9720_v22 = vld [vmem:[#allocation9 + $0x80] ss:$12 sps:$4 sm:$0xff]   ;;  %v9723_v50 = vld [vmem:[#allocation9 + $0x64] ss:$12 sps:$4 sm:$0xff]  }
 0x4c3   :  { %3034 = vmatpush1.bf16.msra.mxu0 %v9648_v37  ;;  %6720 = vmatpush3.bf16.msra.mxu1 %v9651_v29  ;;  %11847 = vst [vmem:[#allocation25_spill] sm:$0xff] %v9720_v22  ;;  %11848 = vst [vmem:[#allocation28_spill] sm:$0xff] %v9723_v50 }
 0x4c4   :  { %3035 = vmatprep.subr.bf16.mxu0 %v9654_v62  ;;  %6721 = vmatprep.subr.bf16.mxu1 %v11718_v51  ;;  %7498 = vrcp.f32 %v2671_v41  ;;  %v9737_v41 = vld [vmem:[#allocation9 + $0x48] ss:$12 sps:$4 sm:$0xff]  }
 0x4c5   :  { %11852 = vst [vmem:[#allocation30_spill] sm:$0xff] %v9737_v41 }
 0x4c7   :  { %3036 = vmatpush1.bf16.msra.mxu0 %v9658_v38  ;;  %6722 = vmatpush3.bf16.msra.mxu1 %v9661_v31 }
 0x4c8   :  { %3037 = vmatprep.subr.bf16.mxu0 %v9664_v13  ;;  %6723 = vmatprep.subr.bf16.mxu1 %v11718_v51 }
 0x4cb   :  { %3038 = vmatpush1.bf16.msra.mxu0 %v9668_v63  ;;  %6724 = vmatpush3.bf16.msra.mxu1 %v9671_v58 }
 0x4cc   :  { %3039 = vmatprep.subr.bf16.mxu0 %v9674_v2  ;;  %6725 = vmatprep.subr.bf16.mxu1 %v11718_v51 }
 0x4cf   :  { %v7497_v45 = vpop.eup %7496  ;;  %3040 = vmatpush1.bf16.msra.mxu0 %v9680_v6  ;;  %6726 = vmatpush3.bf16.msra.mxu1 %v9683_v44 }
 0x4d0   :  { %v2677_v46 = vmul.f32 %v7497_v45, %v2676_v14  ;;  %3107 = vmatprep.subr.bf16.mxu0 %v9686_v12  ;;  %6731 = vmatprep.subr.bf16.mxu1 %v11718_v51  ;;  %v9727_v14 = vld [vmem:[#allocation9 + $0x60] ss:$12 sps:$4 sm:$0xff]   ;;  %v9730_v45 = vld [vmem:[#allocation9 + $0x68] ss:$12 sps:$4 sm:$0xff]  }
 0x4d1   :  { %11849 = vst [vmem:[#allocation31_spill] sm:$0xff] %v9727_v14  ;;  %11850 = vst [vmem:[#allocation34_spill] sm:$0xff] %v9730_v45 }
 0x4d2   :  { %3058 = vmatmul.mubr.bf16.vlgmr.msra.gmra.mxu0 %v9595_v47  ;;  %6728 = vmatmul.mubr.bf16.vlgmr.msra.gmra.mxu1 %v9595_v47  ;;  %v2678_v5 = vadd.f32 %v2677_v46, %v2575_v59  ;;  %v9710_v47 = vld [vmem:[#allocation9 + $0x98] ss:$12 sps:$4 sm:$0xff]   ;;  %v7499_v59 = vpop.eup %7498 }
 0x4d3   :  { %3108 = vmatpush1.bf16.msra.mxu0 %v9694_v3  ;;  %6732 = vmatpush3.bf16.msra.mxu1 %v9697_v60  ;;  %11844 = vst [vmem:[#allocation29_spill] sm:$0xff] %v9710_v47  ;;  %v9733_v46 = vld [vmem:[#allocation9 + $0x4c] ss:$12 sps:$4 sm:$0xff]  }
 0x4d4   :  { %3109 = vmatprep.subr.bf16.mxu0 %v9700_v32  ;;  %6733 = vmatprep.subr.bf16.mxu1 %v11718_v51  ;;  %7500 = vtanh.f32 %v2678_v5  ;;  %11851 = vst [vmem:[#allocation27_spill] sm:$0xff] %v9733_v46  ;;  %v9740_v5 = vld [vmem:[#allocation9 + $0x50] ss:$12 sps:$4 sm:$0xff]  }
 0x4d5   :  { %3139 = vmatprep.mubr.bf16.mxu0 %v11648_v54  ;;  %6747 = vmatprep.mubr.msk.bf16.mxu1 %vm8177_vm2, %v11718_v51  ;;  %11853 = vst [vmem:[#allocation37_spill] sm:$0xff] %v9740_v5 }
 0x4d7   :  { %3110 = vmatpush1.bf16.msra.mxu0 %v9707_v9  ;;  %6734 = vmatpush3.bf16.msra.mxu1 %v9710_v47 }
 0x4d8   :  { %3111 = vmatprep.subr.bf16.mxu0 %v9713_v20  ;;  %6735 = vmatprep.subr.bf16.mxu1 %v11718_v51  ;;  %v9761_v20 = vld [vmem:[#allocation9 + $0x20] ss:$12 sps:$4 sm:$0xff]  }
 0x4d9   :  { %11859 = vst [vmem:[#allocation39_spill] sm:$0xff] %v9761_v20 }
 0x4db   :  { %3112 = vmatpush1.bf16.msra.mxu0 %v9717_v36  ;;  %6736 = vmatpush3.bf16.msra.mxu1 %v9720_v22  ;;  %v9750_v22 = vld [vmem:[#allocation9 + $0x38] ss:$12 sps:$4 sm:$0xff]  }
 0x4dc   :  { %3113 = vmatprep.subr.bf16.mxu0 %v9723_v50  ;;  %6737 = vmatprep.subr.bf16.mxu1 %v11718_v51  ;;  %v2680_v50 = vsub.f32 1.0, %v7499_v59  ;;  %11856 = vst [vmem:[#allocation38_spill] sm:$0xff] %v9750_v22  ;;  %v9758_v36 = vld [vmem:[#allocation9 + $0x18] ss:$12 sps:$4 sm:$0xff]  }
 0x4dd   :  { %11858 = vst [vmem:[#allocation36_spill] sm:$0xff] %v9758_v36 }
 0x4df   :  { %3114 = vmatpush1.bf16.msra.mxu0 %v9727_v14  ;;  %6738 = vmatpush3.bf16.msra.mxu1 %v9730_v45  ;;  %v9743_v14 = vld [vmem:[#allocation9 + $0x34] ss:$12 sps:$4 sm:$0xff]  }
 0x4e0   :  { %3115 = vmatprep.subr.bf16.mxu0 %v9733_v46  ;;  %6739 = vmatprep.subr.bf16.mxu1 %v11718_v51  ;;  %11854 = vst [vmem:[#allocation32_spill] sm:$0xff] %v9743_v14  ;;  %v9747_v46 = vld [vmem:[#allocation9 + $0x30] ss:$12 sps:$4 sm:$0xff]  }
 0x4e1   :  { %v7501_v45 = vpop.eup %7500  ;;  %11855 = vst [vmem:[#allocation33_spill] sm:$0xff] %v9747_v46 }
 0x4e3   :  { %3116 = vmatpush1.bf16.msra.mxu0 %v9737_v41  ;;  %6740 = vmatpush3.bf16.msra.mxu1 %v9740_v5  ;;  %v9753_v41 = vld [vmem:[#allocation9 + $0x1c] ss:$12 sps:$4 sm:$0xff]   ;;  %v2681_v5 = vmul.f32 %v7501_v45, %v2680_v50 }
 0x4e4   :  { %3117 = vmatprep.subr.bf16.mxu0 %v9743_v14  ;;  %6741 = vmatprep.subr.bf16.mxu1 %v11718_v51  ;;  %11857 = vst [vmem:[#allocation35_spill] sm:$0xff] %v9753_v41  ;;  %v2682_v14 = vmul.f32 %v7499_v59, %v9424_v30  ;;  %v9773_v50 = vld [vmem:[#allocation9 + $0x8] ss:$12 sps:$4 sm:$0xff]   ;;  %v9801_v59 = vld [vmem:[#allocation2 + $0x64] ss:$12 sps:$4 sm:$0xff]  }
 0x4e5   :  { %11863 = vst [vmem:[#allocation43_spill] sm:$0xff] %v9773_v50  ;;  %11868 = vst [vmem:[#allocation50_spill] sm:$0xff] %v9801_v59  ;;  %v9818_v30 = vld [vmem:[#allocation2 + $0x50] ss:$12 sps:$4 sm:$0xff]  }
 0x4e6   :  { %11873 = vst [vmem:[#allocation55_spill] sm:$0xff] %v9818_v30 }
 0x4e7   :  { %3118 = vmatpush1.bf16.msra.mxu0 %v9747_v46  ;;  %6742 = vmatpush3.bf16.msra.mxu1 %v9750_v22  ;;  %v9764_v46 = vld [vmem:[#allocation9 + $0x4] ss:$12 sps:$4 sm:$0xff]   ;;  %v9770_v22 = vld [vmem:[#allocation9] ss:$12 sps:$4 sm:$0xff]  }
 0x4e8   :  { %3119 = vmatprep.subr.bf16.mxu0 %v9753_v41  ;;  %6743 = vmatprep.subr.bf16.mxu1 %v11718_v51  ;;  %11860 = vst [vmem:[#allocation41_spill] sm:$0xff] %v9764_v46  ;;  %v9768_v41 = vadd.f32 %v2682_v14, %v2681_v5  ;;  %11862 = vst [vmem:[#allocation42_spill] sm:$0xff] %v9770_v22  ;;  %v9781_v14 = vld [vmem:[#allocation2 + $0xb0] ss:$12 sps:$4 sm:$0xff]   ;;  %v9811_v5 = vld [vmem:[#allocation2 + $0x4c] ss:$12 sps:$4 sm:$0xff]  }
 0x4e9   :  { %11864 = vst [vmem:[#allocation44_spill] sm:$0xff] %v9781_v14  ;;  %11871 = vst [vmem:[#allocation53_spill] sm:$0xff] %v9811_v5 }
 0x4ea   :  { %11861 = vst [vmem:[#allocation40_spill] sm:$0xff] %v9768_v41  ;;  %v3106_v45 = vpack.c.bf16 %v9768_v41, %v9768_v41 }
 0x4eb   :  { %3120 = vmatpush1.bf16.msra.mxu0 %v9758_v36  ;;  %6744 = vmatpush3.bf16.msra.mxu1 %v9761_v20 }
 0x4ec   :  { %3121 = vmatprep.subr.bf16.mxu0 %v9764_v46  ;;  %6745 = vmatprep.subr.bf16.mxu1 %v11718_v51 }
 0x4ef   :  { %3122 = vmatpush1.bf16.msra.mxu0 %v9770_v22  ;;  %6746 = vmatpush3.bf16.msra.mxu1 %v9773_v50 }
 0x4f0   :  { %3221 = vmatprep.subr.bf16.mxu0 %v9438_v52  ;;  %6751 = vmatprep.subr.bf16.mxu1 %v11718_v51  ;;  %v9790_v52 = vld [vmem:[#allocation2 + $0x98] ss:$12 sps:$4 sm:$0xff]  }
 0x4f1   :  { %11865 = vst [vmem:[#allocation47_spill] sm:$0xff] %v9790_v52 }
 0x4f2   :  { %3140 = vmatmul.mubr.bf16.vlgmr.msra.gmra.mxu0 %v3106_v45  ;;  %6748 = vmatmul.mubr.bf16.vlgmr.msra.gmra.mxu1 %v3106_v45  ;;  %v9815_v45 = vld [vmem:[#allocation2 + $0x48] ss:$12 sps:$4 sm:$0xff]  }
 0x4f3   :  { %3222 = vmatpush1.bf16.msra.mxu0 %v9442_v43  ;;  %6752 = vmatpush3.bf16.msra.mxu1 %v9781_v14  ;;  %v9795_v43 = vld [vmem:[#allocation2 + $0x78] ss:$12 sps:$4 sm:$0xff]   ;;  %11872 = vst [vmem:[#allocation54_spill] sm:$0xff] %v9815_v45 }
 0x4f4   :  { %3223 = vmatprep.subr.bf16.mxu0 %v9446_v53  ;;  %6753 = vmatprep.subr.bf16.mxu1 %v11718_v51  ;;  %11866 = vst [vmem:[#allocation48_spill] sm:$0xff] %v9795_v43  ;;  %v9798_v53 = vld [vmem:[#allocation2 + $0x80] ss:$12 sps:$4 sm:$0xff]  }
 0x4f5   :  { %3253 = vmatprep.mubr.bf16.mxu0 %v11648_v54  ;;  %6767 = vmatprep.mubr.msk.bf16.mxu1 %vm8177_vm2, %v11718_v51  ;;  %11867 = vst [vmem:[#allocation49_spill] sm:$0xff] %v9798_v53 }
 0x4f7   :  { %3224 = vmatpush1.bf16.msra.mxu0 %v9453_v40  ;;  %6754 = vmatpush3.bf16.msra.mxu1 %v9790_v52  ;;  %v9805_v40 = vld [vmem:[#allocation2 + $0x60] ss:$12 sps:$4 sm:$0xff]  }
 0x4f8   :  { %3225 = vmatprep.subr.bf16.mxu0 %v9457_v4  ;;  %6755 = vmatprep.subr.bf16.mxu1 %v11718_v51  ;;  %11869 = vst [vmem:[#allocation51_spill] sm:$0xff] %v9805_v40  ;;  %v9808_v4 = vld [vmem:[#allocation2 + $0x68] ss:$12 sps:$4 sm:$0xff]  }
 0x4f9   :  { %11870 = vst [vmem:[#allocation52_spill] sm:$0xff] %v9808_v4 }
 0x4fb   :  { %3226 = vmatpush1.bf16.msra.mxu0 %v9795_v43  ;;  %6756 = vmatpush3.bf16.msra.mxu1 %v9798_v53 }
 0x4fc   :  { %3227 = vmatprep.subr.bf16.mxu0 %v9801_v59  ;;  %6757 = vmatprep.subr.bf16.mxu1 %v11718_v51  ;;  %v9821_v59 = vld [vmem:[#allocation2 + $0x34] ss:$12 sps:$4 sm:$0xff]  }
 0x4fd   :  { %11874 = vst [vmem:[#allocation56_spill] sm:$0xff] %v9821_v59 }
 0x4ff   :  { %3228 = vmatpush1.bf16.msra.mxu0 %v9805_v40  ;;  %6758 = vmatpush3.bf16.msra.mxu1 %v9808_v4  ;;  %v9825_v4 = vld [vmem:[#allocation2 + $0x30] ss:$12 sps:$4 sm:$0xff]  }
 0x500   :  { %3229 = vmatprep.subr.bf16.mxu0 %v9811_v5  ;;  %6759 = vmatprep.subr.bf16.mxu1 %v11718_v51  ;;  %11875 = vst [vmem:[#allocation57_spill] sm:$0xff] %v9825_v4  ;;  %v9828_v5 = vld [vmem:[#allocation2 + $0x38] ss:$12 sps:$4 sm:$0xff]   ;;  %v9831_v40 = vld [vmem:[#allocation2 + $0x1c] ss:$12 sps:$4 sm:$0xff]  }
 0x501   :  { %11876 = vst [vmem:[#allocation58_spill] sm:$0xff] %v9828_v5  ;;  %11877 = vst [vmem:[#allocation59_spill] sm:$0xff] %v9831_v40 }
 0x503   :  { %3230 = vmatpush1.bf16.msra.mxu0 %v9815_v45  ;;  %6760 = vmatpush3.bf16.msra.mxu1 %v9818_v30  ;;  %v9835_v30 = vld [vmem:[#allocation2 + $0x18] ss:$12 sps:$4 sm:$0xff]  }
 0x504   :  { %3231 = vmatprep.subr.bf16.mxu0 %v9821_v59  ;;  %6761 = vmatprep.subr.bf16.mxu1 %v11718_v51  ;;  %11878 = vst [vmem:[#allocation60_spill] sm:$0xff] %v9835_v30  ;;  %v9838_v59 = vld [vmem:[#allocation2 + $0x20] ss:$12 sps:$4 sm:$0xff]   ;;  %v9841_v45 = vld [vmem:[#allocation2 + $0x4] ss:$12 sps:$4 sm:$0xff]  }
 0x505   :  { %11879 = vst [vmem:[#allocation61_spill] sm:$0xff] %v9838_v59  ;;  %11880 = vst [vmem:[#allocation62_spill] sm:$0xff] %v9841_v45 }
 0x507   :  { %3232 = vmatpush1.bf16.msra.mxu0 %v9825_v4  ;;  %6762 = vmatpush3.bf16.msra.mxu1 %v9828_v5  ;;  %v9845_v5 = vld [vmem:[#allocation2] ss:$12 sps:$4 sm:$0xff]  }
 0x508   :  { %3233 = vmatprep.subr.bf16.mxu0 %v9831_v40  ;;  %6763 = vmatprep.subr.bf16.mxu1 %v11718_v51  ;;  %11881 = vst [vmem:[#allocation63_spill] sm:$0xff] %v9845_v5  ;;  %v9848_v40 = vld [vmem:[#allocation2 + $0x8] ss:$12 sps:$4 sm:$0xff]   ;;  %v9851_v4 = vld [vmem:[#allocation4 + $0xac] ss:$12 sps:$4 sm:$0xff]  }
 0x509   :  { %11882 = vst [vmem:[#allocation64_spill] sm:$0xff] %v9848_v40  ;;  %11883 = vst [vmem:[#allocation65_spill] sm:$0xff] %v9851_v4 }
 0x50b   :  { %3234 = vmatpush1.bf16.msra.mxu0 %v9835_v30  ;;  %6764 = vmatpush3.bf16.msra.mxu1 %v9838_v59 }
 0x50c   :  { %3235 = vmatprep.subr.bf16.mxu0 %v9841_v45  ;;  %6765 = vmatprep.subr.bf16.mxu1 %v11718_v51 }
 0x50f   :  { %3236 = vmatpush1.bf16.msra.mxu0 %v9845_v5  ;;  %6766 = vmatpush3.bf16.msra.mxu1 %v9848_v40 }
 0x510   :  { %3366 = vmatprep.subr.bf16.mxu0 %v9851_v4  ;;  %6771 = vmatprep.subr.bf16.mxu1 %v11718_v51 }
 0x532   :  { %v2729_v59 = vpop.f32.mrf.mxu0  ;;  %v2770_v30 = vpop.f32.mrf.mxu1 }
 0x533   :  { %v2778_v53 = vrot.slane %v2729_v59, 4  ;;  %v2780_v45 = vrot.slane %v2729_v59, 5 }
 0x534   :  { %v2731_v43 = vpop.f32.mrf.mxu0  ;;  %v6669_v52 = vpop.f32.mrf.mxu1 }
 0x535   :  { %v2786_v14 = vadd.f32 %v2778_v53, %v8467_v0  ;;  %v2788_v5 = vadd.f32 %v2780_v45, %v11800_v1  ;;  %v2779_v20 = vrot.slane %v2731_v43, 4  ;;  %v2781_v36 = vrot.slane %v2731_v43, 5 }
 0x536   :  { %v2733_v50 = vpop.f32.mrf.mxu0  ;;  %v2773_v22 = vpop.f32.mrf.mxu1  ;;  %v2832_v1 = vrot.slane %v9496_v39, 7 }
 0x537   :  { %v5943_v46 = vmul.f32 -1.442695, %v2786_v14  ;;  %v5945_v40 = vmul.f32 -1.442695, %v2788_v5  ;;  %v2787_v47 = vadd.f32 %v2779_v20, %v11801_v11  ;;  %v2789_v59 = vadd.f32 %v2781_v36, %v11802_v15 }
 0x538   :  { %v2734_v41 = vpop.f32.mrf.mxu0  ;;  %v6670_v4 = vpop.f32.mrf.mxu1 }
 0x539   :  { %7502 = vpow2.f32 %v5943_v46  ;;  %v5944_v9 = vmul.f32 -1.442695, %v2787_v47  ;;  %v5946_v52 = vmul.f32 -1.442695, %v2789_v59  ;;  %v9862_v46 = vld [vmem:[%s11320_s5] ss:$0 sm:$0xff] }
 0x53a   :  { %7504 = vpow2.f32 %v5945_v40  ;;  %11884 = vst [vmem:[#allocation66_spill] sm:$0xff] %v9862_v46  ;;  %v2814_v20 = vadd.f32 %v9862_v46, %v2770_v30 }
 0x53b   :  { %7506 = vpow2.f32 %v5944_v9 }
 0x53c   :  { %7508 = vpow2.f32 %v5946_v52  ;;  %v2816_v5 = vrot.slane %v2814_v20, 4  ;;  %v2817_v52 = vrot.slane %v2814_v20, 5 }
 0x546   :  { %v7503_v53 = vpop.eup %7502 }
 0x547   :  { %v7505_v45 = vpop.eup %7504  ;;  %v2802_v50 = vadd.f32 1.0, %v7503_v53 }
 0x548   :  { %v2804_v22 = vadd.f32 1.0, %v7505_v45  ;;  %v7507_v14 = vpop.eup %7506 }
 0x549   :  { %7510 = vrcp.f32 %v2802_v50  ;;  %v7509_v43 = vpop.eup %7508  ;;  %v2803_v9 = vadd.f32 1.0, %v7507_v14 }
 0x54a   :  { %7512 = vrcp.f32 %v2804_v22  ;;  %v2805_v41 = vadd.f32 1.0, %v7509_v43 }
 0x54b   :  { %7514 = vrcp.f32 %v2803_v9 }
 0x54c   :  { %7516 = vrcp.f32 %v2805_v41 }
 0x552   :  { %v2874_v36 = vpop.f32.mrf.mxu0  ;;  %v9865_v47 = vpop.f32.mrf.mxu1 }
 0x554   :  { %v9867_v40 = vpop.f32.mrf.mxu0  ;;  %v6689_v4 = vpop.f32.mrf.mxu1 }
 0x556   :  { %v7511_v59 = vpop.eup %7510  ;;  %v2878_v53 = vpop.f32.mrf.mxu0 }
 0x557   :  { %v2918_v45 = vpop.f32.mrf.mxu1  ;;  %v7513_v50 = vpop.eup %7512  ;;  %v2820_v22 = vmul.f32 %v7511_v59, %v2816_v5 }
 0x558   :  { %v2821_v15 = vmul.f32 %v7513_v50, %v2817_v52  ;;  %v2879_v11 = vpop.f32.mrf.mxu0  ;;  %v7515_v43 = vpop.eup %7514  ;;  %v2833_v45 = vrot.slane %v9498_v24, 7  ;;  %v2875_v24 = vadd.f32 %v2874_v36, %v8753_v35  ;;  %v9889_v36 = vld [vmem:[#allocation4 + $0xa8] ss:$12 sps:$4 sm:$0xff]  }
 0x559   :  { %v6690_v30 = vpop.f32.mrf.mxu1  ;;  %v2822_v46 = vadd.f32 %v2820_v22, %v8490_v7  ;;  %v7517_v4 = vpop.eup %7516  ;;  %v2826_v20 = vsub.f32 1.0, %v7515_v43  ;;  %v2836_v41 = vmul.f32 %v7515_v43, %v2832_v1 }
 0x55a   :  { %v2823_v14 = vadd.f32 %v2821_v15, %v11804_v10  ;;  %v2827_v5 = vsub.f32 1.0, %v7517_v4  ;;  %v2837_v52 = vmul.f32 %v7517_v4, %v2833_v45 }
 0x55b   :  { %7518 = vtanh.f32 %v2822_v46 }
 0x55c   :  { %7520 = vtanh.f32 %v2823_v14 }
 0x568   :  { %v7519_v53 = vpop.eup %7518 }
 0x569   :  { %v7521_v9 = vpop.eup %7520  ;;  %v2828_v59 = vmul.f32 %v7519_v53, %v2826_v20 }
 0x56a   :  { %v2829_v11 = vmul.f32 %v7521_v9, %v2827_v5 }
 0x56b   :  { %v9873_v50 = vadd.f32 %v2836_v41, %v2828_v59 }
 0x56c   :  { %v9875_v22 = vadd.f32 %v2837_v52, %v2829_v11  ;;  %v9892_v11 = vld [vmem:[#allocation4 + $0xb0] ss:$12 sps:$4 sm:$0xff]  }
 0x56d   :  { %v3210_v15 = vpack.c.bf16 %v9873_v50, %v9873_v50 }
 0x56e   :  { %v3211_v39 = vpack.c.bf16 %v9875_v22, %v9875_v22 }
 0x56f   :  { %v3214_v46 = vunpack.c.l.b16 %v3210_v15  ;;  %v9895_v15 = vld [vmem:[#allocation4 + $0x94] ss:$12 sps:$4 sm:$0xff]  }
 0x570   :  { %v3215_v30 = vunpack.c.l.b16 %v3211_v39  ;;  %v2877_v39 = vadd.f32 %v9867_v40, %v8762_v42  ;;  %v9917_v40 = vld [vmem:[#allocation4 + $0x80] ss:$12 sps:$4 sm:$0xff]  }
 0x571   :  { %v3216_v14 = vrot.slane %v3214_v46, 4  ;;  %v9904_v46 = vld [vmem:[#allocation4 + $0x90] ss:$12 sps:$4 sm:$0xff]   ;;  %11885 = vst [vmem:[#allocation67_spill] sm:$0xff] %v9917_v40 }
 0x572   :  { %v2956_v10 = vpop.f32.mrf.mxu0  ;;  %v9882_v20 = vpop.f32.mrf.mxu1  ;;  %v3217_v1 = vrot.slane %v3215_v30, 3  ;;  %v9907_v30 = vld [vmem:[#allocation4 + $0x98] ss:$12 sps:$4 sm:$0xff]  }
 0x573   :  { %v3003_v43 = vadd.f32 %v2956_v10, %v2875_v24  ;;  %v9910_v24 = vld [vmem:[#allocation4 + $0x7c] ss:$12 sps:$4 sm:$0xff]  }
 0x574   :  { %v2958_v4 = vpop.f32.mrf.mxu0  ;;  %v6709_v53 = vpop.f32.mrf.mxu1  ;;  %v3218_v45 = vsel %vm438_vm3, %v3217_v1, %v3216_v14  ;;  %v9914_v1 = vld [vmem:[#allocation4 + $0x78] ss:$12 sps:$4 sm:$0xff]  }
 0x575   :  { %v5947_v5 = vmul.f32 -1.442695, %v3003_v43  ;;  %v9885_v9 = vpack.c.b16 %v3218_v45, %v3218_v45  ;;  %v3004_v14 = vadd.f32 %v2958_v4, %v2877_v39  ;;  %v9920_v43 = vld [vmem:[#allocation4 + $0x64] ss:$12 sps:$4 sm:$0xff]   ;;  %v9927_v4 = vld [vmem:[#allocation4 + $0x68] ss:$12 sps:$4 sm:$0xff]  }
 0x576   :  { %v2960_v59 = vpop.f32.mrf.mxu0  ;;  %v3000_v41 = vpop.f32.mrf.mxu1  ;;  %11886 = vst [vmem:[#allocation68_spill] sm:$0xff] %v9920_v43  ;;  %11888 = vst [vmem:[#allocation70_spill] sm:$0xff] %v9927_v4  ;;  %v9940_v39 = vld [vmem:[#allocation4 + $0x34] ss:$12 sps:$4 sm:$0xff]  }
 0x577   :  { %7522 = vpow2.f32 %v5947_v5  ;;  %3254 = vmatmul.mubr.bf16.vlgmr.msra.gmra.mxu0 %v9885_v9  ;;  %6768 = vmatmul.mubr.bf16.vlgmr.msra.gmra.mxu1 %v9885_v9  ;;  %v5948_v53 = vmul.f32 -1.442695, %v3004_v14  ;;  %v9924_v5 = vld [vmem:[#allocation4 + $0x60] ss:$12 sps:$4 sm:$0xff]   ;;  %11892 = vst [vmem:[#allocation74_spill] sm:$0xff] %v9940_v39 }
 0x578   :  { %3367 = vmatpush1.bf16.msra.mxu0 %v9889_v36  ;;  %6772 = vmatpush3.bf16.msra.mxu1 %v9892_v11  ;;  %v2961_v10 = vpop.f32.mrf.mxu0  ;;  %v6710_v52 = vpop.f32.mrf.mxu1  ;;  %11887 = vst [vmem:[#allocation69_spill] sm:$0xff] %v9924_v5  ;;  %v9930_v41 = vld [vmem:[#allocation4 + $0x4c] ss:$12 sps:$4 sm:$0xff]   ;;  %v9944_v14 = vld [vmem:[#allocation4 + $0x30] ss:$12 sps:$4 sm:$0xff]  }
 0x579   :  { %3368 = vmatprep.subr.bf16.mxu0 %v9895_v15  ;;  %6773 = vmatprep.subr.bf16.mxu1 %v11718_v51  ;;  %11889 = vst [vmem:[#allocation71_spill] sm:$0xff] %v9930_v41  ;;  %7524 = vpow2.f32 %v5948_v53  ;;  %v9934_v10 = vld [vmem:[#allocation4 + $0x48] ss:$12 sps:$4 sm:$0xff]   ;;  %v9937_v52 = vld [vmem:[#allocation4 + $0x50] ss:$12 sps:$4 sm:$0xff]   ;;  %11893 = vst [vmem:[#allocation75_spill] sm:$0xff] %v9944_v14 }
 0x57a   :  { %3398 = vmatprep.mubr.bf16.mxu0 %v11648_v54  ;;  %6787 = vmatprep.mubr.msk.bf16.mxu1 %vm8177_vm2, %v11718_v51  ;;  %11890 = vst [vmem:[#allocation72_spill] sm:$0xff] %v9934_v10  ;;  %11891 = vst [vmem:[#allocation73_spill] sm:$0xff] %v9937_v52  ;;  %v9947_v53 = vld [vmem:[#allocation4 + $0x38] ss:$12 sps:$4 sm:$0xff]  }
 0x57b   :  { %11894 = vst [vmem:[#allocation76_spill] sm:$0xff] %v9947_v53 }
 0x57c   :  { %3369 = vmatpush1.bf16.msra.mxu0 %v9904_v46  ;;  %6774 = vmatpush3.bf16.msra.mxu1 %v9907_v30 }
 0x57d   :  { %3370 = vmatprep.subr.bf16.mxu0 %v9910_v24  ;;  %6775 = vmatprep.subr.bf16.mxu1 %v11718_v51 }
 0x580   :  { %3371 = vmatpush1.bf16.msra.mxu0 %v9914_v1  ;;  %6776 = vmatpush3.bf16.msra.mxu1 %v9917_v40  ;;  %v2916_v40 = vadd.f32 %v9865_v47, %v8804_v8  ;;  %v9999_v47 = vld [vmem:[#allocation6 + $0x90] ss:$12 sps:$4 sm:$0xff]  }
 0x581   :  { %3372 = vmatprep.subr.bf16.mxu0 %v9920_v43  ;;  %6777 = vmatprep.subr.bf16.mxu1 %v11718_v51  ;;  %v9978_v43 = vld [vmem:[#allocation6 + $0xac] ss:$12 sps:$4 sm:$0xff]   ;;  %11902 = vst [vmem:[#allocation84_spill] sm:$0xff] %v9999_v47 }
 0x584   :  { %v7523_v45 = vpop.eup %7522  ;;  %3373 = vmatpush1.bf16.msra.mxu0 %v9924_v5  ;;  %6778 = vmatpush3.bf16.msra.mxu1 %v9927_v4 }
 0x585   :  { %v3011_v59 = vadd.f32 1.0, %v7523_v45  ;;  %3374 = vmatprep.subr.bf16.mxu0 %v9930_v41  ;;  %6779 = vmatprep.subr.bf16.mxu1 %v11718_v51  ;;  %v9950_v45 = vld [vmem:[#allocation4 + $0x1c] ss:$12 sps:$4 sm:$0xff]  }
 0x586   :  { %11895 = vst [vmem:[#allocation77_spill] sm:$0xff] %v9950_v45 }
 0x587   :  { %7526 = vrcp.f32 %v3011_v59  ;;  %v9954_v59 = vld [vmem:[#allocation4 + $0x18] ss:$12 sps:$4 sm:$0xff]  }
 0x588   :  { %3375 = vmatpush1.bf16.msra.mxu0 %v9934_v10  ;;  %6780 = vmatpush3.bf16.msra.mxu1 %v9937_v52  ;;  %11896 = vst [vmem:[#allocation78_spill] sm:$0xff] %v9954_v59  ;;  %v9960_v52 = vld [vmem:[#allocation4 + $0x4] ss:$12 sps:$4 sm:$0xff]   ;;  %v3017_v10 = vadd.f32 %v9543_v28, %v9882_v20 }
 0x589   :  { %3376 = vmatprep.subr.bf16.mxu0 %v9940_v39  ;;  %6781 = vmatprep.subr.bf16.mxu1 %v11718_v51  ;;  %v9957_v39 = vld [vmem:[#allocation4 + $0x20] ss:$12 sps:$4 sm:$0xff]   ;;  %11898 = vst [vmem:[#allocation80_spill] sm:$0xff] %v9960_v52 }
 0x58a   :  { %11897 = vst [vmem:[#allocation79_spill] sm:$0xff] %v9957_v39 }
 0x58c   :  { %3377 = vmatpush1.bf16.msra.mxu0 %v9944_v14  ;;  %6782 = vmatpush3.bf16.msra.mxu1 %v9947_v53 }
 0x58d   :  { %3378 = vmatprep.subr.bf16.mxu0 %v9950_v45  ;;  %6783 = vmatprep.subr.bf16.mxu1 %v11718_v51  ;;  %v7525_v45 = vpop.eup %7524 }
 0x590   :  { %3379 = vmatpush1.bf16.msra.mxu0 %v9954_v59  ;;  %6784 = vmatpush3.bf16.msra.mxu1 %v9957_v39  ;;  %v9970_v59 = vld [vmem:[#allocation4] ss:$12 sps:$4 sm:$0xff]   ;;  %v9973_v39 = vld [vmem:[#allocation4 + $0x8] ss:$12 sps:$4 sm:$0xff]  }
 0x591   :  { %3380 = vmatprep.subr.bf16.mxu0 %v9960_v52  ;;  %6785 = vmatprep.subr.bf16.mxu1 %v11718_v51  ;;  %11899 = vst [vmem:[#allocation81_spill] sm:$0xff] %v9970_v59  ;;  %11900 = vst [vmem:[#allocation82_spill] sm:$0xff] %v9973_v39 }
 0x592   :  { %v9964_v53 = vpop.f32.mrf.mxu0  ;;  %v9966_v14 = vpop.f32.mrf.mxu1 }
 0x594   :  { %v7527_v41 = vpop.eup %7526  ;;  %3381 = vmatpush1.bf16.msra.mxu0 %v9970_v59  ;;  %6786 = vmatpush3.bf16.msra.mxu1 %v9973_v39  ;;  %v9976_v52 = vpop.f32.mrf.mxu0  ;;  %v3012_v59 = vadd.f32 1.0, %v7525_v45  ;;  %v9986_v39 = vld [vmem:[#allocation6 + $0xa8] ss:$12 sps:$4 sm:$0xff]   ;;  %v10012_v45 = vld [vmem:[#allocation6 + $0x80] ss:$12 sps:$4 sm:$0xff]  }
 0x595   :  { %v6729_v4 = vpop.f32.mrf.mxu1  ;;  %v3018_v5 = vmul.f32 %v7527_v41, %v3017_v10  ;;  %3448 = vmatprep.subr.bf16.mxu0 %v9978_v43  ;;  %6791 = vmatprep.subr.bf16.mxu1 %v11718_v51  ;;  %11906 = vst [vmem:[#allocation88_spill] sm:$0xff] %v10012_v45 }
 0x596   :  { %v3063_v28 = vpop.f32.mrf.mxu0  ;;  %v9989_v4 = vld [vmem:[#allocation6 + $0xb0] ss:$12 sps:$4 sm:$0xff]   ;;  %7528 = vrcp.f32 %v3012_v59 }
 0x597   :  { %v3103_v20 = vpop.f32.mrf.mxu1  ;;  %3399 = vmatmul.mubr.bf16.vlgmr.msra.gmra.mxu0 %v9885_v9  ;;  %6788 = vmatmul.mubr.bf16.vlgmr.msra.gmra.mxu1 %v9885_v9  ;;  %v3019_v28 = vadd.f32 %v3018_v5, %v2916_v40  ;;  %v10002_v9 = vld [vmem:[#allocation6 + $0x98] ss:$12 sps:$4 sm:$0xff]   ;;  %v10005_v40 = vld [vmem:[#allocation6 + $0x7c] ss:$12 sps:$4 sm:$0xff]  }
 0x598   :  { %3449 = vmatpush1.bf16.msra.mxu0 %v9986_v39  ;;  %6792 = vmatpush3.bf16.msra.mxu1 %v9989_v4  ;;  %v3064_v41 = vpop.f32.mrf.mxu0  ;;  %v9992_v20 = vld [vmem:[#allocation6 + $0x94] ss:$12 sps:$4 sm:$0xff]   ;;  %11903 = vst [vmem:[#allocation85_spill] sm:$0xff] %v10002_v9  ;;  %11904 = vst [vmem:[#allocation86_spill] sm:$0xff] %v10005_v40  ;;  %v10009_v5 = vld [vmem:[#allocation6 + $0x78] ss:$12 sps:$4 sm:$0xff]  }
 0x599   :  { %v6730_v10 = vpop.f32.mrf.mxu1  ;;  %11901 = vst [vmem:[#allocation83_spill] sm:$0xff] %v9992_v20  ;;  %3450 = vmatprep.subr.bf16.mxu0 %v9992_v20  ;;  %6793 = vmatprep.subr.bf16.mxu1 %v11718_v51  ;;  %7530 = vtanh.f32 %v3019_v28  ;;  %11905 = vst [vmem:[#allocation87_spill] sm:$0xff] %v10009_v5  ;;  %v10015_v59 = vld [vmem:[#allocation6 + $0x64] ss:$12 sps:$4 sm:$0xff]   ;;  %v10019_v41 = vld [vmem:[#allocation6 + $0x60] ss:$12 sps:$4 sm:$0xff]  }
 0x59a   :  { %3480 = vmatprep.mubr.bf16.mxu0 %v11648_v54  ;;  %6807 = vmatprep.mubr.msk.bf16.mxu1 %vm8177_vm2, %v11718_v51  ;;  %11907 = vst [vmem:[#allocation89_spill] sm:$0xff] %v10015_v59  ;;  %11908 = vst [vmem:[#allocation90_spill] sm:$0xff] %v10019_v41  ;;  %v10022_v10 = vld [vmem:[#allocation6 + $0x68] ss:$12 sps:$4 sm:$0xff]   ;;  %v10025_v28 = vld [vmem:[#allocation6 + $0x4c] ss:$12 sps:$4 sm:$0xff]  }
 0x59b   :  { %11909 = vst [vmem:[#allocation91_spill] sm:$0xff] %v10022_v10  ;;  %11910 = vst [vmem:[#allocation92_spill] sm:$0xff] %v10025_v28  ;;  %v10053_v20 = vld [vmem:[#allocation6 + $0x20] ss:$12 sps:$4 sm:$0xff]  }
 0x59c   :  { %3451 = vmatpush1.bf16.msra.mxu0 %v9999_v47  ;;  %6794 = vmatpush3.bf16.msra.mxu1 %v10002_v9  ;;  %v10042_v9 = vld [vmem:[#allocation6 + $0x38] ss:$12 sps:$4 sm:$0xff]   ;;  %11918 = vst [vmem:[#allocation101_spill] sm:$0xff] %v10053_v20 }
 0x59d   :  { %3452 = vmatprep.subr.bf16.mxu0 %v10005_v40  ;;  %6795 = vmatprep.subr.bf16.mxu1 %v11718_v51  ;;  %11915 = vst [vmem:[#allocation97_spill] sm:$0xff] %v10042_v9  ;;  %v10050_v47 = vld [vmem:[#allocation6 + $0x18] ss:$12 sps:$4 sm:$0xff]  }
 0x59e   :  { %11917 = vst [vmem:[#allocation100_spill] sm:$0xff] %v10050_v47 }
 0x5a0   :  { %3453 = vmatpush1.bf16.msra.mxu0 %v10009_v5  ;;  %6796 = vmatpush3.bf16.msra.mxu1 %v10012_v45  ;;  %v10029_v5 = vld [vmem:[#allocation6 + $0x48] ss:$12 sps:$4 sm:$0xff]  }
 0x5a1   :  { %3454 = vmatprep.subr.bf16.mxu0 %v10015_v59  ;;  %6797 = vmatprep.subr.bf16.mxu1 %v11718_v51  ;;  %11911 = vst [vmem:[#allocation93_spill] sm:$0xff] %v10029_v5  ;;  %v10032_v59 = vld [vmem:[#allocation6 + $0x50] ss:$12 sps:$4 sm:$0xff]  }
 0x5a2   :  { %11912 = vst [vmem:[#allocation94_spill] sm:$0xff] %v10032_v59 }
 0x5a3   :  { %v7529_v45 = vpop.eup %7528 }
 0x5a4   :  { %3455 = vmatpush1.bf16.msra.mxu0 %v10019_v41  ;;  %6798 = vmatpush3.bf16.msra.mxu1 %v10022_v10  ;;  %v10035_v41 = vld [vmem:[#allocation6 + $0x34] ss:$12 sps:$4 sm:$0xff]   ;;  %v3021_v40 = vsub.f32 1.0, %v7529_v45 }
 0x5a5   :  { %3456 = vmatprep.subr.bf16.mxu0 %v10025_v28  ;;  %6799 = vmatprep.subr.bf16.mxu1 %v11718_v51  ;;  %11913 = vst [vmem:[#allocation95_spill] sm:$0xff] %v10035_v41  ;;  %v10039_v28 = vld [vmem:[#allocation6 + $0x30] ss:$12 sps:$4 sm:$0xff]  }
 0x5a6   :  { %v7531_v10 = vpop.eup %7530  ;;  %11914 = vst [vmem:[#allocation96_spill] sm:$0xff] %v10039_v28 }
 0x5a8   :  { %3457 = vmatpush1.bf16.msra.mxu0 %v10029_v5  ;;  %6800 = vmatpush3.bf16.msra.mxu1 %v10032_v59  ;;  %v10045_v5 = vld [vmem:[#allocation6 + $0x1c] ss:$12 sps:$4 sm:$0xff]   ;;  %v3022_v59 = vmul.f32 %v7531_v10, %v3021_v40 }
 0x5a9   :  { %3458 = vmatprep.subr.bf16.mxu0 %v10035_v41  ;;  %6801 = vmatprep.subr.bf16.mxu1 %v11718_v51  ;;  %11916 = vst [vmem:[#allocation98_spill] sm:$0xff] %v10045_v5  ;;  %v3023_v41 = vmul.f32 %v7529_v45, %v9587_v57 }
 0x5ab   :  { %v10062_v40 = vadd.f32 %v3023_v41, %v3022_v59 }
 0x5ac   :  { %3459 = vmatpush1.bf16.msra.mxu0 %v10039_v28  ;;  %6802 = vmatpush3.bf16.msra.mxu1 %v10042_v9  ;;  %v3060_v9 = vadd.f32 %v9964_v53, %v11840_v18  ;;  %v10058_v28 = vld [vmem:[#allocation6 + $0x4] ss:$12 sps:$4 sm:$0xff]  }
 0x5ad   :  { %3460 = vmatprep.subr.bf16.mxu0 %v10045_v5  ;;  %6803 = vmatprep.subr.bf16.mxu1 %v11718_v51  ;;  %11919 = vst [vmem:[#allocation102_spill] sm:$0xff] %v10058_v28  ;;  %v10064_v5 = vld [vmem:[#allocation6] ss:$12 sps:$4 sm:$0xff]  }
 0x5b0   :  { %3461 = vmatpush1.bf16.msra.mxu0 %v10050_v47  ;;  %6804 = vmatpush3.bf16.msra.mxu1 %v10053_v20  ;;  %v10067_v47 = vld [vmem:[#allocation6 + $0x8] ss:$12 sps:$4 sm:$0xff]  }
 0x5b1   :  { %3462 = vmatprep.subr.bf16.mxu0 %v10058_v28  ;;  %6805 = vmatprep.subr.bf16.mxu1 %v11718_v51  ;;  %v3447_v28 = vpack.c.bf16 %v10062_v40, %v10062_v40 }
 0x5b2   :  { %v3141_v57 = vpop.f32.mrf.mxu0  ;;  %v3182_v45 = vpop.f32.mrf.mxu1 }
 0x5b3   :  { %v3188_v10 = vadd.f32 %v3141_v57, %v3060_v9 }
 0x5b4   :  { %3463 = vmatpush1.bf16.msra.mxu0 %v10064_v5  ;;  %6806 = vmatpush3.bf16.msra.mxu1 %v10067_v47  ;;  %v3143_v53 = vpop.f32.mrf.mxu0  ;;  %v6749_v18 = vpop.f32.mrf.mxu1 }
 0x5b5   :  { %v5949_v20 = vmul.f32 -1.442695, %v3188_v10  ;;  %3551 = vmatprep.subr.bf16.mxu0 %v9597_v48  ;;  %6811 = vmatprep.subr.bf16.mxu1 %v11718_v51  ;;  %v3062_v18 = vadd.f32 %v9976_v52, %v9337_v27  ;;  %v11933_v52 = vld [vmem:[#allocation38_spill] sm:$0xff]  ;;  %v11936_v10 = vld [vmem:[#allocation36_spill] sm:$0xff] }
 0x5b6   :  { %v3145_v59 = vpop.f32.mrf.mxu0  ;;  %v3185_v9 = vpop.f32.mrf.mxu1 }
 0x5b7   :  { %7532 = vpow2.f32 %v5949_v20  ;;  %3481 = vmatmul.mubr.bf16.vlgmr.msra.gmra.mxu0 %v3447_v28  ;;  %6808 = vmatmul.mubr.bf16.vlgmr.msra.gmra.mxu1 %v3447_v28  ;;  %v3189_v48 = vadd.f32 %v3143_v53, %v3062_v18  ;;  %v11937_v53 = vld [vmem:[#allocation39_spill] sm:$0xff]  ;;  %v11938_v59 = vld [vmem:[#allocation41_spill] sm:$0xff] }
 0x5b8   :  { %3552 = vmatpush1.bf16.msra.mxu0 %v9603_v61  ;;  %6812 = vmatpush3.bf16.msra.mxu1 %v9606_v17  ;;  %v3146_v41 = vpop.f32.mrf.mxu0  ;;  %v6750_v57 = vpop.f32.mrf.mxu1 }
 0x5b9   :  { %3553 = vmatprep.subr.bf16.mxu0 %v9609_v23  ;;  %6813 = vmatprep.subr.bf16.mxu1 %v11718_v51  ;;  %v5950_v61 = vmul.f32 -1.442695, %v3189_v48  ;;  %v11940_v41 = vld [vmem:[#allocation42_spill] sm:$0xff]  ;;  %v11941_v57 = vld [vmem:[#allocation43_spill] sm:$0xff] }
 0x5ba   :  { %3583 = vmatprep.mubr.bf16.mxu0 %v11648_v54  ;;  %6827 = vmatprep.mubr.msk.bf16.mxu1 %vm8177_vm2, %v11718_v51  ;;  %v10157_v48 = vld [vmem:[#allocation2 + $0xac] ss:$12 sps:$4 sm:$0xff]  }
 0x5bb   :  { %7534 = vpow2.f32 %v5950_v61  ;;  %v10161_v61 = vld [vmem:[#allocation2 + $0xa8] ss:$12 sps:$4 sm:$0xff]  }
 0x5bc   :  { %3554 = vmatpush1.bf16.msra.mxu0 %v9618_v33  ;;  %6814 = vmatpush3.bf16.msra.mxu1 %v9621_v16  ;;  %v10110_v16 = vld [vmem:[%s11328_s13] ss:$0 sm:$0xff] }
 0x5bd   :  { %3555 = vmatprep.subr.bf16.mxu0 %v9624_v19  ;;  %6815 = vmatprep.subr.bf16.mxu1 %v11718_v51  ;;  %v3202_v19 = vadd.f32 %v10110_v16, %v3182_v45 }
 0x5c0   :  { %3556 = vmatpush1.bf16.msra.mxu0 %v9628_v34  ;;  %6816 = vmatpush3.bf16.msra.mxu1 %v9631_v25 }
 0x5c1   :  { %3557 = vmatprep.subr.bf16.mxu0 %v9634_v49  ;;  %6817 = vmatprep.subr.bf16.mxu1 %v11718_v51  ;;  %v3101_v49 = vadd.f32 %v9966_v14, %v9387_v55  ;;  %v11934_v14 = vld [vmem:[#allocation35_spill] sm:$0xff] }
 0x5c4   :  { %v7533_v17 = vpop.eup %7532  ;;  %3558 = vmatpush1.bf16.msra.mxu0 %v9638_v21  ;;  %6818 = vmatpush3.bf16.msra.mxu1 %v9641_v56 }
 0x5c5   :  { %v3196_v23 = vadd.f32 1.0, %v7533_v17  ;;  %3559 = vmatprep.subr.bf16.mxu0 %v9644_v26  ;;  %6819 = vmatprep.subr.bf16.mxu1 %v11718_v51  ;;  %v11920_v26 = vld [vmem:[#allocation19_spill] sm:$0xff]  ;;  %v11942_v17 = vld [vmem:[#allocation44_spill] sm:$0xff] }
 0x5c7   :  { %7536 = vrcp.f32 %v3196_v23  ;;  %v10165_v23 = vld [vmem:[#allocation2 + $0x94] ss:$12 sps:$4 sm:$0xff]  }
 0x5c8   :  { %3560 = vmatpush1.bf16.msra.mxu0 %v9648_v37  ;;  %6820 = vmatpush3.bf16.msra.mxu1 %v9651_v29  ;;  %v7535_v33 = vpop.eup %7534  ;;  %v11921_v37 = vld [vmem:[#allocation29_spill] sm:$0xff]  ;;  %v11922_v29 = vld [vmem:[#allocation24_spill] sm:$0xff] }
 0x5c9   :  { %3561 = vmatprep.subr.bf16.mxu0 %v9654_v62  ;;  %6821 = vmatprep.subr.bf16.mxu1 %v11718_v51  ;;  %v3197_v21 = vadd.f32 1.0, %v7535_v33  ;;  %v11923_v62 = vld [vmem:[#allocation26_spill] sm:$0xff]  ;;  %v10172_v33 = vld [vmem:[#allocation2 + $0x90] ss:$12 sps:$4 sm:$0xff]  }
 0x5cb   :  { %7538 = vrcp.f32 %v3197_v21  ;;  %v11946_v21 = vld [vmem:[#allocation50_spill] sm:$0xff] }
 0x5cc   :  { %3562 = vmatpush1.bf16.msra.mxu0 %v9658_v38  ;;  %6822 = vmatpush3.bf16.msra.mxu1 %v9661_v31  ;;  %v11924_v38 = vld [vmem:[#allocation25_spill] sm:$0xff]  ;;  %v11925_v31 = vld [vmem:[#allocation28_spill] sm:$0xff] }
 0x5cd   :  { %3563 = vmatprep.subr.bf16.mxu0 %v9664_v13  ;;  %6823 = vmatprep.subr.bf16.mxu1 %v11718_v51  ;;  %v11926_v13 = vld [vmem:[#allocation31_spill] sm:$0xff] }
 0x5d0   :  { %3564 = vmatpush1.bf16.msra.mxu0 %v9668_v63  ;;  %6824 = vmatpush3.bf16.msra.mxu1 %v9671_v58  ;;  %v11927_v63 = vld [vmem:[#allocation34_spill] sm:$0xff]  ;;  %v11928_v58 = vld [vmem:[#allocation27_spill] sm:$0xff] }
 0x5d1   :  { %3565 = vmatprep.subr.bf16.mxu0 %v9674_v2  ;;  %6825 = vmatprep.subr.bf16.mxu1 %v11718_v51 }
 0x5d4   :  { %v7537_v34 = vpop.eup %7536  ;;  %3566 = vmatpush1.bf16.msra.mxu0 %v9680_v6  ;;  %6826 = vmatpush3.bf16.msra.mxu1 %v9683_v44  ;;  %v11929_v6 = vld [vmem:[#allocation30_spill] sm:$0xff]  ;;  %v11930_v44 = vld [vmem:[#allocation37_spill] sm:$0xff] }
 0x5d5   :  { %v3203_v25 = vmul.f32 %v7537_v34, %v3202_v19  ;;  %3633 = vmatprep.subr.bf16.mxu0 %v9686_v12  ;;  %6831 = vmatprep.subr.bf16.mxu1 %v11718_v51  ;;  %v11931_v12 = vld [vmem:[#allocation32_spill] sm:$0xff]  ;;  %v11943_v19 = vld [vmem:[#allocation47_spill] sm:$0xff] }
 0x5d6   :  { %v10176_v34 = vld [vmem:[#allocation2 + $0x7c] ss:$12 sps:$4 sm:$0xff]  }
 0x5d7   :  { %3584 = vmatmul.mubr.bf16.vlgmr.msra.gmra.mxu0 %v3447_v28  ;;  %6828 = vmatmul.mubr.bf16.vlgmr.msra.gmra.mxu1 %v3447_v28  ;;  %v3204_v56 = vadd.f32 %v3203_v25, %v3101_v49  ;;  %v11935_v28 = vld [vmem:[#allocation40_spill] sm:$0xff]  ;;  %v11945_v49 = vld [vmem:[#allocation49_spill] sm:$0xff] }
 0x5d8   :  { %3634 = vmatpush1.bf16.msra.mxu0 %v9694_v3  ;;  %6832 = vmatpush3.bf16.msra.mxu1 %v9697_v60  ;;  %v7539_v2 = vpop.eup %7538  ;;  %v11944_v25 = vld [vmem:[#allocation48_spill] sm:$0xff] }
 0x5d9   :  { %3635 = vmatprep.subr.bf16.mxu0 %v9700_v32  ;;  %6833 = vmatprep.subr.bf16.mxu1 %v11718_v51  ;;  %7540 = vtanh.f32 %v3204_v56  ;;  %v3206_v60 = vsub.f32 1.0, %v7539_v2  ;;  %v11932_v32 = vld [vmem:[#allocation33_spill] sm:$0xff]  ;;  %v3208_v45 = vmul.f32 %v7539_v2, %v11935_v28  ;;  %v11947_v56 = vld [vmem:[#allocation51_spill] sm:$0xff] }
 0x5da   :  { %3665 = vmatprep.mubr.bf16.mxu0 %v11648_v54  ;;  %6847 = vmatprep.mubr.msk.bf16.mxu1 %vm8177_vm2, %v11718_v51  ;;  %v11957_v2 = vld [vmem:[#allocation61_spill] sm:$0xff]  ;;  %v10459_v28 = vld [vmem:[#allocation9 + $0x50] ss:$12 sps:$4 sm:$0xff]  }
 0x5db   :  { %12013 = vst [vmem:[#allocation37_spill] sm:$0xff] %v10459_v28 }
 0x5dc   :  { %3636 = vmatpush1.bf16.msra.mxu0 %v11920_v26  ;;  %6834 = vmatpush3.bf16.msra.mxu1 %v11921_v37  ;;  %v11948_v26 = vld [vmem:[#allocation52_spill] sm:$0xff]  ;;  %v11949_v37 = vld [vmem:[#allocation53_spill] sm:$0xff] }
 0x5dd   :  { %3637 = vmatprep.subr.bf16.mxu0 %v11922_v29  ;;  %6835 = vmatprep.subr.bf16.mxu1 %v11718_v51  ;;  %v11950_v29 = vld [vmem:[#allocation54_spill] sm:$0xff] }
 0x5e0   :  { %3638 = vmatpush1.bf16.msra.mxu0 %v11923_v62  ;;  %6836 = vmatpush3.bf16.msra.mxu1 %v11924_v38  ;;  %v11951_v62 = vld [vmem:[#allocation55_spill] sm:$0xff]  ;;  %v11952_v38 = vld [vmem:[#allocation56_spill] sm:$0xff] }
 0x5e1   :  { %3639 = vmatprep.subr.bf16.mxu0 %v11925_v31  ;;  %6837 = vmatprep.subr.bf16.mxu1 %v11718_v51  ;;  %v11953_v31 = vld [vmem:[#allocation57_spill] sm:$0xff] }
 0x5e4   :  { %3640 = vmatpush1.bf16.msra.mxu0 %v11926_v13  ;;  %6838 = vmatpush3.bf16.msra.mxu1 %v11927_v63  ;;  %v11954_v13 = vld [vmem:[#allocation58_spill] sm:$0xff]  ;;  %v11955_v63 = vld [vmem:[#allocation59_spill] sm:$0xff] }
 0x5e5   :  { %3641 = vmatprep.subr.bf16.mxu0 %v11928_v58  ;;  %6839 = vmatprep.subr.bf16.mxu1 %v11718_v51  ;;  %v11956_v58 = vld [vmem:[#allocation60_spill] sm:$0xff] }
 0x5e6   :  { %v7541_v3 = vpop.eup %7540 }
 0x5e7   :  { %v3207_v20 = vmul.f32 %v7541_v3, %v3206_v60  ;;  %v11961_v3 = vld [vmem:[#allocation65_spill] sm:$0xff] }
 0x5e8   :  { %3642 = vmatpush1.bf16.msra.mxu0 %v11929_v6  ;;  %6840 = vmatpush3.bf16.msra.mxu1 %v11930_v44  ;;  %v11958_v6 = vld [vmem:[#allocation62_spill] sm:$0xff]  ;;  %v11959_v44 = vld [vmem:[#allocation63_spill] sm:$0xff] }
 0x5e9   :  { %3643 = vmatprep.subr.bf16.mxu0 %v11931_v12  ;;  %6841 = vmatprep.subr.bf16.mxu1 %v11718_v51  ;;  %v10151_v9 = vadd.f32 %v3208_v45, %v3207_v20  ;;  %v11960_v12 = vld [vmem:[#allocation64_spill] sm:$0xff] }
 0x5eb   :  { %11939 = vst [vmem:[#allocation103_spill] sm:$0xff] %v10151_v9  ;;  %v3632_v18 = vpack.c.bf16 %v10151_v9, %v10151_v9 }
 0x5ec   :  { %3644 = vmatpush1.bf16.msra.mxu0 %v11932_v32  ;;  %6842 = vmatpush3.bf16.msra.mxu1 %v11933_v52 }
 0x5ed   :  { %3645 = vmatprep.subr.bf16.mxu0 %v11934_v14  ;;  %6843 = vmatprep.subr.bf16.mxu1 %v11718_v51 }
 0x5f0   :  { %3646 = vmatpush1.bf16.msra.mxu0 %v11936_v10  ;;  %6844 = vmatpush3.bf16.msra.mxu1 %v11937_v53  ;;  %v11962_v53 = vld [vmem:[#allocation16_spill] sm:$0xff] }
 0x5f1   :  { %3647 = vmatprep.subr.bf16.mxu0 %v11938_v59  ;;  %6845 = vmatprep.subr.bf16.mxu1 %v11718_v51 }
 0x5f4   :  { %3648 = vmatpush1.bf16.msra.mxu0 %v11940_v41  ;;  %6846 = vmatpush3.bf16.msra.mxu1 %v11941_v57 }
 0x5f5   :  { %3747 = vmatprep.subr.bf16.mxu0 %v10157_v48  ;;  %6851 = vmatprep.subr.bf16.mxu1 %v11718_v51 }
 0x5f7   :  { %3666 = vmatmul.mubr.bf16.vlgmr.msra.gmra.mxu0 %v3632_v18  ;;  %6848 = vmatmul.mubr.bf16.vlgmr.msra.gmra.mxu1 %v3632_v18 }
 0x5f8   :  { %3748 = vmatpush1.bf16.msra.mxu0 %v10161_v61  ;;  %6852 = vmatpush3.bf16.msra.mxu1 %v11942_v17 }
 0x5f9   :  { %3749 = vmatprep.subr.bf16.mxu0 %v10165_v23  ;;  %6853 = vmatprep.subr.bf16.mxu1 %v11718_v51 }
 0x5fa   :  { %3779 = vmatprep.mubr.bf16.mxu0 %v11648_v54  ;;  %6867 = vmatprep.mubr.msk.bf16.mxu1 %vm8177_vm2, %v11718_v51 }
 0x5fc   :  { %3750 = vmatpush1.bf16.msra.mxu0 %v10172_v33  ;;  %6854 = vmatpush3.bf16.msra.mxu1 %v11943_v19 }
 0x5fd   :  { %3751 = vmatprep.subr.bf16.mxu0 %v10176_v34  ;;  %6855 = vmatprep.subr.bf16.mxu1 %v11718_v51 }
 0x600   :  { %3752 = vmatpush1.bf16.msra.mxu0 %v11944_v25  ;;  %6856 = vmatpush3.bf16.msra.mxu1 %v11945_v49 }
 0x601   :  { %3753 = vmatprep.subr.bf16.mxu0 %v11946_v21  ;;  %6857 = vmatprep.subr.bf16.mxu1 %v11718_v51 }
 0x604   :  { %3754 = vmatpush1.bf16.msra.mxu0 %v11947_v56  ;;  %6858 = vmatpush3.bf16.msra.mxu1 %v11948_v26  ;;  %v11963_v56 = vld [vmem:[#allocation17_spill] sm:$0xff] }
 0x605   :  { %3755 = vmatprep.subr.bf16.mxu0 %v11949_v37  ;;  %6859 = vmatprep.subr.bf16.mxu1 %v11718_v51  ;;  %v11964_v37 = vld [vmem:[#allocation18_spill] sm:$0xff] }
 0x608   :  { %3756 = vmatpush1.bf16.msra.mxu0 %v11950_v29  ;;  %6860 = vmatpush3.bf16.msra.mxu1 %v11951_v62 }
 0x609   :  { %3757 = vmatprep.subr.bf16.mxu0 %v11952_v38  ;;  %6861 = vmatprep.subr.bf16.mxu1 %v11718_v51 }
 0x60c   :  { %3758 = vmatpush1.bf16.msra.mxu0 %v11953_v31  ;;  %6862 = vmatpush3.bf16.msra.mxu1 %v11954_v13 }
 0x60d   :  { %3759 = vmatprep.subr.bf16.mxu0 %v11955_v63  ;;  %6863 = vmatprep.subr.bf16.mxu1 %v11718_v51 }
 0x610   :  { %3760 = vmatpush1.bf16.msra.mxu0 %v11956_v58  ;;  %6864 = vmatpush3.bf16.msra.mxu1 %v11957_v2 }
 0x611   :  { %3761 = vmatprep.subr.bf16.mxu0 %v11958_v6  ;;  %6865 = vmatprep.subr.bf16.mxu1 %v11718_v51 }
 0x614   :  { %3762 = vmatpush1.bf16.msra.mxu0 %v11959_v44  ;;  %6866 = vmatpush3.bf16.msra.mxu1 %v11960_v12  ;;  %v11965_v44 = vld [vmem:[#allocation66_spill] sm:$0xff] }
 0x615   :  { %3892 = vmatprep.subr.bf16.mxu0 %v11961_v3  ;;  %6871 = vmatprep.subr.bf16.mxu1 %v11718_v51 }
 0x637   :  { %v3255_v60 = vpop.f32.mrf.mxu0  ;;  %v3296_v32 = vpop.f32.mrf.mxu1 }
 0x638   :  { %v3304_v52 = vrot.slane %v3255_v60, 3  ;;  %v3306_v14 = vrot.slane %v3255_v60, 4  ;;  %v3340_v12 = vadd.f32 %v11965_v44, %v3296_v32 }
 0x639   :  { %v3257_v20 = vpop.f32.mrf.mxu0  ;;  %v6769_v45 = vpop.f32.mrf.mxu1 }
 0x63a   :  { %v3312_v10 = vadd.f32 %v3304_v52, %v8467_v0  ;;  %v3314_v59 = vadd.f32 %v3306_v14, %v11962_v53  ;;  %v3305_v19 = vrot.slane %v3257_v20, 3  ;;  %v3307_v25 = vrot.slane %v3257_v20, 4 }
 0x63b   :  { %v3259_v41 = vpop.f32.mrf.mxu0  ;;  %v3299_v57 = vpop.f32.mrf.mxu1 }
 0x63c   :  { %v5951_v18 = vmul.f32 -1.442695, %v3312_v10  ;;  %v5953_v17 = vmul.f32 -1.442695, %v3314_v59  ;;  %v3313_v26 = vadd.f32 %v3305_v19, %v11963_v56  ;;  %v3315_v29 = vadd.f32 %v3307_v25, %v11964_v37 }
 0x63d   :  { %v3260_v49 = vpop.f32.mrf.mxu0  ;;  %v6770_v21 = vpop.f32.mrf.mxu1  ;;  %v3342_v10 = vrot.slane %v3340_v12, 3  ;;  %v3343_v41 = vrot.slane %v3340_v12, 4 }
 0x63e   :  { %7542 = vpow2.f32 %v5951_v18  ;;  %v5952_v62 = vmul.f32 -1.442695, %v3313_v26  ;;  %v5954_v38 = vmul.f32 -1.442695, %v3315_v29  ;;  %v11966_v26 = vld [vmem:[#allocation21_spill] sm:$0xff] }
 0x63f   :  { %7544 = vpow2.f32 %v5953_v17 }
 0x640   :  { %7546 = vpow2.f32 %v5952_v62 }
 0x641   :  { %7548 = vpow2.f32 %v5954_v38 }
 0x64b   :  { %v7543_v31 = vpop.eup %7542 }
 0x64c   :  { %v7545_v13 = vpop.eup %7544  ;;  %v3328_v63 = vadd.f32 1.0, %v7543_v31  ;;  %v3358_v31 = vrot.slane %v9873_v50, 7 }
 0x64d   :  { %v3330_v58 = vadd.f32 1.0, %v7545_v13  ;;  %v7547_v2 = vpop.eup %7546 }
 0x64e   :  { %7550 = vrcp.f32 %v3328_v63  ;;  %v7549_v6 = vpop.eup %7548  ;;  %v3329_v52 = vadd.f32 1.0, %v7547_v2 }
 0x64f   :  { %7552 = vrcp.f32 %v3330_v58  ;;  %v3331_v14 = vadd.f32 1.0, %v7549_v6  ;;  %v3359_v58 = vrot.slane %v9875_v22, 7 }
 0x650   :  { %7554 = vrcp.f32 %v3329_v52 }
 0x651   :  { %7556 = vrcp.f32 %v3331_v14 }
 0x657   :  { %v3400_v3 = vpop.f32.mrf.mxu0  ;;  %v10209_v60 = vpop.f32.mrf.mxu1 }
 0x658   :  { %v3401_v22 = vadd.f32 %v3400_v3, %v8753_v35 }
 0x659   :  { %v3402_v20 = vpop.f32.mrf.mxu0  ;;  %v6789_v45 = vpop.f32.mrf.mxu1 }
 0x65b   :  { %v7551_v59 = vpop.eup %7550  ;;  %v3404_v57 = vpop.f32.mrf.mxu0 }
 0x65c   :  { %v3444_v18 = vpop.f32.mrf.mxu1  ;;  %v7553_v17 = vpop.eup %7552  ;;  %v3346_v19 = vmul.f32 %v7551_v59, %v3342_v10 }
 0x65d   :  { %v3347_v25 = vmul.f32 %v7553_v17, %v3343_v41  ;;  %v3405_v49 = vpop.f32.mrf.mxu0  ;;  %v7555_v62 = vpop.eup %7554 }
 0x65e   :  { %v6790_v21 = vpop.f32.mrf.mxu1  ;;  %v3348_v32 = vadd.f32 %v3346_v19, %v8490_v7  ;;  %v7557_v38 = vpop.eup %7556  ;;  %v3352_v13 = vsub.f32 1.0, %v7555_v62  ;;  %v3362_v12 = vmul.f32 %v7555_v62, %v3358_v31 }
 0x65f   :  { %v3349_v29 = vadd.f32 %v3347_v25, %v11966_v26  ;;  %v3353_v2 = vsub.f32 1.0, %v7557_v38  ;;  %v3363_v14 = vmul.f32 %v7557_v38, %v3359_v58  ;;  %v3403_v58 = vadd.f32 %v3402_v20, %v8762_v42  ;;  %v11969_v20 = vld [vmem:[#allocation69_spill] sm:$0xff] }
 0x660   :  { %7558 = vtanh.f32 %v3348_v32 }
 0x661   :  { %7560 = vtanh.f32 %v3349_v29 }
 0x66d   :  { %v7559_v63 = vpop.eup %7558 }
 0x66e   :  { %v7561_v6 = vpop.eup %7560  ;;  %v3354_v44 = vmul.f32 %v7559_v63, %v3352_v13 }
 0x66f   :  { %v3355_v52 = vmul.f32 %v7561_v6, %v3353_v2 }
 0x670   :  { %v10215_v45 = vadd.f32 %v3362_v12, %v3354_v44  ;;  %v11971_v44 = vld [vmem:[#allocation71_spill] sm:$0xff]  ;;  %v11974_v12 = vld [vmem:[#allocation74_spill] sm:$0xff] }
 0x671   :  { %v10217_v10 = vadd.f32 %v3363_v14, %v3355_v52  ;;  %v11975_v52 = vld [vmem:[#allocation75_spill] sm:$0xff]  ;;  %v11976_v14 = vld [vmem:[#allocation76_spill] sm:$0xff] }
 0x672   :  { %v3736_v59 = vpack.c.bf16 %v10215_v45, %v10215_v45 }
 0x673   :  { %v3737_v50 = vpack.c.bf16 %v10217_v10, %v10217_v10 }
 0x674   :  { %v3740_v41 = vunpack.c.l.b16 %v3736_v59  ;;  %v11977_v59 = vld [vmem:[#allocation77_spill] sm:$0xff] }
 0x675   :  { %v3741_v57 = vunpack.c.l.b16 %v3737_v50  ;;  %v11978_v50 = vld [vmem:[#allocation78_spill] sm:$0xff] }
 0x676   :  { %v3742_v18 = vrot.slane %v3740_v41, 5  ;;  %v11979_v41 = vld [vmem:[#allocation79_spill] sm:$0xff] }
 0x677   :  { %v3482_v17 = vpop.f32.mrf.mxu0  ;;  %v3523_v19 = vpop.f32.mrf.mxu1  ;;  %v3743_v25 = vrot.slane %v3741_v57, 4  ;;  %v11980_v57 = vld [vmem:[#allocation80_spill] sm:$0xff] }
 0x678   :  { %v3529_v49 = vadd.f32 %v3482_v17, %v3401_v22 }
 0x679   :  { %v3484_v21 = vpop.f32.mrf.mxu0  ;;  %v6809_v32 = vpop.f32.mrf.mxu1  ;;  %v3744_v29 = vsel %vm438_vm3, %v3743_v25, %v3742_v18  ;;  %v10262_v25 = vld [vmem:[%s11324_s9] ss:$0 sm:$0xff] }
 0x67a   :  { %v5955_v62 = vmul.f32 -1.442695, %v3529_v49  ;;  %v3745_v38 = vpack.c.b16 %v3744_v29, %v3744_v29  ;;  %v3543_v49 = vadd.f32 %v10262_v25, %v3523_v19  ;;  %v11981_v32 = vld [vmem:[#allocation81_spill] sm:$0xff]  ;;  %v11982_v29 = vld [vmem:[#allocation82_spill] sm:$0xff] }
 0x67b   :  { %v3486_v31 = vpop.f32.mrf.mxu0  ;;  %v3526_v13 = vpop.f32.mrf.mxu1 }
 0x67c   :  { %7562 = vpow2.f32 %v5955_v62  ;;  %3780 = vmatmul.mubr.bf16.vlgmr.msra.gmra.mxu0 %v3745_v38  ;;  %6868 = vmatmul.mubr.bf16.vlgmr.msra.gmra.mxu1 %v3745_v38 }
 0x67d   :  { %3893 = vmatpush1.bf16.msra.mxu0 %v9889_v36  ;;  %6872 = vmatpush3.bf16.msra.mxu1 %v9892_v11  ;;  %v3487_v3 = vpop.f32.mrf.mxu0  ;;  %v6810_v63 = vpop.f32.mrf.mxu1  ;;  %v3530_v36 = vadd.f32 %v3484_v21, %v3403_v58  ;;  %v11967_v11 = vld [vmem:[#allocation67_spill] sm:$0xff]  ;;  %v3442_v58 = vadd.f32 %v10209_v60, %v8804_v8  ;;  %v11985_v60 = vld [vmem:[#allocation85_spill] sm:$0xff] }
 0x67e   :  { %3894 = vmatprep.subr.bf16.mxu0 %v9895_v15  ;;  %6873 = vmatprep.subr.bf16.mxu1 %v11718_v51  ;;  %v11968_v15 = vld [vmem:[#allocation68_spill] sm:$0xff] }
 0x67f   :  { %3924 = vmatprep.mubr.bf16.mxu0 %v11648_v54  ;;  %6887 = vmatprep.mubr.msk.bf16.mxu1 %vm8177_vm2, %v11718_v51  ;;  %v5956_v2 = vmul.f32 -1.442695, %v3530_v36 }
 0x681   :  { %3895 = vmatpush1.bf16.msra.mxu0 %v9904_v46  ;;  %6874 = vmatpush3.bf16.msra.mxu1 %v9907_v30  ;;  %v11970_v46 = vld [vmem:[#allocation70_spill] sm:$0xff]  ;;  %7564 = vpow2.f32 %v5956_v2  ;;  %v11983_v2 = vld [vmem:[#allocation83_spill] sm:$0xff] }
 0x682   :  { %3896 = vmatprep.subr.bf16.mxu0 %v9910_v24  ;;  %6875 = vmatprep.subr.bf16.mxu1 %v11718_v51  ;;  %v11972_v24 = vld [vmem:[#allocation72_spill] sm:$0xff] }
 0x685   :  { %3897 = vmatpush1.bf16.msra.mxu0 %v9914_v1  ;;  %6876 = vmatpush3.bf16.msra.mxu1 %v11967_v11  ;;  %v11973_v1 = vld [vmem:[#allocation73_spill] sm:$0xff] }
 0x686   :  { %3898 = vmatprep.subr.bf16.mxu0 %v11968_v15  ;;  %6877 = vmatprep.subr.bf16.mxu1 %v11718_v51 }
 0x689   :  { %v7563_v6 = vpop.eup %7562  ;;  %3899 = vmatpush1.bf16.msra.mxu0 %v11969_v20  ;;  %6878 = vmatpush3.bf16.msra.mxu1 %v11970_v46  ;;  %v11990_v20 = vld [vmem:[#allocation90_spill] sm:$0xff]  ;;  %v11991_v46 = vld [vmem:[#allocation91_spill] sm:$0xff] }
 0x68a   :  { %v3537_v30 = vadd.f32 1.0, %v7563_v6  ;;  %3900 = vmatprep.subr.bf16.mxu0 %v11971_v44  ;;  %6879 = vmatprep.subr.bf16.mxu1 %v11718_v51  ;;  %v11989_v6 = vld [vmem:[#allocation89_spill] sm:$0xff] }
 0x68c   :  { %7566 = vrcp.f32 %v3537_v30  ;;  %v11992_v30 = vld [vmem:[#allocation92_spill] sm:$0xff] }
 0x68d   :  { %3901 = vmatpush1.bf16.msra.mxu0 %v11972_v24  ;;  %6880 = vmatpush3.bf16.msra.mxu1 %v11973_v1  ;;  %v11993_v24 = vld [vmem:[#allocation93_spill] sm:$0xff]  ;;  %v11994_v1 = vld [vmem:[#allocation94_spill] sm:$0xff] }
 0x68e   :  { %3902 = vmatprep.subr.bf16.mxu0 %v11974_v12  ;;  %6881 = vmatprep.subr.bf16.mxu1 %v11718_v51  ;;  %v7565_v17 = vpop.eup %7564  ;;  %v11995_v12 = vld [vmem:[#allocation95_spill] sm:$0xff] }
 0x68f   :  { %v3538_v36 = vadd.f32 1.0, %v7565_v17 }
 0x691   :  { %3903 = vmatpush1.bf16.msra.mxu0 %v11975_v52  ;;  %6882 = vmatpush3.bf16.msra.mxu1 %v11976_v14  ;;  %7568 = vrcp.f32 %v3538_v36 }
 0x692   :  { %3904 = vmatprep.subr.bf16.mxu0 %v11977_v59  ;;  %6883 = vmatprep.subr.bf16.mxu1 %v11718_v51  ;;  %v11996_v59 = vld [vmem:[#allocation96_spill] sm:$0xff] }
 0x695   :  { %3905 = vmatpush1.bf16.msra.mxu0 %v11978_v50  ;;  %6884 = vmatpush3.bf16.msra.mxu1 %v11979_v41  ;;  %v11997_v50 = vld [vmem:[#allocation97_spill] sm:$0xff]  ;;  %v11998_v41 = vld [vmem:[#allocation98_spill] sm:$0xff] }
 0x696   :  { %3906 = vmatprep.subr.bf16.mxu0 %v11980_v57  ;;  %6885 = vmatprep.subr.bf16.mxu1 %v11718_v51 }
 0x697   :  { %v3585_v22 = vpop.f32.mrf.mxu0  ;;  %v10257_v18 = vpop.f32.mrf.mxu1 }
 0x699   :  { %v7567_v21 = vpop.eup %7566  ;;  %3907 = vmatpush1.bf16.msra.mxu0 %v11981_v32  ;;  %6886 = vmatpush3.bf16.msra.mxu1 %v11982_v29  ;;  %v10267_v62 = vpop.f32.mrf.mxu0  ;;  %v12001_v32 = vld [vmem:[#allocation99_spill] sm:$0xff] }
 0x69a   :  { %v6829_v31 = vpop.f32.mrf.mxu1  ;;  %v3544_v13 = vmul.f32 %v7567_v21, %v3543_v49  ;;  %3974 = vmatprep.subr.bf16.mxu0 %v9978_v43  ;;  %6891 = vmatprep.subr.bf16.mxu1 %v11718_v51  ;;  %v11984_v43 = vld [vmem:[#allocation84_spill] sm:$0xff]  ;;  %v12000_v21 = vld [vmem:[#allocation101_spill] sm:$0xff]  ;;  %v3586_v29 = vadd.f32 %v3585_v22, %v12001_v32 }
 0x69b   :  { %v3589_v3 = vpop.f32.mrf.mxu0  ;;  %v11999_v49 = vld [vmem:[#allocation100_spill] sm:$0xff]  ;;  %v12002_v31 = vld [vmem:[#allocation102_spill] sm:$0xff] }
 0x69c   :  { %v3629_v63 = vpop.f32.mrf.mxu1  ;;  %3925 = vmatmul.mubr.bf16.vlgmr.msra.gmra.mxu0 %v3745_v38  ;;  %6888 = vmatmul.mubr.bf16.vlgmr.msra.gmra.mxu1 %v3745_v38  ;;  %v3545_v15 = vadd.f32 %v3544_v13, %v3442_v58  ;;  %v11988_v38 = vld [vmem:[#allocation88_spill] sm:$0xff] }
 0x69d   :  { %3975 = vmatpush1.bf16.msra.mxu0 %v9986_v39  ;;  %6892 = vmatpush3.bf16.msra.mxu1 %v9989_v4  ;;  %v3590_v19 = vpop.f32.mrf.mxu0  ;;  %v11986_v39 = vld [vmem:[#allocation86_spill] sm:$0xff]  ;;  %v11987_v4 = vld [vmem:[#allocation87_spill] sm:$0xff] }
 0x69e   :  { %v6830_v11 = vpop.f32.mrf.mxu1  ;;  %3976 = vmatprep.subr.bf16.mxu0 %v11983_v2  ;;  %6893 = vmatprep.subr.bf16.mxu1 %v11718_v51  ;;  %7570 = vtanh.f32 %v3545_v15  ;;  %v7569_v44 = vpop.eup %7568 }
 0x69f   :  { %4006 = vmatprep.mubr.bf16.mxu0 %v11648_v54  ;;  %6907 = vmatprep.mubr.msk.bf16.mxu1 %vm8177_vm2, %v11718_v51  ;;  %v3547_v14 = vsub.f32 1.0, %v7569_v44  ;;  %v3549_v17 = vmul.f32 %v7569_v44, %v10062_v40  ;;  %v10316_v11 = vld [vmem:[#allocation7 + $0xac] ss:$12 sps:$4 sm:$0xff]   ;;  %v10353_v44 = vld [vmem:[#allocation7 + $0x64] ss:$12 sps:$4 sm:$0xff]  }
 0x6a1   :  { %3977 = vmatpush1.bf16.msra.mxu0 %v11984_v43  ;;  %6894 = vmatpush3.bf16.msra.mxu1 %v11985_v60 }
 0x6a2   :  { %3978 = vmatprep.subr.bf16.mxu0 %v11986_v39  ;;  %6895 = vmatprep.subr.bf16.mxu1 %v11718_v51  ;;  %v10328_v39 = vld [vmem:[#allocation7 + $0x94] ss:$12 sps:$4 sm:$0xff]  }
 0x6a5   :  { %3979 = vmatpush1.bf16.msra.mxu0 %v11987_v4  ;;  %6896 = vmatpush3.bf16.msra.mxu1 %v11988_v38  ;;  %v3588_v4 = vadd.f32 %v10267_v62, %v9337_v27  ;;  %v10337_v38 = vld [vmem:[#allocation7 + $0x90] ss:$12 sps:$4 sm:$0xff]   ;;  %v10350_v62 = vld [vmem:[#allocation7 + $0x80] ss:$12 sps:$4 sm:$0xff]  }
 0x6a6   :  { %3980 = vmatprep.subr.bf16.mxu0 %v11989_v6  ;;  %6897 = vmatprep.subr.bf16.mxu1 %v11718_v51  ;;  %v10340_v6 = vld [vmem:[#allocation7 + $0x98] ss:$12 sps:$4 sm:$0xff]  }
 0x6a9   :  { %3981 = vmatpush1.bf16.msra.mxu0 %v11990_v20  ;;  %6898 = vmatpush3.bf16.msra.mxu1 %v11991_v46  ;;  %v10343_v20 = vld [vmem:[#allocation7 + $0x7c] ss:$12 sps:$4 sm:$0xff]  }
 0x6aa   :  { %3982 = vmatprep.subr.bf16.mxu0 %v11992_v30  ;;  %6899 = vmatprep.subr.bf16.mxu1 %v11718_v51  ;;  %v10347_v30 = vld [vmem:[#allocation7 + $0x78] ss:$12 sps:$4 sm:$0xff]  }
 0x6ab   :  { %v7571_v52 = vpop.eup %7570 }
 0x6ac   :  { %v3548_v57 = vmul.f32 %v7571_v52, %v3547_v14  ;;  %v10360_v52 = vld [vmem:[#allocation7 + $0x68] ss:$12 sps:$4 sm:$0xff]  }
 0x6ad   :  { %3983 = vmatpush1.bf16.msra.mxu0 %v11993_v24  ;;  %6900 = vmatpush3.bf16.msra.mxu1 %v11994_v1 }
 0x6ae   :  { %3984 = vmatprep.subr.bf16.mxu0 %v11995_v12  ;;  %6901 = vmatprep.subr.bf16.mxu1 %v11718_v51  ;;  %v10306_v13 = vadd.f32 %v3549_v17, %v3548_v57  ;;  %v10357_v12 = vld [vmem:[#allocation7 + $0x60] ss:$12 sps:$4 sm:$0xff]   ;;  %v10377_v17 = vld [vmem:[#allocation7 + $0x30] ss:$12 sps:$4 sm:$0xff]  }
 0x6af   :  { %v10373_v57 = vld [vmem:[#allocation7 + $0x34] ss:$12 sps:$4 sm:$0xff]  }
 0x6b0   :  { %v10314_v22 = vpack.c.bf16 %v10306_v13, %v10306_v13 }
 0x6b1   :  { %3985 = vmatpush1.bf16.msra.mxu0 %v11996_v59  ;;  %6902 = vmatpush3.bf16.msra.mxu1 %v11997_v50  ;;  %v10363_v59 = vld [vmem:[#allocation7 + $0x4c] ss:$12 sps:$4 sm:$0xff]   ;;  %v10367_v50 = vld [vmem:[#allocation7 + $0x48] ss:$12 sps:$4 sm:$0xff]  }
 0x6b2   :  { %3986 = vmatprep.subr.bf16.mxu0 %v11998_v41  ;;  %6903 = vmatprep.subr.bf16.mxu1 %v11718_v51  ;;  %v10370_v41 = vld [vmem:[#allocation7 + $0x50] ss:$12 sps:$4 sm:$0xff]  }
 0x6b5   :  { %3987 = vmatpush1.bf16.msra.mxu0 %v11999_v49  ;;  %6904 = vmatpush3.bf16.msra.mxu1 %v12000_v21  ;;  %v10380_v49 = vld [vmem:[#allocation7 + $0x38] ss:$12 sps:$4 sm:$0xff]   ;;  %v10383_v21 = vld [vmem:[#allocation7 + $0x1c] ss:$12 sps:$4 sm:$0xff]  }
 0x6b6   :  { %3988 = vmatprep.subr.bf16.mxu0 %v12002_v31  ;;  %6905 = vmatprep.subr.bf16.mxu1 %v11718_v51  ;;  %v10390_v31 = vld [vmem:[#allocation7 + $0x20] ss:$12 sps:$4 sm:$0xff]  }
 0x6b7   :  { %v3667_v3 = vpop.f32.mrf.mxu0  ;;  %v10308_v63 = vpop.f32.mrf.mxu1 }
 0x6b8   :  { %v3714_v58 = vadd.f32 %v3667_v3, %v3586_v29  ;;  %v10387_v29 = vld [vmem:[#allocation7 + $0x18] ss:$12 sps:$4 sm:$0xff]  }
 0x6b9   :  { %3989 = vmatpush1.bf16.msra.mxu0 %v10064_v5  ;;  %6906 = vmatpush3.bf16.msra.mxu1 %v10067_v47  ;;  %v3669_v40 = vpop.f32.mrf.mxu0  ;;  %v6849_v36 = vpop.f32.mrf.mxu1  ;;  %v10322_v47 = vld [vmem:[#allocation7 + $0xa8] ss:$12 sps:$4 sm:$0xff]   ;;  %v10325_v5 = vld [vmem:[#allocation7 + $0xb0] ss:$12 sps:$4 sm:$0xff]  }
 0x6ba   :  { %v5957_v19 = vmul.f32 -1.442695, %v3714_v58  ;;  %4077 = vmatprep.subr.bf16.mxu0 %v10316_v11  ;;  %6911 = vmatprep.subr.bf16.mxu1 %v11718_v51  ;;  %v3715_v46 = vadd.f32 %v3669_v40, %v3588_v4  ;;  %v10393_v3 = vld [vmem:[#allocation7 + $0x4] ss:$12 sps:$4 sm:$0xff]   ;;  %v3728_v40 = vadd.f32 %v10110_v16, %v10308_v63  ;;  %v10413_v63 = vld [vmem:[#allocation9 + $0xa8] ss:$12 sps:$4 sm:$0xff]  }
 0x6bb   :  { %v3671_v15 = vpop.f32.mrf.mxu0  ;;  %v3711_v2 = vpop.f32.mrf.mxu1  ;;  %v10416_v4 = vld [vmem:[#allocation9 + $0xb0] ss:$12 sps:$4 sm:$0xff]  }
 0x6bc   :  { %7572 = vpow2.f32 %v5957_v19  ;;  %4007 = vmatmul.mubr.bf16.vlgmr.msra.gmra.mxu0 %v10314_v22  ;;  %6908 = vmatmul.mubr.bf16.vlgmr.msra.gmra.mxu1 %v10314_v22  ;;  %v5958_v24 = vmul.f32 -1.442695, %v3715_v46  ;;  %v10399_v19 = vld [vmem:[#allocation7] ss:$12 sps:$4 sm:$0xff]   ;;  %v10402_v15 = vld [vmem:[#allocation7 + $0x8] ss:$12 sps:$4 sm:$0xff]  }
 0x6bd   :  { %4078 = vmatpush1.bf16.msra.mxu0 %v10322_v47  ;;  %6912 = vmatpush3.bf16.msra.mxu1 %v10325_v5  ;;  %v3672_v43 = vpop.f32.mrf.mxu0  ;;  %v6850_v60 = vpop.f32.mrf.mxu1 }
 0x6be   :  { %4079 = vmatprep.subr.bf16.mxu0 %v10328_v39  ;;  %6913 = vmatprep.subr.bf16.mxu1 %v11718_v51  ;;  %7574 = vpow2.f32 %v5958_v24  ;;  %v10405_v43 = vld [vmem:[#allocation9 + $0xac] ss:$12 sps:$4 sm:$0xff]   ;;  %v3627_v60 = vadd.f32 %v10257_v18, %v9387_v55  ;;  %v10419_v24 = vld [vmem:[#allocation9 + $0x94] ss:$12 sps:$4 sm:$0xff]   ;;  %v10426_v18 = vld [vmem:[#allocation9 + $0x90] ss:$12 sps:$4 sm:$0xff]  }
 0x6bf   :  { %4109 = vmatprep.mubr.bf16.mxu0 %v11648_v54  ;;  %6927 = vmatprep.mubr.msk.bf16.mxu1 %vm8177_vm2, %v11718_v51  ;;  %12003 = vst [vmem:[#allocation19_spill] sm:$0xff] %v10426_v18 }
 0x6c1   :  { %4080 = vmatpush1.bf16.msra.mxu0 %v10337_v38  ;;  %6914 = vmatpush3.bf16.msra.mxu1 %v10340_v6 }
 0x6c2   :  { %4081 = vmatprep.subr.bf16.mxu0 %v10343_v20  ;;  %6915 = vmatprep.subr.bf16.mxu1 %v11718_v51 }
 0x6c5   :  { %4082 = vmatpush1.bf16.msra.mxu0 %v10347_v30  ;;  %6916 = vmatpush3.bf16.msra.mxu1 %v10350_v62 }
 0x6c6   :  { %4083 = vmatprep.subr.bf16.mxu0 %v10353_v44  ;;  %6917 = vmatprep.subr.bf16.mxu1 %v11718_v51 }
 0x6c9   :  { %v7573_v1 = vpop.eup %7572  ;;  %4084 = vmatpush1.bf16.msra.mxu0 %v10357_v12  ;;  %6918 = vmatpush3.bf16.msra.mxu1 %v10360_v52 }
 0x6ca   :  { %v3722_v14 = vadd.f32 1.0, %v7573_v1  ;;  %4085 = vmatprep.subr.bf16.mxu0 %v10363_v59  ;;  %6919 = vmatprep.subr.bf16.mxu1 %v11718_v51  ;;  %v10432_v1 = vld [vmem:[#allocation9 + $0x7c] ss:$12 sps:$4 sm:$0xff]  }
 0x6cb   :  { %v7575_v58 = vpop.eup %7574  ;;  %12005 = vst [vmem:[#allocation24_spill] sm:$0xff] %v10432_v1 }
 0x6cc   :  { %7576 = vrcp.f32 %v3722_v14  ;;  %v3723_v16 = vadd.f32 1.0, %v7575_v58  ;;  %v10436_v14 = vld [vmem:[#allocation9 + $0x78] ss:$12 sps:$4 sm:$0xff]   ;;  %v10439_v58 = vld [vmem:[#allocation9 + $0x80] ss:$12 sps:$4 sm:$0xff]  }
 0x6cd   :  { %4086 = vmatpush1.bf16.msra.mxu0 %v10367_v50  ;;  %6920 = vmatpush3.bf16.msra.mxu1 %v10370_v41  ;;  %12006 = vst [vmem:[#allocation26_spill] sm:$0xff] %v10436_v14  ;;  %12007 = vst [vmem:[#allocation25_spill] sm:$0xff] %v10439_v58 }
 0x6ce   :  { %4087 = vmatprep.subr.bf16.mxu0 %v10373_v57  ;;  %6921 = vmatprep.subr.bf16.mxu1 %v11718_v51  ;;  %7578 = vrcp.f32 %v3723_v16 }
 0x6d1   :  { %4088 = vmatpush1.bf16.msra.mxu0 %v10377_v17  ;;  %6922 = vmatpush3.bf16.msra.mxu1 %v10380_v49 }
 0x6d2   :  { %4089 = vmatprep.subr.bf16.mxu0 %v10383_v21  ;;  %6923 = vmatprep.subr.bf16.mxu1 %v11718_v51 }
 0x6d5   :  { %4090 = vmatpush1.bf16.msra.mxu0 %v10387_v29  ;;  %6924 = vmatpush3.bf16.msra.mxu1 %v10390_v31 }
 0x6d6   :  { %4091 = vmatprep.subr.bf16.mxu0 %v10393_v3  ;;  %6925 = vmatprep.subr.bf16.mxu1 %v11718_v51 }
 0x6d9   :  { %v7577_v36 = vpop.eup %7576  ;;  %4092 = vmatpush1.bf16.msra.mxu0 %v10399_v19  ;;  %6926 = vmatpush3.bf16.msra.mxu1 %v10402_v15 }
 0x6da   :  { %v3729_v2 = vmul.f32 %v7577_v36, %v3728_v40  ;;  %4159 = vmatprep.subr.bf16.mxu0 %v10405_v43  ;;  %6931 = vmatprep.subr.bf16.mxu1 %v11718_v51  ;;  %v10442_v40 = vld [vmem:[#allocation9 + $0x64] ss:$12 sps:$4 sm:$0xff]   ;;  %v10446_v36 = vld [vmem:[#allocation9 + $0x60] ss:$12 sps:$4 sm:$0xff]  }
 0x6db   :  { %12008 = vst [vmem:[#allocation28_spill] sm:$0xff] %v10442_v40  ;;  %12009 = vst [vmem:[#allocation31_spill] sm:$0xff] %v10446_v36  ;;  %v7579_v16 = vpop.eup %7578 }
 0x6dc   :  { %4110 = vmatmul.mubr.bf16.vlgmr.msra.gmra.mxu0 %v10314_v22  ;;  %6928 = vmatmul.mubr.bf16.vlgmr.msra.gmra.mxu1 %v10314_v22  ;;  %v3730_v46 = vadd.f32 %v3729_v2, %v3627_v60  ;;  %v10429_v22 = vld [vmem:[#allocation9 + $0x98] ss:$12 sps:$4 sm:$0xff]   ;;  %v10449_v2 = vld [vmem:[#allocation9 + $0x68] ss:$12 sps:$4 sm:$0xff]  }
 0x6dd   :  { %4160 = vmatpush1.bf16.msra.mxu0 %v10413_v63  ;;  %6932 = vmatpush3.bf16.msra.mxu1 %v10416_v4  ;;  %12004 = vst [vmem:[#allocation29_spill] sm:$0xff] %v10429_v22  ;;  %12010 = vst [vmem:[#allocation34_spill] sm:$0xff] %v10449_v2  ;;  %v10452_v60 = vld [vmem:[#allocation9 + $0x4c] ss:$12 sps:$4 sm:$0xff]  }
 0x6de   :  { %4161 = vmatprep.subr.bf16.mxu0 %v10419_v24  ;;  %6933 = vmatprep.subr.bf16.mxu1 %v11718_v51  ;;  %7580 = vtanh.f32 %v3730_v46  ;;  %12011 = vst [vmem:[#allocation27_spill] sm:$0xff] %v10452_v60  ;;  %v10456_v46 = vld [vmem:[#allocation9 + $0x48] ss:$12 sps:$4 sm:$0xff]  }
 0x6df   :  { %4191 = vmatprep.mubr.bf16.mxu0 %v11648_v54  ;;  %6947 = vmatprep.mubr.msk.bf16.mxu1 %vm8177_vm2, %v11718_v51  ;;  %12012 = vst [vmem:[#allocation30_spill] sm:$0xff] %v10456_v46 }
 0x6e1   :  { %4162 = vmatpush1.bf16.msra.mxu0 %v10426_v18  ;;  %6934 = vmatpush3.bf16.msra.mxu1 %v10429_v22 }
 0x6e2   :  { %4163 = vmatprep.subr.bf16.mxu0 %v10432_v1  ;;  %6935 = vmatprep.subr.bf16.mxu1 %v11718_v51  ;;  %v10480_v1 = vld [vmem:[#allocation9 + $0x20] ss:$12 sps:$4 sm:$0xff]  }
 0x6e3   :  { %12019 = vst [vmem:[#allocation39_spill] sm:$0xff] %v10480_v1 }
 0x6e5   :  { %4164 = vmatpush1.bf16.msra.mxu0 %v10436_v14  ;;  %6936 = vmatpush3.bf16.msra.mxu1 %v10439_v58  ;;  %v10469_v58 = vld [vmem:[#allocation9 + $0x38] ss:$12 sps:$4 sm:$0xff]  }
 0x6e6   :  { %4165 = vmatprep.subr.bf16.mxu0 %v10442_v40  ;;  %6937 = vmatprep.subr.bf16.mxu1 %v11718_v51  ;;  %v3732_v40 = vsub.f32 1.0, %v7579_v16  ;;  %12016 = vst [vmem:[#allocation38_spill] sm:$0xff] %v10469_v58  ;;  %v10477_v14 = vld [vmem:[#allocation9 + $0x18] ss:$12 sps:$4 sm:$0xff]  }
 0x6e7   :  { %12018 = vst [vmem:[#allocation36_spill] sm:$0xff] %v10477_v14 }
 0x6e9   :  { %4166 = vmatpush1.bf16.msra.mxu0 %v10446_v36  ;;  %6938 = vmatpush3.bf16.msra.mxu1 %v10449_v2  ;;  %v10462_v36 = vld [vmem:[#allocation9 + $0x34] ss:$12 sps:$4 sm:$0xff]  }
 0x6ea   :  { %4167 = vmatprep.subr.bf16.mxu0 %v10452_v60  ;;  %6939 = vmatprep.subr.bf16.mxu1 %v11718_v51  ;;  %12014 = vst [vmem:[#allocation32_spill] sm:$0xff] %v10462_v36  ;;  %v10466_v60 = vld [vmem:[#allocation9 + $0x30] ss:$12 sps:$4 sm:$0xff]  }
 0x6eb   :  { %v7581_v2 = vpop.eup %7580  ;;  %12015 = vst [vmem:[#allocation33_spill] sm:$0xff] %v10466_v60 }
 0x6ed   :  { %4168 = vmatpush1.bf16.msra.mxu0 %v10456_v46  ;;  %6940 = vmatpush3.bf16.msra.mxu1 %v10459_v28  ;;  %v10472_v46 = vld [vmem:[#allocation9 + $0x1c] ss:$12 sps:$4 sm:$0xff]   ;;  %v3733_v28 = vmul.f32 %v7581_v2, %v3732_v40 }
 0x6ee   :  { %4169 = vmatprep.subr.bf16.mxu0 %v10462_v36  ;;  %6941 = vmatprep.subr.bf16.mxu1 %v11718_v51  ;;  %12017 = vst [vmem:[#allocation35_spill] sm:$0xff] %v10472_v46  ;;  %v3734_v36 = vmul.f32 %v7579_v16, %v10151_v9  ;;  %v10492_v40 = vld [vmem:[#allocation9 + $0x8] ss:$12 sps:$4 sm:$0xff]   ;;  %v7947_v16 = vld [vmem:[#allocation2 + $0x60] ss:$12 sps:$4 sm:$0xff]  }
 0x6ef   :  { %12023 = vst [vmem:[#allocation44_spill] sm:$0xff] %v10492_v40 }
 0x6f1   :  { %4170 = vmatpush1.bf16.msra.mxu0 %v10466_v60  ;;  %6942 = vmatpush3.bf16.msra.mxu1 %v10469_v58  ;;  %v10483_v60 = vld [vmem:[#allocation9 + $0x4] ss:$12 sps:$4 sm:$0xff]   ;;  %v10489_v58 = vld [vmem:[#allocation9] ss:$12 sps:$4 sm:$0xff]  }
 0x6f2   :  { %4171 = vmatprep.subr.bf16.mxu0 %v10472_v46  ;;  %6943 = vmatprep.subr.bf16.mxu1 %v11718_v51  ;;  %12020 = vst [vmem:[#allocation41_spill] sm:$0xff] %v10483_v60  ;;  %v10487_v46 = vadd.f32 %v3734_v36, %v3733_v28  ;;  %12022 = vst [vmem:[#allocation43_spill] sm:$0xff] %v10489_v58  ;;  %v7942_v28 = vld [vmem:[#allocation2 + $0xb0] ss:$12 sps:$4 sm:$0xff]   ;;  %v7945_v36 = vld [vmem:[#allocation2 + $0x80] ss:$12 sps:$4 sm:$0xff]  }
 0x6f4   :  { %12021 = vst [vmem:[#allocation42_spill] sm:$0xff] %v10487_v46  ;;  %v4158_v2 = vpack.c.bf16 %v10487_v46, %v10487_v46 }
 0x6f5   :  { %4172 = vmatpush1.bf16.msra.mxu0 %v10477_v14  ;;  %6944 = vmatpush3.bf16.msra.mxu1 %v10480_v1 }
 0x6f6   :  { %4173 = vmatprep.subr.bf16.mxu0 %v10483_v60  ;;  %6945 = vmatprep.subr.bf16.mxu1 %v11718_v51 }
 0x6f9   :  { %4174 = vmatpush1.bf16.msra.mxu0 %v10489_v58  ;;  %6946 = vmatpush3.bf16.msra.mxu1 %v10492_v40 }
 0x6fa   :  { %4273 = vmatprep.subr.bf16.mxu0 %v10157_v48  ;;  %6951 = vmatprep.subr.bf16.mxu1 %v11718_v51  ;;  %v7943_v48 = vld [vmem:[#allocation2 + $0x98] ss:$12 sps:$4 sm:$0xff]  }
 0x6fc   :  { %4192 = vmatmul.mubr.bf16.vlgmr.msra.gmra.mxu0 %v4158_v2  ;;  %6948 = vmatmul.mubr.bf16.vlgmr.msra.gmra.mxu1 %v4158_v2  ;;  %v7948_v2 = vld [vmem:[#allocation2 + $0x68] ss:$12 sps:$4 sm:$0xff]  }
 0x6fd   :  { %4274 = vmatpush1.bf16.msra.mxu0 %v10161_v61  ;;  %6952 = vmatpush3.bf16.msra.mxu1 %v7942_v28  ;;  %v7944_v61 = vld [vmem:[#allocation2 + $0x78] ss:$12 sps:$4 sm:$0xff]  }
 0x6fe   :  { %4275 = vmatprep.subr.bf16.mxu0 %v10165_v23  ;;  %6953 = vmatprep.subr.bf16.mxu1 %v11718_v51  ;;  %v7946_v23 = vld [vmem:[#allocation2 + $0x64] ss:$12 sps:$4 sm:$0xff]   ;;  %v7949_v28 = vld [vmem:[#allocation2 + $0x4c] ss:$12 sps:$4 sm:$0xff]  }
 0x6ff   :  { %4305 = vmatprep.mubr.bf16.mxu0 %v11648_v54  ;;  %6967 = vmatprep.mubr.msk.bf16.mxu1 %vm8177_vm2, %v11718_v51 }
 0x701   :  { %4276 = vmatpush1.bf16.msra.mxu0 %v10172_v33  ;;  %6954 = vmatpush3.bf16.msra.mxu1 %v7943_v48  ;;  %v7950_v33 = vld [vmem:[#allocation2 + $0x48] ss:$12 sps:$4 sm:$0xff]  }
 0x702   :  { %4277 = vmatprep.subr.bf16.mxu0 %v10176_v34  ;;  %6955 = vmatprep.subr.bf16.mxu1 %v11718_v51  ;;  %v7951_v34 = vld [vmem:[#allocation2 + $0x50] ss:$12 sps:$4 sm:$0xff]   ;;  %v7952_v48 = vld [vmem:[#allocation2 + $0x34] ss:$12 sps:$4 sm:$0xff]  }
 0x705   :  { %4278 = vmatpush1.bf16.msra.mxu0 %v7944_v61  ;;  %6956 = vmatpush3.bf16.msra.mxu1 %v7945_v36  ;;  %v7953_v61 = vld [vmem:[#allocation2 + $0x30] ss:$12 sps:$4 sm:$0xff]   ;;  %v7954_v36 = vld [vmem:[#allocation2 + $0x38] ss:$12 sps:$4 sm:$0xff]  }
 0x706   :  { %4279 = vmatprep.subr.bf16.mxu0 %v7946_v23  ;;  %6957 = vmatprep.subr.bf16.mxu1 %v11718_v51  ;;  %v7955_v23 = vld [vmem:[#allocation2 + $0x1c] ss:$12 sps:$4 sm:$0xff]  }
 0x709   :  { %4280 = vmatpush1.bf16.msra.mxu0 %v7947_v16  ;;  %6958 = vmatpush3.bf16.msra.mxu1 %v7948_v2  ;;  %v7956_v16 = vld [vmem:[#allocation2 + $0x18] ss:$12 sps:$4 sm:$0xff]   ;;  %v7957_v2 = vld [vmem:[#allocation2 + $0x20] ss:$12 sps:$4 sm:$0xff]  }
 0x70a   :  { %4281 = vmatprep.subr.bf16.mxu0 %v7949_v28  ;;  %6959 = vmatprep.subr.bf16.mxu1 %v11718_v51  ;;  %v7958_v28 = vld [vmem:[#allocation2 + $0x4] ss:$12 sps:$4 sm:$0xff]  }
 0x70d   :  { %4282 = vmatpush1.bf16.msra.mxu0 %v7950_v33  ;;  %6960 = vmatpush3.bf16.msra.mxu1 %v7951_v34  ;;  %v7959_v33 = vld [vmem:[#allocation2] ss:$12 sps:$4 sm:$0xff]   ;;  %v7960_v34 = vld [vmem:[#allocation2 + $0x8] ss:$12 sps:$4 sm:$0xff]  }
 0x70e   :  { %4283 = vmatprep.subr.bf16.mxu0 %v7952_v48  ;;  %6961 = vmatprep.subr.bf16.mxu1 %v11718_v51  ;;  %v10513_v48 = vld [vmem:[#allocation4 + $0xac] ss:$12 sps:$4 sm:$0xff]  }
 0x70f   :  { %12024 = vst [vmem:[#allocation47_spill] sm:$0xff] %v10513_v48 }
 0x711   :  { %4284 = vmatpush1.bf16.msra.mxu0 %v7953_v61  ;;  %6962 = vmatpush3.bf16.msra.mxu1 %v7954_v36 }
 0x712   :  { %4285 = vmatprep.subr.bf16.mxu0 %v7955_v23  ;;  %6963 = vmatprep.subr.bf16.mxu1 %v11718_v51 }
 0x715   :  { %4286 = vmatpush1.bf16.msra.mxu0 %v7956_v16  ;;  %6964 = vmatpush3.bf16.msra.mxu1 %v7957_v2 }
 0x716   :  { %4287 = vmatprep.subr.bf16.mxu0 %v7958_v28  ;;  %6965 = vmatprep.subr.bf16.mxu1 %v11718_v51 }
 0x719   :  { %4288 = vmatpush1.bf16.msra.mxu0 %v7959_v33  ;;  %6966 = vmatpush3.bf16.msra.mxu1 %v7960_v34 }
 0x71a   :  { %4418 = vmatprep.subr.bf16.mxu0 %v10513_v48  ;;  %6971 = vmatprep.subr.bf16.mxu1 %v11718_v51 }
 0x73c   :  { %v3781_v61 = vpop.f32.mrf.mxu0  ;;  %v3822_v36 = vpop.f32.mrf.mxu1 }
 0x73d   :  { %v3830_v23 = vrot.slane %v3781_v61, 2  ;;  %v3832_v16 = vrot.slane %v3781_v61, 3 }
 0x73e   :  { %v3783_v9 = vpop.f32.mrf.mxu0  ;;  %v6869_v2 = vpop.f32.mrf.mxu1 }
 0x73f   :  { %v3838_v28 = vadd.f32 %v3830_v23, %v8467_v0  ;;  %v3840_v40 = vadd.f32 %v3832_v16, %v11962_v53  ;;  %v3831_v1 = vrot.slane %v3783_v9, 2  ;;  %v3833_v14 = vrot.slane %v3783_v9, 3 }
 0x740   :  { %v3785_v58 = vpop.f32.mrf.mxu0  ;;  %v3825_v33 = vpop.f32.mrf.mxu1  ;;  %v3884_v53 = vrot.slane %v10215_v45, 7 }
 0x741   :  { %v5959_v60 = vmul.f32 -1.442695, %v3838_v28  ;;  %v5961_v34 = vmul.f32 -1.442695, %v3840_v40  ;;  %v3839_v22 = vadd.f32 %v3831_v1, %v11963_v56  ;;  %v3841_v61 = vadd.f32 %v3833_v14, %v11964_v37 }
 0x742   :  { %v3786_v46 = vpop.f32.mrf.mxu0  ;;  %v6870_v48 = vpop.f32.mrf.mxu1 }
 0x743   :  { %7582 = vpow2.f32 %v5959_v60  ;;  %v5960_v18 = vmul.f32 -1.442695, %v3839_v22  ;;  %v5962_v2 = vmul.f32 -1.442695, %v3841_v61  ;;  %v10524_v60 = vld [vmem:[%s11320_s5] ss:$0 sm:$0xff] }
 0x744   :  { %7584 = vpow2.f32 %v5961_v34  ;;  %12025 = vst [vmem:[#allocation48_spill] sm:$0xff] %v10524_v60  ;;  %v3866_v1 = vadd.f32 %v10524_v60, %v3822_v36 }
 0x745   :  { %7586 = vpow2.f32 %v5960_v18 }
 0x746   :  { %7588 = vpow2.f32 %v5962_v2  ;;  %v3868_v34 = vrot.slane %v3866_v1, 2  ;;  %v3869_v2 = vrot.slane %v3866_v1, 3 }
 0x750   :  { %v7583_v23 = vpop.eup %7582 }
 0x751   :  { %v7585_v16 = vpop.eup %7584  ;;  %v3854_v58 = vadd.f32 1.0, %v7583_v23 }
 0x752   :  { %v3856_v33 = vadd.f32 1.0, %v7585_v16  ;;  %v7587_v40 = vpop.eup %7586 }
 0x753   :  { %7590 = vrcp.f32 %v3854_v58  ;;  %v7589_v9 = vpop.eup %7588  ;;  %v3855_v18 = vadd.f32 1.0, %v7587_v40 }
 0x754   :  { %7592 = vrcp.f32 %v3856_v33  ;;  %v3857_v46 = vadd.f32 1.0, %v7589_v9 }
 0x755   :  { %7594 = vrcp.f32 %v3855_v18 }
 0x756   :  { %7596 = vrcp.f32 %v3857_v46 }
 0x75c   :  { %v3926_v14 = vpop.f32.mrf.mxu0  ;;  %v10527_v22 = vpop.f32.mrf.mxu1 }
 0x75e   :  { %v10529_v48 = vpop.f32.mrf.mxu0  ;;  %v6889_v28 = vpop.f32.mrf.mxu1 }
 0x760   :  { %v7591_v61 = vpop.eup %7590  ;;  %v3930_v23 = vpop.f32.mrf.mxu0 }
 0x761   :  { %v3970_v16 = vpop.f32.mrf.mxu1  ;;  %v7593_v58 = vpop.eup %7592  ;;  %v3872_v33 = vmul.f32 %v7591_v61, %v3868_v34 }
 0x762   :  { %v3873_v37 = vmul.f32 %v7593_v58, %v3869_v2  ;;  %v3931_v56 = vpop.f32.mrf.mxu0  ;;  %v7595_v9 = vpop.eup %7594  ;;  %v3885_v16 = vrot.slane %v10217_v10, 7  ;;  %v3927_v10 = vadd.f32 %v3926_v14, %v8753_v35  ;;  %v10551_v14 = vld [vmem:[#allocation4 + $0xa8] ss:$12 sps:$4 sm:$0xff]   ;;  %v10622_v35 = vld [vmem:[#allocation4 + $0x4] ss:$12 sps:$4 sm:$0xff]  }
 0x763   :  { %v6890_v36 = vpop.f32.mrf.mxu1  ;;  %v3874_v60 = vadd.f32 %v3872_v33, %v8490_v7  ;;  %v7597_v28 = vpop.eup %7596  ;;  %v3878_v1 = vsub.f32 1.0, %v7595_v9  ;;  %v3888_v46 = vmul.f32 %v7595_v9, %v3884_v53  ;;  %12035 = vst [vmem:[#allocation58_spill] sm:$0xff] %v10622_v35 }
 0x764   :  { %v3875_v40 = vadd.f32 %v3873_v37, %v11966_v26  ;;  %v3879_v34 = vsub.f32 1.0, %v7597_v28  ;;  %v3889_v2 = vmul.f32 %v7597_v28, %v3885_v16 }
 0x765   :  { %7598 = vtanh.f32 %v3874_v60 }
 0x766   :  { %7600 = vtanh.f32 %v3875_v40 }
 0x772   :  { %v7599_v23 = vpop.eup %7598 }
 0x773   :  { %v7601_v18 = vpop.eup %7600  ;;  %v3880_v61 = vmul.f32 %v7599_v23, %v3878_v1 }
 0x774   :  { %v3881_v56 = vmul.f32 %v7601_v18, %v3879_v34 }
 0x775   :  { %v10535_v58 = vadd.f32 %v3888_v46, %v3880_v61 }
 0x776   :  { %v10537_v33 = vadd.f32 %v3889_v2, %v3881_v56  ;;  %v10554_v56 = vld [vmem:[#allocation4 + $0xb0] ss:$12 sps:$4 sm:$0xff]  }
 0x777   :  { %12026 = vst [vmem:[#allocation49_spill] sm:$0xff] %v10535_v58  ;;  %v4262_v37 = vpack.c.bf16 %v10535_v58, %v10535_v58 }
 0x778   :  { %12027 = vst [vmem:[#allocation50_spill] sm:$0xff] %v10537_v33  ;;  %v4263_v45 = vpack.c.bf16 %v10537_v33, %v10537_v33 }
 0x779   :  { %v4266_v60 = vunpack.c.l.b16 %v4262_v37  ;;  %v10557_v37 = vld [vmem:[#allocation4 + $0x94] ss:$12 sps:$4 sm:$0xff]  }
 0x77a   :  { %v4267_v36 = vunpack.c.l.b16 %v4263_v45  ;;  %v3929_v45 = vadd.f32 %v10529_v48, %v8762_v42  ;;  %v10579_v48 = vld [vmem:[#allocation4 + $0x80] ss:$12 sps:$4 sm:$0xff]  }
 0x77b   :  { %v4268_v40 = vrot.slane %v4266_v60, 6  ;;  %v10566_v60 = vld [vmem:[#allocation4 + $0x90] ss:$12 sps:$4 sm:$0xff]   ;;  %v10619_v42 = vld [vmem:[#allocation4 + $0x20] ss:$12 sps:$4 sm:$0xff]  }
 0x77c   :  { %v4008_v26 = vpop.f32.mrf.mxu0  ;;  %v10544_v1 = vpop.f32.mrf.mxu1  ;;  %v4269_v53 = vrot.slane %v4267_v36, 5  ;;  %v10569_v36 = vld [vmem:[#allocation4 + $0x98] ss:$12 sps:$4 sm:$0xff]   ;;  %12034 = vst [vmem:[#allocation57_spill] sm:$0xff] %v10619_v42 }
 0x77d   :  { %v4055_v9 = vadd.f32 %v4008_v26, %v3927_v10  ;;  %v10572_v10 = vld [vmem:[#allocation4 + $0x7c] ss:$12 sps:$4 sm:$0xff]   ;;  %v4069_v0 = vadd.f32 %v10262_v25, %v10544_v1 }
 0x77e   :  { %v4010_v28 = vpop.f32.mrf.mxu0  ;;  %v6909_v23 = vpop.f32.mrf.mxu1  ;;  %v4270_v16 = vsel %vm438_vm3, %v4269_v53, %v4268_v40  ;;  %v10576_v53 = vld [vmem:[#allocation4 + $0x78] ss:$12 sps:$4 sm:$0xff]  }
 0x77f   :  { %v5963_v34 = vmul.f32 -1.442695, %v4055_v9  ;;  %v10547_v18 = vpack.c.b16 %v4270_v16, %v4270_v16  ;;  %v4056_v40 = vadd.f32 %v4010_v28, %v3929_v45  ;;  %v10582_v9 = vld [vmem:[#allocation4 + $0x64] ss:$12 sps:$4 sm:$0xff]   ;;  %v10589_v28 = vld [vmem:[#allocation4 + $0x68] ss:$12 sps:$4 sm:$0xff]  }
 0x780   :  { %v4012_v61 = vpop.f32.mrf.mxu0  ;;  %v4052_v46 = vpop.f32.mrf.mxu1  ;;  %v10602_v45 = vld [vmem:[#allocation4 + $0x34] ss:$12 sps:$4 sm:$0xff]  }
 0x781   :  { %7602 = vpow2.f32 %v5963_v34  ;;  %4306 = vmatmul.mubr.bf16.vlgmr.msra.gmra.mxu0 %v10547_v18  ;;  %6968 = vmatmul.mubr.bf16.vlgmr.msra.gmra.mxu1 %v10547_v18  ;;  %v5964_v23 = vmul.f32 -1.442695, %v4056_v40  ;;  %v10586_v34 = vld [vmem:[#allocation4 + $0x60] ss:$12 sps:$4 sm:$0xff]   ;;  %12029 = vst [vmem:[#allocation52_spill] sm:$0xff] %v10602_v45 }
 0x782   :  { %4419 = vmatpush1.bf16.msra.mxu0 %v10551_v14  ;;  %6972 = vmatpush3.bf16.msra.mxu1 %v10554_v56  ;;  %v4013_v26 = vpop.f32.mrf.mxu0  ;;  %v6910_v2 = vpop.f32.mrf.mxu1  ;;  %v10592_v46 = vld [vmem:[#allocation4 + $0x4c] ss:$12 sps:$4 sm:$0xff]   ;;  %v10606_v40 = vld [vmem:[#allocation4 + $0x30] ss:$12 sps:$4 sm:$0xff]  }
 0x783   :  { %4420 = vmatprep.subr.bf16.mxu0 %v10557_v37  ;;  %6973 = vmatprep.subr.bf16.mxu1 %v11718_v51  ;;  %7604 = vpow2.f32 %v5964_v23  ;;  %v10596_v26 = vld [vmem:[#allocation4 + $0x48] ss:$12 sps:$4 sm:$0xff]   ;;  %v10599_v2 = vld [vmem:[#allocation4 + $0x50] ss:$12 sps:$4 sm:$0xff]   ;;  %12030 = vst [vmem:[#allocation53_spill] sm:$0xff] %v10606_v40 }
 0x784   :  { %4450 = vmatprep.mubr.bf16.mxu0 %v11648_v54  ;;  %6987 = vmatprep.mubr.msk.bf16.mxu1 %vm8177_vm2, %v11718_v51  ;;  %12028 = vst [vmem:[#allocation51_spill] sm:$0xff] %v10599_v2  ;;  %v10609_v23 = vld [vmem:[#allocation4 + $0x38] ss:$12 sps:$4 sm:$0xff]  }
 0x785   :  { %12031 = vst [vmem:[#allocation54_spill] sm:$0xff] %v10609_v23 }
 0x786   :  { %4421 = vmatpush1.bf16.msra.mxu0 %v10566_v60  ;;  %6974 = vmatpush3.bf16.msra.mxu1 %v10569_v36 }
 0x787   :  { %4422 = vmatprep.subr.bf16.mxu0 %v10572_v10  ;;  %6975 = vmatprep.subr.bf16.mxu1 %v11718_v51 }
 0x78a   :  { %4423 = vmatpush1.bf16.msra.mxu0 %v10576_v53  ;;  %6976 = vmatpush3.bf16.msra.mxu1 %v10579_v48 }
 0x78b   :  { %4424 = vmatprep.subr.bf16.mxu0 %v10582_v9  ;;  %6977 = vmatprep.subr.bf16.mxu1 %v11718_v51 }
 0x78e   :  { %v7603_v16 = vpop.eup %7602  ;;  %4425 = vmatpush1.bf16.msra.mxu0 %v10586_v34  ;;  %6978 = vmatpush3.bf16.msra.mxu1 %v10589_v28 }
 0x78f   :  { %v4063_v61 = vadd.f32 1.0, %v7603_v16  ;;  %4426 = vmatprep.subr.bf16.mxu0 %v10592_v46  ;;  %6979 = vmatprep.subr.bf16.mxu1 %v11718_v51  ;;  %v10612_v16 = vld [vmem:[#allocation4 + $0x1c] ss:$12 sps:$4 sm:$0xff]  }
 0x790   :  { %12032 = vst [vmem:[#allocation55_spill] sm:$0xff] %v10612_v16  ;;  %v7605_v7 = vpop.eup %7604 }
 0x791   :  { %7606 = vrcp.f32 %v4063_v61  ;;  %v10616_v61 = vld [vmem:[#allocation4 + $0x18] ss:$12 sps:$4 sm:$0xff]  }
 0x792   :  { %4427 = vmatpush1.bf16.msra.mxu0 %v10596_v26  ;;  %6980 = vmatpush3.bf16.msra.mxu1 %v10599_v2  ;;  %12033 = vst [vmem:[#allocation56_spill] sm:$0xff] %v10616_v61  ;;  %v3968_v2 = vadd.f32 %v10527_v22, %v8804_v8  ;;  %v10664_v22 = vld [vmem:[#allocation6 + $0x98] ss:$12 sps:$4 sm:$0xff]  }
 0x793   :  { %4428 = vmatprep.subr.bf16.mxu0 %v10602_v45  ;;  %6981 = vmatprep.subr.bf16.mxu1 %v11718_v51  ;;  %v10640_v45 = vld [vmem:[#allocation6 + $0xac] ss:$12 sps:$4 sm:$0xff]   ;;  %12039 = vst [vmem:[#allocation62_spill] sm:$0xff] %v10664_v22 }
 0x796   :  { %4429 = vmatpush1.bf16.msra.mxu0 %v10606_v40  ;;  %6982 = vmatpush3.bf16.msra.mxu1 %v10609_v23 }
 0x797   :  { %4430 = vmatprep.subr.bf16.mxu0 %v10612_v16  ;;  %6983 = vmatprep.subr.bf16.mxu1 %v11718_v51 }
 0x79a   :  { %4431 = vmatpush1.bf16.msra.mxu0 %v10616_v61  ;;  %6984 = vmatpush3.bf16.msra.mxu1 %v10619_v42  ;;  %v10632_v61 = vld [vmem:[#allocation4] ss:$12 sps:$4 sm:$0xff]   ;;  %v10635_v42 = vld [vmem:[#allocation4 + $0x8] ss:$12 sps:$4 sm:$0xff]  }
 0x79b   :  { %4432 = vmatprep.subr.bf16.mxu0 %v10622_v35  ;;  %6985 = vmatprep.subr.bf16.mxu1 %v11718_v51  ;;  %12036 = vst [vmem:[#allocation59_spill] sm:$0xff] %v10632_v61  ;;  %12037 = vst [vmem:[#allocation60_spill] sm:$0xff] %v10635_v42 }
 0x79c   :  { %v10626_v33 = vpop.f32.mrf.mxu0  ;;  %v10628_v58 = vpop.f32.mrf.mxu1 }
 0x79e   :  { %v7607_v16 = vpop.eup %7606  ;;  %4433 = vmatpush1.bf16.msra.mxu0 %v10632_v61  ;;  %6986 = vmatpush3.bf16.msra.mxu1 %v10635_v42  ;;  %v10638_v35 = vpop.f32.mrf.mxu0  ;;  %v4064_v61 = vadd.f32 1.0, %v7605_v7  ;;  %v10648_v42 = vld [vmem:[#allocation6 + $0xa8] ss:$12 sps:$4 sm:$0xff]   ;;  %v10661_v7 = vld [vmem:[#allocation6 + $0x90] ss:$12 sps:$4 sm:$0xff]  }
 0x79f   :  { %v6929_v23 = vpop.f32.mrf.mxu1  ;;  %v4070_v40 = vmul.f32 %v7607_v16, %v4069_v0  ;;  %4500 = vmatprep.subr.bf16.mxu0 %v10640_v45  ;;  %6991 = vmatprep.subr.bf16.mxu1 %v11718_v51  ;;  %v10651_v0 = vld [vmem:[#allocation6 + $0xb0] ss:$12 sps:$4 sm:$0xff]   ;;  %12038 = vst [vmem:[#allocation61_spill] sm:$0xff] %v10661_v7 }
 0x7a0   :  { %v4115_v25 = vpop.f32.mrf.mxu0  ;;  %7608 = vrcp.f32 %v4064_v61  ;;  %v10677_v61 = vld [vmem:[#allocation6 + $0x64] ss:$12 sps:$4 sm:$0xff]  }
 0x7a1   :  { %v4155_v1 = vpop.f32.mrf.mxu1  ;;  %4451 = vmatmul.mubr.bf16.vlgmr.msra.gmra.mxu0 %v10547_v18  ;;  %6988 = vmatmul.mubr.bf16.vlgmr.msra.gmra.mxu1 %v10547_v18  ;;  %v4071_v25 = vadd.f32 %v4070_v40, %v3968_v2  ;;  %v10667_v18 = vld [vmem:[#allocation6 + $0x7c] ss:$12 sps:$4 sm:$0xff]   ;;  %v10671_v2 = vld [vmem:[#allocation6 + $0x78] ss:$12 sps:$4 sm:$0xff]   ;;  %v10674_v40 = vld [vmem:[#allocation6 + $0x80] ss:$12 sps:$4 sm:$0xff]  }
 0x7a2   :  { %4501 = vmatpush1.bf16.msra.mxu0 %v10648_v42  ;;  %6992 = vmatpush3.bf16.msra.mxu1 %v10651_v0  ;;  %v4116_v23 = vpop.f32.mrf.mxu0  ;;  %v10654_v1 = vld [vmem:[#allocation6 + $0x94] ss:$12 sps:$4 sm:$0xff]   ;;  %12040 = vst [vmem:[#allocation63_spill] sm:$0xff] %v10667_v18  ;;  %12041 = vst [vmem:[#allocation64_spill] sm:$0xff] %v10671_v2 }
 0x7a3   :  { %v6930_v16 = vpop.f32.mrf.mxu1  ;;  %4502 = vmatprep.subr.bf16.mxu0 %v10654_v1  ;;  %6993 = vmatprep.subr.bf16.mxu1 %v11718_v51  ;;  %7610 = vtanh.f32 %v4071_v25  ;;  %12042 = vst [vmem:[#allocation65_spill] sm:$0xff] %v10674_v40  ;;  %12043 = vst [vmem:[#allocation66_spill] sm:$0xff] %v10677_v61  ;;  %v10681_v23 = vld [vmem:[#allocation6 + $0x60] ss:$12 sps:$4 sm:$0xff]  }
 0x7a4   :  { %4532 = vmatprep.mubr.bf16.mxu0 %v11648_v54  ;;  %7007 = vmatprep.mubr.msk.bf16.mxu1 %vm8177_vm2, %v11718_v51  ;;  %12044 = vst [vmem:[#allocation67_spill] sm:$0xff] %v10681_v23  ;;  %v10684_v16 = vld [vmem:[#allocation6 + $0x68] ss:$12 sps:$4 sm:$0xff]   ;;  %v10687_v25 = vld [vmem:[#allocation6 + $0x4c] ss:$12 sps:$4 sm:$0xff]  }
 0x7a5   :  { %12045 = vst [vmem:[#allocation68_spill] sm:$0xff] %v10684_v16  ;;  %12046 = vst [vmem:[#allocation69_spill] sm:$0xff] %v10687_v25 }
 0x7a6   :  { %4503 = vmatpush1.bf16.msra.mxu0 %v10661_v7  ;;  %6994 = vmatpush3.bf16.msra.mxu1 %v10664_v22  ;;  %v10712_v22 = vld [vmem:[#allocation6 + $0x18] ss:$12 sps:$4 sm:$0xff]   ;;  %v10715_v7 = vld [vmem:[#allocation6 + $0x20] ss:$12 sps:$4 sm:$0xff]  }
 0x7a7   :  { %4504 = vmatprep.subr.bf16.mxu0 %v10667_v18  ;;  %6995 = vmatprep.subr.bf16.mxu1 %v11718_v51  ;;  %v10704_v18 = vld [vmem:[#allocation6 + $0x38] ss:$12 sps:$4 sm:$0xff]   ;;  %12053 = vst [vmem:[#allocation76_spill] sm:$0xff] %v10712_v22  ;;  %12054 = vst [vmem:[#allocation77_spill] sm:$0xff] %v10715_v7 }
 0x7a8   :  { %12051 = vst [vmem:[#allocation74_spill] sm:$0xff] %v10704_v18 }
 0x7aa   :  { %4505 = vmatpush1.bf16.msra.mxu0 %v10671_v2  ;;  %6996 = vmatpush3.bf16.msra.mxu1 %v10674_v40  ;;  %v10691_v40 = vld [vmem:[#allocation6 + $0x48] ss:$12 sps:$4 sm:$0xff]  }
 0x7ab   :  { %4506 = vmatprep.subr.bf16.mxu0 %v10677_v61  ;;  %6997 = vmatprep.subr.bf16.mxu1 %v11718_v51  ;;  %12047 = vst [vmem:[#allocation70_spill] sm:$0xff] %v10691_v40  ;;  %v10694_v61 = vld [vmem:[#allocation6 + $0x50] ss:$12 sps:$4 sm:$0xff]  }
 0x7ac   :  { %12048 = vst [vmem:[#allocation71_spill] sm:$0xff] %v10694_v61 }
 0x7ad   :  { %v7609_v8 = vpop.eup %7608 }
 0x7ae   :  { %4507 = vmatpush1.bf16.msra.mxu0 %v10681_v23  ;;  %6998 = vmatpush3.bf16.msra.mxu1 %v10684_v16  ;;  %v10697_v23 = vld [vmem:[#allocation6 + $0x34] ss:$12 sps:$4 sm:$0xff]   ;;  %v4073_v2 = vsub.f32 1.0, %v7609_v8 }
 0x7af   :  { %4508 = vmatprep.subr.bf16.mxu0 %v10687_v25  ;;  %6999 = vmatprep.subr.bf16.mxu1 %v11718_v51  ;;  %12049 = vst [vmem:[#allocation72_spill] sm:$0xff] %v10697_v23  ;;  %v10701_v25 = vld [vmem:[#allocation6 + $0x30] ss:$12 sps:$4 sm:$0xff]  }
 0x7b0   :  { %v7611_v16 = vpop.eup %7610  ;;  %12050 = vst [vmem:[#allocation73_spill] sm:$0xff] %v10701_v25 }
 0x7b2   :  { %4509 = vmatpush1.bf16.msra.mxu0 %v10691_v40  ;;  %7000 = vmatpush3.bf16.msra.mxu1 %v10694_v61  ;;  %v10707_v40 = vld [vmem:[#allocation6 + $0x1c] ss:$12 sps:$4 sm:$0xff]   ;;  %v4074_v61 = vmul.f32 %v7611_v16, %v4073_v2 }
 0x7b3   :  { %4510 = vmatprep.subr.bf16.mxu0 %v10697_v23  ;;  %7001 = vmatprep.subr.bf16.mxu1 %v11718_v51  ;;  %12052 = vst [vmem:[#allocation75_spill] sm:$0xff] %v10707_v40  ;;  %v4075_v23 = vmul.f32 %v7609_v8, %v10306_v13 }
 0x7b5   :  { %v10724_v2 = vadd.f32 %v4075_v23, %v4074_v61 }
 0x7b6   :  { %4511 = vmatpush1.bf16.msra.mxu0 %v10701_v25  ;;  %7002 = vmatpush3.bf16.msra.mxu1 %v10704_v18  ;;  %v4112_v18 = vadd.f32 %v10626_v33, %v12001_v32  ;;  %v10720_v25 = vld [vmem:[#allocation6 + $0x4] ss:$12 sps:$4 sm:$0xff]  }
 0x7b7   :  { %4512 = vmatprep.subr.bf16.mxu0 %v10707_v40  ;;  %7003 = vmatprep.subr.bf16.mxu1 %v11718_v51  ;;  %12055 = vst [vmem:[#allocation78_spill] sm:$0xff] %v10720_v25  ;;  %v10726_v40 = vld [vmem:[#allocation6] ss:$12 sps:$4 sm:$0xff]  }
 0x7ba   :  { %4513 = vmatpush1.bf16.msra.mxu0 %v10712_v22  ;;  %7004 = vmatpush3.bf16.msra.mxu1 %v10715_v7  ;;  %v10729_v22 = vld [vmem:[#allocation6 + $0x8] ss:$12 sps:$4 sm:$0xff]  }
 0x7bb   :  { %4514 = vmatprep.subr.bf16.mxu0 %v10720_v25  ;;  %7005 = vmatprep.subr.bf16.mxu1 %v11718_v51  ;;  %v4499_v25 = vpack.c.bf16 %v10724_v2, %v10724_v2 }
 0x7bc   :  { %v4193_v8 = vpop.f32.mrf.mxu0  ;;  %v4234_v13 = vpop.f32.mrf.mxu1 }
 0x7bd   :  { %v4240_v16 = vadd.f32 %v4193_v8, %v4112_v18 }
 0x7be   :  { %4515 = vmatpush1.bf16.msra.mxu0 %v10726_v40  ;;  %7006 = vmatpush3.bf16.msra.mxu1 %v10729_v22  ;;  %v4195_v33 = vpop.f32.mrf.mxu0  ;;  %v6949_v32 = vpop.f32.mrf.mxu1 }
 0x7bf   :  { %v5965_v7 = vmul.f32 -1.442695, %v4240_v16  ;;  %4603 = vmatprep.subr.bf16.mxu0 %v10316_v11  ;;  %7011 = vmatprep.subr.bf16.mxu1 %v11718_v51  ;;  %v4114_v32 = vadd.f32 %v10638_v35, %v9337_v27  ;;  %v12073_v16 = vld [vmem:[#allocation36_spill] sm:$0xff] }
 0x7c0   :  { %v4197_v61 = vpop.f32.mrf.mxu0  ;;  %v4237_v18 = vpop.f32.mrf.mxu1 }
 0x7c1   :  { %7612 = vpow2.f32 %v5965_v7  ;;  %4533 = vmatmul.mubr.bf16.vlgmr.msra.gmra.mxu0 %v4499_v25  ;;  %7008 = vmatmul.mubr.bf16.vlgmr.msra.gmra.mxu1 %v4499_v25  ;;  %v4241_v11 = vadd.f32 %v4195_v33, %v4114_v32  ;;  %v12074_v33 = vld [vmem:[#allocation39_spill] sm:$0xff]  ;;  %v12075_v61 = vld [vmem:[#allocation41_spill] sm:$0xff] }
 0x7c2   :  { %4604 = vmatpush1.bf16.msra.mxu0 %v10322_v47  ;;  %7012 = vmatpush3.bf16.msra.mxu1 %v10325_v5  ;;  %v4198_v23 = vpop.f32.mrf.mxu0  ;;  %v6950_v8 = vpop.f32.mrf.mxu1 }
 0x7c3   :  { %4605 = vmatprep.subr.bf16.mxu0 %v10328_v39  ;;  %7013 = vmatprep.subr.bf16.mxu1 %v11718_v51  ;;  %v5966_v47 = vmul.f32 -1.442695, %v4241_v11  ;;  %v12076_v23 = vld [vmem:[#allocation43_spill] sm:$0xff]  ;;  %v12077_v8 = vld [vmem:[#allocation44_spill] sm:$0xff] }
 0x7c4   :  { %4635 = vmatprep.mubr.bf16.mxu0 %v11648_v54  ;;  %7027 = vmatprep.mubr.msk.bf16.mxu1 %vm8177_vm2, %v11718_v51  ;;  %v12078_v11 = vld [vmem:[#allocation47_spill] sm:$0xff] }
 0x7c5   :  { %7614 = vpow2.f32 %v5966_v47 }
 0x7c6   :  { %4606 = vmatpush1.bf16.msra.mxu0 %v10337_v38  ;;  %7014 = vmatpush3.bf16.msra.mxu1 %v10340_v6  ;;  %v10772_v38 = vld [vmem:[%s11328_s13] ss:$0 sm:$0xff] }
 0x7c7   :  { %4607 = vmatprep.subr.bf16.mxu0 %v10343_v20  ;;  %7015 = vmatprep.subr.bf16.mxu1 %v11718_v51  ;;  %12056 = vst [vmem:[#allocation79_spill] sm:$0xff] %v10772_v38  ;;  %v4254_v6 = vadd.f32 %v10772_v38, %v4234_v13 }
 0x7ca   :  { %4608 = vmatpush1.bf16.msra.mxu0 %v10347_v30  ;;  %7016 = vmatpush3.bf16.msra.mxu1 %v10350_v62  ;;  %v4153_v62 = vadd.f32 %v10628_v58, %v9387_v55  ;;  %v12071_v58 = vld [vmem:[#allocation35_spill] sm:$0xff] }
 0x7cb   :  { %4609 = vmatprep.subr.bf16.mxu0 %v10353_v44  ;;  %7017 = vmatprep.subr.bf16.mxu1 %v11718_v51 }
 0x7ce   :  { %v7613_v5 = vpop.eup %7612  ;;  %4610 = vmatpush1.bf16.msra.mxu0 %v10357_v12  ;;  %7018 = vmatpush3.bf16.msra.mxu1 %v10360_v52  ;;  %v12057_v52 = vld [vmem:[#allocation19_spill] sm:$0xff] }
 0x7cf   :  { %v4248_v35 = vadd.f32 1.0, %v7613_v5  ;;  %4611 = vmatprep.subr.bf16.mxu0 %v10363_v59  ;;  %7019 = vmatprep.subr.bf16.mxu1 %v11718_v51  ;;  %v12058_v59 = vld [vmem:[#allocation29_spill] sm:$0xff] }
 0x7d1   :  { %7616 = vrcp.f32 %v4248_v35 }
 0x7d2   :  { %4612 = vmatpush1.bf16.msra.mxu0 %v10367_v50  ;;  %7020 = vmatpush3.bf16.msra.mxu1 %v10370_v41  ;;  %v7615_v39 = vpop.eup %7614  ;;  %v12059_v50 = vld [vmem:[#allocation24_spill] sm:$0xff]  ;;  %v12060_v41 = vld [vmem:[#allocation26_spill] sm:$0xff] }
 0x7d3   :  { %4613 = vmatprep.subr.bf16.mxu0 %v10373_v57  ;;  %7021 = vmatprep.subr.bf16.mxu1 %v11718_v51  ;;  %v4249_v44 = vadd.f32 1.0, %v7615_v39  ;;  %v12061_v57 = vld [vmem:[#allocation25_spill] sm:$0xff]  ;;  %v12089_v39 = vld [vmem:[#allocation15_spill] sm:$0xff] }
 0x7d5   :  { %7618 = vrcp.f32 %v4249_v44 }
 0x7d6   :  { %4614 = vmatpush1.bf16.msra.mxu0 %v10377_v17  ;;  %7022 = vmatpush3.bf16.msra.mxu1 %v10380_v49  ;;  %v12062_v17 = vld [vmem:[#allocation28_spill] sm:$0xff]  ;;  %v12063_v49 = vld [vmem:[#allocation31_spill] sm:$0xff] }
 0x7d7   :  { %4615 = vmatprep.subr.bf16.mxu0 %v10383_v21  ;;  %7023 = vmatprep.subr.bf16.mxu1 %v11718_v51  ;;  %v12064_v21 = vld [vmem:[#allocation34_spill] sm:$0xff] }
 0x7da   :  { %4616 = vmatpush1.bf16.msra.mxu0 %v10387_v29  ;;  %7024 = vmatpush3.bf16.msra.mxu1 %v10390_v31  ;;  %v12065_v29 = vld [vmem:[#allocation27_spill] sm:$0xff] }
 0x7db   :  { %4617 = vmatprep.subr.bf16.mxu0 %v10393_v3  ;;  %7025 = vmatprep.subr.bf16.mxu1 %v11718_v51  ;;  %v12066_v3 = vld [vmem:[#allocation30_spill] sm:$0xff] }
 0x7de   :  { %v7617_v20 = vpop.eup %7616  ;;  %4618 = vmatpush1.bf16.msra.mxu0 %v10399_v19  ;;  %7026 = vmatpush3.bf16.msra.mxu1 %v10402_v15  ;;  %v12067_v19 = vld [vmem:[#allocation37_spill] sm:$0xff]  ;;  %v12068_v15 = vld [vmem:[#allocation32_spill] sm:$0xff] }
 0x7df   :  { %v4255_v30 = vmul.f32 %v7617_v20, %v4254_v6  ;;  %4685 = vmatprep.subr.bf16.mxu0 %v10405_v43  ;;  %7031 = vmatprep.subr.bf16.mxu1 %v11718_v51  ;;  %v12090_v20 = vld [vmem:[#allocation16_spill] sm:$0xff] }
 0x7e1   :  { %4636 = vmatmul.mubr.bf16.vlgmr.msra.gmra.mxu0 %v4499_v25  ;;  %7028 = vmatmul.mubr.bf16.vlgmr.msra.gmra.mxu1 %v4499_v25  ;;  %v4256_v12 = vadd.f32 %v4255_v30, %v4153_v62  ;;  %v12072_v25 = vld [vmem:[#allocation42_spill] sm:$0xff] }
 0x7e2   :  { %4686 = vmatpush1.bf16.msra.mxu0 %v10413_v63  ;;  %7032 = vmatpush3.bf16.msra.mxu1 %v10416_v4  ;;  %v7619_v31 = vpop.eup %7618  ;;  %v12069_v4 = vld [vmem:[#allocation33_spill] sm:$0xff] }
 0x7e3   :  { %4687 = vmatprep.subr.bf16.mxu0 %v10419_v24  ;;  %7033 = vmatprep.subr.bf16.mxu1 %v11718_v51  ;;  %7620 = vtanh.f32 %v4256_v12  ;;  %v4258_v63 = vsub.f32 1.0, %v7619_v31  ;;  %v12070_v24 = vld [vmem:[#allocation38_spill] sm:$0xff]  ;;  %v4260_v13 = vmul.f32 %v7619_v31, %v12072_v25 }
 0x7e4   :  { %4717 = vmatprep.mubr.bf16.mxu0 %v11648_v54  ;;  %7047 = vmatprep.mubr.msk.bf16.mxu1 %vm8177_vm2, %v11718_v51 }
 0x7e6   :  { %4688 = vmatpush1.bf16.msra.mxu0 %v12057_v52  ;;  %7034 = vmatpush3.bf16.msra.mxu1 %v12058_v59 }
 0x7e7   :  { %4689 = vmatprep.subr.bf16.mxu0 %v12059_v50  ;;  %7035 = vmatprep.subr.bf16.mxu1 %v11718_v51 }
 0x7ea   :  { %4690 = vmatpush1.bf16.msra.mxu0 %v12060_v41  ;;  %7036 = vmatpush3.bf16.msra.mxu1 %v12061_v57  ;;  %v12091_v57 = vld [vmem:[#allocation17_spill] sm:$0xff] }
 0x7eb   :  { %4691 = vmatprep.subr.bf16.mxu0 %v12062_v17  ;;  %7037 = vmatprep.subr.bf16.mxu1 %v11718_v51 }
 0x7ee   :  { %4692 = vmatpush1.bf16.msra.mxu0 %v12063_v49  ;;  %7038 = vmatpush3.bf16.msra.mxu1 %v12064_v21  ;;  %v12092_v49 = vld [vmem:[#allocation18_spill] sm:$0xff] }
 0x7ef   :  { %4693 = vmatprep.subr.bf16.mxu0 %v12065_v29  ;;  %7039 = vmatprep.subr.bf16.mxu1 %v11718_v51 }
 0x7f0   :  { %v7621_v43 = vpop.eup %7620 }
 0x7f1   :  { %v4259_v7 = vmul.f32 %v7621_v43, %v4258_v63 }
 0x7f2   :  { %4694 = vmatpush1.bf16.msra.mxu0 %v12066_v3  ;;  %7040 = vmatpush3.bf16.msra.mxu1 %v12067_v19 }
 0x7f3   :  { %4695 = vmatprep.subr.bf16.mxu0 %v12068_v15  ;;  %7041 = vmatprep.subr.bf16.mxu1 %v11718_v51  ;;  %v10813_v18 = vadd.f32 %v4260_v13, %v4259_v7 }
 0x7f5   :  { %v4684_v32 = vpack.c.bf16 %v10813_v18, %v10813_v18 }
 0x7f6   :  { %4696 = vmatpush1.bf16.msra.mxu0 %v12069_v4  ;;  %7042 = vmatpush3.bf16.msra.mxu1 %v12070_v24  ;;  %v12093_v24 = vld [vmem:[#allocation48_spill] sm:$0xff] }
 0x7f7   :  { %4697 = vmatprep.subr.bf16.mxu0 %v12071_v58  ;;  %7043 = vmatprep.subr.bf16.mxu1 %v11718_v51 }
 0x7fa   :  { %4698 = vmatpush1.bf16.msra.mxu0 %v12073_v16  ;;  %7044 = vmatpush3.bf16.msra.mxu1 %v12074_v33 }
 0x7fb   :  { %4699 = vmatprep.subr.bf16.mxu0 %v12075_v61  ;;  %7045 = vmatprep.subr.bf16.mxu1 %v11718_v51 }
 0x7fe   :  { %4700 = vmatpush1.bf16.msra.mxu0 %v12076_v23  ;;  %7046 = vmatpush3.bf16.msra.mxu1 %v12077_v8 }
 0x7ff   :  { %4799 = vmatprep.subr.bf16.mxu0 %v12078_v11  ;;  %7051 = vmatprep.subr.bf16.mxu1 %v11718_v51 }
 0x801   :  { %4718 = vmatmul.mubr.bf16.vlgmr.msra.gmra.mxu0 %v4684_v32  ;;  %7048 = vmatmul.mubr.bf16.vlgmr.msra.gmra.mxu1 %v4684_v32 }
 0x802   :  { %4800 = vmatpush1.bf16.msra.mxu0 %v10551_v14  ;;  %7052 = vmatpush3.bf16.msra.mxu1 %v10554_v56  ;;  %v12079_v14 = vld [vmem:[#allocation51_spill] sm:$0xff]  ;;  %v12080_v56 = vld [vmem:[#allocation52_spill] sm:$0xff] }
 0x803   :  { %4801 = vmatprep.subr.bf16.mxu0 %v10557_v37  ;;  %7053 = vmatprep.subr.bf16.mxu1 %v11718_v51  ;;  %v12081_v37 = vld [vmem:[#allocation53_spill] sm:$0xff] }
 0x804   :  { %4831 = vmatprep.mubr.bf16.mxu0 %v11648_v54  ;;  %7067 = vmatprep.mubr.msk.bf16.mxu1 %vm8177_vm2, %v11718_v51 }
 0x806   :  { %4802 = vmatpush1.bf16.msra.mxu0 %v10566_v60  ;;  %7054 = vmatpush3.bf16.msra.mxu1 %v10569_v36  ;;  %v12082_v60 = vld [vmem:[#allocation54_spill] sm:$0xff]  ;;  %v12083_v36 = vld [vmem:[#allocation55_spill] sm:$0xff] }
 0x807   :  { %4803 = vmatprep.subr.bf16.mxu0 %v10572_v10  ;;  %7055 = vmatprep.subr.bf16.mxu1 %v11718_v51  ;;  %v12084_v10 = vld [vmem:[#allocation56_spill] sm:$0xff] }
 0x80a   :  { %4804 = vmatpush1.bf16.msra.mxu0 %v10576_v53  ;;  %7056 = vmatpush3.bf16.msra.mxu1 %v10579_v48  ;;  %v12085_v53 = vld [vmem:[#allocation57_spill] sm:$0xff]  ;;  %v12086_v48 = vld [vmem:[#allocation58_spill] sm:$0xff] }
 0x80b   :  { %4805 = vmatprep.subr.bf16.mxu0 %v10582_v9  ;;  %7057 = vmatprep.subr.bf16.mxu1 %v11718_v51  ;;  %v12087_v9 = vld [vmem:[#allocation59_spill] sm:$0xff] }
 0x80e   :  { %4806 = vmatpush1.bf16.msra.mxu0 %v10586_v34  ;;  %7058 = vmatpush3.bf16.msra.mxu1 %v10589_v28  ;;  %v12088_v34 = vld [vmem:[#allocation60_spill] sm:$0xff] }
 0x80f   :  { %4807 = vmatprep.subr.bf16.mxu0 %v10592_v46  ;;  %7059 = vmatprep.subr.bf16.mxu1 %v11718_v51 }
 0x812   :  { %4808 = vmatpush1.bf16.msra.mxu0 %v10596_v26  ;;  %7060 = vmatpush3.bf16.msra.mxu1 %v12079_v14 }
 0x813   :  { %4809 = vmatprep.subr.bf16.mxu0 %v12080_v56  ;;  %7061 = vmatprep.subr.bf16.mxu1 %v11718_v51 }
 0x816   :  { %4810 = vmatpush1.bf16.msra.mxu0 %v12081_v37  ;;  %7062 = vmatpush3.bf16.msra.mxu1 %v12082_v60 }
 0x817   :  { %4811 = vmatprep.subr.bf16.mxu0 %v12083_v36  ;;  %7063 = vmatprep.subr.bf16.mxu1 %v11718_v51 }
 0x81a   :  { %4812 = vmatpush1.bf16.msra.mxu0 %v12084_v10  ;;  %7064 = vmatpush3.bf16.msra.mxu1 %v12085_v53 }
 0x81b   :  { %4813 = vmatprep.subr.bf16.mxu0 %v12086_v48  ;;  %7065 = vmatprep.subr.bf16.mxu1 %v11718_v51  ;;  %v12094_v48 = vld [vmem:[#allocation20_spill] sm:$0xff] }
 0x81e   :  { %4814 = vmatpush1.bf16.msra.mxu0 %v12087_v9  ;;  %7066 = vmatpush3.bf16.msra.mxu1 %v12088_v34  ;;  %v12095_v34 = vld [vmem:[#allocation21_spill] sm:$0xff] }
 0x81f   :  { %4881 = vmatprep.subr.bf16.mxu0 %v10640_v45  ;;  %7071 = vmatprep.subr.bf16.mxu1 %v11718_v51 }
 0x841   :  { %v4307_v28 = vpop.f32.mrf.mxu0  ;;  %v4348_v46 = vpop.f32.mrf.mxu1 }
 0x842   :  { %v4356_v26 = vrot.slane %v4307_v28, 1  ;;  %v4358_v47 = vrot.slane %v4307_v28, 2  ;;  %v4392_v58 = vadd.f32 %v12093_v24, %v4348_v46 }
 0x843   :  { %v4309_v5 = vpop.f32.mrf.mxu0  ;;  %v6969_v35 = vpop.f32.mrf.mxu1 }
 0x844   :  { %v4364_v6 = vadd.f32 %v4356_v26, %v12089_v39  ;;  %v4366_v30 = vadd.f32 %v4358_v47, %v12090_v20  ;;  %v4357_v59 = vrot.slane %v4309_v5, 1  ;;  %v4359_v50 = vrot.slane %v4309_v5, 2  ;;  %v12096_v47 = vld [vmem:[#allocation49_spill] sm:$0xff] }
 0x845   :  { %v4311_v62 = vpop.f32.mrf.mxu0  ;;  %v4351_v44 = vpop.f32.mrf.mxu1  ;;  %v4394_v8 = vrot.slane %v4392_v58, 1  ;;  %v4395_v11 = vrot.slane %v4392_v58, 2  ;;  %v4410_v5 = vrot.slane %v12096_v47, 7  ;;  %v12113_v47 = vld [vmem:[#allocation74_spill] sm:$0xff] }
 0x846   :  { %v5967_v12 = vmul.f32 -1.442695, %v4364_v6  ;;  %v5969_v52 = vmul.f32 -1.442695, %v4366_v30  ;;  %v4365_v17 = vadd.f32 %v4357_v59, %v12091_v57  ;;  %v4367_v21 = vadd.f32 %v4359_v50, %v12092_v49  ;;  %v12097_v6 = vld [vmem:[#allocation50_spill] sm:$0xff] }
 0x847   :  { %v4312_v41 = vpop.f32.mrf.mxu0  ;;  %v6970_v45 = vpop.f32.mrf.mxu1  ;;  %v4411_v20 = vrot.slane %v12097_v6, 7  ;;  %v12116_v6 = vld [vmem:[#allocation77_spill] sm:$0xff] }
 0x848   :  { %7622 = vpow2.f32 %v5967_v12  ;;  %v5968_v29 = vmul.f32 -1.442695, %v4365_v17  ;;  %v5970_v31 = vmul.f32 -1.442695, %v4367_v21  ;;  %v12098_v21 = vld [vmem:[#allocation45_spill] sm:$0xff] }
 0x849   :  { %7624 = vpow2.f32 %v5969_v52 }
 0x84a   :  { %7626 = vpow2.f32 %v5968_v29 }
 0x84b   :  { %7628 = vpow2.f32 %v5970_v31 }
 0x855   :  { %v7623_v3 = vpop.eup %7622 }
 0x856   :  { %v7625_v19 = vpop.eup %7624  ;;  %v4380_v15 = vadd.f32 1.0, %v7623_v3 }
 0x857   :  { %v4382_v43 = vadd.f32 1.0, %v7625_v19  ;;  %v7627_v63 = vpop.eup %7626 }
 0x858   :  { %7630 = vrcp.f32 %v4380_v15  ;;  %v7629_v4 = vpop.eup %7628  ;;  %v4381_v16 = vadd.f32 1.0, %v7627_v63 }
 0x859   :  { %7632 = vrcp.f32 %v4382_v43  ;;  %v4383_v33 = vadd.f32 1.0, %v7629_v4 }
 0x85a   :  { %7634 = vrcp.f32 %v4381_v16 }
 0x85b   :  { %7636 = vrcp.f32 %v4383_v33 }
 0x861   :  { %v4452_v7 = vpop.f32.mrf.mxu0  ;;  %v10861_v13 = vpop.f32.mrf.mxu1 }
 0x862   :  { %v4453_v29 = vadd.f32 %v4452_v7, %v12098_v21 }
 0x863   :  { %v4454_v61 = vpop.f32.mrf.mxu0  ;;  %v6989_v23 = vpop.f32.mrf.mxu1 }
 0x865   :  { %v7631_v32 = vpop.eup %7630  ;;  %v4456_v14 = vpop.f32.mrf.mxu0 }
 0x866   :  { %v4496_v56 = vpop.f32.mrf.mxu1  ;;  %v7633_v37 = vpop.eup %7632  ;;  %v4398_v60 = vmul.f32 %v7631_v32, %v4394_v8  ;;  %v12099_v8 = vld [vmem:[#allocation46_spill] sm:$0xff] }
 0x867   :  { %v4399_v36 = vmul.f32 %v7633_v37, %v4395_v11  ;;  %v4457_v10 = vpop.f32.mrf.mxu0  ;;  %v7635_v46 = vpop.eup %7634  ;;  %v4455_v32 = vadd.f32 %v4454_v61, %v12099_v8  ;;  %v12100_v61 = vld [vmem:[#allocation61_spill] sm:$0xff]  ;;  %v12101_v56 = vld [vmem:[#allocation62_spill] sm:$0xff] }
 0x868   :  { %v6990_v53 = vpop.f32.mrf.mxu1  ;;  %v4400_v9 = vadd.f32 %v4398_v60, %v12094_v48  ;;  %v7637_v26 = vpop.eup %7636  ;;  %v4404_v35 = vsub.f32 1.0, %v7635_v46  ;;  %v4414_v12 = vmul.f32 %v7635_v46, %v4410_v5  ;;  %v12102_v60 = vld [vmem:[#allocation63_spill] sm:$0xff]  ;;  %v12111_v46 = vld [vmem:[#allocation72_spill] sm:$0xff] }
 0x869   :  { %v4401_v28 = vadd.f32 %v4399_v36, %v12095_v34  ;;  %v4405_v30 = vsub.f32 1.0, %v7637_v26  ;;  %v4415_v59 = vmul.f32 %v7637_v26, %v4411_v20  ;;  %v12106_v10 = vld [vmem:[#allocation67_spill] sm:$0xff]  ;;  %v12107_v53 = vld [vmem:[#allocation68_spill] sm:$0xff]  ;;  %v12109_v34 = vld [vmem:[#allocation70_spill] sm:$0xff] }
 0x86a   :  { %7638 = vtanh.f32 %v4400_v9  ;;  %v12108_v9 = vld [vmem:[#allocation69_spill] sm:$0xff]  ;;  %v12114_v5 = vld [vmem:[#allocation75_spill] sm:$0xff] }
 0x86b   :  { %7640 = vtanh.f32 %v4401_v28  ;;  %v12110_v28 = vld [vmem:[#allocation71_spill] sm:$0xff]  ;;  %v12112_v26 = vld [vmem:[#allocation73_spill] sm:$0xff] }
 0x877   :  { %v7639_v39 = vpop.eup %7638 }
 0x878   :  { %v7641_v62 = vpop.eup %7640  ;;  %v4406_v44 = vmul.f32 %v7639_v39, %v4404_v35  ;;  %v12115_v39 = vld [vmem:[#allocation76_spill] sm:$0xff] }
 0x879   :  { %v4407_v52 = vmul.f32 %v7641_v62, %v4405_v30  ;;  %v12117_v30 = vld [vmem:[#allocation78_spill] sm:$0xff] }
 0x87a   :  { %v4416_v50 = vadd.f32 %v4414_v12, %v4406_v44  ;;  %v10912_v12 = vld [vmem:[%s11324_s9] ss:$0 sm:$0xff] }
 0x87b   :  { %v4417_v41 = vadd.f32 %v4415_v59, %v4407_v52 }
 0x87c   :  { %v4788_v45 = vpack.c.bf16 %v4416_v50, %v4416_v50  ;;  %5355 = vst [vmem:[%s11332_s17 - $0x7] sm:$0x80] %v4416_v50 }
 0x87d   :  { %v4789_v57 = vpack.c.bf16 %v4417_v41, %v4417_v41  ;;  %5356 = vst [vmem:[%s11332_s17 - $0x3] sm:$0x80] %v4417_v41 }
 0x87e   :  { %v4792_v17 = vunpack.c.l.b16 %v4788_v45  ;;  %v12118_v45 = vld [vmem:[#allocation22_spill] sm:$0xff] }
 0x87f   :  { %v4793_v49 = vunpack.c.l.b16 %v4789_v57  ;;  %v4494_v57 = vadd.f32 %v10861_v13, %v12118_v45 }
 0x880   :  { %v4794_v31 = vrot.slane %v4792_v17, 7 }
 0x881   :  { %v4534_v3 = vpop.f32.mrf.mxu0  ;;  %v4575_v19 = vpop.f32.mrf.mxu1  ;;  %v4795_v15 = vrot.slane %v4793_v49, 6  ;;  %v10919_v49 = vld [vmem:[#allocation7 + $0xac] ss:$12 sps:$4 sm:$0xff]  }
 0x882   :  { %v4581_v43 = vadd.f32 %v4534_v3, %v4453_v29  ;;  %v4595_v52 = vadd.f32 %v10912_v12, %v4575_v19 }
 0x883   :  { %v4536_v63 = vpop.f32.mrf.mxu0  ;;  %v7009_v4 = vpop.f32.mrf.mxu1  ;;  %v4796_v24 = vsel %vm438_vm3, %v4795_v15, %v4794_v31 }
 0x884   :  { %v5971_v58 = vmul.f32 -1.442695, %v4581_v43  ;;  %v4797_v16 = vpack.c.b16 %v4796_v24, %v4796_v24  ;;  %v4582_v14 = vadd.f32 %v4536_v63, %v4455_v32  ;;  %v10946_v32 = vld [vmem:[#allocation7 + $0x90] ss:$12 sps:$4 sm:$0xff]  }
 0x885   :  { %v4538_v33 = vpop.f32.mrf.mxu0  ;;  %v4578_v23 = vpop.f32.mrf.mxu1 }
 0x886   :  { %7642 = vpow2.f32 %v5971_v58  ;;  %4832 = vmatmul.mubr.bf16.vlgmr.msra.gmra.mxu0 %v4797_v16  ;;  %7068 = vmatmul.mubr.bf16.vlgmr.msra.gmra.mxu1 %v4797_v16  ;;  %v5972_v37 = vmul.f32 -1.442695, %v4582_v14  ;;  %v10932_v58 = vld [vmem:[#allocation7 + $0xa8] ss:$12 sps:$4 sm:$0xff]   ;;  %v10935_v16 = vld [vmem:[#allocation7 + $0xb0] ss:$12 sps:$4 sm:$0xff]  }
 0x887   :  { %v4539_v11 = vpop.f32.mrf.mxu0  ;;  %v7010_v7 = vpop.f32.mrf.mxu1  ;;  %4882 = vmatpush1.bf16.msra.mxu0 %v10648_v42  ;;  %7072 = vmatpush3.bf16.msra.mxu1 %v10651_v0  ;;  %v12103_v42 = vld [vmem:[#allocation64_spill] sm:$0xff]  ;;  %v12104_v0 = vld [vmem:[#allocation65_spill] sm:$0xff] }
 0x888   :  { %4883 = vmatprep.subr.bf16.mxu0 %v10654_v1  ;;  %7073 = vmatprep.subr.bf16.mxu1 %v11718_v51  ;;  %7644 = vpow2.f32 %v5972_v37  ;;  %v12105_v1 = vld [vmem:[#allocation66_spill] sm:$0xff]  ;;  %v10938_v33 = vld [vmem:[#allocation7 + $0x94] ss:$12 sps:$4 sm:$0xff]   ;;  %v10949_v11 = vld [vmem:[#allocation7 + $0x98] ss:$12 sps:$4 sm:$0xff]  }
 0x889   :  { %4913 = vmatprep.mubr.bf16.mxu0 %v11648_v54  ;;  %7087 = vmatprep.mubr.msk.bf16.mxu1 %vm8177_vm2, %v11718_v51 }
 0x88b   :  { %4884 = vmatpush1.bf16.msra.mxu0 %v12100_v61  ;;  %7074 = vmatpush3.bf16.msra.mxu1 %v12101_v56  ;;  %v10954_v56 = vld [vmem:[#allocation7 + $0x7c] ss:$12 sps:$4 sm:$0xff]  }
 0x88c   :  { %4885 = vmatprep.subr.bf16.mxu0 %v12102_v60  ;;  %7075 = vmatprep.subr.bf16.mxu1 %v11718_v51 }
 0x88f   :  { %4886 = vmatpush1.bf16.msra.mxu0 %v12103_v42  ;;  %7076 = vmatpush3.bf16.msra.mxu1 %v12104_v0  ;;  %v10958_v0 = vld [vmem:[#allocation7 + $0x78] ss:$12 sps:$4 sm:$0xff]  }
 0x890   :  { %4887 = vmatprep.subr.bf16.mxu0 %v12105_v1  ;;  %7077 = vmatprep.subr.bf16.mxu1 %v11718_v51  ;;  %v10961_v1 = vld [vmem:[#allocation7 + $0x80] ss:$12 sps:$4 sm:$0xff]  }
 0x893   :  { %v7643_v36 = vpop.eup %7642  ;;  %4888 = vmatpush1.bf16.msra.mxu0 %v12106_v10  ;;  %7078 = vmatpush3.bf16.msra.mxu1 %v12107_v53 }
 0x894   :  { %v4589_v48 = vadd.f32 1.0, %v7643_v36  ;;  %4889 = vmatprep.subr.bf16.mxu0 %v12108_v9  ;;  %7079 = vmatprep.subr.bf16.mxu1 %v11718_v51 }
 0x895   :  { %v7645_v35 = vpop.eup %7644 }
 0x896   :  { %7646 = vrcp.f32 %v4589_v48  ;;  %v4590_v20 = vadd.f32 1.0, %v7645_v35  ;;  %v10965_v48 = vld [vmem:[#allocation7 + $0x64] ss:$12 sps:$4 sm:$0xff]   ;;  %v10979_v35 = vld [vmem:[#allocation7 + $0x48] ss:$12 sps:$4 sm:$0xff]  }
 0x897   :  { %4890 = vmatpush1.bf16.msra.mxu0 %v12109_v34  ;;  %7080 = vmatpush3.bf16.msra.mxu1 %v12110_v28 }
 0x898   :  { %4891 = vmatprep.subr.bf16.mxu0 %v12111_v46  ;;  %7081 = vmatprep.subr.bf16.mxu1 %v11718_v51  ;;  %7648 = vrcp.f32 %v4590_v20  ;;  %v10969_v46 = vld [vmem:[#allocation7 + $0x60] ss:$12 sps:$4 sm:$0xff]   ;;  %v10989_v20 = vld [vmem:[#allocation7 + $0x30] ss:$12 sps:$4 sm:$0xff]  }
 0x89b   :  { %4892 = vmatpush1.bf16.msra.mxu0 %v12112_v26  ;;  %7082 = vmatpush3.bf16.msra.mxu1 %v12113_v47  ;;  %v10972_v26 = vld [vmem:[#allocation7 + $0x68] ss:$12 sps:$4 sm:$0xff]   ;;  %v10975_v47 = vld [vmem:[#allocation7 + $0x4c] ss:$12 sps:$4 sm:$0xff]  }
 0x89c   :  { %4893 = vmatprep.subr.bf16.mxu0 %v12114_v5  ;;  %7083 = vmatprep.subr.bf16.mxu1 %v11718_v51 }
 0x89f   :  { %4894 = vmatpush1.bf16.msra.mxu0 %v12115_v39  ;;  %7084 = vmatpush3.bf16.msra.mxu1 %v12116_v6  ;;  %v10982_v39 = vld [vmem:[#allocation7 + $0x50] ss:$12 sps:$4 sm:$0xff]   ;;  %v10985_v6 = vld [vmem:[#allocation7 + $0x34] ss:$12 sps:$4 sm:$0xff]  }
 0x8a0   :  { %4895 = vmatprep.subr.bf16.mxu0 %v12117_v30  ;;  %7085 = vmatprep.subr.bf16.mxu1 %v11718_v51  ;;  %v10992_v30 = vld [vmem:[#allocation7 + $0x38] ss:$12 sps:$4 sm:$0xff]  }
 0x8a1   :  { %v4637_v62 = vpop.f32.mrf.mxu0  ;;  %v10907_v44 = vpop.f32.mrf.mxu1 }
 0x8a3   :  { %v7647_v59 = vpop.eup %7646  ;;  %v4639_v50 = vpop.f32.mrf.mxu0  ;;  %4896 = vmatpush1.bf16.msra.mxu0 %v10726_v40  ;;  %7086 = vmatpush3.bf16.msra.mxu1 %v10729_v22 }
 0x8a4   :  { %v7029_v41 = vpop.f32.mrf.mxu1  ;;  %v4596_v17 = vmul.f32 %v7647_v59, %v4595_v52  ;;  %4984 = vmatprep.subr.bf16.mxu0 %v10919_v49  ;;  %7091 = vmatprep.subr.bf16.mxu1 %v11718_v51  ;;  %v4640_v53 = vadd.f32 %v4639_v50, %v9337_v27  ;;  %v10999_v50 = vld [vmem:[#allocation7 + $0x18] ss:$12 sps:$4 sm:$0xff]  }
 0x8a5   :  { %v4641_v29 = vpop.f32.mrf.mxu0  ;;  %v7649_v40 = vpop.eup %7648  ;;  %v11002_v41 = vld [vmem:[#allocation7 + $0x20] ss:$12 sps:$4 sm:$0xff]  }
 0x8a6   :  { %v4681_v31 = vpop.f32.mrf.mxu1  ;;  %v4597_v3 = vadd.f32 %v4596_v17, %v4494_v57  ;;  %v4599_v43 = vsub.f32 1.0, %v7649_v40  ;;  %v4601_v13 = vmul.f32 %v7649_v40, %v10724_v2  ;;  %v12119_v2 = vld [vmem:[#allocation99_spill] sm:$0xff]  ;;  %v11009_v17 = vld [vmem:[#allocation7] ss:$12 sps:$4 sm:$0xff]  }
 0x8a7   :  { %v4642_v19 = vpop.f32.mrf.mxu0  ;;  %v4638_v23 = vadd.f32 %v4637_v62, %v12119_v2  ;;  %v10995_v62 = vld [vmem:[#allocation7 + $0x1c] ss:$12 sps:$4 sm:$0xff]   ;;  %v11005_v57 = vld [vmem:[#allocation7 + $0x4] ss:$12 sps:$4 sm:$0xff]   ;;  %v11015_v31 = vld [vmem:[#allocation9 + $0xac] ss:$12 sps:$4 sm:$0xff]  }
 0x8a8   :  { %v7030_v15 = vpop.f32.mrf.mxu1  ;;  %7650 = vtanh.f32 %v4597_v3  ;;  %v11012_v29 = vld [vmem:[#allocation7 + $0x8] ss:$12 sps:$4 sm:$0xff]  }
 0x8a9   :  { %v11021_v19 = vld [vmem:[#allocation9 + $0xa8] ss:$12 sps:$4 sm:$0xff]   ;;  %v11024_v15 = vld [vmem:[#allocation9 + $0xb0] ss:$12 sps:$4 sm:$0xff]  }
 0x8aa   :  { %v11027_v40 = vld [vmem:[#allocation9 + $0x94] ss:$12 sps:$4 sm:$0xff]  }
 0x8b5   :  { %v7651_v22 = vpop.eup %7650 }
 0x8b6   :  { %v4600_v63 = vmul.f32 %v7651_v22, %v4599_v43  ;;  %v11034_v22 = vld [vmem:[#allocation9 + $0x90] ss:$12 sps:$4 sm:$0xff]  }
 0x8b8   :  { %v10924_v4 = vadd.f32 %v4601_v13, %v4600_v63  ;;  %v11037_v63 = vld [vmem:[#allocation9 + $0x98] ss:$12 sps:$4 sm:$0xff]  }
 0x8ba   :  { %v10928_v24 = vpack.c.bf16 %v10924_v4, %v10924_v4 }
 0x8bc   :  { %4914 = vmatmul.mubr.bf16.vlgmr.msra.gmra.mxu0 %v10928_v24  ;;  %7088 = vmatmul.mubr.bf16.vlgmr.msra.gmra.mxu1 %v10928_v24 }
 0x8bd   :  { %4985 = vmatpush1.bf16.msra.mxu0 %v10932_v58  ;;  %7092 = vmatpush3.bf16.msra.mxu1 %v10935_v16 }
 0x8be   :  { %4986 = vmatprep.subr.bf16.mxu0 %v10938_v33  ;;  %7093 = vmatprep.subr.bf16.mxu1 %v11718_v51 }
 0x8bf   :  { %5016 = vmatprep.mubr.bf16.mxu0 %v11648_v54  ;;  %7107 = vmatprep.mubr.msk.bf16.mxu1 %vm8177_vm2, %v11718_v51 }
 0x8c1   :  { %4987 = vmatpush1.bf16.msra.mxu0 %v10946_v32  ;;  %7094 = vmatpush3.bf16.msra.mxu1 %v10949_v11  ;;  %v4719_v7 = vpop.f32.mrf.mxu0  ;;  %v10952_v14 = vpop.f32.mrf.mxu1 }
 0x8c2   :  { %v4766_v61 = vadd.f32 %v4719_v7, %v4638_v23  ;;  %4988 = vmatprep.subr.bf16.mxu0 %v10954_v56  ;;  %7095 = vmatprep.subr.bf16.mxu1 %v11718_v51  ;;  %v4780_v13 = vadd.f32 %v10772_v38, %v10952_v14  ;;  %v4679_v7 = vadd.f32 %v10907_v44, %v9387_v55  ;;  %v11061_v44 = vld [vmem:[#allocation9 + $0x68] ss:$12 sps:$4 sm:$0xff]   ;;  %v11101_v55 = vld [vmem:[#allocation9] ss:$12 sps:$4 sm:$0xff]  }
 0x8c3   :  { %v4721_v37 = vpop.f32.mrf.mxu0  ;;  %v7049_v60 = vpop.f32.mrf.mxu1  ;;  %v11104_v38 = vld [vmem:[#allocation9 + $0x8] ss:$12 sps:$4 sm:$0xff]  }
 0x8c4   :  { %v5973_v42 = vmul.f32 -1.442695, %v4766_v61  ;;  %v4767_v28 = vadd.f32 %v4721_v37, %v4640_v53  ;;  %v11048_v37 = vld [vmem:[#allocation9 + $0x78] ss:$12 sps:$4 sm:$0xff]   ;;  %v11051_v60 = vld [vmem:[#allocation9 + $0x80] ss:$12 sps:$4 sm:$0xff]  }
 0x8c5   :  { %4989 = vmatpush1.bf16.msra.mxu0 %v10958_v0  ;;  %7096 = vmatpush3.bf16.msra.mxu1 %v10961_v1  ;;  %v4723_v36 = vpop.f32.mrf.mxu0  ;;  %v4763_v10 = vpop.f32.mrf.mxu1  ;;  %v11068_v53 = vld [vmem:[#allocation9 + $0x48] ss:$12 sps:$4 sm:$0xff]  }
 0x8c6   :  { %7652 = vpow2.f32 %v5973_v42  ;;  %4990 = vmatprep.subr.bf16.mxu0 %v10965_v48  ;;  %7097 = vmatprep.subr.bf16.mxu1 %v11718_v51  ;;  %v5974_v5 = vmul.f32 -1.442695, %v4767_v28  ;;  %v11054_v42 = vld [vmem:[#allocation9 + $0x64] ss:$12 sps:$4 sm:$0xff]   ;;  %v11058_v36 = vld [vmem:[#allocation9 + $0x60] ss:$12 sps:$4 sm:$0xff]  }
 0x8c7   :  { %v4724_v9 = vpop.f32.mrf.mxu0  ;;  %v7050_v34 = vpop.f32.mrf.mxu1  ;;  %v11064_v10 = vld [vmem:[#allocation9 + $0x4c] ss:$12 sps:$4 sm:$0xff]  }
 0x8c8   :  { %7654 = vpow2.f32 %v5974_v5  ;;  %v11071_v9 = vld [vmem:[#allocation9 + $0x50] ss:$12 sps:$4 sm:$0xff]   ;;  %v11074_v34 = vld [vmem:[#allocation9 + $0x34] ss:$12 sps:$4 sm:$0xff]  }
 0x8c9   :  { %4991 = vmatpush1.bf16.msra.mxu0 %v10969_v46  ;;  %7098 = vmatpush3.bf16.msra.mxu1 %v10972_v26  ;;  %v11078_v5 = vld [vmem:[#allocation9 + $0x30] ss:$12 sps:$4 sm:$0xff]  }
 0x8ca   :  { %4992 = vmatprep.subr.bf16.mxu0 %v10975_v47  ;;  %7099 = vmatprep.subr.bf16.mxu1 %v11718_v51 }
 0x8cd   :  { %4993 = vmatpush1.bf16.msra.mxu0 %v10979_v35  ;;  %7100 = vmatpush3.bf16.msra.mxu1 %v10982_v39 }
 0x8ce   :  { %4994 = vmatprep.subr.bf16.mxu0 %v10985_v6  ;;  %7101 = vmatprep.subr.bf16.mxu1 %v11718_v51 }
 0x8d1   :  { %4995 = vmatpush1.bf16.msra.mxu0 %v10989_v20  ;;  %7102 = vmatpush3.bf16.msra.mxu1 %v10992_v30 }
 0x8d2   :  { %4996 = vmatprep.subr.bf16.mxu0 %v10995_v62  ;;  %7103 = vmatprep.subr.bf16.mxu1 %v11718_v51 }
 0x8d3   :  { %v7653_v52 = vpop.eup %7652 }
 0x8d4   :  { %v4774_v59 = vadd.f32 1.0, %v7653_v52  ;;  %v11081_v52 = vld [vmem:[#allocation9 + $0x38] ss:$12 sps:$4 sm:$0xff]  }
 0x8d5   :  { %4997 = vmatpush1.bf16.msra.mxu0 %v10999_v50  ;;  %7104 = vmatpush3.bf16.msra.mxu1 %v11002_v41  ;;  %v7655_v3 = vpop.eup %7654 }
 0x8d6   :  { %7656 = vrcp.f32 %v4774_v59  ;;  %4998 = vmatprep.subr.bf16.mxu0 %v11005_v57  ;;  %7105 = vmatprep.subr.bf16.mxu1 %v11718_v51  ;;  %v4775_v43 = vadd.f32 1.0, %v7655_v3  ;;  %v11084_v59 = vld [vmem:[#allocation9 + $0x1c] ss:$12 sps:$4 sm:$0xff]  }
 0x8d8   :  { %7658 = vrcp.f32 %v4775_v43 }
 0x8d9   :  { %4999 = vmatpush1.bf16.msra.mxu0 %v11009_v17  ;;  %7106 = vmatpush3.bf16.msra.mxu1 %v11012_v29 }
 0x8da   :  { %5066 = vmatprep.subr.bf16.mxu0 %v11015_v31  ;;  %7111 = vmatprep.subr.bf16.mxu1 %v11718_v51 }
 0x8dc   :  { %5017 = vmatmul.mubr.bf16.vlgmr.msra.gmra.mxu0 %v10928_v24  ;;  %7108 = vmatmul.mubr.bf16.vlgmr.msra.gmra.mxu1 %v10928_v24  ;;  %v11042_v24 = vld [vmem:[#allocation9 + $0x7c] ss:$12 sps:$4 sm:$0xff]  }
 0x8dd   :  { %5067 = vmatpush1.bf16.msra.mxu0 %v11021_v19  ;;  %7112 = vmatpush3.bf16.msra.mxu1 %v11024_v15 }
 0x8de   :  { %5068 = vmatprep.subr.bf16.mxu0 %v11027_v40  ;;  %7113 = vmatprep.subr.bf16.mxu1 %v11718_v51 }
 0x8df   :  { %5098 = vmatprep.mubr.bf16.mxu0 %v11648_v54  ;;  %7127 = vmatprep.mubr.msk.bf16.mxu1 %vm8177_vm2, %v11718_v51 }
 0x8e1   :  { %5069 = vmatpush1.bf16.msra.mxu0 %v11034_v22  ;;  %7114 = vmatpush3.bf16.msra.mxu1 %v11037_v63 }
 0x8e2   :  { %5070 = vmatprep.subr.bf16.mxu0 %v11042_v24  ;;  %7115 = vmatprep.subr.bf16.mxu1 %v11718_v51 }
 0x8e3   :  { %v7657_v23 = vpop.eup %7656 }
 0x8e4   :  { %v4781_v61 = vmul.f32 %v7657_v23, %v4780_v13  ;;  %v11088_v13 = vld [vmem:[#allocation9 + $0x18] ss:$12 sps:$4 sm:$0xff]   ;;  %v11091_v23 = vld [vmem:[#allocation9 + $0x20] ss:$12 sps:$4 sm:$0xff]  }
 0x8e5   :  { %5071 = vmatpush1.bf16.msra.mxu0 %v11048_v37  ;;  %7116 = vmatpush3.bf16.msra.mxu1 %v11051_v60  ;;  %v7659_v28 = vpop.eup %7658  ;;  %12120 = vst [vmem:[#allocation80_spill] sm:$0xff] %v11091_v23 }
 0x8e6   :  { %v4782_v14 = vadd.f32 %v4781_v61, %v4679_v7  ;;  %5072 = vmatprep.subr.bf16.mxu0 %v11054_v42  ;;  %7117 = vmatprep.subr.bf16.mxu1 %v11718_v51  ;;  %v4784_v3 = vsub.f32 1.0, %v7659_v28  ;;  %v11094_v7 = vld [vmem:[#allocation9 + $0x4] ss:$12 sps:$4 sm:$0xff]  }
 0x8e8   :  { %7660 = vtanh.f32 %v4782_v14  ;;  %v4786_v14 = vmul.f32 %v7659_v28, %v10813_v18 }
 0x8e9   :  { %5073 = vmatpush1.bf16.msra.mxu0 %v11058_v36  ;;  %7118 = vmatpush3.bf16.msra.mxu1 %v11061_v44 }
 0x8ea   :  { %5074 = vmatprep.subr.bf16.mxu0 %v11064_v10  ;;  %7119 = vmatprep.subr.bf16.mxu1 %v11718_v51 }
 0x8ed   :  { %5075 = vmatpush1.bf16.msra.mxu0 %v11068_v53  ;;  %7120 = vmatpush3.bf16.msra.mxu1 %v11071_v9 }
 0x8ee   :  { %5076 = vmatprep.subr.bf16.mxu0 %v11074_v34  ;;  %7121 = vmatprep.subr.bf16.mxu1 %v11718_v51 }
 0x8f1   :  { %5077 = vmatpush1.bf16.msra.mxu0 %v11078_v5  ;;  %7122 = vmatpush3.bf16.msra.mxu1 %v11081_v52 }
 0x8f2   :  { %5078 = vmatprep.subr.bf16.mxu0 %v11084_v59  ;;  %7123 = vmatprep.subr.bf16.mxu1 %v11718_v51 }
 0x8f5   :  { %v7661_v43 = vpop.eup %7660  ;;  %5079 = vmatpush1.bf16.msra.mxu0 %v11088_v13  ;;  %7124 = vmatpush3.bf16.msra.mxu1 %v11091_v23 }
 0x8f6   :  { %5080 = vmatprep.subr.bf16.mxu0 %v11094_v7  ;;  %7125 = vmatprep.subr.bf16.mxu1 %v11718_v51  ;;  %v4785_v61 = vmul.f32 %v7661_v43, %v4784_v3 }
 0x8f8   :  { %v11099_v25 = vadd.f32 %v4786_v14, %v4785_v61 }
 0x8f9   :  { %5081 = vmatpush1.bf16.msra.mxu0 %v11101_v55  ;;  %7126 = vmatpush3.bf16.msra.mxu1 %v11104_v38 }
 0x8fa   :  { %v5065_v23 = vpack.c.bf16 %v11099_v25, %v11099_v25  ;;  %5170 = vmatprep.subr.bf16.mxu0 %v10919_v49  ;;  %7131 = vmatprep.subr.bf16.mxu1 %v11718_v51 }
 0x8fc   :  { %5099 = vmatmul.mubr.bf16.vlgmr.msra.gmra.mxu0 %v5065_v23  ;;  %7128 = vmatmul.mubr.bf16.vlgmr.msra.gmra.mxu1 %v5065_v23 }
 0x8fd   :  { %5171 = vmatpush1.bf16.msra.mxu0 %v10932_v58  ;;  %7132 = vmatpush3.bf16.msra.mxu1 %v10935_v16 }
 0x8fe   :  { %5172 = vmatprep.subr.bf16.mxu0 %v10938_v33  ;;  %7133 = vmatprep.subr.bf16.mxu1 %v11718_v51 }
 0x8ff   :  { %5202 = vmatprep.mubr.bf16.mxu0 %v11648_v54  ;;  %7147 = vmatprep.mubr.msk.bf16.mxu1 %vm8177_vm2, %v11718_v51 }
 0x901   :  { %5173 = vmatpush1.bf16.msra.mxu0 %v10946_v32  ;;  %7134 = vmatpush3.bf16.msra.mxu1 %v10949_v11 }
 0x902   :  { %5174 = vmatprep.subr.bf16.mxu0 %v10954_v56  ;;  %7135 = vmatprep.subr.bf16.mxu1 %v11718_v51 }
 0x905   :  { %5175 = vmatpush1.bf16.msra.mxu0 %v10958_v0  ;;  %7136 = vmatpush3.bf16.msra.mxu1 %v10961_v1 }
 0x906   :  { %5176 = vmatprep.subr.bf16.mxu0 %v10965_v48  ;;  %7137 = vmatprep.subr.bf16.mxu1 %v11718_v51 }
 0x909   :  { %5177 = vmatpush1.bf16.msra.mxu0 %v10969_v46  ;;  %7138 = vmatpush3.bf16.msra.mxu1 %v10972_v26 }
 0x90a   :  { %5178 = vmatprep.subr.bf16.mxu0 %v10975_v47  ;;  %7139 = vmatprep.subr.bf16.mxu1 %v11718_v51 }
 0x90d   :  { %5179 = vmatpush1.bf16.msra.mxu0 %v10979_v35  ;;  %7140 = vmatpush3.bf16.msra.mxu1 %v10982_v39 }
 0x90e   :  { %5180 = vmatprep.subr.bf16.mxu0 %v10985_v6  ;;  %7141 = vmatprep.subr.bf16.mxu1 %v11718_v51 }
 0x911   :  { %5181 = vmatpush1.bf16.msra.mxu0 %v10989_v20  ;;  %7142 = vmatpush3.bf16.msra.mxu1 %v10992_v30 }
 0x912   :  { %5182 = vmatprep.subr.bf16.mxu0 %v10995_v62  ;;  %7143 = vmatprep.subr.bf16.mxu1 %v11718_v51 }
 0x915   :  { %5183 = vmatpush1.bf16.msra.mxu0 %v10999_v50  ;;  %7144 = vmatpush3.bf16.msra.mxu1 %v11002_v41 }
 0x916   :  { %5184 = vmatprep.subr.bf16.mxu0 %v11005_v57  ;;  %7145 = vmatprep.subr.bf16.mxu1 %v11718_v51 }
 0x919   :  { %5185 = vmatpush1.bf16.msra.mxu0 %v11009_v17  ;;  %7146 = vmatpush3.bf16.msra.mxu1 %v11012_v29 }
 0x91a   :  { %5252 = vmatprep.subr.bf16.mxu0 %v11015_v31  ;;  %7151 = vmatprep.subr.bf16.mxu1 %v11718_v51 }
 0x946   :  { %v4833_v49 = vpop.f32.mrf.mxu0  ;;  %v4874_v58 = vpop.f32.mrf.mxu1 }
 0x947   :  { %v4834_v1 = vadd.f32 %v4833_v49, %v12098_v21 }
 0x948   :  { %v4835_v16 = vpop.f32.mrf.mxu0  ;;  %v7069_v33 = vpop.f32.mrf.mxu1 }
 0x949   :  { %v4836_v30 = vadd.f32 %v4835_v16, %v12099_v8  ;;  %v4875_v8 = vadd.f32 %v4874_v58, %v12118_v45 }
 0x94a   :  { %v4837_v32 = vpop.f32.mrf.mxu0  ;;  %v4877_v11 = vpop.f32.mrf.mxu1 }
 0x94c   :  { %v4838_v56 = vpop.f32.mrf.mxu0  ;;  %v7070_v0 = vpop.f32.mrf.mxu1 }
 0x94d   :  { %v8178_v0 = vmov 1966171168  }
 0x97c   :  { %v4915_v48 = vpop.f32.mrf.mxu0  ;;  %v4956_v46 = vpop.f32.mrf.mxu1 }
 0x97d   :  { %v4962_v26 = vadd.f32 %v4915_v48, %v4834_v1  ;;  %v4976_v43 = vadd.f32 %v10912_v12, %v4956_v46  ;;  %v5359_v1 = vunpack.c.l.s4 %v8178_v0 }
 0x97e   :  { %v4917_v47 = vpop.f32.mrf.mxu0  ;;  %v7089_v35 = vpop.f32.mrf.mxu1 }
 0x97f   :  { %v5975_v39 = vmul.f32 -1.442695, %v4962_v26  ;;  %v4963_v41 = vadd.f32 %v4917_v47, %v4836_v30  ;;  %v5360_v26 = vunpack.c.0.s8 %v5359_v1 }
 0x980   :  { %v4919_v6 = vpop.f32.mrf.mxu0  ;;  %v4959_v20 = vpop.f32.mrf.mxu1 }
 0x981   :  { %7662 = vpow2.f32 %v5975_v39  ;;  %v5976_v57 = vmul.f32 -1.442695, %v4963_v41  ;;  %v12121_v39 = vld [vmem:[#allocation13_spill] sm:$0xff] }
 0x982   :  { %v4920_v62 = vpop.f32.mrf.mxu0  ;;  %v7090_v50 = vpop.f32.mrf.mxu1  ;;  %v11154_v6 = vsub.s32 %v5360_v26, %v12121_v39 }
 0x983   :  { %7664 = vpow2.f32 %v5976_v57 }
 0x98e   :  { %v7663_v17 = vpop.eup %7662 }
 0x98f   :  { %v4970_v29 = vadd.f32 1.0, %v7663_v17 }
 0x990   :  { %v7665_v21 = vpop.eup %7664 }
 0x991   :  { %7666 = vrcp.f32 %v4970_v29  ;;  %v4971_v31 = vadd.f32 1.0, %v7665_v21 }
 0x993   :  { %7668 = vrcp.f32 %v4971_v31 }
 0x99c   :  { %v5018_v28 = vpop.f32.mrf.mxu0  ;;  %v11148_v3 = vpop.f32.mrf.mxu1 }
 0x99e   :  { %v7667_v23 = vpop.eup %7666  ;;  %v5020_v61 = vpop.f32.mrf.mxu0 }
 0x99f   :  { %v7109_v14 = vpop.f32.mrf.mxu1  ;;  %v4977_v49 = vmul.f32 %v7667_v23, %v4976_v43  ;;  %v5021_v17 = vadd.f32 %v5020_v61, %v9337_v27  ;;  %v7365_v43 = vld [vmem:[%s11329_s14 + $0x30] sm:$0xff]   ;;  %v7366_v23 = vld [vmem:[%s11329_s14 + $0x28] sm:$0xff]   ;;  %v7367_v61 = vld [vmem:[%s11329_s14 + $0x20] sm:$0xff]  }
 0x9a0   :  { %v5022_v16 = vpop.f32.mrf.mxu0  ;;  %v7669_v48 = vpop.eup %7668  ;;  %v7368_v14 = vld [vmem:[%s11329_s14 + $0x18] sm:$0xff]  }
 0x9a1   :  { %v5062_v33 = vpop.f32.mrf.mxu1  ;;  %v4978_v32 = vadd.f32 %v4977_v49, %v4875_v8  ;;  %v4980_v47 = vsub.f32 1.0, %v7669_v48  ;;  %v4982_v46 = vmul.f32 %v7669_v48, %v10924_v4  ;;  %v5019_v4 = vadd.f32 %v5018_v28, %v12119_v2  ;;  %v7369_v8 = vld [vmem:[%s11329_s14 + $0x10] sm:$0xff]   ;;  %v7370_v49 = vld [vmem:[%s11329_s14 + $0x8] sm:$0xff]   ;;  %v7371_v16 = vld [vmem:[%s11329_s14] sm:$0xff]  }
 0x9a2   :  { %v5023_v11 = vpop.f32.mrf.mxu0 }
 0x9a3   :  { %v7110_v56 = vpop.f32.mrf.mxu1  ;;  %7670 = vtanh.f32 %v4978_v32 }
 0x9b0   :  { %v7671_v35 = vpop.eup %7670 }
 0x9b1   :  { %v4981_v12 = vmul.f32 %v7671_v35, %v4980_v47 }
 0x9b3   :  { %v4983_v45 = vadd.f32 %v4982_v46, %v4981_v12 }
 0x9b5   :  { %v5169_v58 = vpack.c.bf16 %v4983_v45, %v4983_v45  ;;  %v5364_v20 = vrot.slane %v4983_v45, %v11154_v6 }
 0x9b7   :  { %5203 = vmatmul.mubr.bf16.vlgmr.msra.gmra.mxu0 %v5169_v58  ;;  %v5365_v30 = vcombine.high %v5364_v20, %v5364_v20  ;;  %5981 = vst.sshfl [vmem:[%s11332_s17 + $0x1] sm:$0x1 pattern:$0x73625140] %v5364_v20  ;;  %7148 = vmatmul.mubr.bf16.vlgmr.msra.gmra.mxu1 %v5169_v58 }
 0x9b8   :  { %5253 = vmatpush1.bf16.msra.mxu0 %v11021_v19  ;;  %7152 = vmatpush3.bf16.msra.mxu1 %v11024_v15 }
 0x9b9   :  { %5982 = vst.sshfl [vmem:[%s11332_s17 + $0x5] sm:$0x1 pattern:$0x73625140] %v5365_v30  ;;  %5254 = vmatprep.subr.bf16.mxu0 %v11027_v40  ;;  %7153 = vmatprep.subr.bf16.mxu1 %v11718_v51 }
 0x9ba   :  { %5284 = vmatprep.mubr.bf16.mxu0 %v11648_v54  ;;  %7167 = vmatprep.mubr.msk.bf16.mxu1 %vm8177_vm2, %v11718_v51 }
 0x9bc   :  { %v5100_v62 = vpop.f32.mrf.mxu0  ;;  %v5141_v50 = vpop.f32.mrf.mxu1  ;;  %5255 = vmatpush1.bf16.msra.mxu0 %v11034_v22  ;;  %7154 = vmatpush3.bf16.msra.mxu1 %v11037_v63 }
 0x9bd   :  { %v5147_v19 = vadd.f32 %v5100_v62, %v5019_v4  ;;  %5256 = vmatprep.subr.bf16.mxu0 %v11042_v24  ;;  %7155 = vmatprep.subr.bf16.mxu1 %v11718_v51 }
 0x9be   :  { %v5102_v15 = vpop.f32.mrf.mxu0  ;;  %v7129_v40 = vpop.f32.mrf.mxu1 }
 0x9bf   :  { %v5977_v41 = vmul.f32 -1.442695, %v5147_v19  ;;  %v5148_v24 = vadd.f32 %v5102_v15, %v5021_v17 }
 0x9c0   :  { %v5104_v54 = vpop.f32.mrf.mxu0  ;;  %v5144_v57 = vpop.f32.mrf.mxu1  ;;  %5257 = vmatpush1.bf16.msra.mxu0 %v11048_v37  ;;  %7156 = vmatpush3.bf16.msra.mxu1 %v11051_v60 }
 0x9c1   :  { %7672 = vpow2.f32 %v5977_v41  ;;  %5258 = vmatprep.subr.bf16.mxu0 %v11054_v42  ;;  %7157 = vmatprep.subr.bf16.mxu1 %v11718_v51  ;;  %v5978_v37 = vmul.f32 -1.442695, %v5148_v24  ;;  %v8060_v54 = vld [vmem:[%s11328_s13] ss:$0 sm:$0xff]  ;;  %v12125_v24 = vld [vmem:[#allocation40_spill] sm:$0xff] }
 0x9c2   :  { %v5105_v22 = vpop.f32.mrf.mxu0  ;;  %v7130_v63 = vpop.f32.mrf.mxu1 }
 0x9c3   :  { %7674 = vpow2.f32 %v5978_v37  ;;  %v5443_v37 = vrot.slane %v12125_v24, %v11154_v6 }
 0x9c4   :  { %5259 = vmatpush1.bf16.msra.mxu0 %v11058_v36  ;;  %7158 = vmatpush3.bf16.msra.mxu1 %v11061_v44  ;;  %v12122_v36 = vld [vmem:[#allocation80_spill] sm:$0xff] }
 0x9c5   :  { %5260 = vmatprep.subr.bf16.mxu0 %v11064_v10  ;;  %7159 = vmatprep.subr.bf16.mxu1 %v11718_v51 }
 0x9c8   :  { %5261 = vmatpush1.bf16.msra.mxu0 %v11068_v53  ;;  %7160 = vmatpush3.bf16.msra.mxu1 %v11071_v9  ;;  %v12123_v53 = vld [vmem:[#allocation79_spill] sm:$0xff] }
 0x9c9   :  { %5262 = vmatprep.subr.bf16.mxu0 %v11074_v34  ;;  %7161 = vmatprep.subr.bf16.mxu1 %v11718_v51  ;;  %v5161_v9 = vadd.f32 %v12123_v53, %v5141_v50  ;;  %v12128_v53 = vld [vmem:[#allocation23_spill] sm:$0xff] }
 0x9cc   :  { %5263 = vmatpush1.bf16.msra.mxu0 %v11078_v5  ;;  %7162 = vmatpush3.bf16.msra.mxu1 %v11081_v52  ;;  %v12124_v5 = vld [vmem:[#allocation104_spill] sm:$0xff] }
 0x9cd   :  { %5264 = vmatprep.subr.bf16.mxu0 %v11084_v59  ;;  %7163 = vmatprep.subr.bf16.mxu1 %v11718_v51  ;;  %v5060_v52 = vadd.f32 %v11148_v3, %v12124_v5  ;;  %v7364_v3 = vld [vmem:[%s11329_s14 + $0x38] sm:$0xff]  }
 0x9ce   :  { %v7673_v60 = vpop.eup %7672 }
 0x9cf   :  { %v5155_v42 = vadd.f32 1.0, %v7673_v60  ;;  %v12126_v60 = vld [vmem:[#allocation103_spill] sm:$0xff] }
 0x9d0   :  { %5265 = vmatpush1.bf16.msra.mxu0 %v11088_v13  ;;  %7164 = vmatpush3.bf16.msra.mxu1 %v12122_v36  ;;  %v7675_v44 = vpop.eup %7674  ;;  %v5444_v36 = vcombine.high %v5443_v37, %v5443_v37 }
 0x9d1   :  { %7676 = vrcp.f32 %v5155_v42  ;;  %5266 = vmatprep.subr.bf16.mxu0 %v11094_v7  ;;  %7165 = vmatprep.subr.bf16.mxu1 %v11718_v51  ;;  %v5156_v10 = vadd.f32 1.0, %v7675_v44  ;;  %v5466_v42 = vrot.slane %v12126_v60, %v11154_v6  ;;  %v12127_v44 = vld [vmem:[#allocation42_spill] sm:$0xff] }
 0x9d3   :  { %7678 = vrcp.f32 %v5156_v10  ;;  %v5489_v10 = vrot.slane %v12127_v44, %v11154_v6 }
 0x9d4   :  { %5267 = vmatpush1.bf16.msra.mxu0 %v11101_v55  ;;  %7166 = vmatpush3.bf16.msra.mxu1 %v11104_v38 }
 0x9d5   :  { %7171 = vmatprep.subr.bf16.mxu0 %v11718_v51 }
 0x9de   :  { %v7677_v34 = vpop.eup %7676 }
 0x9df   :  { %v5162_v59 = vmul.f32 %v7677_v34, %v5161_v9  ;;  %v5418_v9 = vrot.slane %v12128_v53, %v11154_v6  ;;  %v5467_v34 = vcombine.high %v5466_v42, %v5466_v42 }
 0x9e0   :  { %v7679_v7 = vpop.eup %7678 }
 0x9e1   :  { %v5163_v13 = vadd.f32 %v5162_v59, %v5060_v52  ;;  %v5165_v29 = vsub.f32 1.0, %v7679_v7  ;;  %v5167_v38 = vmul.f32 %v7679_v7, %v11099_v25  ;;  %v5451_v52 = vrot.slane %v5443_v37, %v11154_v6 }
 0x9e2   :  { %v5535_v59 = vrot.slane %v11099_v25, %v11154_v6  ;;  %v5458_v7 = vrot.slane %v5444_v36, %v11154_v6 }
 0x9e3   :  { %7680 = vtanh.f32 %v5163_v13 }
 0x9f0   :  { %v7681_v21 = vpop.eup %7680 }
 0x9f1   :  { %v5166_v55 = vmul.f32 %v7681_v21, %v5165_v29  ;;  %v5474_v21 = vrot.slane %v5466_v42, %v11154_v6 }
 0x9f3   :  { %v11203_v31 = vadd.f32 %v5167_v38, %v5166_v55  ;;  %v5490_v55 = vcombine.high %v5489_v10, %v5489_v10  ;;  %v5419_v38 = vcombine.high %v5418_v9, %v5418_v9 }
 0x9f5   :  { %v5251_v28 = vpack.c.bf16 %v11203_v31, %v11203_v31  ;;  %v5558_v29 = vrot.slane %v11203_v31, %v11154_v6 }
 0x9f7   :  { %5285 = vmatmul.mubr.bf16.vlgmr.msra.gmra.mxu0 %v5251_v28  ;;  %7168 = vmatmul.mubr.bf16.vlgmr.msra.gmra.mxu1 %v5251_v28  ;;  %v5481_v28 = vrot.slane %v5467_v34, %v11154_v6 }
 0x9f8   :  { %7187 = vmatprep.mubr.msk.bf16.mxu0 %vm8177_vm2, %v11718_v51  ;;  %7172 = vmatpush3.bf16.msra.mxu0 %v7364_v3 }
 0x9f9   :  { %7173 = vmatprep.subr.bf16.mxu0 %v11718_v51 }
 0x9fc   :  { %7174 = vmatpush3.bf16.msra.mxu0 %v7365_v43  ;;  %v12129_v43 = vld [vmem:[#allocation14_spill] sm:$0xff] }
 0x9fd   :  { %7175 = vmatprep.subr.bf16.mxu0 %v11718_v51 }
 0xa00   :  { %7176 = vmatpush3.bf16.msra.mxu0 %v7366_v23  ;;  %v5577_v23 = vrot.slane %v5451_v52, %v12129_v43 }
 0xa01   :  { %7177 = vmatprep.subr.bf16.mxu0 %v11718_v51 }
 0xa04   :  { %7178 = vmatpush3.bf16.msra.mxu0 %v7367_v61  ;;  %v5536_v61 = vcombine.high %v5535_v59, %v5535_v59 }
 0xa05   :  { %7179 = vmatprep.subr.bf16.mxu0 %v11718_v51 }
 0xa08   :  { %7180 = vmatpush3.bf16.msra.mxu0 %v7368_v14 }
 0xa09   :  { %7181 = vmatprep.subr.bf16.mxu0 %v11718_v51 }
 0xa0c   :  { %7182 = vmatpush3.bf16.msra.mxu0 %v7369_v8  ;;  %v5581_v8 = vrot.slane %v5458_v7, %v12129_v43 }
 0xa0d   :  { %7183 = vmatprep.subr.bf16.mxu0 %v11718_v51 }
 0xa10   :  { %7184 = vmatpush3.bf16.msra.mxu0 %v7370_v49  ;;  %v5497_v49 = vrot.slane %v5489_v10, %v11154_v6 }
 0xa11   :  { %7185 = vmatprep.subr.bf16.mxu0 %v11718_v51 }
 0xa14   :  { %7186 = vmatpush3.bf16.msra.mxu0 %v7371_v16  ;;  %v5559_v16 = vcombine.high %v5558_v29, %v5558_v29 }
 0xa77   :  { %v5204_v33 = vpop.f32.mrf.mxu0  ;;  %v5245_v32 = vpop.f32.mrf.mxu1 }
 0xa78   :  { %v5205_v47 = vadd.f32 %v5204_v33, %v12119_v2  ;;  %v5246_v22 = vadd.f32 %v5245_v32, %v12124_v5  ;;  %v5512_v5 = vrot.slane %v10813_v18, %v11154_v6  ;;  %v5426_v18 = vrot.slane %v5418_v9, %v11154_v6  ;;  %v5985_v9 = vld [vmem:[%s11330_s15] ss:$0 sm:$0xff] }
 0xa79   :  { %v5206_v11 = vpop.f32.mrf.mxu0  ;;  %v7149_v56 = vpop.f32.mrf.mxu1  ;;  %v5587_v33 = vrot.slane %v5474_v21, %v12129_v43  ;;  %v5504_v32 = vrot.slane %v5490_v55, %v11154_v6 }
 0xa7a   :  { %v5207_v51 = vadd.f32 %v5206_v11, %v9337_v27  ;;  %v5513_v3 = vcombine.high %v5512_v5, %v5512_v5 }
 0xa7b   :  { %v5208_v0 = vpop.f32.mrf.mxu0  ;;  %v5248_v1 = vpop.f32.mrf.mxu1 }
 0xa7c   :  { %v5433_v0 = vrot.slane %v5419_v38, %v11154_v6  ;;  %v5591_v1 = vrot.slane %v5481_v28, %v12129_v43 }
 0xa7d   :  { %v5209_v48 = vpop.f32.mrf.mxu0  ;;  %v7150_v26 = vpop.f32.mrf.mxu1 }
 0xa7e   :  { %v5520_v48 = vrot.slane %v5512_v5, %v11154_v6  ;;  %v5527_v26 = vrot.slane %v5513_v3, %v11154_v6 }
 0xab7   :  { %v5286_v35 = vpop.f32.mrf.mxu0  ;;  %v5327_v12 = vpop.f32.mrf.mxu1 }
 0xab8   :  { %v5333_v46 = vadd.f32 %v5286_v35, %v5205_v47  ;;  %v5347_v57 = vadd.f32 %v8060_v54, %v5327_v12  ;;  %v5645_v47 = vsel %vm5644_vm4, %v5426_v18, %v5577_v23  ;;  %v5543_v35 = vrot.slane %v5535_v59, %v11154_v6 }
 0xab9   :  { %v5288_v39 = vpop.f32.mrf.mxu0  ;;  %v7169_v45 = vpop.f32.mrf.mxu1 }
 0xaba   :  { %v5979_v58 = vmul.f32 -1.442695, %v5333_v46  ;;  %v5334_v50 = vadd.f32 %v5288_v39, %v5207_v51  ;;  %v5550_v46 = vrot.slane %v5536_v61, %v11154_v6  ;;  %v5597_v39 = vrot.slane %v5497_v49, %v12129_v43 }
 0xabb   :  { %v5290_v20 = vpop.f32.mrf.mxu0  ;;  %v5330_v30 = vpop.f32.mrf.mxu1  ;;  %v5566_v45 = vrot.slane %v5558_v29, %v11154_v6  ;;  %v5647_v51 = vsel %vm331_vm0, %v5645_v47, %v5587_v33 }
 0xabc   :  { %7682 = vpow2.f32 %v5979_v58  ;;  %v5980_v19 = vmul.f32 -1.442695, %v5334_v50  ;;  %v5646_v58 = vsel %vm5644_vm4, %v5433_v0, %v5581_v8  ;;  %v5601_v30 = vrot.slane %v5504_v32, %v12129_v43 }
 0xabd   :  { %v5291_v4 = vpop.f32.mrf.mxu0  ;;  %v7170_v62 = vpop.f32.mrf.mxu1  ;;  %v5648_v50 = vsel %vm331_vm0, %v5646_v58, %v5591_v1 }
 0xabe   :  { %7684 = vpow2.f32 %v5980_v19  ;;  %v5607_v4 = vrot.slane %v5520_v48, %v12129_v43  ;;  %v5611_v62 = vrot.slane %v5527_v26, %v12129_v43 }
 0xac9   :  { %v7683_v15 = vpop.eup %7682 }
 0xaca   :  { %v5341_v40 = vadd.f32 1.0, %v7683_v15 }
 0xacb   :  { %v7685_v2 = vpop.eup %7684 }
 0xacc   :  { %7686 = vrcp.f32 %v5341_v40  ;;  %v5342_v41 = vadd.f32 1.0, %v7685_v2  ;;  %v5617_v40 = vrot.slane %v5543_v35, %v12129_v43  ;;  %v5621_v2 = vrot.slane %v5550_v46, %v12129_v43 }
 0xace   :  { %7688 = vrcp.f32 %v5342_v41  ;;  %v5627_v41 = vrot.slane %v5566_v45, %v12129_v43 }
 0xad9   :  { %v7687_v17 = vpop.eup %7686 }
 0xada   :  { %v5348_v27 = vmul.f32 %v7687_v17, %v5347_v57  ;;  %v5650_v57 = vsel %vm5649_vm5, %v5647_v51, %v5597_v39 }
 0xadb   :  { %v7689_v13 = vpop.eup %7688 }
 0xadc   :  { %v5349_v63 = vadd.f32 %v5348_v27, %v5246_v22  ;;  %v5351_v14 = vsub.f32 1.0, %v7689_v13  ;;  %v5353_v56 = vmul.f32 %v7689_v13, %v11203_v31  ;;  %v5573_v31 = vrot.slane %v5559_v16, %v11154_v6 }
 0xadd   :  { %v5651_v27 = vsel %vm5649_vm5, %v5648_v50, %v5601_v30 }
 0xade   :  { %7690 = vtanh.f32 %v5349_v63  ;;  %v5631_v54 = vrot.slane %v5573_v31, %v12129_v43  ;;  %v5653_v63 = vsel %vm5652_vm6, %v5650_v57, %v5607_v4  ;;  %v5654_v24 = vsel %vm5652_vm6, %v5651_v27, %v5611_v62 }
 0xadf   :  { %v5656_v60 = vsel %vm5655_vm7, %v5653_v63, %v5617_v40  ;;  %v5657_v42 = vsel %vm5655_vm7, %v5654_v24, %v5621_v2 }
 0xae0   :  { %v5659_v36 = vsel %vm5658_vm8, %v5656_v60, %v5627_v41 }
 0xaeb   :  { %v7691_v25 = vpop.eup %7690 }
 0xaec   :  { %v5352_v11 = vmul.f32 %v7691_v25, %v5351_v14 }
 0xaee   :  { %v5354_v12 = vadd.f32 %v5353_v56, %v5352_v11 }
 0xaf0   :  { %v5391_v20 = vrot.slane %v5354_v12, %v11154_v6 }
 0xaf2   :  { %5983 = vst.sshfl [vmem:[%s11332_s17 + $0x2] sm:$0x1 pattern:$0x73625140] %v5391_v20  ;;  %v5392_v19 = vcombine.high %v5391_v20, %v5391_v20  ;;  %v5399_v15 = vrot.slane %v5391_v20, %v11154_v6 }
 0xaf4   :  { %v5406_v17 = vrot.slane %v5392_v19, %v11154_v6  ;;  %5984 = vst.sshfl [vmem:[%s11332_s17 + $0x6] sm:$0x1 pattern:$0x73625140] %v5392_v19  ;;  %v5637_v22 = vrot.slane %v5399_v15, %v12129_v43  ;;  %v5660_v6 = vsel %vm5658_vm8, %v5657_v42, %v5631_v54 }
 0xaf6   :  { %v5641_v37 = vrot.slane %v5406_v17, %v12129_v43  ;;  %v5662_v44 = vsel %vm5661_vm9, %v5659_v36, %v5637_v22 }
 0xaf8   :  { %v5663_v10 = vsel %vm5661_vm9, %v5660_v6, %v5641_v37 }
 0xaf9   :  { %v5664_v53 = vpack.c.bf16 %v5663_v10, %v5662_v44 }
 0xafb   :  { %7188 = vmatmul.mubr.bf16.vlgmr.msra.gmra.mxu0 %v5664_v53 }
 0xbbb   :  { %v5770_v34 = vpop.f32.mrf.mxu0 }
 0xbbc   :  { %v5771_v5 = vadd.f32 %v5985_v9, %v5770_v34 }
 0xbbd   :  { %v7189_v52 = vpop.f32.mrf.mxu0 }
 0xbbe   :  { %5778 = vst.msk [vmem:[%s11331_s16] sm:$0xff] %vm5777_vm10, %v5771_v5 }
 0xbbf   :  { %v5773_v59 = vpop.f32.mrf.mxu0 }
 0xbc0   :  { %v5774_v13 = vadd.f32 %v5985_v9, %v5773_v59 }
 0xbc1   :  { %v7190_v7 = vpop.f32.mrf.mxu0 }
 0xbc2   :  { %5779 = vst.msk [vmem:[%s11331_s16 + $0x8] sm:$0xff] %vm5777_vm10, %v5774_v13 }
 0xbc3   :  { %5788 = vsyncpa [#allocation3], 1 }
 0xbc4   :  { %5789 = vsyncpa [#allocation5], 1 }
 0xbc5   :  { %5790 = vsyncpa [#allocation8], 1 }

</bundles_post_ra>
